<compile_context>
chip_gen: v6e
topology: v6e:2x2x1
jax: 0.10.0
libtpu: 0.0.40
codegen_flags: <defaults>
</compile_context>

<pallas_src>
import jax
import jax.numpy as jnp
from jax.experimental import pallas as pl
from jax.experimental.pallas import tpu as pltpu

# Set to jnp.bfloat16 on v6e/v7x for ~2-3x MXU throughput (accumulation stays f32;
# relax the allclose tolerance accordingly). Kept f32 here for a bit-tight check.
DOT_OPERAND_DTYPE = jnp.float32


# ---------------------------------------------------------------------------
# helpers
# ---------------------------------------------------------------------------

def _round_up(x, m):
    return ((x + m - 1) // m) * m


def _pick_tile(n, cap):
    """Largest divisor of n that is <= cap."""
    t = min(cap, n)
    while n % t:
        t -= 1
    return t


# ---------------------------------------------------------------------------
# Deconv (ConvTranspose2d k=2 s=2) kernel
# ---------------------------------------------------------------------------

def _make_deconv_kernel(th2, w2, cin, cout, dot_dtype):
    two_cout = 2 * cout

    def kernel(x_ref, w_ref, b_ref, o_ref):
        # x_ref: (1, th2, w2, cin)   w_ref: (cin, 4*cout)   b_ref: (1, 4*cout)
        # o_ref: (1, 2*th2, w2, 2*cout)  -- rows 2t / 2t+1 hold dy=0 / dy=1.
        w = w_ref[...].astype(dot_dtype)
        b = b_ref[...]
        if w2 % 8 == 0:
            # Band-wide matmul: M = th2*w2 (layout-preserving reshape).
            xb = x_ref[...].reshape(th2 * w2, cin).astype(dot_dtype)
            y = jnp.dot(xb, w, preferred_element_type=jnp.float32) + b
            y = y.reshape(th2, w2, 4 * cout)
            for t in range(th2):
                o_ref[0, 2 * t] = y[t, :, :two_cout]      # dy = 0 half
                o_ref[0, 2 * t + 1] = y[t, :, two_cout:]  # dy = 1 half
        else:
            # TODO(synk): non-8-multiple widths fall back to per-row matmuls.
            for t in range(th2):
                yt = jnp.dot(x_ref[0, t].astype(dot_dtype), w,
                             preferred_element_type=jnp.float32) + b
                o_ref[0, 2 * t] = yt[:, :two_cout]
                o_ref[0, 2 * t + 1] = yt[:, two_cout:]

    return kernel


def deconv2x2_s2(x_nhwc, w_t, bias, *, tile_cap=32, dot_dtype=DOT_OPERAND_DTYPE):
    """ConvTranspose2d(kernel=2, stride=2).  x: (N,H2,W2,Cin), w_t: (Cin,Cout,2,2)."""
    n, h2, w2, cin = x_nhwc.shape
    cout = w_t.shape[1]
    # (Cin, Cout, 2, 2) -> (Cin, (dy, dx, Cout)): the deconv is one matmul per band.
    wf = jnp.transpose(w_t, (0, 2, 3, 1)).reshape(cin, 4 * cout)
    bf = jnp.tile(bias, 4).reshape(1, 4 * cout)

    th2 = _pick_tile(h2, tile_cap)
    kernel = _make_deconv_kernel(th2, w2, cin, cout, dot_dtype)

    yf = pl.pallas_call(
        kernel,
        out_shape=jax.ShapeDtypeStruct((n, 2 * h2, w2, 2 * cout), jnp.float32),
        grid=(n, h2 // th2),
        in_specs=[
            pl.BlockSpec((1, th2, w2, cin), lambda ni, bi: (ni, bi, 0, 0)),
            pl.BlockSpec((cin, 4 * cout), lambda ni, bi: (0, 0)),
            pl.BlockSpec((1, 4 * cout), lambda ni, bi: (0, 0)),
        ],
        out_specs=pl.BlockSpec((1, 2 * th2, w2, 2 * cout),
                               lambda ni, bi: (ni, bi, 0, 0)),
        compiler_params=pltpu.CompilerParams(
            dimension_semantics=("parallel", "parallel")),
    )(x_nhwc, wf, bf)

    # (N, 2H2, W2, (dx,Cout)) -> (N, 2H2, 2W2, Cout): contiguous merge => free
    # reshape in XLA (no transpose / HBM round trip).
    return yf.reshape(n, 2 * h2, 2 * w2, cout)


# ---------------------------------------------------------------------------
# Fused double 3x3-valid conv (+ channel-concat fused via weight splitting)
# ---------------------------------------------------------------------------

def _make_fused_conv_kernel(n_inputs, tile_h, wc1, wc2, dot_dtype):
    rows1 = tile_h + 2  # conv1 output rows needed per band

    def kernel(*refs):
        x_refs = refs[:n_inputs]                  # each (1, H_pad, W_pad, Ci)
        w1_refs = refs[n_inputs:2 * n_inputs]     # each (3, 3, Ci, Cpad)
        b1_ref = refs[2 * n_inputs]               # (1, Cpad)
        w2_ref = refs[2 * n_inputs + 1]           # (3, 3, Cpad, Cpad)
        b2_ref = refs[2 * n_inputs + 2]           # (1, Cpad)
        o_ref = refs[2 * n_inputs + 3]            # (1, tile_h, wc2, Cpad)
        h_ref = refs[2 * n_inputs + 4]            # VMEM scratch (rows1, wc1, Cpad)
        cpad = o_ref.shape[-1]

        i0 = pl.multiple_of(pl.program_id(1) * tile_h, tile_h)

        # ---- conv1: one band-wide matmul per (input, ky, kx) tap ----
        acc1 = None
        for xi in range(n_inputs):
            x_ref = x_refs[xi]
            ci = x_ref.shape[-1]
            for ky in range(3):
                for kx in range(3):
                    patch = x_ref[0, pl.ds(i0 + ky, rows1), pl.ds(kx, wc1), :]
                    patch = patch.reshape(rows1 * wc1, ci).astype(dot_dtype)
                    tap = w1_refs[xi][ky, kx].astype(dot_dtype)      # (Ci, Cpad)
                    c = jnp.dot(patch, tap, preferred_element_type=jnp.float32)
                    acc1 = c if acc1 is None else acc1 + c
        h1 = jnp.maximum(acc1 + b1_ref[...], 0.0)                    # bias once
        h_ref[...] = h1.reshape(rows1, wc1, cpad)                    # stays in VMEM

        # ---- conv2 over the VMEM intermediate (never touches HBM) ----
        acc2 = None
        for ky in range(3):
            for kx in range(3):
                patch = h_ref[pl.ds(ky, tile_h), pl.ds(kx, wc2), :]
                patch = patch.reshape(tile_h * wc2, cpad).astype(dot_dtype)
                tap = w2_ref[ky, kx].astype(dot_dtype)               # (Cpad, Cpad)
                c = jnp.dot(patch, tap, preferred_element_type=jnp.float32)
                acc2 = c if acc2 is None else acc2 + c
        y = jnp.maximum(acc2 + b2_ref[...], 0.0)
        o_ref[0] = y.reshape(tile_h, wc2, cpad)                      # lane-dense store

    return kernel


def fused_double_conv(xs, w1_list, b1, w2, b2, *, tile_cap=16,
                      dot_dtype=DOT_OPERAND_DTYPE):
    """ReLU(conv3x3(ReLU(conv3x3(concat(xs, C))))) with both convs 'valid'.

    xs: NHWC inputs sharing (N, H, W); w1_list[i]: (3,3,Ci,Cpad); w2: (3,3,Cpad,Cpad);
    b1, b2: (1, Cpad).  Returns (N, H-4, W-4, Cpad).
    """
    n, h, w = xs[0].shape[0], xs[0].shape[1], xs[0].shape[2]
    hout2, wout2 = h - 4, w - 4
    cpad = w2.shape[-1]

    # Band/row tiling: pad H so hout2 is a multiple of tile_h (no tile_h=1 cliff).
    tile_h = min(tile_cap, hout2)
    hout2_pad = _round_up(hout2, tile_h)
    # Per-band column counts, rounded to 8 so the (rows, cols, C)->(rows*cols, C)
    # reshapes are layout-preserving views.
    wc2 = _round_up(wout2, 8)
    wc1 = wc2 + 8
    h_pad, w_pad = hout2_pad + 4, wc1 + 2

    if h_pad > h or w_pad > w:
        xs = [jnp.pad(x, ((0, 0), (0, h_pad - h), (0, w_pad - w), (0, 0)))
              for x in xs]

    rows1 = tile_h + 2
    kernel = _make_fused_conv_kernel(len(xs), tile_h, wc1, wc2, dot_dtype)

    in_specs = [pl.BlockSpec((1, h_pad, w_pad, x.shape[-1]),
                             lambda ni, bi: (ni, 0, 0, 0)) for x in xs]
    in_specs += [pl.BlockSpec(wgt.shape, lambda ni, bi: (0, 0, 0, 0))
                 for wgt in w1_list]
    in_specs += [pl.BlockSpec(b1.shape, lambda ni, bi: (0, 0)),
                 pl.BlockSpec(w2.shape, lambda ni, bi: (0, 0, 0, 0)),
                 pl.BlockSpec(b2.shape, lambda ni, bi: (0, 0))]

    out = pl.pallas_call(
        kernel,
        out_shape=jax.ShapeDtypeStruct((n, hout2_pad, wc2, cpad), jnp.float32),
        grid=(n, hout2_pad // tile_h),
        in_specs=in_specs,
        out_specs=pl.BlockSpec((1, tile_h, wc2, cpad), lambda ni, bi: (ni, bi, 0, 0)),
        scratch_shapes=[pltpu.VMEM((rows1, wc1, cpad), jnp.float32)],
        # Raise vmem_limit_bytes here when using larger tile_cap on v5e/v6e.
        compiler_params=pltpu.CompilerParams(
            dimension_semantics=("parallel", "parallel")),
    )(*xs, *w1_list, b1, w2, b2)

    return out[:, :hout2, :wout2, :]


# ---------------------------------------------------------------------------
# parameter packing + forward
# ---------------------------------------------------------------------------

def _pack_conv_weight(w_oihw, cout_pad, cin_pad=None):
    """(Cout, Cin, 3, 3) -> (3, 3, Cin[_pad], Cout_pad), zero-padded channels."""
    co, ci = w_oihw.shape[0], w_oihw.shape[1]
    w = jnp.transpose(w_oihw, (2, 3, 1, 0))
    if cin_pad is not None and cin_pad > ci:
        w = jnp.pad(w, ((0, 0), (0, 0), (0, cin_pad - ci), (0, 0)))
    if cout_pad > co:
        w = jnp.pad(w, ((0, 0), (0, 0), (0, 0), (0, cout_pad - co)))
    return w


def _pack_bias(b, cpad):
    return jnp.pad(b, (0, cpad - b.shape[0])).reshape(1, cpad)


def unet_up_forward(inputs1_nchw, inputs2_nchw, params,
                    dot_dtype=DOT_OPERAND_DTYPE):
    """Forward pass of unetUp (is_deconv=True).  Inputs/outputs are NCHW."""
    x1 = jnp.transpose(inputs1_nchw, (0, 2, 3, 1))  # NHWC
    x2 = jnp.transpose(inputs2_nchw, (0, 2, 3, 1))  # NHWC

    cout = params["up_w"].shape[1]
    # Lane-dense conv outputs.  TODO(synk): on v6e/v7x with real cout >= 192,
    # consider rounding to 256 to fill the 256-wide MXU.
    cpad = _round_up(cout, 128)

    up = deconv2x2_s2(x2, params["up_w"], params["up_b"],
                      dot_dtype=dot_dtype)                      # (N, 2H2, 2W2, cout)

    offset = up.shape[1] - x1.shape[1]
    assert offset % 2 == 0 and offset >= 0, \
        "odd/negative offset not supported (breaks torch cat too)"
    p = offset // 2
    if p > 0:
        # TODO(synk): could be folded into the conv kernel's index math.
        x1 = jnp.pad(x1, ((0, 0), (p, p), (p, p), (0, 0)))
    c1 = x1.shape[-1]

    # conv1: fuse concat([x1, up], C) by splitting the weight along Cin.
    w1 = params["c1_w"]                                          # (cout, c1+cout, 3, 3)
    w1a = _pack_conv_weight(w1[:, :c1], cpad)                    # x1 part
    w1b = _pack_conv_weight(w1[:, c1:], cpad)                    # up part
    b1 = _pack_bias(params["c1_b"], cpad)
    w2 = _pack_conv_weight(params["c2_w"], cpad, cin_pad=cpad)
    b2 = _pack_bias(params["c2_b"], cpad)

    out = fused_double_conv([x1, up], [w1a, w1b], b1, w2, b2,
                            dot_dtype=dot_dtype)                 # (N, H-4, W-4, cpad)
    out = out[..., :cout]                                        # drop channel padding
    return jnp.transpose(out, (0, 3, 1, 2))                      # back to NCHW


# ---------------------------------------------------------------------------
# Pure-JAX reference (for correctness check)
# ---------------------------------------------------------------------------

def _ref_forward(inputs1_nchw, inputs2_nchw, params):
    x1 = jnp.transpose(inputs1_nchw, (0, 2, 3, 1))
    x2 = jnp.transpose(inputs2_nchw, (0, 2, 3, 1))
    n, h2, w2, _ = x2.shape
    wt = params["up_w"]  # (Cin, Cout, 2, 2)
    cout = wt.shape[1]
    up = jnp.einsum("nhwc,coyx->nhywxo", x2, wt).reshape(n, 2 * h2, 2 * w2, cout)
    up = up + params["up_b"]

    offset = up.shape[1] - x1.shape[1]
    p = offset // 2
    x1p = jnp.pad(x1, ((0, 0), (p, p), (p, p), (0, 0)))
    cat = jnp.concatenate([x1p, up], axis=-1)

    def conv(x, w_oihw, b):
        y = jax.lax.conv_general_dilated(
            x, jnp.transpose(w_oihw, (2, 3, 1, 0)), (1, 1), "VALID",
            dimension_numbers=("NHWC", "HWIO", "NHWC"))
        return jax.nn.relu(y + b)

    out = conv(conv(cat, params["c1_w"], params["c1_b"]),
               params["c2_w"], params["c2_b"])
    return jnp.transpose(out, (0, 3, 1, 2))


# ---------------------------------------------------------------------------
# Main
# ---------------------------------------------------------------------------

if __name__ == "__main__":
    in_size, out_size = 8, 4          # unetUp(in_size=8, out_size=4, is_deconv=True)
    N, H2, W2 = 2, 8, 8               # inputs2: (N, in_size, H2, W2)
    H1, W1 = 2 * H2, 2 * W2           # inputs1: (N, in_size - out_size, H1, W1)

    key = jax.random.PRNGKey(0)
    k = jax.random.split(key, 8)

    params = {
        # ConvTranspose2d(in_size, out_size, 2, 2): weight (in, out, 2, 2)
        "up_w": 0.1 * jax.random.normal(k[0], (in_size, out_size, 2, 2), jnp.float32),
        "up_b": 0.1 * jax.random.normal(k[1], (out_size,), jnp.float32),
        # Conv2d(in_size, out_size, 3): weight (out, in, 3, 3)
        "c1_w": 0.1 * jax.random.normal(k[2], (out_size, in_size, 3, 3), jnp.float32),
        "c1_b": 0.1 * jax.random.normal(k[3], (out_size,), jnp.float32),
        # Conv2d(out_size, out_size, 3)
        "c2_w": 0.1 * jax.random.normal(k[4], (out_size, out_size, 3, 3), jnp.float32),
        "c2_b": 0.1 * jax.random.normal(k[5], (out_size,), jnp.float32),
    }

    inputs1 = jax.random.normal(k[6], (N, in_size - out_size, H1, W1), jnp.float32)
    inputs2 = jax.random.normal(k[7], (N, in_size, H2, W2), jnp.float32)

    out = jax.jit(unet_up_forward)(inputs1, inputs2, params)
    out = jax.block_until_ready(out)

    ref = _ref_forward(inputs1, inputs2, params)
    assert out.shape == (N, out_size, H1 - 4, W1 - 4), out.shape
    assert bool(jnp.allclose(out, ref, rtol=1e-4, atol=1e-4)), "mismatch vs reference"

    print("KERNEL_OK")
</pallas_src>

<mosaic_0001>
module attributes {stable_mosaic.version = 11 : i64} {
  func.func @kernel(%arg0: i32, %arg1: i32, %arg2: memref<1x8x8x8xf32, #tpu.memory_space<vmem>>, %arg3: memref<8x16xf32, #tpu.memory_space<vmem>>, %arg4: memref<1x16xf32, #tpu.memory_space<vmem>>, %arg5: memref<1x16x8x8xf32, #tpu.memory_space<vmem>>) attributes {dimension_semantics = [#tpu.dimension_semantics<parallel>, #tpu.dimension_semantics<parallel>], iteration_bounds = array<i64: 2, 1>, scalar_prefetch = 0 : i64, scratch_operands = 0 : i64, tpu.core_type = #tpu.core_type<tc>, window_params = [{transform_indices = @transform_0, window_bounds = array<i64: 1, 8, 8, 8>}, {pipeline_mode = #tpu.pipeline_mode<synchronous>, transform_indices = @transform_1, window_bounds = array<i64: 8, 16>}, {pipeline_mode = #tpu.pipeline_mode<synchronous>, transform_indices = @transform_2, window_bounds = array<i64: 1, 16>}, {transform_indices = @transform_3, window_bounds = array<i64: 1, 16, 8, 8>}]} {
    %c0 = arith.constant 0 : index
    %c0_0 = arith.constant 0 : index
    %0 = vector.load %arg3[%c0, %c0_0] : memref<8x16xf32, #tpu.memory_space<vmem>>, vector<8x16xf32>
    %c0_1 = arith.constant 0 : index
    %c0_2 = arith.constant 0 : index
    %1 = vector.load %arg4[%c0_1, %c0_2] : memref<1x16xf32, #tpu.memory_space<vmem>>, vector<1x16xf32>
    %c0_3 = arith.constant 0 : index
    %c0_4 = arith.constant 0 : index
    %c0_5 = arith.constant 0 : index
    %c0_6 = arith.constant 0 : index
    %2 = vector.load %arg2[%c0_3, %c0_4, %c0_5, %c0_6] : memref<1x8x8x8xf32, #tpu.memory_space<vmem>>, vector<1x8x8x8xf32>
    %3 = vector.shape_cast %2 : vector<1x8x8x8xf32> to vector<64x8xf32>
    %cst = arith.constant dense<0.000000e+00> : vector<64x16xf32>
    %4 = tpu.matmul %3, %0, %cst {dimension_numbers = #tpu.dot_dimension_numbers<[1], [0], [0], [1], [0, 0, 1, 1], [], []>} : vector<64x8xf32>, vector<8x16xf32>, vector<64x16xf32> -> vector<64x16xf32>
    %5 = vector.broadcast %1 : vector<1x16xf32> to vector<64x16xf32>
    %6 = arith.addf %4, %5 : vector<64x16xf32>
    %7 = vector.shape_cast %6 : vector<64x16xf32> to vector<8x8x16xf32>
    %8 = vector.extract_strided_slice %7 {offsets = [0, 0, 0], sizes = [1, 8, 8], strides = [1, 1, 1]} : vector<8x8x16xf32> to vector<1x8x8xf32>
    %9 = vector.shape_cast %8 : vector<1x8x8xf32> to vector<8x8xf32>
    %c0_7 = arith.constant 0 : index
    %c0_8 = arith.constant 0 : index
    %c0_9 = arith.constant 0 : index
    %c0_10 = arith.constant 0 : index
    %10 = vector.load %arg5[%c0_7, %c0_8, %c0_9, %c0_10] : memref<1x16x8x8xf32, #tpu.memory_space<vmem>>, vector<1x1x8x8xf32>
    %11 = vector.shape_cast %10 : vector<1x1x8x8xf32> to vector<8x8xf32>
    %12 = vector.shape_cast %9 : vector<8x8xf32> to vector<1x1x8x8xf32>
    tpu.vector_store %arg5[%c0_7, %c0_8, %c0_9, %c0_10], %12 {strides = array<i32>} : memref<1x16x8x8xf32, #tpu.memory_space<vmem>>, vector<1x1x8x8xf32>,
    %13 = vector.extract_strided_slice %7 {offsets = [0, 0, 8], sizes = [1, 8, 8], strides = [1, 1, 1]} : vector<8x8x16xf32> to vector<1x8x8xf32>
    %14 = vector.shape_cast %13 : vector<1x8x8xf32> to vector<8x8xf32>
    %c0_11 = arith.constant 0 : index
    %c1 = arith.constant 1 : index
    %c0_12 = arith.constant 0 : index
    %c0_13 = arith.constant 0 : index
    %15 = vector.load %arg5[%c0_11, %c1, %c0_12, %c0_13] : memref<1x16x8x8xf32, #tpu.memory_space<vmem>>, vector<1x1x8x8xf32>
    %16 = vector.shape_cast %15 : vector<1x1x8x8xf32> to vector<8x8xf32>
    %17 = vector.shape_cast %14 : vector<8x8xf32> to vector<1x1x8x8xf32>
    tpu.vector_store %arg5[%c0_11, %c1, %c0_12, %c0_13], %17 {strides = array<i32>} : memref<1x16x8x8xf32, #tpu.memory_space<vmem>>, vector<1x1x8x8xf32>,
    %18 = vector.extract_strided_slice %7 {offsets = [1, 0, 0], sizes = [1, 8, 8], strides = [1, 1, 1]} : vector<8x8x16xf32> to vector<1x8x8xf32>
    %19 = vector.shape_cast %18 : vector<1x8x8xf32> to vector<8x8xf32>
    %c0_14 = arith.constant 0 : index
    %c2 = arith.constant 2 : index
    %c0_15 = arith.constant 0 : index
    %c0_16 = arith.constant 0 : index
    %20 = vector.load %arg5[%c0_14, %c2, %c0_15, %c0_16] : memref<1x16x8x8xf32, #tpu.memory_space<vmem>>, vector<1x1x8x8xf32>
    %21 = vector.shape_cast %20 : vector<1x1x8x8xf32> to vector<8x8xf32>
    %22 = vector.shape_cast %19 : vector<8x8xf32> to vector<1x1x8x8xf32>
    tpu.vector_store %arg5[%c0_14, %c2, %c0_15, %c0_16], %22 {strides = array<i32>} : memref<1x16x8x8xf32, #tpu.memory_space<vmem>>, vector<1x1x8x8xf32>,
    %23 = vector.extract_strided_slice %7 {offsets = [1, 0, 8], sizes = [1, 8, 8], strides = [1, 1, 1]} : vector<8x8x16xf32> to vector<1x8x8xf32>
    %24 = vector.shape_cast %23 : vector<1x8x8xf32> to vector<8x8xf32>
    %c0_17 = arith.constant 0 : index
    %c3 = arith.constant 3 : index
    %c0_18 = arith.constant 0 : index
    %c0_19 = arith.constant 0 : index
    %25 = vector.load %arg5[%c0_17, %c3, %c0_18, %c0_19] : memref<1x16x8x8xf32, #tpu.memory_space<vmem>>, vector<1x1x8x8xf32>
    %26 = vector.shape_cast %25 : vector<1x1x8x8xf32> to vector<8x8xf32>
    %27 = vector.shape_cast %24 : vector<8x8xf32> to vector<1x1x8x8xf32>
    tpu.vector_store %arg5[%c0_17, %c3, %c0_18, %c0_19], %27 {strides = array<i32>} : memref<1x16x8x8xf32, #tpu.memory_space<vmem>>, vector<1x1x8x8xf32>,
    %28 = vector.extract_strided_slice %7 {offsets = [2, 0, 0], sizes = [1, 8, 8], strides = [1, 1, 1]} : vector<8x8x16xf32> to vector<1x8x8xf32>
    %29 = vector.shape_cast %28 : vector<1x8x8xf32> to vector<8x8xf32>
    %c0_20 = arith.constant 0 : index
    %c4 = arith.constant 4 : index
    %c0_21 = arith.constant 0 : index
    %c0_22 = arith.constant 0 : index
    %30 = vector.load %arg5[%c0_20, %c4, %c0_21, %c0_22] : memref<1x16x8x8xf32, #tpu.memory_space<vmem>>, vector<1x1x8x8xf32>
    %31 = vector.shape_cast %30 : vector<1x1x8x8xf32> to vector<8x8xf32>
    %32 = vector.shape_cast %29 : vector<8x8xf32> to vector<1x1x8x8xf32>
    tpu.vector_store %arg5[%c0_20, %c4, %c0_21, %c0_22], %32 {strides = array<i32>} : memref<1x16x8x8xf32, #tpu.memory_space<vmem>>, vector<1x1x8x8xf32>,
    %33 = vector.extract_strided_slice %7 {offsets = [2, 0, 8], sizes = [1, 8, 8], strides = [1, 1, 1]} : vector<8x8x16xf32> to vector<1x8x8xf32>
    %34 = vector.shape_cast %33 : vector<1x8x8xf32> to vector<8x8xf32>
    %c0_23 = arith.constant 0 : index
    %c5 = arith.constant 5 : index
    %c0_24 = arith.constant 0 : index
    %c0_25 = arith.constant 0 : index
    %35 = vector.load %arg5[%c0_23, %c5, %c0_24, %c0_25] : memref<1x16x8x8xf32, #tpu.memory_space<vmem>>, vector<1x1x8x8xf32>
    %36 = vector.shape_cast %35 : vector<1x1x8x8xf32> to vector<8x8xf32>
    %37 = vector.shape_cast %34 : vector<8x8xf32> to vector<1x1x8x8xf32>
    tpu.vector_store %arg5[%c0_23, %c5, %c0_24, %c0_25], %37 {strides = array<i32>} : memref<1x16x8x8xf32, #tpu.memory_space<vmem>>, vector<1x1x8x8xf32>,
    %38 = vector.extract_strided_slice %7 {offsets = [3, 0, 0], sizes = [1, 8, 8], strides = [1, 1, 1]} : vector<8x8x16xf32> to vector<1x8x8xf32>
    %39 = vector.shape_cast %38 : vector<1x8x8xf32> to vector<8x8xf32>
    %c0_26 = arith.constant 0 : index
    %c6 = arith.constant 6 : index
    %c0_27 = arith.constant 0 : index
    %c0_28 = arith.constant 0 : index
    %40 = vector.load %arg5[%c0_26, %c6, %c0_27, %c0_28] : memref<1x16x8x8xf32, #tpu.memory_space<vmem>>, vector<1x1x8x8xf32>
    %41 = vector.shape_cast %40 : vector<1x1x8x8xf32> to vector<8x8xf32>
    %42 = vector.shape_cast %39 : vector<8x8xf32> to vector<1x1x8x8xf32>
    tpu.vector_store %arg5[%c0_26, %c6, %c0_27, %c0_28], %42 {strides = array<i32>} : memref<1x16x8x8xf32, #tpu.memory_space<vmem>>, vector<1x1x8x8xf32>,
    %43 = vector.extract_strided_slice %7 {offsets = [3, 0, 8], sizes = [1, 8, 8], strides = [1, 1, 1]} : vector<8x8x16xf32> to vector<1x8x8xf32>
    %44 = vector.shape_cast %43 : vector<1x8x8xf32> to vector<8x8xf32>
    %c0_29 = arith.constant 0 : index
    %c7 = arith.constant 7 : index
    %c0_30 = arith.constant 0 : index
    %c0_31 = arith.constant 0 : index
    %45 = vector.load %arg5[%c0_29, %c7, %c0_30, %c0_31] : memref<1x16x8x8xf32, #tpu.memory_space<vmem>>, vector<1x1x8x8xf32>
    %46 = vector.shape_cast %45 : vector<1x1x8x8xf32> to vector<8x8xf32>
    %47 = vector.shape_cast %44 : vector<8x8xf32> to vector<1x1x8x8xf32>
    tpu.vector_store %arg5[%c0_29, %c7, %c0_30, %c0_31], %47 {strides = array<i32>} : memref<1x16x8x8xf32, #tpu.memory_space<vmem>>, vector<1x1x8x8xf32>,
    %48 = vector.extract_strided_slice %7 {offsets = [4, 0, 0], sizes = [1, 8, 8], strides = [1, 1, 1]} : vector<8x8x16xf32> to vector<1x8x8xf32>
    %49 = vector.shape_cast %48 : vector<1x8x8xf32> to vector<8x8xf32>
    %c0_32 = arith.constant 0 : index
    %c8 = arith.constant 8 : index
    %c0_33 = arith.constant 0 : index
    %c0_34 = arith.constant 0 : index
    %50 = vector.load %arg5[%c0_32, %c8, %c0_33, %c0_34] : memref<1x16x8x8xf32, #tpu.memory_space<vmem>>, vector<1x1x8x8xf32>
    %51 = vector.shape_cast %50 : vector<1x1x8x8xf32> to vector<8x8xf32>
    %52 = vector.shape_cast %49 : vector<8x8xf32> to vector<1x1x8x8xf32>
    tpu.vector_store %arg5[%c0_32, %c8, %c0_33, %c0_34], %52 {strides = array<i32>} : memref<1x16x8x8xf32, #tpu.memory_space<vmem>>, vector<1x1x8x8xf32>,
    %53 = vector.extract_strided_slice %7 {offsets = [4, 0, 8], sizes = [1, 8, 8], strides = [1, 1, 1]} : vector<8x8x16xf32> to vector<1x8x8xf32>
    %54 = vector.shape_cast %53 : vector<1x8x8xf32> to vector<8x8xf32>
    %c0_35 = arith.constant 0 : index
    %c9 = arith.constant 9 : index
    %c0_36 = arith.constant 0 : index
    %c0_37 = arith.constant 0 : index
    %55 = vector.load %arg5[%c0_35, %c9, %c0_36, %c0_37] : memref<1x16x8x8xf32, #tpu.memory_space<vmem>>, vector<1x1x8x8xf32>
    %56 = vector.shape_cast %55 : vector<1x1x8x8xf32> to vector<8x8xf32>
    %57 = vector.shape_cast %54 : vector<8x8xf32> to vector<1x1x8x8xf32>
    tpu.vector_store %arg5[%c0_35, %c9, %c0_36, %c0_37], %57 {strides = array<i32>} : memref<1x16x8x8xf32, #tpu.memory_space<vmem>>, vector<1x1x8x8xf32>,
    %58 = vector.extract_strided_slice %7 {offsets = [5, 0, 0], sizes = [1, 8, 8], strides = [1, 1, 1]} : vector<8x8x16xf32> to vector<1x8x8xf32>
    %59 = vector.shape_cast %58 : vector<1x8x8xf32> to vector<8x8xf32>
    %c0_38 = arith.constant 0 : index
    %c10 = arith.constant 10 : index
    %c0_39 = arith.constant 0 : index
    %c0_40 = arith.constant 0 : index
    %60 = vector.load %arg5[%c0_38, %c10, %c0_39, %c0_40] : memref<1x16x8x8xf32, #tpu.memory_space<vmem>>, vector<1x1x8x8xf32>
    %61 = vector.shape_cast %60 : vector<1x1x8x8xf32> to vector<8x8xf32>
    %62 = vector.shape_cast %59 : vector<8x8xf32> to vector<1x1x8x8xf32>
    tpu.vector_store %arg5[%c0_38, %c10, %c0_39, %c0_40], %62 {strides = array<i32>} : memref<1x16x8x8xf32, #tpu.memory_space<vmem>>, vector<1x1x8x8xf32>,
    %63 = vector.extract_strided_slice %7 {offsets = [5, 0, 8], sizes = [1, 8, 8], strides = [1, 1, 1]} : vector<8x8x16xf32> to vector<1x8x8xf32>
    %64 = vector.shape_cast %63 : vector<1x8x8xf32> to vector<8x8xf32>
    %c0_41 = arith.constant 0 : index
    %c11 = arith.constant 11 : index
    %c0_42 = arith.constant 0 : index
    %c0_43 = arith.constant 0 : index
    %65 = vector.load %arg5[%c0_41, %c11, %c0_42, %c0_43] : memref<1x16x8x8xf32, #tpu.memory_space<vmem>>, vector<1x1x8x8xf32>
    %66 = vector.shape_cast %65 : vector<1x1x8x8xf32> to vector<8x8xf32>
    %67 = vector.shape_cast %64 : vector<8x8xf32> to vector<1x1x8x8xf32>
    tpu.vector_store %arg5[%c0_41, %c11, %c0_42, %c0_43], %67 {strides = array<i32>} : memref<1x16x8x8xf32, #tpu.memory_space<vmem>>, vector<1x1x8x8xf32>,
    %68 = vector.extract_strided_slice %7 {offsets = [6, 0, 0], sizes = [1, 8, 8], strides = [1, 1, 1]} : vector<8x8x16xf32> to vector<1x8x8xf32>
    %69 = vector.shape_cast %68 : vector<1x8x8xf32> to vector<8x8xf32>
    %c0_44 = arith.constant 0 : index
    %c12 = arith.constant 12 : index
    %c0_45 = arith.constant 0 : index
    %c0_46 = arith.constant 0 : index
    %70 = vector.load %arg5[%c0_44, %c12, %c0_45, %c0_46] : memref<1x16x8x8xf32, #tpu.memory_space<vmem>>, vector<1x1x8x8xf32>
    %71 = vector.shape_cast %70 : vector<1x1x8x8xf32> to vector<8x8xf32>
    %72 = vector.shape_cast %69 : vector<8x8xf32> to vector<1x1x8x8xf32>
    tpu.vector_store %arg5[%c0_44, %c12, %c0_45, %c0_46], %72 {strides = array<i32>} : memref<1x16x8x8xf32, #tpu.memory_space<vmem>>, vector<1x1x8x8xf32>,
    %73 = vector.extract_strided_slice %7 {offsets = [6, 0, 8], sizes = [1, 8, 8], strides = [1, 1, 1]} : vector<8x8x16xf32> to vector<1x8x8xf32>
    %74 = vector.shape_cast %73 : vector<1x8x8xf32> to vector<8x8xf32>
    %c0_47 = arith.constant 0 : index
    %c13 = arith.constant 13 : index
    %c0_48 = arith.constant 0 : index
    %c0_49 = arith.constant 0 : index
    %75 = vector.load %arg5[%c0_47, %c13, %c0_48, %c0_49] : memref<1x16x8x8xf32, #tpu.memory_space<vmem>>, vector<1x1x8x8xf32>
    %76 = vector.shape_cast %75 : vector<1x1x8x8xf32> to vector<8x8xf32>
    %77 = vector.shape_cast %74 : vector<8x8xf32> to vector<1x1x8x8xf32>
    tpu.vector_store %arg5[%c0_47, %c13, %c0_48, %c0_49], %77 {strides = array<i32>} : memref<1x16x8x8xf32, #tpu.memory_space<vmem>>, vector<1x1x8x8xf32>,
    %78 = vector.extract_strided_slice %7 {offsets = [7, 0, 0], sizes = [1, 8, 8], strides = [1, 1, 1]} : vector<8x8x16xf32> to vector<1x8x8xf32>
    %79 = vector.shape_cast %78 : vector<1x8x8xf32> to vector<8x8xf32>
    %c0_50 = arith.constant 0 : index
    %c14 = arith.constant 14 : index
    %c0_51 = arith.constant 0 : index
    %c0_52 = arith.constant 0 : index
    %80 = vector.load %arg5[%c0_50, %c14, %c0_51, %c0_52] : memref<1x16x8x8xf32, #tpu.memory_space<vmem>>, vector<1x1x8x8xf32>
    %81 = vector.shape_cast %80 : vector<1x1x8x8xf32> to vector<8x8xf32>
    %82 = vector.shape_cast %79 : vector<8x8xf32> to vector<1x1x8x8xf32>
    tpu.vector_store %arg5[%c0_50, %c14, %c0_51, %c0_52], %82 {strides = array<i32>} : memref<1x16x8x8xf32, #tpu.memory_space<vmem>>, vector<1x1x8x8xf32>,
    %83 = vector.extract_strided_slice %7 {offsets = [7, 0, 8], sizes = [1, 8, 8], strides = [1, 1, 1]} : vector<8x8x16xf32> to vector<1x8x8xf32>
    %84 = vector.shape_cast %83 : vector<1x8x8xf32> to vector<8x8xf32>
    %c0_53 = arith.constant 0 : index
    %c15 = arith.constant 15 : index
    %c0_54 = arith.constant 0 : index
    %c0_55 = arith.constant 0 : index
    %85 = vector.load %arg5[%c0_53, %c15, %c0_54, %c0_55] : memref<1x16x8x8xf32, #tpu.memory_space<vmem>>, vector<1x1x8x8xf32>
    %86 = vector.shape_cast %85 : vector<1x1x8x8xf32> to vector<8x8xf32>
    %87 = vector.shape_cast %84 : vector<8x8xf32> to vector<1x1x8x8xf32>
    tpu.vector_store %arg5[%c0_53, %c15, %c0_54, %c0_55], %87 {strides = array<i32>} : memref<1x16x8x8xf32, #tpu.memory_space<vmem>>, vector<1x1x8x8xf32>,
    return
  }
  func.func @transform_0(%arg0: i32, %arg1: i32) -> (i32, i32, i32, i32) {
    %c0_i32 = arith.constant 0 : i32
    %c0_i32_0 = arith.constant 0 : i32
    %c0_i32_1 = arith.constant 0 : i32
    return %arg0, %arg1, %c0_i32, %c0_i32_0 : i32, i32, i32, i32
  }
  func.func @transform_1(%arg0: i32, %arg1: i32) -> (i32, i32) {
    %c0_i32 = arith.constant 0 : i32
    %c0_i32_0 = arith.constant 0 : i32
    %c0_i32_1 = arith.constant 0 : i32
    return %c0_i32, %c0_i32_0 : i32, i32
  }
  func.func @transform_2(%arg0: i32, %arg1: i32) -> (i32, i32) {
    %c0_i32 = arith.constant 0 : i32
    %c0_i32_0 = arith.constant 0 : i32
    %c0_i32_1 = arith.constant 0 : i32
    return %c0_i32, %c0_i32_0 : i32, i32
  }
  func.func @transform_3(%arg0: i32, %arg1: i32) -> (i32, i32, i32, i32) {
    %c0_i32 = arith.constant 0 : i32
    %c0_i32_0 = arith.constant 0 : i32
    %c0_i32_1 = arith.constant 0 : i32
    return %arg0, %arg1, %c0_i32, %c0_i32_0 : i32, i32, i32, i32
  }
}

module attributes {stable_mosaic.version = 11 : i64} {
  func.func @kernel(%arg0: i32, %arg1: i32, %arg2: memref<1x16x26x4xf32, #tpu.memory_space<vmem>>, %arg3: memref<1x16x26x4xf32, #tpu.memory_space<vmem>>, %arg4: memref<3x3x4x128xf32, #tpu.memory_space<vmem>>, %arg5: memref<3x3x4x128xf32, #tpu.memory_space<vmem>>, %arg6: memref<1x128xf32, #tpu.memory_space<vmem>>, %arg7: memref<3x3x128x128xf32, #tpu.memory_space<vmem>>, %arg8: memref<1x128xf32, #tpu.memory_space<vmem>>, %arg9: memref<1x12x16x128xf32, #tpu.memory_space<vmem>>, %arg10: memref<14x24x128xf32, #tpu.memory_space<vmem>>) attributes {dimension_semantics = [#tpu.dimension_semantics<parallel>, #tpu.dimension_semantics<parallel>], iteration_bounds = array<i64: 2, 1>, scalar_prefetch = 0 : i64, scratch_operands = 1 : i64, tpu.core_type = #tpu.core_type<tc>, window_params = [{transform_indices = @transform_0, window_bounds = array<i64: 1, 16, 26, 4>}, {transform_indices = @transform_1, window_bounds = array<i64: 1, 16, 26, 4>}, {pipeline_mode = #tpu.pipeline_mode<synchronous>, transform_indices = @transform_2, window_bounds = array<i64: 3, 3, 4, 128>}, {pipeline_mode = #tpu.pipeline_mode<synchronous>, transform_indices = @transform_3, window_bounds = array<i64: 3, 3, 4, 128>}, {pipeline_mode = #tpu.pipeline_mode<synchronous>, transform_indices = @transform_4, window_bounds = array<i64: 1, 128>}, {pipeline_mode = #tpu.pipeline_mode<synchronous>, transform_indices = @transform_5, window_bounds = array<i64: 3, 3, 128, 128>}, {pipeline_mode = #tpu.pipeline_mode<synchronous>, transform_indices = @transform_6, window_bounds = array<i64: 1, 128>}, {transform_indices = @transform_7, window_bounds = array<i64: 1, 12, 16, 128>}]} {
    %c12_i32 = arith.constant 12 : i32
    %0 = arith.muli %arg1, %c12_i32 : i32
    %1 = tpu.assume_multiple %0, 12 : i32
    %c0_i32 = arith.constant 0 : i32
    %2 = arith.addi %1, %c0_i32 : i32
    %c0 = arith.constant 0 : index
    %3 = arith.index_cast %2 : i32 to index
    %c0_0 = arith.constant 0 : index
    %c0_1 = arith.constant 0 : index
    %4 = vector.load %arg2[%c0, %3, %c0_0, %c0_1] : memref<1x16x26x4xf32, #tpu.memory_space<vmem>>, vector<1x14x24x4xf32>
    %5 = vector.shape_cast %4 : vector<1x14x24x4xf32> to vector<14x24x4xf32>
    %6 = vector.shape_cast %5 : vector<14x24x4xf32> to vector<336x4xf32>
    %c0_2 = arith.constant 0 : index
    %c0_3 = arith.constant 0 : index
    %c0_4 = arith.constant 0 : index
    %c0_5 = arith.constant 0 : index
    %7 = vector.load %arg4[%c0_2, %c0_3, %c0_4, %c0_5] : memref<3x3x4x128xf32, #tpu.memory_space<vmem>>, vector<1x1x4x128xf32>
    %8 = vector.shape_cast %7 : vector<1x1x4x128xf32> to vector<4x128xf32>
    %cst = arith.constant dense<0.000000e+00> : vector<336x128xf32>
    %9 = tpu.matmul %6, %8, %cst {dimension_numbers = #tpu.dot_dimension_numbers<[1], [0], [0], [1], [0, 0, 1, 1], [], []>} : vector<336x4xf32>, vector<4x128xf32>, vector<336x128xf32> -> vector<336x128xf32>
    %c0_i32_6 = arith.constant 0 : i32
    %10 = arith.addi %1, %c0_i32_6 : i32
    %c0_7 = arith.constant 0 : index
    %11 = arith.index_cast %10 : i32 to index
    %c1 = arith.constant 1 : index
    %c0_8 = arith.constant 0 : index
    %12 = vector.load %arg2[%c0_7, %11, %c1, %c0_8] : memref<1x16x26x4xf32, #tpu.memory_space<vmem>>, vector<1x14x24x4xf32>
    %13 = vector.shape_cast %12 : vector<1x14x24x4xf32> to vector<14x24x4xf32>
    %14 = vector.shape_cast %13 : vector<14x24x4xf32> to vector<336x4xf32>
    %c0_9 = arith.constant 0 : index
    %c1_10 = arith.constant 1 : index
    %c0_11 = arith.constant 0 : index
    %c0_12 = arith.constant 0 : index
    %15 = vector.load %arg4[%c0_9, %c1_10, %c0_11, %c0_12] : memref<3x3x4x128xf32, #tpu.memory_space<vmem>>, vector<1x1x4x128xf32>
    %16 = vector.shape_cast %15 : vector<1x1x4x128xf32> to vector<4x128xf32>
    %cst_13 = arith.constant dense<0.000000e+00> : vector<336x128xf32>
    %17 = tpu.matmul %14, %16, %cst_13 {dimension_numbers = #tpu.dot_dimension_numbers<[1], [0], [0], [1], [0, 0, 1, 1], [], []>} : vector<336x4xf32>, vector<4x128xf32>, vector<336x128xf32> -> vector<336x128xf32>
    %18 = arith.addf %9, %17 : vector<336x128xf32>
    %c0_i32_14 = arith.constant 0 : i32
    %19 = arith.addi %1, %c0_i32_14 : i32
    %c0_15 = arith.constant 0 : index
    %20 = arith.index_cast %19 : i32 to index
    %c2 = arith.constant 2 : index
    %c0_16 = arith.constant 0 : index
    %21 = vector.load %arg2[%c0_15, %20, %c2, %c0_16] : memref<1x16x26x4xf32, #tpu.memory_space<vmem>>, vector<1x14x24x4xf32>
    %22 = vector.shape_cast %21 : vector<1x14x24x4xf32> to vector<14x24x4xf32>
    %23 = vector.shape_cast %22 : vector<14x24x4xf32> to vector<336x4xf32>
    %c0_17 = arith.constant 0 : index
    %c2_18 = arith.constant 2 : index
    %c0_19 = arith.constant 0 : index
    %c0_20 = arith.constant 0 : index
    %24 = vector.load %arg4[%c0_17, %c2_18, %c0_19, %c0_20] : memref<3x3x4x128xf32, #tpu.memory_space<vmem>>, vector<1x1x4x128xf32>
    %25 = vector.shape_cast %24 : vector<1x1x4x128xf32> to vector<4x128xf32>
    %cst_21 = arith.constant dense<0.000000e+00> : vector<336x128xf32>
    %26 = tpu.matmul %23, %25, %cst_21 {dimension_numbers = #tpu.dot_dimension_numbers<[1], [0], [0], [1], [0, 0, 1, 1], [], []>} : vector<336x4xf32>, vector<4x128xf32>, vector<336x128xf32> -> vector<336x128xf32>
    %27 = arith.addf %18, %26 : vector<336x128xf32>
    %c1_i32 = arith.constant 1 : i32
    %28 = arith.addi %1, %c1_i32 : i32
    %c0_22 = arith.constant 0 : index
    %29 = arith.index_cast %28 : i32 to index
    %c0_23 = arith.constant 0 : index
    %c0_24 = arith.constant 0 : index
    %30 = vector.load %arg2[%c0_22, %29, %c0_23, %c0_24] : memref<1x16x26x4xf32, #tpu.memory_space<vmem>>, vector<1x14x24x4xf32>
    %31 = vector.shape_cast %30 : vector<1x14x24x4xf32> to vector<14x24x4xf32>
    %32 = vector.shape_cast %31 : vector<14x24x4xf32> to vector<336x4xf32>
    %c1_25 = arith.constant 1 : index
    %c0_26 = arith.constant 0 : index
    %c0_27 = arith.constant 0 : index
    %c0_28 = arith.constant 0 : index
    %33 = vector.load %arg4[%c1_25, %c0_26, %c0_27, %c0_28] : memref<3x3x4x128xf32, #tpu.memory_space<vmem>>, vector<1x1x4x128xf32>
    %34 = vector.shape_cast %33 : vector<1x1x4x128xf32> to vector<4x128xf32>
    %cst_29 = arith.constant dense<0.000000e+00> : vector<336x128xf32>
    %35 = tpu.matmul %32, %34, %cst_29 {dimension_numbers = #tpu.dot_dimension_numbers<[1], [0], [0], [1], [0, 0, 1, 1], [], []>} : vector<336x4xf32>, vector<4x128xf32>, vector<336x128xf32> -> vector<336x128xf32>
    %36 = arith.addf %27, %35 : vector<336x128xf32>
    %c1_i32_30 = arith.constant 1 : i32
    %37 = arith.addi %1, %c1_i32_30 : i32
    %c0_31 = arith.constant 0 : index
    %38 = arith.index_cast %37 : i32 to index
    %c1_32 = arith.constant 1 : index
    %c0_33 = arith.constant 0 : index
    %39 = vector.load %arg2[%c0_31, %38, %c1_32, %c0_33] : memref<1x16x26x4xf32, #tpu.memory_space<vmem>>, vector<1x14x24x4xf32>
    %40 = vector.shape_cast %39 : vector<1x14x24x4xf32> to vector<14x24x4xf32>
    %41 = vector.shape_cast %40 : vector<14x24x4xf32> to vector<336x4xf32>
    %c1_34 = arith.constant 1 : index
    %c1_35 = arith.constant 1 : index
    %c0_36 = arith.constant 0 : index
    %c0_37 = arith.constant 0 : index
    %42 = vector.load %arg4[%c1_34, %c1_35, %c0_36, %c0_37] : memref<3x3x4x128xf32, #tpu.memory_space<vmem>>, vector<1x1x4x128xf32>
    %43 = vector.shape_cast %42 : vector<1x1x4x128xf32> to vector<4x128xf32>
    %cst_38 = arith.constant dense<0.000000e+00> : vector<336x128xf32>
    %44 = tpu.matmul %41, %43, %cst_38 {dimension_numbers = #tpu.dot_dimension_numbers<[1], [0], [0], [1], [0, 0, 1, 1], [], []>} : vector<336x4xf32>, vector<4x128xf32>, vector<336x128xf32> -> vector<336x128xf32>
    %45 = arith.addf %36, %44 : vector<336x128xf32>
    %c1_i32_39 = arith.constant 1 : i32
    %46 = arith.addi %1, %c1_i32_39 : i32
    %c0_40 = arith.constant 0 : index
    %47 = arith.index_cast %46 : i32 to index
    %c2_41 = arith.constant 2 : index
    %c0_42 = arith.constant 0 : index
    %48 = vector.load %arg2[%c0_40, %47, %c2_41, %c0_42] : memref<1x16x26x4xf32, #tpu.memory_space<vmem>>, vector<1x14x24x4xf32>
    %49 = vector.shape_cast %48 : vector<1x14x24x4xf32> to vector<14x24x4xf32>
    %50 = vector.shape_cast %49 : vector<14x24x4xf32> to vector<336x4xf32>
    %c1_43 = arith.constant 1 : index
    %c2_44 = arith.constant 2 : index
    %c0_45 = arith.constant 0 : index
    %c0_46 = arith.constant 0 : index
    %51 = vector.load %arg4[%c1_43, %c2_44, %c0_45, %c0_46] : memref<3x3x4x128xf32, #tpu.memory_space<vmem>>, vector<1x1x4x128xf32>
    %52 = vector.shape_cast %51 : vector<1x1x4x128xf32> to vector<4x128xf32>
    %cst_47 = arith.constant dense<0.000000e+00> : vector<336x128xf32>
    %53 = tpu.matmul %50, %52, %cst_47 {dimension_numbers = #tpu.dot_dimension_numbers<[1], [0], [0], [1], [0, 0, 1, 1], [], []>} : vector<336x4xf32>, vector<4x128xf32>, vector<336x128xf32> -> vector<336x128xf32>
    %54 = arith.addf %45, %53 : vector<336x128xf32>
    %c2_i32 = arith.constant 2 : i32
    %55 = arith.addi %1, %c2_i32 : i32
    %c0_48 = arith.constant 0 : index
    %56 = arith.index_cast %55 : i32 to index
    %c0_49 = arith.constant 0 : index
    %c0_50 = arith.constant 0 : index
    %57 = vector.load %arg2[%c0_48, %56, %c0_49, %c0_50] : memref<1x16x26x4xf32, #tpu.memory_space<vmem>>, vector<1x14x24x4xf32>
    %58 = vector.shape_cast %57 : vector<1x14x24x4xf32> to vector<14x24x4xf32>
    %59 = vector.shape_cast %58 : vector<14x24x4xf32> to vector<336x4xf32>
    %c2_51 = arith.constant 2 : index
    %c0_52 = arith.constant 0 : index
    %c0_53 = arith.constant 0 : index
    %c0_54 = arith.constant 0 : index
    %60 = vector.load %arg4[%c2_51, %c0_52, %c0_53, %c0_54] : memref<3x3x4x128xf32, #tpu.memory_space<vmem>>, vector<1x1x4x128xf32>
    %61 = vector.shape_cast %60 : vector<1x1x4x128xf32> to vector<4x128xf32>
    %cst_55 = arith.constant dense<0.000000e+00> : vector<336x128xf32>
    %62 = tpu.matmul %59, %61, %cst_55 {dimension_numbers = #tpu.dot_dimension_numbers<[1], [0], [0], [1], [0, 0, 1, 1], [], []>} : vector<336x4xf32>, vector<4x128xf32>, vector<336x128xf32> -> vector<336x128xf32>
    %63 = arith.addf %54, %62 : vector<336x128xf32>
    %c2_i32_56 = arith.constant 2 : i32
    %64 = arith.addi %1, %c2_i32_56 : i32
    %c0_57 = arith.constant 0 : index
    %65 = arith.index_cast %64 : i32 to index
    %c1_58 = arith.constant 1 : index
    %c0_59 = arith.constant 0 : index
    %66 = vector.load %arg2[%c0_57, %65, %c1_58, %c0_59] : memref<1x16x26x4xf32, #tpu.memory_space<vmem>>, vector<1x14x24x4xf32>
    %67 = vector.shape_cast %66 : vector<1x14x24x4xf32> to vector<14x24x4xf32>
    %68 = vector.shape_cast %67 : vector<14x24x4xf32> to vector<336x4xf32>
    %c2_60 = arith.constant 2 : index
    %c1_61 = arith.constant 1 : index
    %c0_62 = arith.constant 0 : index
    %c0_63 = arith.constant 0 : index
    %69 = vector.load %arg4[%c2_60, %c1_61, %c0_62, %c0_63] : memref<3x3x4x128xf32, #tpu.memory_space<vmem>>, vector<1x1x4x128xf32>
    %70 = vector.shape_cast %69 : vector<1x1x4x128xf32> to vector<4x128xf32>
    %cst_64 = arith.constant dense<0.000000e+00> : vector<336x128xf32>
    %71 = tpu.matmul %68, %70, %cst_64 {dimension_numbers = #tpu.dot_dimension_numbers<[1], [0], [0], [1], [0, 0, 1, 1], [], []>} : vector<336x4xf32>, vector<4x128xf32>, vector<336x128xf32> -> vector<336x128xf32>
    %72 = arith.addf %63, %71 : vector<336x128xf32>
    %c2_i32_65 = arith.constant 2 : i32
    %73 = arith.addi %1, %c2_i32_65 : i32
    %c0_66 = arith.constant 0 : index
    %74 = arith.index_cast %73 : i32 to index
    %c2_67 = arith.constant 2 : index
    %c0_68 = arith.constant 0 : index
    %75 = vector.load %arg2[%c0_66, %74, %c2_67, %c0_68] : memref<1x16x26x4xf32, #tpu.memory_space<vmem>>, vector<1x14x24x4xf32>
    %76 = vector.shape_cast %75 : vector<1x14x24x4xf32> to vector<14x24x4xf32>
    %77 = vector.shape_cast %76 : vector<14x24x4xf32> to vector<336x4xf32>
    %c2_69 = arith.constant 2 : index
    %c2_70 = arith.constant 2 : index
    %c0_71 = arith.constant 0 : index
    %c0_72 = arith.constant 0 : index
    %78 = vector.load %arg4[%c2_69, %c2_70, %c0_71, %c0_72] : memref<3x3x4x128xf32, #tpu.memory_space<vmem>>, vector<1x1x4x128xf32>
    %79 = vector.shape_cast %78 : vector<1x1x4x128xf32> to vector<4x128xf32>
    %cst_73 = arith.constant dense<0.000000e+00> : vector<336x128xf32>
    %80 = tpu.matmul %77, %79, %cst_73 {dimension_numbers = #tpu.dot_dimension_numbers<[1], [0], [0], [1], [0, 0, 1, 1], [], []>} : vector<336x4xf32>, vector<4x128xf32>, vector<336x128xf32> -> vector<336x128xf32>
    %81 = arith.addf %72, %80 : vector<336x128xf32>
    %c0_i32_74 = arith.constant 0 : i32
    %82 = arith.addi %1, %c0_i32_74 : i32
    %c0_75 = arith.constant 0 : index
    %83 = arith.index_cast %82 : i32 to index
    %c0_76 = arith.constant 0 : index
    %c0_77 = arith.constant 0 : index
    %84 = vector.load %arg3[%c0_75, %83, %c0_76, %c0_77] : memref<1x16x26x4xf32, #tpu.memory_space<vmem>>, vector<1x14x24x4xf32>
    %85 = vector.shape_cast %84 : vector<1x14x24x4xf32> to vector<14x24x4xf32>
    %86 = vector.shape_cast %85 : vector<14x24x4xf32> to vector<336x4xf32>
    %c0_78 = arith.constant 0 : index
    %c0_79 = arith.constant 0 : index
    %c0_80 = arith.constant 0 : index
    %c0_81 = arith.constant 0 : index
    %87 = vector.load %arg5[%c0_78, %c0_79, %c0_80, %c0_81] : memref<3x3x4x128xf32, #tpu.memory_space<vmem>>, vector<1x1x4x128xf32>
    %88 = vector.shape_cast %87 : vector<1x1x4x128xf32> to vector<4x128xf32>
    %cst_82 = arith.constant dense<0.000000e+00> : vector<336x128xf32>
    %89 = tpu.matmul %86, %88, %cst_82 {dimension_numbers = #tpu.dot_dimension_numbers<[1], [0], [0], [1], [0, 0, 1, 1], [], []>} : vector<336x4xf32>, vector<4x128xf32>, vector<336x128xf32> -> vector<336x128xf32>
    %90 = arith.addf %81, %89 : vector<336x128xf32>
    %c0_i32_83 = arith.constant 0 : i32
    %91 = arith.addi %1, %c0_i32_83 : i32
    %c0_84 = arith.constant 0 : index
    %92 = arith.index_cast %91 : i32 to index
    %c1_85 = arith.constant 1 : index
    %c0_86 = arith.constant 0 : index
    %93 = vector.load %arg3[%c0_84, %92, %c1_85, %c0_86] : memref<1x16x26x4xf32, #tpu.memory_space<vmem>>, vector<1x14x24x4xf32>
    %94 = vector.shape_cast %93 : vector<1x14x24x4xf32> to vector<14x24x4xf32>
    %95 = vector.shape_cast %94 : vector<14x24x4xf32> to vector<336x4xf32>
    %c0_87 = arith.constant 0 : index
    %c1_88 = arith.constant 1 : index
    %c0_89 = arith.constant 0 : index
    %c0_90 = arith.constant 0 : index
    %96 = vector.load %arg5[%c0_87, %c1_88, %c0_89, %c0_90] : memref<3x3x4x128xf32, #tpu.memory_space<vmem>>, vector<1x1x4x128xf32>
    %97 = vector.shape_cast %96 : vector<1x1x4x128xf32> to vector<4x128xf32>
    %cst_91 = arith.constant dense<0.000000e+00> : vector<336x128xf32>
    %98 = tpu.matmul %95, %97, %cst_91 {dimension_numbers = #tpu.dot_dimension_numbers<[1], [0], [0], [1], [0, 0, 1, 1], [], []>} : vector<336x4xf32>, vector<4x128xf32>, vector<336x128xf32> -> vector<336x128xf32>
    %99 = arith.addf %90, %98 : vector<336x128xf32>
    %c0_i32_92 = arith.constant 0 : i32
    %100 = arith.addi %1, %c0_i32_92 : i32
    %c0_93 = arith.constant 0 : index
    %101 = arith.index_cast %100 : i32 to index
    %c2_94 = arith.constant 2 : index
    %c0_95 = arith.constant 0 : index
    %102 = vector.load %arg3[%c0_93, %101, %c2_94, %c0_95] : memref<1x16x26x4xf32, #tpu.memory_space<vmem>>, vector<1x14x24x4xf32>
    %103 = vector.shape_cast %102 : vector<1x14x24x4xf32> to vector<14x24x4xf32>
    %104 = vector.shape_cast %103 : vector<14x24x4xf32> to vector<336x4xf32>
    %c0_96 = arith.constant 0 : index
    %c2_97 = arith.constant 2 : index
    %c0_98 = arith.constant 0 : index
    %c0_99 = arith.constant 0 : index
    %105 = vector.load %arg5[%c0_96, %c2_97, %c0_98, %c0_99] : memref<3x3x4x128xf32, #tpu.memory_space<vmem>>, vector<1x1x4x128xf32>
    %106 = vector.shape_cast %105 : vector<1x1x4x128xf32> to vector<4x128xf32>
    %cst_100 = arith.constant dense<0.000000e+00> : vector<336x128xf32>
    %107 = tpu.matmul %104, %106, %cst_100 {dimension_numbers = #tpu.dot_dimension_numbers<[1], [0], [0], [1], [0, 0, 1, 1], [], []>} : vector<336x4xf32>, vector<4x128xf32>, vector<336x128xf32> -> vector<336x128xf32>
    %108 = arith.addf %99, %107 : vector<336x128xf32>
    %c1_i32_101 = arith.constant 1 : i32
    %109 = arith.addi %1, %c1_i32_101 : i32
    %c0_102 = arith.constant 0 : index
    %110 = arith.index_cast %109 : i32 to index
    %c0_103 = arith.constant 0 : index
    %c0_104 = arith.constant 0 : index
    %111 = vector.load %arg3[%c0_102, %110, %c0_103, %c0_104] : memref<1x16x26x4xf32, #tpu.memory_space<vmem>>, vector<1x14x24x4xf32>
    %112 = vector.shape_cast %111 : vector<1x14x24x4xf32> to vector<14x24x4xf32>
    %113 = vector.shape_cast %112 : vector<14x24x4xf32> to vector<336x4xf32>
    %c1_105 = arith.constant 1 : index
    %c0_106 = arith.constant 0 : index
    %c0_107 = arith.constant 0 : index
    %c0_108 = arith.constant 0 : index
    %114 = vector.load %arg5[%c1_105, %c0_106, %c0_107, %c0_108] : memref<3x3x4x128xf32, #tpu.memory_space<vmem>>, vector<1x1x4x128xf32>
    %115 = vector.shape_cast %114 : vector<1x1x4x128xf32> to vector<4x128xf32>
    %cst_109 = arith.constant dense<0.000000e+00> : vector<336x128xf32>
    %116 = tpu.matmul %113, %115, %cst_109 {dimension_numbers = #tpu.dot_dimension_numbers<[1], [0], [0], [1], [0, 0, 1, 1], [], []>} : vector<336x4xf32>, vector<4x128xf32>, vector<336x128xf32> -> vector<336x128xf32>
    %117 = arith.addf %108, %116 : vector<336x128xf32>
    %c1_i32_110 = arith.constant 1 : i32
    %118 = arith.addi %1, %c1_i32_110 : i32
    %c0_111 = arith.constant 0 : index
    %119 = arith.index_cast %118 : i32 to index
    %c1_112 = arith.constant 1 : index
    %c0_113 = arith.constant 0 : index
    %120 = vector.load %arg3[%c0_111, %119, %c1_112, %c0_113] : memref<1x16x26x4xf32, #tpu.memory_space<vmem>>, vector<1x14x24x4xf32>
    %121 = vector.shape_cast %120 : vector<1x14x24x4xf32> to vector<14x24x4xf32>
    %122 = vector.shape_cast %121 : vector<14x24x4xf32> to vector<336x4xf32>
    %c1_114 = arith.constant 1 : index
    %c1_115 = arith.constant 1 : index
    %c0_116 = arith.constant 0 : index
    %c0_117 = arith.constant 0 : index
    %123 = vector.load %arg5[%c1_114, %c1_115, %c0_116, %c0_117] : memref<3x3x4x128xf32, #tpu.memory_space<vmem>>, vector<1x1x4x128xf32>
    %124 = vector.shape_cast %123 : vector<1x1x4x128xf32> to vector<4x128xf32>
    %cst_118 = arith.constant dense<0.000000e+00> : vector<336x128xf32>
    %125 = tpu.matmul %122, %124, %cst_118 {dimension_numbers = #tpu.dot_dimension_numbers<[1], [0], [0], [1], [0, 0, 1, 1], [], []>} : vector<336x4xf32>, vector<4x128xf32>, vector<336x128xf32> -> vector<336x128xf32>
    %126 = arith.addf %117, %125 : vector<336x128xf32>
    %c1_i32_119 = arith.constant 1 : i32
    %127 = arith.addi %1, %c1_i32_119 : i32
    %c0_120 = arith.constant 0 : index
    %128 = arith.index_cast %127 : i32 to index
    %c2_121 = arith.constant 2 : index
    %c0_122 = arith.constant 0 : index
    %129 = vector.load %arg3[%c0_120, %128, %c2_121, %c0_122] : memref<1x16x26x4xf32, #tpu.memory_space<vmem>>, vector<1x14x24x4xf32>
    %130 = vector.shape_cast %129 : vector<1x14x24x4xf32> to vector<14x24x4xf32>
    %131 = vector.shape_cast %130 : vector<14x24x4xf32> to vector<336x4xf32>
    %c1_123 = arith.constant 1 : index
    %c2_124 = arith.constant 2 : index
    %c0_125 = arith.constant 0 : index
    %c0_126 = arith.constant 0 : index
    %132 = vector.load %arg5[%c1_123, %c2_124, %c0_125, %c0_126] : memref<3x3x4x128xf32, #tpu.memory_space<vmem>>, vector<1x1x4x128xf32>
    %133 = vector.shape_cast %132 : vector<1x1x4x128xf32> to vector<4x128xf32>
    %cst_127 = arith.constant dense<0.000000e+00> : vector<336x128xf32>
    %134 = tpu.matmul %131, %133, %cst_127 {dimension_numbers = #tpu.dot_dimension_numbers<[1], [0], [0], [1], [0, 0, 1, 1], [], []>} : vector<336x4xf32>, vector<4x128xf32>, vector<336x128xf32> -> vector<336x128xf32>
    %135 = arith.addf %126, %134 : vector<336x128xf32>
    %c2_i32_128 = arith.constant 2 : i32
    %136 = arith.addi %1, %c2_i32_128 : i32
    %c0_129 = arith.constant 0 : index
    %137 = arith.index_cast %136 : i32 to index
    %c0_130 = arith.constant 0 : index
    %c0_131 = arith.constant 0 : index
    %138 = vector.load %arg3[%c0_129, %137, %c0_130, %c0_131] : memref<1x16x26x4xf32, #tpu.memory_space<vmem>>, vector<1x14x24x4xf32>
    %139 = vector.shape_cast %138 : vector<1x14x24x4xf32> to vector<14x24x4xf32>
    %140 = vector.shape_cast %139 : vector<14x24x4xf32> to vector<336x4xf32>
    %c2_132 = arith.constant 2 : index
    %c0_133 = arith.constant 0 : index
    %c0_134 = arith.constant 0 : index
    %c0_135 = arith.constant 0 : index
    %141 = vector.load %arg5[%c2_132, %c0_133, %c0_134, %c0_135] : memref<3x3x4x128xf32, #tpu.memory_space<vmem>>, vector<1x1x4x128xf32>
    %142 = vector.shape_cast %141 : vector<1x1x4x128xf32> to vector<4x128xf32>
    %cst_136 = arith.constant dense<0.000000e+00> : vector<336x128xf32>
    %143 = tpu.matmul %140, %142, %cst_136 {dimension_numbers = #tpu.dot_dimension_numbers<[1], [0], [0], [1], [0, 0, 1, 1], [], []>} : vector<336x4xf32>, vector<4x128xf32>, vector<336x128xf32> -> vector<336x128xf32>
    %144 = arith.addf %135, %143 : vector<336x128xf32>
    %c2_i32_137 = arith.constant 2 : i32
    %145 = arith.addi %1, %c2_i32_137 : i32
    %c0_138 = arith.constant 0 : index
    %146 = arith.index_cast %145 : i32 to index
    %c1_139 = arith.constant 1 : index
    %c0_140 = arith.constant 0 : index
    %147 = vector.load %arg3[%c0_138, %146, %c1_139, %c0_140] : memref<1x16x26x4xf32, #tpu.memory_space<vmem>>, vector<1x14x24x4xf32>
    %148 = vector.shape_cast %147 : vector<1x14x24x4xf32> to vector<14x24x4xf32>
    %149 = vector.shape_cast %148 : vector<14x24x4xf32> to vector<336x4xf32>
    %c2_141 = arith.constant 2 : index
    %c1_142 = arith.constant 1 : index
    %c0_143 = arith.constant 0 : index
    %c0_144 = arith.constant 0 : index
    %150 = vector.load %arg5[%c2_141, %c1_142, %c0_143, %c0_144] : memref<3x3x4x128xf32, #tpu.memory_space<vmem>>, vector<1x1x4x128xf32>
    %151 = vector.shape_cast %150 : vector<1x1x4x128xf32> to vector<4x128xf32>
    %cst_145 = arith.constant dense<0.000000e+00> : vector<336x128xf32>
    %152 = tpu.matmul %149, %151, %cst_145 {dimension_numbers = #tpu.dot_dimension_numbers<[1], [0], [0], [1], [0, 0, 1, 1], [], []>} : vector<336x4xf32>, vector<4x128xf32>, vector<336x128xf32> -> vector<336x128xf32>
    %153 = arith.addf %144, %152 : vector<336x128xf32>
    %c2_i32_146 = arith.constant 2 : i32
    %154 = arith.addi %1, %c2_i32_146 : i32
    %c0_147 = arith.constant 0 : index
    %155 = arith.index_cast %154 : i32 to index
    %c2_148 = arith.constant 2 : index
    %c0_149 = arith.constant 0 : index
    %156 = vector.load %arg3[%c0_147, %155, %c2_148, %c0_149] : memref<1x16x26x4xf32, #tpu.memory_space<vmem>>, vector<1x14x24x4xf32>
    %157 = vector.shape_cast %156 : vector<1x14x24x4xf32> to vector<14x24x4xf32>
    %158 = vector.shape_cast %157 : vector<14x24x4xf32> to vector<336x4xf32>
    %c2_150 = arith.constant 2 : index
    %c2_151 = arith.constant 2 : index
    %c0_152 = arith.constant 0 : index
    %c0_153 = arith.constant 0 : index
    %159 = vector.load %arg5[%c2_150, %c2_151, %c0_152, %c0_153] : memref<3x3x4x128xf32, #tpu.memory_space<vmem>>, vector<1x1x4x128xf32>
    %160 = vector.shape_cast %159 : vector<1x1x4x128xf32> to vector<4x128xf32>
    %cst_154 = arith.constant dense<0.000000e+00> : vector<336x128xf32>
    %161 = tpu.matmul %158, %160, %cst_154 {dimension_numbers = #tpu.dot_dimension_numbers<[1], [0], [0], [1], [0, 0, 1, 1], [], []>} : vector<336x4xf32>, vector<4x128xf32>, vector<336x128xf32> -> vector<336x128xf32>
    %162 = arith.addf %153, %161 : vector<336x128xf32>
    %c0_155 = arith.constant 0 : index
    %c0_156 = arith.constant 0 : index
    %163 = vector.load %arg6[%c0_155, %c0_156] : memref<1x128xf32, #tpu.memory_space<vmem>>, vector<1x128xf32>
    %164 = vector.broadcast %163 : vector<1x128xf32> to vector<336x128xf32>
    %165 = arith.addf %162, %164 : vector<336x128xf32>
    %cst_157 = arith.constant 0.000000e+00 : f32
    %166 = vector.broadcast %cst_157 : f32 to vector<336x128xf32>
    %167 = arith.maximumf %165, %166 : vector<336x128xf32>
    %168 = vector.shape_cast %167 : vector<336x128xf32> to vector<14x24x128xf32>
    %c0_158 = arith.constant 0 : index
    %c0_159 = arith.constant 0 : index
    %c0_160 = arith.constant 0 : index
    %169 = vector.load %arg10[%c0_158, %c0_159, %c0_160] : memref<14x24x128xf32, #tpu.memory_space<vmem>>, vector<14x24x128xf32>
    tpu.vector_store %arg10[%c0_158, %c0_159, %c0_160], %168 {strides = array<i32>} : memref<14x24x128xf32, #tpu.memory_space<vmem>>, vector<14x24x128xf32>,
    %c0_161 = arith.constant 0 : index
    %c0_162 = arith.constant 0 : index
    %c0_163 = arith.constant 0 : index
    %170 = vector.load %arg10[%c0_161, %c0_162, %c0_163] : memref<14x24x128xf32, #tpu.memory_space<vmem>>, vector<12x16x128xf32>
    %171 = vector.shape_cast %170 : vector<12x16x128xf32> to vector<192x128xf32>
    %c0_164 = arith.constant 0 : index
    %c0_165 = arith.constant 0 : index
    %c0_166 = arith.constant 0 : index
    %c0_167 = arith.constant 0 : index
    %172 = vector.load %arg7[%c0_164, %c0_165, %c0_166, %c0_167] : memref<3x3x128x128xf32, #tpu.memory_space<vmem>>, vector<1x1x128x128xf32>
    %173 = vector.shape_cast %172 : vector<1x1x128x128xf32> to vector<128x128xf32>
    %cst_168 = arith.constant dense<0.000000e+00> : vector<192x128xf32>
    %174 = tpu.matmul %171, %173, %cst_168 {dimension_numbers = #tpu.dot_dimension_numbers<[1], [0], [0], [1], [0, 0, 1, 1], [], []>} : vector<192x128xf32>, vector<128x128xf32>, vector<192x128xf32> -> vector<192x128xf32>
    %c0_169 = arith.constant 0 : index
    %c1_170 = arith.constant 1 : index
    %c0_171 = arith.constant 0 : index
    %175 = vector.load %arg10[%c0_169, %c1_170, %c0_171] : memref<14x24x128xf32, #tpu.memory_space<vmem>>, vector<12x16x128xf32>
    %176 = vector.shape_cast %175 : vector<12x16x128xf32> to vector<192x128xf32>
    %c0_172 = arith.constant 0 : index
    %c1_173 = arith.constant 1 : index
    %c0_174 = arith.constant 0 : index
    %c0_175 = arith.constant 0 : index
    %177 = vector.load %arg7[%c0_172, %c1_173, %c0_174, %c0_175] : memref<3x3x128x128xf32, #tpu.memory_space<vmem>>, vector<1x1x128x128xf32>
    %178 = vector.shape_cast %177 : vector<1x1x128x128xf32> to vector<128x128xf32>
    %cst_176 = arith.constant dense<0.000000e+00> : vector<192x128xf32>
    %179 = tpu.matmul %176, %178, %cst_176 {dimension_numbers = #tpu.dot_dimension_numbers<[1], [0], [0], [1], [0, 0, 1, 1], [], []>} : vector<192x128xf32>, vector<128x128xf32>, vector<192x128xf32> -> vector<192x128xf32>
    %180 = arith.addf %174, %179 : vector<192x128xf32>
    %c0_177 = arith.constant 0 : index
    %c2_178 = arith.constant 2 : index
    %c0_179 = arith.constant 0 : index
    %181 = vector.load %arg10[%c0_177, %c2_178, %c0_179] : memref<14x24x128xf32, #tpu.memory_space<vmem>>, vector<12x16x128xf32>
    %182 = vector.shape_cast %181 : vector<12x16x128xf32> to vector<192x128xf32>
    %c0_180 = arith.constant 0 : index
    %c2_181 = arith.constant 2 : index
    %c0_182 = arith.constant 0 : index
    %c0_183 = arith.constant 0 : index
    %183 = vector.load %arg7[%c0_180, %c2_181, %c0_182, %c0_183] : memref<3x3x128x128xf32, #tpu.memory_space<vmem>>, vector<1x1x128x128xf32>
    %184 = vector.shape_cast %183 : vector<1x1x128x128xf32> to vector<128x128xf32>
    %cst_184 = arith.constant dense<0.000000e+00> : vector<192x128xf32>
    %185 = tpu.matmul %182, %184, %cst_184 {dimension_numbers = #tpu.dot_dimension_numbers<[1], [0], [0], [1], [0, 0, 1, 1], [], []>} : vector<192x128xf32>, vector<128x128xf32>, vector<192x128xf32> -> vector<192x128xf32>
    %186 = arith.addf %180, %185 : vector<192x128xf32>
    %c1_185 = arith.constant 1 : index
    %c0_186 = arith.constant 0 : index
    %c0_187 = arith.constant 0 : index
    %187 = vector.load %arg10[%c1_185, %c0_186, %c0_187] : memref<14x24x128xf32, #tpu.memory_space<vmem>>, vector<12x16x128xf32>
    %188 = vector.shape_cast %187 : vector<12x16x128xf32> to vector<192x128xf32>
    %c1_188 = arith.constant 1 : index
    %c0_189 = arith.constant 0 : index
    %c0_190 = arith.constant 0 : index
    %c0_191 = arith.constant 0 : index
    %189 = vector.load %arg7[%c1_188, %c0_189, %c0_190, %c0_191] : memref<3x3x128x128xf32, #tpu.memory_space<vmem>>, vector<1x1x128x128xf32>
    %190 = vector.shape_cast %189 : vector<1x1x128x128xf32> to vector<128x128xf32>
    %cst_192 = arith.constant dense<0.000000e+00> : vector<192x128xf32>
    %191 = tpu.matmul %188, %190, %cst_192 {dimension_numbers = #tpu.dot_dimension_numbers<[1], [0], [0], [1], [0, 0, 1, 1], [], []>} : vector<192x128xf32>, vector<128x128xf32>, vector<192x128xf32> -> vector<192x128xf32>
    %192 = arith.addf %186, %191 : vector<192x128xf32>
    %c1_193 = arith.constant 1 : index
    %c1_194 = arith.constant 1 : index
    %c0_195 = arith.constant 0 : index
    %193 = vector.load %arg10[%c1_193, %c1_194, %c0_195] : memref<14x24x128xf32, #tpu.memory_space<vmem>>, vector<12x16x128xf32>
    %194 = vector.shape_cast %193 : vector<12x16x128xf32> to vector<192x128xf32>
    %c1_196 = arith.constant 1 : index
    %c1_197 = arith.constant 1 : index
    %c0_198 = arith.constant 0 : index
    %c0_199 = arith.constant 0 : index
    %195 = vector.load %arg7[%c1_196, %c1_197, %c0_198, %c0_199] : memref<3x3x128x128xf32, #tpu.memory_space<vmem>>, vector<1x1x128x128xf32>
    %196 = vector.shape_cast %195 : vector<1x1x128x128xf32> to vector<128x128xf32>
    %cst_200 = arith.constant dense<0.000000e+00> : vector<192x128xf32>
    %197 = tpu.matmul %194, %196, %cst_200 {dimension_numbers = #tpu.dot_dimension_numbers<[1], [0], [0], [1], [0, 0, 1, 1], [], []>} : vector<192x128xf32>, vector<128x128xf32>, vector<192x128xf32> -> vector<192x128xf32>
    %198 = arith.addf %192, %197 : vector<192x128xf32>
    %c1_201 = arith.constant 1 : index
    %c2_202 = arith.constant 2 : index
    %c0_203 = arith.constant 0 : index
    %199 = vector.load %arg10[%c1_201, %c2_202, %c0_203] : memref<14x24x128xf32, #tpu.memory_space<vmem>>, vector<12x16x128xf32>
    %200 = vector.shape_cast %199 : vector<12x16x128xf32> to vector<192x128xf32>
    %c1_204 = arith.constant 1 : index
    %c2_205 = arith.constant 2 : index
    %c0_206 = arith.constant 0 : index
    %c0_207 = arith.constant 0 : index
    %201 = vector.load %arg7[%c1_204, %c2_205, %c0_206, %c0_207] : memref<3x3x128x128xf32, #tpu.memory_space<vmem>>, vector<1x1x128x128xf32>
    %202 = vector.shape_cast %201 : vector<1x1x128x128xf32> to vector<128x128xf32>
    %cst_208 = arith.constant dense<0.000000e+00> : vector<192x128xf32>
    %203 = tpu.matmul %200, %202, %cst_208 {dimension_numbers = #tpu.dot_dimension_numbers<[1], [0], [0], [1], [0, 0, 1, 1], [], []>} : vector<192x128xf32>, vector<128x128xf32>, vector<192x128xf32> -> vector<192x128xf32>
    %204 = arith.addf %198, %203 : vector<192x128xf32>
    %c2_209 = arith.constant 2 : index
    %c0_210 = arith.constant 0 : index
    %c0_211 = arith.constant 0 : index
    %205 = vector.load %arg10[%c2_209, %c0_210, %c0_211] : memref<14x24x128xf32, #tpu.memory_space<vmem>>, vector<12x16x128xf32>
    %206 = vector.shape_cast %205 : vector<12x16x128xf32> to vector<192x128xf32>
    %c2_212 = arith.constant 2 : index
    %c0_213 = arith.constant 0 : index
    %c0_214 = arith.constant 0 : index
    %c0_215 = arith.constant 0 : index
    %207 = vector.load %arg7[%c2_212, %c0_213, %c0_214, %c0_215] : memref<3x3x128x128xf32, #tpu.memory_space<vmem>>, vector<1x1x128x128xf32>
    %208 = vector.shape_cast %207 : vector<1x1x128x128xf32> to vector<128x128xf32>
    %cst_216 = arith.constant dense<0.000000e+00> : vector<192x128xf32>
    %209 = tpu.matmul %206, %208, %cst_216 {dimension_numbers = #tpu.dot_dimension_numbers<[1], [0], [0], [1], [0, 0, 1, 1], [], []>} : vector<192x128xf32>, vector<128x128xf32>, vector<192x128xf32> -> vector<192x128xf32>
    %210 = arith.addf %204, %209 : vector<192x128xf32>
    %c2_217 = arith.constant 2 : index
    %c1_218 = arith.constant 1 : index
    %c0_219 = arith.constant 0 : index
    %211 = vector.load %arg10[%c2_217, %c1_218, %c0_219] : memref<14x24x128xf32, #tpu.memory_space<vmem>>, vector<12x16x128xf32>
    %212 = vector.shape_cast %211 : vector<12x16x128xf32> to vector<192x128xf32>
    %c2_220 = arith.constant 2 : index
    %c1_221 = arith.constant 1 : index
    %c0_222 = arith.constant 0 : index
    %c0_223 = arith.constant 0 : index
    %213 = vector.load %arg7[%c2_220, %c1_221, %c0_222, %c0_223] : memref<3x3x128x128xf32, #tpu.memory_space<vmem>>, vector<1x1x128x128xf32>
    %214 = vector.shape_cast %213 : vector<1x1x128x128xf32> to vector<128x128xf32>
    %cst_224 = arith.constant dense<0.000000e+00> : vector<192x128xf32>
    %215 = tpu.matmul %212, %214, %cst_224 {dimension_numbers = #tpu.dot_dimension_numbers<[1], [0], [0], [1], [0, 0, 1, 1], [], []>} : vector<192x128xf32>, vector<128x128xf32>, vector<192x128xf32> -> vector<192x128xf32>
    %216 = arith.addf %210, %215 : vector<192x128xf32>
    %c2_225 = arith.constant 2 : index
    %c2_226 = arith.constant 2 : index
    %c0_227 = arith.constant 0 : index
    %217 = vector.load %arg10[%c2_225, %c2_226, %c0_227] : memref<14x24x128xf32, #tpu.memory_space<vmem>>, vector<12x16x128xf32>
    %218 = vector.shape_cast %217 : vector<12x16x128xf32> to vector<192x128xf32>
    %c2_228 = arith.constant 2 : index
    %c2_229 = arith.constant 2 : index
    %c0_230 = arith.constant 0 : index
    %c0_231 = arith.constant 0 : index
    %219 = vector.load %arg7[%c2_228, %c2_229, %c0_230, %c0_231] : memref<3x3x128x128xf32, #tpu.memory_space<vmem>>, vector<1x1x128x128xf32>
    %220 = vector.shape_cast %219 : vector<1x1x128x128xf32> to vector<128x128xf32>
    %cst_232 = arith.constant dense<0.000000e+00> : vector<192x128xf32>
    %221 = tpu.matmul %218, %220, %cst_232 {dimension_numbers = #tpu.dot_dimension_numbers<[1], [0], [0], [1], [0, 0, 1, 1], [], []>} : vector<192x128xf32>, vector<128x128xf32>, vector<192x128xf32> -> vector<192x128xf32>
    %222 = arith.addf %216, %221 : vector<192x128xf32>
    %c0_233 = arith.constant 0 : index
    %c0_234 = arith.constant 0 : index
    %223 = vector.load %arg8[%c0_233, %c0_234] : memref<1x128xf32, #tpu.memory_space<vmem>>, vector<1x128xf32>
    %224 = vector.broadcast %223 : vector<1x128xf32> to vector<192x128xf32>
    %225 = arith.addf %222, %224 : vector<192x128xf32>
    %cst_235 = arith.constant 0.000000e+00 : f32
    %226 = vector.broadcast %cst_235 : f32 to vector<192x128xf32>
    %227 = arith.maximumf %225, %226 : vector<192x128xf32>
    %228 = vector.shape_cast %227 : vector<192x128xf32> to vector<12x16x128xf32>
    %c0_236 = arith.constant 0 : index
    %c0_237 = arith.constant 0 : index
    %c0_238 = arith.constant 0 : index
    %c0_239 = arith.constant 0 : index
    %229 = vector.load %arg9[%c0_236, %c0_237, %c0_238, %c0_239] : memref<1x12x16x128xf32, #tpu.memory_space<vmem>>, vector<1x12x16x128xf32>
    %230 = vector.shape_cast %229 : vector<1x12x16x128xf32> to vector<12x16x128xf32>
    %231 = vector.shape_cast %228 : vector<12x16x128xf32> to vector<1x12x16x128xf32>
    tpu.vector_store %arg9[%c0_236, %c0_237, %c0_238, %c0_239], %231 {strides = array<i32>} : memref<1x12x16x128xf32, #tpu.memory_space<vmem>>, vector<1x12x16x128xf32>,
    return
  }
  func.func @transform_0(%arg0: i32, %arg1: i32) -> (i32, i32, i32, i32) {
    %c0_i32 = arith.constant 0 : i32
    %c0_i32_0 = arith.constant 0 : i32
    %c0_i32_1 = arith.constant 0 : i32
    %c0_i32_2 = arith.constant 0 : i32
    return %arg0, %c0_i32, %c0_i32_0, %c0_i32_1 : i32, i32, i32, i32
  }
  func.func @transform_1(%arg0: i32, %arg1: i32) -> (i32, i32, i32, i32) {
    %c0_i32 = arith.constant 0 : i32
    %c0_i32_0 = arith.constant 0 : i32
    %c0_i32_1 = arith.constant 0 : i32
    %c0_i32_2 = arith.constant 0 : i32
    return %arg0, %c0_i32, %c0_i32_0, %c0_i32_1 : i32, i32, i32, i32
  }
  func.func @transform_2(%arg0: i32, %arg1: i32) -> (i32, i32, i32, i32) {
    %c0_i32 = arith.constant 0 : i32
    %c0_i32_0 = arith.constant 0 : i32
    %c0_i32_1 = arith.constant 0 : i32
    %c0_i32_2 = arith.constant 0 : i32
    %c0_i32_3 = arith.constant 0 : i32
    return %c0_i32, %c0_i32_0, %c0_i32_1, %c0_i32_2 : i32, i32, i32, i32
  }
  func.func @transform_3(%arg0: i32, %arg1: i32) -> (i32, i32, i32, i32) {
    %c0_i32 = arith.constant 0 : i32
    %c0_i32_0 = arith.constant 0 : i32
    %c0_i32_1 = arith.constant 0 : i32
    %c0_i32_2 = arith.constant 0 : i32
    %c0_i32_3 = arith.constant 0 : i32
    return %c0_i32, %c0_i32_0, %c0_i32_1, %c0_i32_2 : i32, i32, i32, i32
  }
  func.func @transform_4(%arg0: i32, %arg1: i32) -> (i32, i32) {
    %c0_i32 = arith.constant 0 : i32
    %c0_i32_0 = arith.constant 0 : i32
    %c0_i32_1 = arith.constant 0 : i32
    return %c0_i32, %c0_i32_0 : i32, i32
  }
  func.func @transform_5(%arg0: i32, %arg1: i32) -> (i32, i32, i32, i32) {
    %c0_i32 = arith.constant 0 : i32
    %c0_i32_0 = arith.constant 0 : i32
    %c0_i32_1 = arith.constant 0 : i32
    %c0_i32_2 = arith.constant 0 : i32
    %c0_i32_3 = arith.constant 0 : i32
    return %c0_i32, %c0_i32_0, %c0_i32_1, %c0_i32_2 : i32, i32, i32, i32
  }
  func.func @transform_6(%arg0: i32, %arg1: i32) -> (i32, i32) {
    %c0_i32 = arith.constant 0 : i32
    %c0_i32_0 = arith.constant 0 : i32
    %c0_i32_1 = arith.constant 0 : i32
    return %c0_i32, %c0_i32_0 : i32, i32
  }
  func.func @transform_7(%arg0: i32, %arg1: i32) -> (i32, i32, i32, i32) {
    %c0_i32 = arith.constant 0 : i32
    %c0_i32_0 = arith.constant 0 : i32
    %c0_i32_1 = arith.constant 0 : i32
    return %arg0, %arg1, %c0_i32, %c0_i32_0 : i32, i32, i32, i32
  }
}

</mosaic_0001>

<bundles_post_ra>
// kernel: tile.8
= control target key start
LH: loop header
LB: loop body
LE: loop exit
PB: predicated region body
PF: predicated region fallthrough
CT: control target
= control target key end

     0   :  { %s22_s0 = inlined_call_operand.vmem [shape: f32[4], index: 0, kind: input, shape index: {}]   ;;  %s23_s1 = inlined_call_operand.vmem [shape: f32[4,4], index: 1, kind: output, shape index: {}]  }
   0x1   :  { %v4_v0 = vld [vmem:[%s22_s0] ss:$0 sm:$0xff] }
   0x2   :  { %5 = vst [vmem:[%s23_s1] sm:$0xf] %v4_v0 }

// kernel: tile.9
= control target key start
LH: loop header
LB: loop body
LE: loop exit
PB: predicated region body
PF: predicated region fallthrough
CT: control target
= control target key end

     0   :  { %vm8_vm0 = vcmask 31744   ;;  %s40_s8 = smov 4   ;;  %s41_s9 = smov 8   ;;  %vm14_vm1 = vcmask 130144   ;;  %vm20_vm2 = vcmask 97344   ;;  %vm26_vm3 = vcmask 64544   ;;  %s58_s0 = inlined_call_operand.vmem [shape: f32[4,4], index: 0, kind: input, shape index: {}]   ;;  %s59_s1 = inlined_call_operand.vmem [shape: f32[1,16], index: 1, kind: output, shape index: {}]  }
   0x1   :  { %v5_v0 = vld [vmem:[%s58_s0] sm:$0xf]  ;;  %s39_s0 = smov 12  }
   0x2   :  { %6 = vst [vmem:[#allocation1] sm:$0xf] %v5_v0 }
   0x9   :  { %v11_v1 = vld [vmem:[#allocation1 + $0x3] sm:$0x1]   ;;  %v23_v2 = vld [vmem:[#allocation1 + $0x1] sm:$0x1]   ;;  %v7_v3 = vld [vmem:[#allocation1] sm:$0x1]  }
   0xa   :  { %12 = vrot.lane.b32.xlu0 %v11_v1, %s39_s0  ;;  %24 = vrot.lane.b32.xlu1 %v23_v2, %s40_s8  ;;  %v17_v4 = vld [vmem:[#allocation1 + $0x2] sm:$0x1]   ;;  %9 = vst.msk [vmem:[#allocation0] sm:$0x1] %vm8_vm0, %v7_v3  }
   0xe   :  { %18 = vrot.lane.b32.xlu0 %v17_v4, %s41_s9 }
  0x7c   :  { %v13_v5 = vpop.permute.xlu0 %12   ;;  %v25_v6 = vpop.permute.xlu1 %24  }
  0x7d   :  { %15 = vst.msk [vmem:[#allocation0] sm:$0x1] %vm14_vm1, %v13_v5  }
  0x80   :  { %v19_v7 = vpop.permute.xlu0 %18  }
  0x81   :  { %21 = vst.msk [vmem:[#allocation0] sm:$0x1] %vm20_vm2, %v19_v7  }
  0x82   :  { %27 = vst.msk [vmem:[#allocation0] sm:$0x1] %vm26_vm3, %v25_v6  }
  0x89   :  { %v32_v8 = vld [vmem:[#allocation0] sm:$0x1] }
  0x8a   :  { %35 = vst [vmem:[%s59_s1] sm:$0x1] %v32_v8 }

// kernel: unet_up_forward.2
= control target key start
LH: loop header
LB: loop body
LE: loop exit
PB: predicated region body
PF: predicated region fallthrough
CT: control target
= control target key end

     0   :  { %s638_s12 = smov 0   ;;  %s640_s13 = smov 0   ;;  %s719_s0 = inlined_call_operand.vmem [shape: f32[2,8,8,8], index: 0, kind: input, shape index: {}]   ;;  %s720_s1 = inlined_call_operand.vmem [shape: f32[8,16], index: 1, kind: input, shape index: {}]   ;;  %s721_s2 = inlined_call_operand.vmem [shape: f32[1,16], index: 2, kind: input, shape index: {}]   ;;  %s722_s3 = inlined_call_operand.vmem [shape: f32[2,16,8,8], index: 3, kind: output, shape index: {}]  }
   0x1   :  { %s642_s14 = smov 0  }
   0x2 LB: > { %s25_s15 = sadd.s32 1, %s611_s13  ;;  %p510_p0 = scmp.ge.s32.totalorder %s615_s14, 1  ;;  %s615_s14 = sphi %s642_s14, %s13_s14   ;;  %s611_s13 = sphi %s640_s13, %s724_s13   ;;  %s607_s12 = sphi %s638_s12, %s723_s12  }
   0x3   : > { %p27_p1 = scmp.ge.s32.totalorder %s25_s15, 2  ;;  %p158_p2 = scmp.lt.s32.totalorder %s615_s14, 3 }
   0x5   : > { %s726_s15 = smov (%p27_p1, %s25_s15), 0  ;;  %p159_p3 = pnand %p510_p0, %p158_p2 }
   0x6   : > { %p191_p4 = scmp.lt.s32.totalorder (!%p159_p3), %s607_s12, 1  ;;  %s617_s28 = smov (!%p159_p3), 120  }
   0x7   : > { %162 = sbr.rel (%p159_p3) target bundleno = 341 (0x155), region = 32 }
   0xc   : > { %v210_v0 = vld [vmem:[%s720_s1] sm:$0xff]  ;;  %s728_s12 = smov (!%p191_p4, %s607_s12), 1  ;;  %vm226_vm0 = vcmask 64512  }
   0xd   : > { %552 = vmatprep.subr.mxu0 %v210_v0  ;;  %566 = vmatprep.subr.mxu1 %v210_v0  ;;  %s541_s18 = sshll.u32 %s728_s12, 6  ;;  %s542_s22 = sshll.u32 %s728_s12, 7  ;;  %v515_v9 = vld [vmem:[%s721_s2] ss:$0 sm:$0xff] }
   0xe   : > { %553 = vmatpush3.msra.mxu0 %v210_v0  ;;  %567 = vmatpush3.msra.mxu1 %v210_v0  ;;  %s198_s21 = scalar_lea.vmem %s719_s0, %s541_s18  ;;  %s676_s27 = scalar_lea.vmem %s722_s3, %s542_s22 }
   0xf   : > { %v212_v1 = vld [vmem:[%s198_s21] sm:$0xff]  ;;  %v213_v3 = vld [vmem:[%s198_s21 + $0x8] sm:$0xff]  ;;  %v214_v5 = vld [vmem:[%s198_s21 + $0x10] sm:$0xff] }
  0x10   : > { %v216_v2 = vld [vmem:[%s198_s21 + $0x20] sm:$0xff]  ;;  %554 = vmatprep.mubr.msk.f32.mxu0 %vm226_vm0, %v212_v1  ;;  %v217_v4 = vld [vmem:[%s198_s21 + $0x28] sm:$0xff]  ;;  %v218_v6 = vld [vmem:[%s198_s21 + $0x30] sm:$0xff] }
  0x11   : > { %560 = vmatprep.mubr.msk.f32.mxu1 %vm226_vm0, %v216_v2  ;;  %555 = vmatmul.mubr.msk.f32.vlgmr.msra.gmra.mxu0 %vm226_vm0, %v213_v3  ;;  %v215_v7 = vld [vmem:[%s198_s21 + $0x18] sm:$0xff] }
  0x12   : > { %561 = vmatmul.mubr.msk.f32.vlgmr.msra.gmra.mxu1 %vm226_vm0, %v217_v4  ;;  %557 = vmatprep.mubr.msk.f32.mxu0 %vm226_vm0, %v214_v5  ;;  %v219_v8 = vld [vmem:[%s198_s21 + $0x38] sm:$0xff] }
  0x13   : > { %563 = vmatprep.mubr.msk.f32.mxu1 %vm226_vm0, %v218_v6 }
  0x15   : > { %558 = vmatmul.mubr.msk.f32.gmra.mxu0 %vm226_vm0, %v215_v7 }
  0x16   : > { %564 = vmatmul.mubr.msk.f32.gmra.mxu1 %vm226_vm0, %v219_v8 }
  0xd1   : > { %v556_v10 = vpop.f32.mrf.mxu0 }
  0xd2   : > { %v562_v11 = vpop.f32.mrf.mxu1  ;;  %v323_v12 = vadd.f32 %v556_v10, %v515_v9 }
  0xd3   : > { %v343_v13 = vadd.f32 %v562_v11, %v515_v9  ;;  %v317_v14 = vpop.f32.mrf.mxu0 }
  0xd4   : > { %v337_v15 = vpop.f32.mrf.mxu1  ;;  %525 = vst.msk [vmem:[%s676_s27 + $0x10] sm:$0xff] %vm226_vm0, %v323_v12  ;;  %v318_v16 = vadd.f32 %v515_v9, %v317_v14  ;;  %366 = vrot.lane.b32.xlu0 %v323_v12, %s617_s28 }
  0xd5   : > { %533 = vst.msk [vmem:[%s676_s27 + $0x50] sm:$0xff] %vm226_vm0, %v343_v13  ;;  %v338_v17 = vadd.f32 %v515_v9, %v337_v15  ;;  %398 = vrot.lane.b32.xlu1 %v343_v13, %s617_s28  ;;  %v559_v18 = vpop.f32.mrf.mxu0 }
  0xd6   : > { %v565_v19 = vpop.f32.mrf.mxu1  ;;  %356 = vst.msk [vmem:[%s676_s27] sm:$0xff] %vm226_vm0, %v318_v16  ;;  %v333_v20 = vadd.f32 %v559_v18, %v515_v9 }
  0xd7   : > { %531 = vst.msk [vmem:[%s676_s27 + $0x40] sm:$0xff] %vm226_vm0, %v338_v17  ;;  %v353_v21 = vadd.f32 %v565_v19, %v515_v9  ;;  %v327_v22 = vpop.f32.mrf.mxu0 }
  0xd8   : > { %v347_v23 = vpop.f32.mrf.mxu1  ;;  %529 = vst.msk [vmem:[%s676_s27 + $0x30] sm:$0xff] %vm226_vm0, %v333_v20  ;;  %v328_v24 = vadd.f32 %v515_v9, %v327_v22  ;;  %358 = vrot.lane.b32.xlu0 %v318_v16, %s617_s28 }
  0xd9   : > { %382 = vrot.lane.b32.xlu1 %v333_v20, %s617_s28  ;;  %537 = vst.msk [vmem:[%s676_s27 + $0x70] sm:$0xff] %vm226_vm0, %v353_v21  ;;  %v348_v25 = vadd.f32 %v515_v9, %v347_v23 }
  0xda   : > { %527 = vst.msk [vmem:[%s676_s27 + $0x20] sm:$0xff] %vm226_vm0, %v328_v24 }
  0xdb   : > { %535 = vst.msk [vmem:[%s676_s27 + $0x60] sm:$0xff] %vm226_vm0, %v348_v25 }
  0xdc   : > { %390 = vrot.lane.b32.xlu0 %v338_v17, %s617_s28 }
  0xdd   : > { %374 = vrot.lane.b32.xlu1 %v328_v24, %s617_s28 }
  0xe0   : > { %406 = vrot.lane.b32.xlu0 %v348_v25, %s617_s28 }
  0xe1   : > { %414 = vrot.lane.b32.xlu1 %v353_v21, %s617_s28 }
 0x146   : > { %v367_v27 = vpop.permute.xlu0 %366 }
 0x147   : > { %v399_v26 = vpop.permute.xlu1 %398  ;;  %526 = vst.msk [vmem:[%s676_s27 + $0x18] sm:$0xff] %vm226_vm0, %v367_v27 }
 0x148   : > { %534 = vst.msk [vmem:[%s676_s27 + $0x58] sm:$0xff] %vm226_vm0, %v399_v26 }
 0x14a   : > { %v359_v29 = vpop.permute.xlu0 %358 }
 0x14b   : > { %v383_v28 = vpop.permute.xlu1 %382  ;;  %524 = vst.msk [vmem:[%s676_s27 + $0x8] sm:$0xff] %vm226_vm0, %v359_v29 }
 0x14c   : > { %530 = vst.msk [vmem:[%s676_s27 + $0x38] sm:$0xff] %vm226_vm0, %v383_v28 }
 0x14e   : > { %v391_v31 = vpop.permute.xlu0 %390 }
 0x14f   : > { %v375_v30 = vpop.permute.xlu1 %374  ;;  %532 = vst.msk [vmem:[%s676_s27 + $0x48] sm:$0xff] %vm226_vm0, %v391_v31 }
 0x150   : > { %528 = vst.msk [vmem:[%s676_s27 + $0x28] sm:$0xff] %vm226_vm0, %v375_v30 }
 0x152   : > { %v407_v33 = vpop.permute.xlu0 %406 }
 0x153   : > { %v415_v32 = vpop.permute.xlu1 %414  ;;  %536 = vst.msk [vmem:[%s676_s27 + $0x68] sm:$0xff] %vm226_vm0, %v407_v33 }
 0x154   : > { %538 = vst.msk [vmem:[%s676_s27 + $0x78] sm:$0xff] %vm226_vm0, %v415_v32 }
 0x155 PF: > { %s13_s14 = sadd.s32 1, %s615_s14   ;;  %s723_s12 = smov %s611_s13 }
 0x156   : > { %p10_p5 = scmp.ge.s32.totalorder %s13_s14, 4   ;;  %s724_s13 = smov %s726_s15 }
 0x158   :  { %12 = sbr.rel (!%p10_p5) target bundleno = 2 (0x2), region = 77 }

// kernel: unet_up_forward.3
= control target key start
LH: loop header
LB: loop body
LE: loop exit
PB: predicated region body
PF: predicated region fallthrough
CT: control target
= control target key end

     0   :  { %s16052_s24 = smov 0   ;;  %s16054_s25 = smov 0   ;;  %s21824_s0 = inlined_call_operand.vmem [shape: f32[2,16,26,4], index: 0, kind: input, shape index: {}]   ;;  %s21825_s1 = inlined_call_operand.vmem [shape: f32[2,16,26,4], index: 1, kind: input, shape index: {}]   ;;  %s21826_s2 = inlined_call_operand.vmem [shape: f32[3,3,4,128], index: 2, kind: input, shape index: {}]   ;;  %s21827_s3 = inlined_call_operand.vmem [shape: f32[3,3,4,128], index: 3, kind: input, shape index: {}]   ;;  %s21828_s4 = inlined_call_operand.vmem [shape: f32[1,128], index: 4, kind: input, shape index: {}]   ;;  %s21829_s5 = inlined_call_operand.vmem [shape: f32[3,3,128,128], index: 5, kind: input, shape index: {}]   ;;  %s21830_s6 = inlined_call_operand.vmem [shape: f32[1,128], index: 6, kind: input, shape index: {}]   ;;  %s21831_s7 = inlined_call_operand.vmem [shape: f32[2,12,16,128], index: 7, kind: output, shape index: {}]  }
   0x1   :  { %s16056_s26 = smov 0  }
   0x2 LB: > { %s29_s27 = sadd.s32 1, %s16006_s25  ;;  %p11610_p0 = scmp.ge.s32.totalorder %s16010_s26, 1  ;;  %s16010_s26 = sphi %s16056_s26, %s17_s26   ;;  %s16006_s25 = sphi %s16054_s25, %s22534_s25   ;;  %s16002_s24 = sphi %s16052_s24, %s22533_s24  }
   0x3   : > { %p31_p1 = scmp.ge.s32.totalorder %s29_s27, 2  ;;  %p261_p2 = scmp.lt.s32.totalorder %s16010_s26, 3 }
   0x5   : > { %s22536_s27 = smov (%p31_p1, %s29_s27), 0  ;;  %p262_p3 = pnand %p11610_p0, %p261_p2 }
   0x7   : > { %265 = sbr.rel (%p262_p3) target bundleno = 1398 (0x576), region = 48 }
   0xc   : > { %v11616_v0 = vld [vmem:[%s21826_s2 + $0x4] sm:$0xf]  ;;  %vm541_vm0 = vcmask 1043456   ;;  %p303_p4 = scmp.lt.s32.totalorder %s16002_s24, 1  ;;  %v369_v1 = vld [vmem:[%s21826_s2] sm:$0xf] }
   0xd   : > { %15960 = vmatprep.subr.msk.mxu1 %vm541_vm0, %v11616_v0  ;;  %14178 = vmatprep.subr.msk.mxu0 %vm541_vm0, %v11616_v0  ;;  %v11703_v2 = vld [vmem:[%s21826_s2 + $0x8] sm:$0xf]  ;;  %vm414_vm1 = vcmask 31744   ;;  %v16098_v3 = vld [vmem:[%s21826_s2 + $0xc] sm:$0xf] }
   0xe   : > { %15961 = vmatpush3.msk.msra.mxu1 %vm541_vm0, %v11616_v0  ;;  %14179 = vmatpush3.msk.msra.mxu0 %vm541_vm0, %v11616_v0  ;;  %s22538_s24 = smov (!%p303_p4, %s16002_s24), 1  ;;  %v16140_v14 = vld [vmem:[%s21826_s2 + $0x10] sm:$0xf]  ;;  %v16240_v35 = vld [vmem:[%s21826_s2 + $0x14] sm:$0xf] }
   0xf   : > { %14243 = vmatprep.subr.msk.mxu1 %vm541_vm0, %v369_v1  ;;  %14308 = vmatprep.subr.msk.mxu0 %vm541_vm0, %v11703_v2  ;;  %s13042_s11 = sshll.u32 %s22538_s24, 9  ;;  %s15962_s19 = smul.u32 192, %s22538_s24 }
  0x10   : > { %s16093_s14 = scalar_lea.vmem %s21824_s0, %s13042_s11  ;;  %s17686_s20 = scalar_lea.vmem %s21825_s1, %s13042_s11 }
  0x11   : > { %v370_v4 = vld [vmem:[%s16093_s14 + $0x1] sm:$0xff]  ;;  %v371_v6 = vld [vmem:[%s16093_s14 + $0x9] sm:$0xff]  ;;  %v372_v8 = vld [vmem:[%s16093_s14 + $0x11] sm:$0xff]  ;;  %s21700_s22 = scalar_lea.vmem %s21831_s7, %s15962_s19 }
  0x12   : > { %v16102_v5 = vld [vmem:[%s16093_s14 + $0x141] sm:$0xff]  ;;  %14180 = vmatprep.mubr.msk.f32.mxu0 %vm414_vm1, %v370_v4  ;;  %v16109_v7 = vld [vmem:[%s16093_s14 + $0x149] sm:$0xff]  ;;  %v16113_v9 = vld [vmem:[%s16093_s14 + $0x151] sm:$0xff] }
  0x13   : > { %21987 = vst [vmem:[#allocation3_spill] sm:$0xff] %v16102_v5  ;;  %14225 = vmatprep.mubr.msk.f32.mxu1 %vm414_vm1, %v16102_v5  ;;  %21988 = vst [vmem:[#allocation4_spill] sm:$0xff] %v16109_v7  ;;  %14181 = vmatmul.mubr.msk.f32.vlgmr.msra.gmra.mxu0 %vm414_vm1, %v371_v6  ;;  %v16121_v10 = vld [vmem:[%s16093_s14 + $0x21] sm:$0xff]  ;;  %v16129_v12 = vld [vmem:[%s16093_s14 + $0x29] sm:$0xff] }
  0x14   : > { %21989 = vst [vmem:[#allocation5_spill] sm:$0xff] %v16113_v9  ;;  %14226 = vmatmul.mubr.msk.f32.vlgmr.msra.gmra.mxu1 %vm414_vm1, %v16109_v7  ;;  %14183 = vmatprep.mubr.msk.f32.mxu0 %vm414_vm1, %v372_v8  ;;  %v16124_v11 = vld [vmem:[%s16093_s14 + $0x161] sm:$0xff]  ;;  %v16132_v13 = vld [vmem:[%s16093_s14 + $0x169] sm:$0xff]  ;;  %v16151_v15 = vld [vmem:[%s16093_s14 + $0x31] sm:$0xff] }
  0x15   : > { %14244 = vmatpush3.msk.msra.mxu1 %vm541_vm0, %v369_v1  ;;  %21990 = vst [vmem:[#allocation6_spill] sm:$0xff] %v16124_v11  ;;  %14228 = vmatprep.mubr.msk.f32.mxu1 %vm414_vm1, %v16113_v9  ;;  %21991 = vst [vmem:[#allocation7_spill] sm:$0xff] %v16132_v13  ;;  %v16154_v16 = vld [vmem:[%s16093_s14 + $0x171] sm:$0xff]  ;;  %v16157_v17 = vld [vmem:[%s16093_s14 + $0x41] sm:$0xff] }
  0x16   : > { %14373 = vmatprep.subr.msk.mxu1 %vm541_vm0, %v16098_v3  ;;  %14309 = vmatpush3.msk.msra.mxu0 %vm541_vm0, %v11703_v2  ;;  %21992 = vst [vmem:[#allocation8_spill] sm:$0xff] %v16154_v16  ;;  %v16160_v18 = vld [vmem:[%s16093_s14 + $0x181] sm:$0xff]  ;;  %v16173_v19 = vld [vmem:[%s16093_s14 + $0x49] sm:$0xff]  ;;  %v16179_v21 = vld [vmem:[%s16093_s14 + $0x51] sm:$0xff] }
  0x17   : > { %14184 = vmatmul.mubr.msk.f32.gmra.mxu0 %vm414_vm1, %v16121_v10  ;;  %21993 = vst [vmem:[#allocation9_spill] sm:$0xff] %v16160_v18  ;;  %14438 = vmatprep.subr.msk.mxu0 %vm541_vm0, %v16140_v14  ;;  %v16176_v20 = vld [vmem:[%s16093_s14 + $0x189] sm:$0xff]  ;;  %v16182_v22 = vld [vmem:[%s16093_s14 + $0x191] sm:$0xff]  ;;  %v16193_v23 = vld [vmem:[%s16093_s14 + $0x61] sm:$0xff] }
  0x18   : > { %14229 = vmatmul.mubr.msk.f32.gmra.mxu1 %vm414_vm1, %v16124_v11  ;;  %14186 = vmatprep.mubr.msk.f32.mxu0 %vm414_vm1, %v16129_v12  ;;  %21994 = vst [vmem:[#allocation10_spill] sm:$0xff] %v16176_v20  ;;  %21995 = vst [vmem:[#allocation11_spill] sm:$0xff] %v16182_v22  ;;  %v16196_v24 = vld [vmem:[%s16093_s14 + $0x1a1] sm:$0xff]  ;;  %v16199_v25 = vld [vmem:[%s16093_s14 + $0x69] sm:$0xff] }
  0x19   : > { %14231 = vmatprep.mubr.msk.f32.mxu1 %vm414_vm1, %v16132_v13  ;;  %21996 = vst [vmem:[#allocation12_spill] sm:$0xff] %v16196_v24  ;;  %v16202_v26 = vld [vmem:[%s16093_s14 + $0x1a9] sm:$0xff]  ;;  %v16213_v27 = vld [vmem:[%s16093_s14 + $0x71] sm:$0xff]  ;;  %v16219_v29 = vld [vmem:[%s16093_s14 + $0x81] sm:$0xff] }
  0x1a   : > { %21997 = vst [vmem:[#allocation13_spill] sm:$0xff] %v16202_v26  ;;  %v16216_v28 = vld [vmem:[%s16093_s14 + $0x1b1] sm:$0xff]  ;;  %v327_v30 = vld [vmem:[%s16093_s14] sm:$0xff]  ;;  %v16230_v31 = vld [vmem:[%s16093_s14 + $0x89] sm:$0xff] }
  0x1b   : > { %14187 = vmatmul.mubr.msk.f32.gmra.mxu0 %vm414_vm1, %v16151_v15  ;;  %21998 = vst [vmem:[#allocation14_spill] sm:$0xff] %v16216_v28  ;;  %v328_v32 = vld [vmem:[%s16093_s14 + $0x8] sm:$0xff]  ;;  %v16234_v33 = vld [vmem:[%s16093_s14 + $0x91] sm:$0xff]  ;;  %v16253_v37 = vld [vmem:[%s16093_s14 + $0x20] sm:$0xff] }
  0x1c   : > { %14232 = vmatmul.mubr.msk.f32.gmra.mxu1 %vm414_vm1, %v16154_v16  ;;  %14189 = vmatprep.mubr.msk.f32.mxu0 %vm414_vm1, %v16157_v17  ;;  %v329_v34 = vld [vmem:[%s16093_s14 + $0x10] sm:$0xff]  ;;  %v16250_v36 = vld [vmem:[%s16093_s14 + $0xa1] sm:$0xff] }
  0x1d   : > { %14234 = vmatprep.mubr.msk.f32.mxu1 %vm414_vm1, %v16160_v18  ;;  %v16257_v38 = vld [vmem:[%s16093_s14 + $0xa9] sm:$0xff]  ;;  %v16273_v40 = vld [vmem:[%s16093_s14 + $0xb1] sm:$0xff]  ;;  %v16279_v42 = vld [vmem:[%s16093_s14 + $0xc1] sm:$0xff] }
  0x1e   : > { %v16260_v39 = vld [vmem:[%s16093_s14 + $0x28] sm:$0xff]  ;;  %v16276_v41 = vld [vmem:[%s16093_s14 + $0x30] sm:$0xff]  ;;  %v16282_v43 = vld [vmem:[%s16093_s14 + $0x40] sm:$0xff] }
  0x1f   : > { %14190 = vmatmul.mubr.msk.f32.gmra.mxu0 %vm414_vm1, %v16173_v19  ;;  %v16293_v44 = vld [vmem:[%s16093_s14 + $0xc9] sm:$0xff]  ;;  %v16299_v46 = vld [vmem:[%s16093_s14 + $0xd1] sm:$0xff]  ;;  %v16313_v48 = vld [vmem:[%s16093_s14 + $0xe1] sm:$0xff] }
  0x20   : > { %14235 = vmatmul.mubr.msk.f32.gmra.mxu1 %vm414_vm1, %v16176_v20  ;;  %14192 = vmatprep.mubr.msk.f32.mxu0 %vm414_vm1, %v16179_v21  ;;  %v16296_v45 = vld [vmem:[%s16093_s14 + $0x48] sm:$0xff]  ;;  %v16302_v47 = vld [vmem:[%s16093_s14 + $0x50] sm:$0xff]  ;;  %v16316_v49 = vld [vmem:[%s16093_s14 + $0x60] sm:$0xff] }
  0x21   : > { %14237 = vmatprep.mubr.msk.f32.mxu1 %vm414_vm1, %v16182_v22  ;;  %v16319_v50 = vld [vmem:[%s16093_s14 + $0xe9] sm:$0xff]  ;;  %v16333_v52 = vld [vmem:[%s16093_s14 + $0xf1] sm:$0xff]  ;;  %v16339_v54 = vld [vmem:[%s16093_s14 + $0x101] sm:$0xff] }
  0x22   : > { %21999 = vst [vmem:[#allocation15_spill] sm:$0xff] %v16319_v50  ;;  %v16322_v51 = vld [vmem:[%s16093_s14 + $0x68] sm:$0xff]  ;;  %22000 = vst [vmem:[#allocation16_spill] sm:$0xff] %v16333_v52  ;;  %v16336_v53 = vld [vmem:[%s16093_s14 + $0x70] sm:$0xff] }
  0x23   : > { %14193 = vmatmul.mubr.msk.f32.gmra.mxu0 %vm414_vm1, %v16193_v23  ;;  %22001 = vst [vmem:[#allocation17_spill] sm:$0xff] %v16339_v54  ;;  %v16342_v55 = vld [vmem:[%s16093_s14 + $0x80] sm:$0xff]  ;;  %v16353_v56 = vld [vmem:[%s16093_s14 + $0x109] sm:$0xff]  ;;  %v16359_v58 = vld [vmem:[%s16093_s14 + $0x111] sm:$0xff] }
  0x24   : > { %14238 = vmatmul.mubr.msk.f32.gmra.mxu1 %vm414_vm1, %v16196_v24  ;;  %14195 = vmatprep.mubr.msk.f32.mxu0 %vm414_vm1, %v16199_v25  ;;  %22002 = vst [vmem:[#allocation18_spill] sm:$0xff] %v16353_v56  ;;  %v16356_v57 = vld [vmem:[%s16093_s14 + $0x88] sm:$0xff]  ;;  %22003 = vst [vmem:[#allocation19_spill] sm:$0xff] %v16359_v58  ;;  %v16362_v59 = vld [vmem:[%s16093_s14 + $0x90] sm:$0xff] }
  0x25   : > { %14240 = vmatprep.mubr.msk.f32.mxu1 %vm414_vm1, %v16202_v26  ;;  %v16373_v60 = vld [vmem:[%s16093_s14 + $0x121] sm:$0xff]  ;;  %v16379_v62 = vld [vmem:[%s16093_s14 + $0x129] sm:$0xff]  ;;  %v16393_v0 = vld [vmem:[%s16093_s14 + $0x131] sm:$0xff] }
  0x26   : > { %22004 = vst [vmem:[#allocation20_spill] sm:$0xff] %v16373_v60  ;;  %v16376_v61 = vld [vmem:[%s16093_s14 + $0xa0] sm:$0xff]  ;;  %22005 = vst [vmem:[#allocation21_spill] sm:$0xff] %v16379_v62  ;;  %v16382_v63 = vld [vmem:[%s16093_s14 + $0xa8] sm:$0xff] }
  0x27   : > { %14196 = vmatmul.mubr.msk.f32.gmra.mxu0 %vm414_vm1, %v16213_v27  ;;  %22006 = vst [vmem:[#allocation22_spill] sm:$0xff] %v16393_v0  ;;  %v16396_v1 = vld [vmem:[%s16093_s14 + $0xb0] sm:$0xff]  ;;  %v16399_v2 = vld [vmem:[%s16093_s14 + $0xc0] sm:$0xff]  ;;  %v16410_v4 = vld [vmem:[%s16093_s14 + $0xc8] sm:$0xff] }
  0x28   : > { %14241 = vmatmul.mubr.msk.f32.gmra.mxu1 %vm414_vm1, %v16216_v28  ;;  %14198 = vmatprep.mubr.msk.f32.mxu0 %vm414_vm1, %v16219_v29  ;;  %v1225_v6 = vld [vmem:[%s16093_s14 + $0xa] sm:$0xff]  ;;  %v16459_v26 = vld [vmem:[%s16093_s14 + $0x100] sm:$0xff]  ;;  %v16482_v16 = vld [vmem:[%s16093_s14 + $0x52] sm:$0xff] }
  0x29   : > { %14245 = vmatprep.mubr.msk.f32.mxu1 %vm414_vm1, %v327_v30  ;;  %v16414_v8 = vld [vmem:[%s16093_s14 + $0xd0] sm:$0xff]  ;;  %v16435_v28 = vld [vmem:[%s16093_s14 + $0xe8] sm:$0xff]  ;;  %22012 = vst [vmem:[#allocation28_spill] sm:$0xff] %v16482_v16  ;;  %v16493_v13 = vld [vmem:[%s16093_s14 + $0x120] sm:$0xff] }
  0x2a   : > { %v1226_v30 = vld [vmem:[%s16093_s14 + $0x12] sm:$0xff]  ;;  %v16462_v24 = vld [vmem:[%s16093_s14 + $0x42] sm:$0xff]  ;;  %v16476_v20 = vld [vmem:[%s16093_s14 + $0x4a] sm:$0xff] }
  0x2b   : > { %14199 = vmatmul.mubr.msk.f32.gmra.mxu0 %vm414_vm1, %v16230_v31  ;;  %22010 = vst [vmem:[#allocation26_spill] sm:$0xff] %v16462_v24  ;;  %v16473_v22 = vld [vmem:[%s16093_s14 + $0x108] sm:$0xff]  ;;  %22011 = vst [vmem:[#allocation27_spill] sm:$0xff] %v16476_v20  ;;  %v16479_v18 = vld [vmem:[%s16093_s14 + $0x110] sm:$0xff] }
  0x2c   : > { %14246 = vmatmul.mubr.msk.f32.vlgmr.msra.gmra.mxu1 %vm414_vm1, %v328_v32  ;;  %14201 = vmatprep.mubr.msk.f32.mxu0 %vm414_vm1, %v16234_v33  ;;  %v16423_v32 = vld [vmem:[%s21826_s2 + $0x18] sm:$0xf]  ;;  %v16496_v11 = vld [vmem:[%s16093_s14 + $0x62] sm:$0xff]  ;;  %v16502_v7 = vld [vmem:[%s16093_s14 + $0x6a] sm:$0xff] }
  0x2d   : > { %14374 = vmatpush3.msk.msra.mxu1 %vm541_vm0, %v16098_v3  ;;  %14248 = vmatprep.mubr.msk.f32.mxu1 %vm414_vm1, %v329_v34  ;;  %v1224_v3 = vld [vmem:[%s16093_s14 + $0x2] sm:$0xff]  ;;  %22013 = vst [vmem:[#allocation29_spill] sm:$0xff] %v16496_v11  ;;  %22014 = vst [vmem:[#allocation30_spill] sm:$0xff] %v16502_v7 }
  0x2e   : > { %14503 = vmatprep.subr.msk.mxu1 %vm541_vm0, %v16240_v35  ;;  %v16429_v34 = vld [vmem:[%s16093_s14 + $0xe0] sm:$0xff]  ;;  %v16499_v9 = vld [vmem:[%s16093_s14 + $0x128] sm:$0xff] }
  0x2f   : > { %14202 = vmatmul.mubr.msk.f32.gmra.mxu0 %vm414_vm1, %v16250_v36  ;;  %v16522_v5 = vld [vmem:[%s16093_s14 + $0x82] sm:$0xff] }
  0x30   : > { %14249 = vmatmul.mubr.msk.f32.gmra.mxu1 %vm414_vm1, %v16253_v37  ;;  %14204 = vmatprep.mubr.msk.f32.mxu0 %vm414_vm1, %v16257_v38  ;;  %22016 = vst [vmem:[#allocation32_spill] sm:$0xff] %v16522_v5 }
  0x31   : > { %14251 = vmatprep.mubr.msk.f32.mxu1 %vm414_vm1, %v16260_v39 }
  0x33   : > { %14205 = vmatmul.mubr.msk.f32.gmra.mxu0 %vm414_vm1, %v16273_v40 }
  0x34   : > { %14252 = vmatmul.mubr.msk.f32.gmra.mxu1 %vm414_vm1, %v16276_v41  ;;  %14207 = vmatprep.mubr.msk.f32.mxu0 %vm414_vm1, %v16279_v42 }
  0x35   : > { %14254 = vmatprep.mubr.msk.f32.mxu1 %vm414_vm1, %v16282_v43 }
  0x37   : > { %14208 = vmatmul.mubr.msk.f32.gmra.mxu0 %vm414_vm1, %v16293_v44 }
  0x38   : > { %14255 = vmatmul.mubr.msk.f32.gmra.mxu1 %vm414_vm1, %v16296_v45  ;;  %14210 = vmatprep.mubr.msk.f32.mxu0 %vm414_vm1, %v16299_v46 }
  0x39   : > { %14257 = vmatprep.mubr.msk.f32.mxu1 %vm414_vm1, %v16302_v47 }
  0x3b   : > { %14211 = vmatmul.mubr.msk.f32.gmra.mxu0 %vm414_vm1, %v16313_v48 }
  0x3c   : > { %14258 = vmatmul.mubr.msk.f32.gmra.mxu1 %vm414_vm1, %v16316_v49  ;;  %14213 = vmatprep.mubr.msk.f32.mxu0 %vm414_vm1, %v16319_v50  ;;  %v16639_v50 = vld [vmem:[%s16093_s14 + $0x102] sm:$0xff] }
  0x3d   : > { %14260 = vmatprep.mubr.msk.f32.mxu1 %vm414_vm1, %v16322_v51  ;;  %22028 = vst [vmem:[#allocation44_spill] sm:$0xff] %v16639_v50 }
  0x3f   : > { %14214 = vmatmul.mubr.msk.f32.gmra.mxu0 %vm414_vm1, %v16333_v52  ;;  %v16622_v52 = vld [vmem:[%s16093_s14 + $0xea] sm:$0xff] }
  0x40   : > { %14261 = vmatmul.mubr.msk.f32.gmra.mxu1 %vm414_vm1, %v16336_v53  ;;  %14216 = vmatprep.mubr.msk.f32.mxu0 %vm414_vm1, %v16339_v54  ;;  %v16619_v54 = vld [vmem:[%s16093_s14 + $0x1a8] sm:$0xff]  ;;  %22027 = vst [vmem:[#allocation43_spill] sm:$0xff] %v16622_v52 }
  0x41   : > { %14263 = vmatprep.mubr.msk.f32.mxu1 %vm414_vm1, %v16342_v55  ;;  %22026 = vst [vmem:[#allocation42_spill] sm:$0xff] %v16619_v54 }
  0x43   : > { %14217 = vmatmul.mubr.msk.f32.gmra.mxu0 %vm414_vm1, %v16353_v56  ;;  %v16602_v56 = vld [vmem:[%s16093_s14 + $0xd2] sm:$0xff] }
  0x44   : > { %14264 = vmatmul.mubr.msk.f32.gmra.mxu1 %vm414_vm1, %v16356_v57  ;;  %14219 = vmatprep.mubr.msk.f32.mxu0 %vm414_vm1, %v16359_v58  ;;  %v16599_v58 = vld [vmem:[%s16093_s14 + $0x190] sm:$0xff]  ;;  %22024 = vst [vmem:[#allocation40_spill] sm:$0xff] %v16602_v56 }
  0x45   : > { %14266 = vmatprep.mubr.msk.f32.mxu1 %vm414_vm1, %v16362_v59 }
  0x47   : > { %14220 = vmatmul.mubr.msk.f32.gmra.mxu0 %vm414_vm1, %v16373_v60  ;;  %v16582_v60 = vld [vmem:[%s16093_s14 + $0xc2] sm:$0xff] }
  0x48   : > { %14267 = vmatmul.mubr.msk.f32.gmra.mxu1 %vm414_vm1, %v16376_v61  ;;  %14222 = vmatprep.mubr.msk.f32.mxu0 %vm414_vm1, %v16379_v62  ;;  %v16562_v62 = vld [vmem:[%s16093_s14 + $0xaa] sm:$0xff]  ;;  %22022 = vst [vmem:[#allocation38_spill] sm:$0xff] %v16582_v60 }
  0x49   : > { %14269 = vmatprep.mubr.msk.f32.mxu1 %vm414_vm1, %v16382_v63  ;;  %22020 = vst [vmem:[#allocation36_spill] sm:$0xff] %v16562_v62 }
  0x4b   : > { %14223 = vmatmul.mubr.msk.f32.gmra.mxu0 %vm414_vm1, %v16393_v0  ;;  %v16542_v0 = vld [vmem:[%s16093_s14 + $0x92] sm:$0xff] }
  0x4c   : > { %14270 = vmatmul.mubr.msk.f32.gmra.mxu1 %vm414_vm1, %v16396_v1  ;;  %14310 = vmatprep.mubr.msk.f32.mxu0 %vm414_vm1, %v1224_v3  ;;  %v16432_v3 = vld [vmem:[%s16093_s14 + $0x22] sm:$0xff]  ;;  %22018 = vst [vmem:[#allocation34_spill] sm:$0xff] %v16542_v0 }
  0x4d   : > { %14272 = vmatprep.mubr.msk.f32.mxu1 %vm414_vm1, %v16399_v2  ;;  %22007 = vst [vmem:[#allocation23_spill] sm:$0xff] %v16432_v3 }
  0x4f   : > { %14311 = vmatmul.mubr.msk.f32.vlgmr.msra.gmra.mxu0 %vm414_vm1, %v1225_v6  ;;  %v16438_v6 = vld [vmem:[%s16093_s14 + $0x2a] sm:$0xff] }
  0x50   : > { %14273 = vmatmul.mubr.msk.f32.gmra.mxu1 %vm414_vm1, %v16410_v4  ;;  %14313 = vmatprep.mubr.msk.f32.mxu0 %vm414_vm1, %v1226_v30  ;;  %22008 = vst [vmem:[#allocation24_spill] sm:$0xff] %v16438_v6  ;;  %v16453_v30 = vld [vmem:[%s16093_s14 + $0xf0] sm:$0xff] }
  0x51   : > { %14275 = vmatprep.mubr.msk.f32.mxu1 %vm414_vm1, %v16414_v8  ;;  %14439 = vmatpush3.msk.msra.mxu0 %vm541_vm0, %v16140_v14  ;;  %v16456_v14 = vld [vmem:[%s16093_s14 + $0x32] sm:$0xff] }
  0x52   : > { %14568 = vmatprep.subr.msk.mxu0 %vm541_vm0, %v16423_v32  ;;  %22009 = vst [vmem:[#allocation25_spill] sm:$0xff] %v16456_v14 }
  0x53   : > { %14314 = vmatmul.mubr.msk.f32.gmra.mxu0 %vm414_vm1, %v16432_v3  ;;  %v16579_v3 = vld [vmem:[%s16093_s14 + $0x180] sm:$0xff] }
  0x54   : > { %14276 = vmatmul.mubr.msk.f32.gmra.mxu1 %vm414_vm1, %v16429_v34  ;;  %14316 = vmatprep.mubr.msk.f32.mxu0 %vm414_vm1, %v16438_v6  ;;  %v16559_v6 = vld [vmem:[%s16093_s14 + $0x168] sm:$0xff] }
  0x55   : > { %14278 = vmatprep.mubr.msk.f32.mxu1 %vm414_vm1, %v16435_v28 }
  0x57   : > { %14317 = vmatmul.mubr.msk.f32.gmra.mxu0 %vm414_vm1, %v16456_v14  ;;  %v16539_v14 = vld [vmem:[%s16093_s14 + $0x150] sm:$0xff] }
  0x58   : > { %14279 = vmatmul.mubr.msk.f32.gmra.mxu1 %vm414_vm1, %v16453_v30  ;;  %14319 = vmatprep.mubr.msk.f32.mxu0 %vm414_vm1, %v16462_v24  ;;  %v16519_v24 = vld [vmem:[%s16093_s14 + $0x140] sm:$0xff] }
  0x59   : > { %14281 = vmatprep.mubr.msk.f32.mxu1 %vm414_vm1, %v16459_v26 }
  0x5b   : > { %14320 = vmatmul.mubr.msk.f32.gmra.mxu0 %vm414_vm1, %v16476_v20  ;;  %v16516_v20 = vld [vmem:[%s16093_s14 + $0x72] sm:$0xff] }
  0x5c   : > { %14282 = vmatmul.mubr.msk.f32.gmra.mxu1 %vm414_vm1, %v16473_v22  ;;  %14322 = vmatprep.mubr.msk.f32.mxu0 %vm414_vm1, %v16482_v16  ;;  %v16513_v16 = vld [vmem:[%s16093_s14 + $0x130] sm:$0xff]  ;;  %22015 = vst [vmem:[#allocation31_spill] sm:$0xff] %v16516_v20 }
  0x5d   : > { %14284 = vmatprep.mubr.msk.f32.mxu1 %vm414_vm1, %v16479_v18 }
  0x5f   : > { %14323 = vmatmul.mubr.msk.f32.gmra.mxu0 %vm414_vm1, %v16496_v11  ;;  %v16536_v11 = vld [vmem:[%s16093_s14 + $0x8a] sm:$0xff] }
  0x60   : > { %14285 = vmatmul.mubr.msk.f32.gmra.mxu1 %vm414_vm1, %v16493_v13  ;;  %14325 = vmatprep.mubr.msk.f32.mxu0 %vm414_vm1, %v16502_v7  ;;  %v16533_v7 = vld [vmem:[%s16093_s14 + $0x148] sm:$0xff]  ;;  %22017 = vst [vmem:[#allocation33_spill] sm:$0xff] %v16536_v11 }
  0x61   : > { %14287 = vmatprep.mubr.msk.f32.mxu1 %vm414_vm1, %v16499_v9 }
  0x63   : > { %14326 = vmatmul.mubr.msk.f32.gmra.mxu0 %vm414_vm1, %v16516_v20  ;;  %v16556_v20 = vld [vmem:[%s16093_s14 + $0xa2] sm:$0xff] }
  0x64   : > { %14288 = vmatmul.mubr.msk.f32.gmra.mxu1 %vm414_vm1, %v16513_v16  ;;  %14328 = vmatprep.mubr.msk.f32.mxu0 %vm414_vm1, %v16522_v5  ;;  %v16553_v5 = vld [vmem:[%s16093_s14 + $0x160] sm:$0xff]  ;;  %22019 = vst [vmem:[#allocation35_spill] sm:$0xff] %v16556_v20 }
  0x65   : > { %14290 = vmatprep.mubr.msk.f32.mxu1 %vm414_vm1, %v16519_v24 }
  0x67   : > { %14329 = vmatmul.mubr.msk.f32.gmra.mxu0 %vm414_vm1, %v16536_v11  ;;  %v16576_v11 = vld [vmem:[%s16093_s14 + $0xb2] sm:$0xff] }
  0x68   : > { %14291 = vmatmul.mubr.msk.f32.gmra.mxu1 %vm414_vm1, %v16533_v7  ;;  %14331 = vmatprep.mubr.msk.f32.mxu0 %vm414_vm1, %v16542_v0  ;;  %v16573_v0 = vld [vmem:[%s16093_s14 + $0x170] sm:$0xff]  ;;  %22021 = vst [vmem:[#allocation37_spill] sm:$0xff] %v16576_v11 }
  0x69   : > { %14293 = vmatprep.mubr.msk.f32.mxu1 %vm414_vm1, %v16539_v14 }
  0x6b   : > { %14332 = vmatmul.mubr.msk.f32.gmra.mxu0 %vm414_vm1, %v16556_v20  ;;  %v16596_v20 = vld [vmem:[%s16093_s14 + $0xca] sm:$0xff] }
  0x6c   : > { %14294 = vmatmul.mubr.msk.f32.gmra.mxu1 %vm414_vm1, %v16553_v5  ;;  %14334 = vmatprep.mubr.msk.f32.mxu0 %vm414_vm1, %v16562_v62  ;;  %v16593_v62 = vld [vmem:[%s16093_s14 + $0x188] sm:$0xff]  ;;  %22023 = vst [vmem:[#allocation39_spill] sm:$0xff] %v16596_v20 }
  0x6d   : > { %14296 = vmatprep.mubr.msk.f32.mxu1 %vm414_vm1, %v16559_v6 }
  0x6f   : > { %14335 = vmatmul.mubr.msk.f32.gmra.mxu0 %vm414_vm1, %v16576_v11  ;;  %v16616_v11 = vld [vmem:[%s16093_s14 + $0xe2] sm:$0xff] }
  0x70   : > { %14297 = vmatmul.mubr.msk.f32.gmra.mxu1 %vm414_vm1, %v16573_v0  ;;  %14337 = vmatprep.mubr.msk.f32.mxu0 %vm414_vm1, %v16582_v60  ;;  %v16613_v60 = vld [vmem:[%s16093_s14 + $0x1a0] sm:$0xff]  ;;  %22025 = vst [vmem:[#allocation41_spill] sm:$0xff] %v16616_v11 }
  0x71   : > { %14299 = vmatprep.mubr.msk.f32.mxu1 %vm414_vm1, %v16579_v3 }
  0x73   : > { %14338 = vmatmul.mubr.msk.f32.gmra.mxu0 %vm414_vm1, %v16596_v20  ;;  %v16636_v20 = vld [vmem:[%s16093_s14 + $0xf2] sm:$0xff] }
  0x74   : > { %14300 = vmatmul.mubr.msk.f32.gmra.mxu1 %vm414_vm1, %v16593_v62  ;;  %14340 = vmatprep.mubr.msk.f32.mxu0 %vm414_vm1, %v16602_v56  ;;  %v16633_v56 = vld [vmem:[%s16093_s14 + $0x1b0] sm:$0xff] }
  0x75   : > { %14302 = vmatprep.mubr.msk.f32.mxu1 %vm414_vm1, %v16599_v58 }
  0x77   : > { %14341 = vmatmul.mubr.msk.f32.gmra.mxu0 %vm414_vm1, %v16616_v11  ;;  %v16653_v11 = vld [vmem:[%s16093_s14 + $0x112] sm:$0xff] }
  0x78   : > { %14303 = vmatmul.mubr.msk.f32.gmra.mxu1 %vm414_vm1, %v16613_v60  ;;  %14343 = vmatprep.mubr.msk.f32.mxu0 %vm414_vm1, %v16622_v52  ;;  %v16650_v52 = vld [vmem:[%s16093_s14 + $0x10a] sm:$0xff] }
  0x79   : > { %14305 = vmatprep.mubr.msk.f32.mxu1 %vm414_vm1, %v16619_v54  ;;  %v16658_v54 = vld [vmem:[%s21826_s2 + $0x1c] sm:$0xf] }
  0x7b   : > { %14344 = vmatmul.mubr.msk.f32.gmra.mxu0 %vm414_vm1, %v16636_v20 }
  0x7c   : > { %14306 = vmatmul.mubr.msk.f32.gmra.mxu1 %vm414_vm1, %v16633_v56  ;;  %14346 = vmatprep.mubr.msk.f32.mxu0 %vm414_vm1, %v16639_v50  ;;  %v16674_v50 = vld [vmem:[%s16093_s14 + $0x12a] sm:$0xff] }
  0x7d   : > { %14375 = vmatprep.mubr.msk.f32.mxu1 %vm414_vm1, %v16253_v37  ;;  %v16669_v37 = vld [vmem:[%s16093_s14 + $0x122] sm:$0xff]  ;;  %22029 = vst [vmem:[#allocation45_spill] sm:$0xff] %v16674_v50 }
  0x7f   : > { %14347 = vmatmul.mubr.msk.f32.gmra.mxu0 %vm414_vm1, %v16650_v52 }
  0x80   : > { %14376 = vmatmul.mubr.msk.f32.vlgmr.msra.gmra.mxu1 %vm414_vm1, %v16260_v39  ;;  %14349 = vmatprep.mubr.msk.f32.mxu0 %vm414_vm1, %v16653_v11  ;;  %v16690_v39 = vld [vmem:[%s16093_s14 + $0x142] sm:$0xff] }
  0x81   : > { %14504 = vmatpush3.msk.msra.mxu1 %vm541_vm0, %v16240_v35  ;;  %14378 = vmatprep.mubr.msk.f32.mxu1 %vm414_vm1, %v16276_v41  ;;  %v16687_v35 = vld [vmem:[%s16093_s14 + $0x132] sm:$0xff]  ;;  %22031 = vst [vmem:[#allocation47_spill] sm:$0xff] %v16690_v39  ;;  %v16701_v41 = vld [vmem:[%s16093_s14 + $0x14a] sm:$0xff] }
  0x82   : > { %14633 = vmatprep.subr.msk.mxu1 %vm541_vm0, %v16658_v54  ;;  %22030 = vst [vmem:[#allocation46_spill] sm:$0xff] %v16687_v35  ;;  %22032 = vst [vmem:[#allocation48_spill] sm:$0xff] %v16701_v41 }
  0x83   : > { %14350 = vmatmul.mubr.msk.f32.gmra.mxu0 %vm414_vm1, %v16669_v37 }
  0x84   : > { %14379 = vmatmul.mubr.msk.f32.gmra.mxu1 %vm414_vm1, %v16282_v43  ;;  %14352 = vmatprep.mubr.msk.f32.mxu0 %vm414_vm1, %v16674_v50  ;;  %v16704_v50 = vld [vmem:[%s16093_s14 + $0x152] sm:$0xff] }
  0x85   : > { %14381 = vmatprep.mubr.msk.f32.mxu1 %vm414_vm1, %v16296_v45  ;;  %22033 = vst [vmem:[#allocation49_spill] sm:$0xff] %v16704_v50 }
  0x87   : > { %14353 = vmatmul.mubr.msk.f32.gmra.mxu0 %vm414_vm1, %v16687_v35  ;;  %v16718_v35 = vld [vmem:[%s16093_s14 + $0x16a] sm:$0xff] }
  0x88   : > { %14382 = vmatmul.mubr.msk.f32.gmra.mxu1 %vm414_vm1, %v16302_v47  ;;  %14355 = vmatprep.mubr.msk.f32.mxu0 %vm414_vm1, %v16690_v39  ;;  %v16715_v39 = vld [vmem:[%s16093_s14 + $0x162] sm:$0xff]  ;;  %22035 = vst [vmem:[#allocation51_spill] sm:$0xff] %v16718_v35 }
  0x89   : > { %14384 = vmatprep.mubr.msk.f32.mxu1 %vm414_vm1, %v16316_v49  ;;  %22034 = vst [vmem:[#allocation50_spill] sm:$0xff] %v16715_v39 }
  0x8b   : > { %14356 = vmatmul.mubr.msk.f32.gmra.mxu0 %vm414_vm1, %v16701_v41  ;;  %v16732_v41 = vld [vmem:[%s16093_s14 + $0x182] sm:$0xff] }
  0x8c   : > { %14385 = vmatmul.mubr.msk.f32.gmra.mxu1 %vm414_vm1, %v16322_v51  ;;  %14358 = vmatprep.mubr.msk.f32.mxu0 %vm414_vm1, %v16704_v50  ;;  %v16729_v50 = vld [vmem:[%s16093_s14 + $0x172] sm:$0xff]  ;;  %22037 = vst [vmem:[#allocation53_spill] sm:$0xff] %v16732_v41 }
  0x8d   : > { %14387 = vmatprep.mubr.msk.f32.mxu1 %vm414_vm1, %v16336_v53  ;;  %22036 = vst [vmem:[#allocation52_spill] sm:$0xff] %v16729_v50 }
  0x8f   : > { %14359 = vmatmul.mubr.msk.f32.gmra.mxu0 %vm414_vm1, %v16715_v39  ;;  %v16746_v39 = vld [vmem:[%s16093_s14 + $0x192] sm:$0xff] }
  0x90   : > { %14388 = vmatmul.mubr.msk.f32.gmra.mxu1 %vm414_vm1, %v16342_v55  ;;  %14361 = vmatprep.mubr.msk.f32.mxu0 %vm414_vm1, %v16718_v35  ;;  %v16743_v35 = vld [vmem:[%s16093_s14 + $0x18a] sm:$0xff]  ;;  %22038 = vst [vmem:[#allocation54_spill] sm:$0xff] %v16746_v39 }
  0x91   : > { %14390 = vmatprep.mubr.msk.f32.mxu1 %vm414_vm1, %v16356_v57 }
  0x93   : > { %14362 = vmatmul.mubr.msk.f32.gmra.mxu0 %vm414_vm1, %v16729_v50  ;;  %v16760_v50 = vld [vmem:[%s16093_s14 + $0x1aa] sm:$0xff] }
  0x94   : > { %14391 = vmatmul.mubr.msk.f32.gmra.mxu1 %vm414_vm1, %v16362_v59  ;;  %14364 = vmatprep.mubr.msk.f32.mxu0 %vm414_vm1, %v16732_v41  ;;  %v16757_v41 = vld [vmem:[%s16093_s14 + $0x1a2] sm:$0xff] }
  0x95   : > { %14393 = vmatprep.mubr.msk.f32.mxu1 %vm414_vm1, %v16376_v61 }
  0x97   : > { %14365 = vmatmul.mubr.msk.f32.gmra.mxu0 %vm414_vm1, %v16743_v35 }
  0x98   : > { %14394 = vmatmul.mubr.msk.f32.gmra.mxu1 %vm414_vm1, %v16382_v63  ;;  %14367 = vmatprep.mubr.msk.f32.mxu0 %vm414_vm1, %v16746_v39  ;;  %v16771_v39 = vld [vmem:[%s16093_s14 + $0x1b2] sm:$0xff] }
  0x99   : > { %14396 = vmatprep.mubr.msk.f32.mxu1 %vm414_vm1, %v16396_v1  ;;  %22039 = vst [vmem:[#allocation55_spill] sm:$0xff] %v16771_v39 }
  0x9b   : > { %14368 = vmatmul.mubr.msk.f32.gmra.mxu0 %vm414_vm1, %v16757_v41 }
  0x9c   : > { %14397 = vmatmul.mubr.msk.f32.gmra.mxu1 %vm414_vm1, %v16399_v2  ;;  %14370 = vmatprep.mubr.msk.f32.mxu0 %vm414_vm1, %v16760_v50 }
  0x9d   : > { %14399 = vmatprep.mubr.msk.f32.mxu1 %vm414_vm1, %v16410_v4 }
  0x9f   : > { %14371 = vmatmul.mubr.msk.f32.gmra.mxu0 %vm414_vm1, %v16771_v39  ;;  %v16792_v39 = vld [vmem:[%s21826_s2 + $0x20] sm:$0xf] }
  0xa0   : > { %14400 = vmatmul.mubr.msk.f32.gmra.mxu1 %vm414_vm1, %v16414_v8  ;;  %14440 = vmatprep.mubr.msk.f32.mxu0 %vm414_vm1, %v16121_v10  ;;  %v16871_v10 = vld [vmem:[%s16093_s14 + $0x1c0] sm:$0xff] }
  0xa1   : > { %14402 = vmatprep.mubr.msk.f32.mxu1 %vm414_vm1, %v16429_v34 }
  0xa3   : > { %14441 = vmatmul.mubr.msk.f32.vlgmr.msra.gmra.mxu0 %vm414_vm1, %v16129_v12  ;;  %v16874_v12 = vld [vmem:[%s16093_s14 + $0x1c8] sm:$0xff] }
  0xa4   : > { %14403 = vmatmul.mubr.msk.f32.gmra.mxu1 %vm414_vm1, %v16435_v28  ;;  %14443 = vmatprep.mubr.msk.f32.mxu0 %vm414_vm1, %v16151_v15  ;;  %v22043_v15 = vld [vmem:[#allocation17_spill] sm:$0xff] }
  0xa5   : > { %14405 = vmatprep.mubr.msk.f32.mxu1 %vm414_vm1, %v16453_v30  ;;  %14569 = vmatpush3.msk.msra.mxu0 %vm541_vm0, %v16423_v32  ;;  %v22058_v32 = vld [vmem:[#allocation5_spill] sm:$0xff] }
  0xa6   : > { %14698 = vmatprep.subr.msk.mxu0 %vm541_vm0, %v16792_v39 }
  0xa7   : > { %14444 = vmatmul.mubr.msk.f32.gmra.mxu0 %vm414_vm1, %v16157_v17  ;;  %v16885_v17 = vld [vmem:[%s16093_s14 + $0x1d0] sm:$0xff] }
  0xa8   : > { %14406 = vmatmul.mubr.msk.f32.gmra.mxu1 %vm414_vm1, %v16459_v26  ;;  %14446 = vmatprep.mubr.msk.f32.mxu0 %vm414_vm1, %v16173_v19  ;;  %v22045_v19 = vld [vmem:[#allocation19_spill] sm:$0xff] }
  0xa9   : > { %14408 = vmatprep.mubr.msk.f32.mxu1 %vm414_vm1, %v16473_v22 }
  0xab   : > { %14447 = vmatmul.mubr.msk.f32.gmra.mxu0 %vm414_vm1, %v16179_v21  ;;  %v22046_v21 = vld [vmem:[#allocation20_spill] sm:$0xff] }
  0xac   : > { %14409 = vmatmul.mubr.msk.f32.gmra.mxu1 %vm414_vm1, %v16479_v18  ;;  %14449 = vmatprep.mubr.msk.f32.mxu0 %vm414_vm1, %v16193_v23  ;;  %v22047_v23 = vld [vmem:[#allocation23_spill] sm:$0xff] }
  0xad   : > { %14411 = vmatprep.mubr.msk.f32.mxu1 %vm414_vm1, %v16493_v13 }
  0xaf   : > { %14450 = vmatmul.mubr.msk.f32.gmra.mxu0 %vm414_vm1, %v16199_v25 }
  0xb0   : > { %14412 = vmatmul.mubr.msk.f32.gmra.mxu1 %vm414_vm1, %v16499_v9  ;;  %14452 = vmatprep.mubr.msk.f32.mxu0 %vm414_vm1, %v16213_v27  ;;  %v22042_v9 = vld [vmem:[#allocation16_spill] sm:$0xff] }
  0xb1   : > { %14414 = vmatprep.mubr.msk.f32.mxu1 %vm414_vm1, %v16513_v16  ;;  %v22044_v16 = vld [vmem:[#allocation18_spill] sm:$0xff] }
  0xb3   : > { %14453 = vmatmul.mubr.msk.f32.gmra.mxu0 %vm414_vm1, %v16219_v29  ;;  %v22048_v29 = vld [vmem:[#allocation21_spill] sm:$0xff] }
  0xb4   : > { %14415 = vmatmul.mubr.msk.f32.gmra.mxu1 %vm414_vm1, %v16519_v24  ;;  %14455 = vmatprep.mubr.msk.f32.mxu0 %vm414_vm1, %v16230_v31  ;;  %v16898_v24 = vld [vmem:[%s21827_s3] sm:$0xf]  ;;  %v22049_v31 = vld [vmem:[#allocation24_spill] sm:$0xff] }
  0xb5   : > { %14417 = vmatprep.mubr.msk.f32.mxu1 %vm414_vm1, %v16533_v7  ;;  %v22041_v7 = vld [vmem:[#allocation15_spill] sm:$0xff] }
  0xb7   : > { %14456 = vmatmul.mubr.msk.f32.gmra.mxu0 %vm414_vm1, %v16234_v33  ;;  %v22050_v33 = vld [vmem:[#allocation22_spill] sm:$0xff] }
  0xb8   : > { %14418 = vmatmul.mubr.msk.f32.gmra.mxu1 %vm414_vm1, %v16539_v14  ;;  %14458 = vmatprep.mubr.msk.f32.mxu0 %vm414_vm1, %v16250_v36  ;;  %v22061_v14 = vld [vmem:[#allocation29_spill] sm:$0xff] }
  0xb9   : > { %14420 = vmatprep.mubr.msk.f32.mxu1 %vm414_vm1, %v16553_v5  ;;  %v22040_v5 = vld [vmem:[#allocation42_spill] sm:$0xff] }
  0xbb   : > { %14459 = vmatmul.mubr.msk.f32.gmra.mxu0 %vm414_vm1, %v16257_v38 }
  0xbc   : > { %14421 = vmatmul.mubr.msk.f32.gmra.mxu1 %vm414_vm1, %v16559_v6  ;;  %14461 = vmatprep.mubr.msk.f32.mxu0 %vm414_vm1, %v16273_v40  ;;  %v22051_v40 = vld [vmem:[#allocation25_spill] sm:$0xff]  ;;  %v22060_v6 = vld [vmem:[#allocation6_spill] sm:$0xff] }
  0xbd   : > { %14423 = vmatprep.mubr.msk.f32.mxu1 %vm414_vm1, %v16573_v0 }
  0xbf   : > { %14462 = vmatmul.mubr.msk.f32.gmra.mxu0 %vm414_vm1, %v16279_v42 }
  0xc0   : > { %14424 = vmatmul.mubr.msk.f32.gmra.mxu1 %vm414_vm1, %v16579_v3  ;;  %14464 = vmatprep.mubr.msk.f32.mxu0 %vm414_vm1, %v16293_v44  ;;  %v22059_v3 = vld [vmem:[#allocation28_spill] sm:$0xff] }
  0xc1   : > { %14426 = vmatprep.mubr.msk.f32.mxu1 %vm414_vm1, %v16593_v62 }
  0xc3   : > { %14465 = vmatmul.mubr.msk.f32.gmra.mxu0 %vm414_vm1, %v16299_v46  ;;  %v22052_v46 = vld [vmem:[#allocation3_spill] sm:$0xff] }
  0xc4   : > { %14427 = vmatmul.mubr.msk.f32.gmra.mxu1 %vm414_vm1, %v16599_v58  ;;  %14467 = vmatprep.mubr.msk.f32.mxu0 %vm414_vm1, %v16313_v48  ;;  %v22053_v48 = vld [vmem:[#allocation26_spill] sm:$0xff] }
  0xc5   : > { %14429 = vmatprep.mubr.msk.f32.mxu1 %vm414_vm1, %v16613_v60 }
  0xc7   : > { %14468 = vmatmul.mubr.msk.f32.gmra.mxu0 %vm414_vm1, %v22041_v7 }
  0xc8   : > { %14430 = vmatmul.mubr.msk.f32.gmra.mxu1 %vm414_vm1, %v22040_v5  ;;  %14470 = vmatprep.mubr.msk.f32.mxu0 %vm414_vm1, %v22042_v9 }
  0xc9   : > { %14432 = vmatprep.mubr.msk.f32.mxu1 %vm414_vm1, %v16633_v56  ;;  %v22055_v56 = vld [vmem:[#allocation27_spill] sm:$0xff] }
  0xcb   : > { %14471 = vmatmul.mubr.msk.f32.gmra.mxu0 %vm414_vm1, %v22043_v15 }
  0xcc   : > { %14433 = vmatmul.mubr.msk.f32.gmra.mxu1 %vm414_vm1, %v16871_v10  ;;  %14473 = vmatprep.mubr.msk.f32.mxu0 %vm414_vm1, %v22044_v16  ;;  %v22064_v16 = vld [vmem:[#allocation7_spill] sm:$0xff] }
  0xcd   : > { %14435 = vmatprep.mubr.msk.f32.mxu1 %vm414_vm1, %v16874_v12 }
  0xcf   : > { %14474 = vmatmul.mubr.msk.f32.gmra.mxu0 %vm414_vm1, %v22045_v19  ;;  %v22065_v19 = vld [vmem:[#allocation30_spill] sm:$0xff] }
  0xd0   : > { %14436 = vmatmul.mubr.msk.f32.gmra.mxu1 %vm414_vm1, %v16885_v17  ;;  %14476 = vmatprep.mubr.msk.f32.mxu0 %vm414_vm1, %v22046_v21  ;;  %v22066_v21 = vld [vmem:[#allocation8_spill] sm:$0xff] }
  0xd1   : > { %14505 = vmatprep.mubr.msk.f32.mxu1 %vm414_vm1, %v22047_v23  ;;  %v22067_v23 = vld [vmem:[#allocation31_spill] sm:$0xff] }
  0xd3   : > { %v14182_v25 = vpop.f32.mrf.mxu0  ;;  %14477 = vmatmul.mubr.msk.f32.gmra.mxu0 %vm414_vm1, %v22048_v29 }
  0xd4   : > { %v16900_v27 = vpop.f32.mrf.mxu1  ;;  %14506 = vmatmul.mubr.msk.f32.vlgmr.msra.gmra.mxu1 %vm414_vm1, %v22049_v31  ;;  %14479 = vmatprep.mubr.msk.f32.mxu0 %vm414_vm1, %v22050_v33 }
  0xd5   : > { %14634 = vmatpush3.msk.msra.mxu1 %vm541_vm0, %v16658_v54  ;;  %v611_v36 = vpop.f32.mrf.mxu0  ;;  %14508 = vmatprep.mubr.msk.f32.mxu1 %vm414_vm1, %v22051_v40  ;;  %v22054_v54 = vld [vmem:[#allocation4_spill] sm:$0xff] }
  0xd6   : > { %v16910_v38 = vpop.f32.mrf.mxu1  ;;  %14763 = vmatprep.subr.msk.mxu1 %vm541_vm0, %v16898_v24 }
  0xd7   : > { %v14185_v42 = vpop.f32.mrf.mxu0  ;;  %14480 = vmatmul.mubr.msk.f32.gmra.mxu0 %vm414_vm1, %v22052_v46  ;;  %v22070_v46 = vld [vmem:[#allocation9_spill] sm:$0xff] }
  0xd8   : > { %v16916_v44 = vpop.f32.mrf.mxu1  ;;  %14509 = vmatmul.mubr.msk.f32.gmra.mxu1 %vm414_vm1, %v22053_v48  ;;  %14482 = vmatprep.mubr.msk.f32.mxu0 %vm414_vm1, %v22054_v54  ;;  %v22071_v48 = vld [vmem:[#allocation32_spill] sm:$0xff]  ;;  %v22072_v54 = vld [vmem:[#allocation10_spill] sm:$0xff] }
  0xd9   : > { %14511 = vmatprep.mubr.msk.f32.mxu1 %vm414_vm1, %v22055_v56  ;;  %v621_v58 = vpop.f32.mrf.mxu0  ;;  %v22073_v56 = vld [vmem:[#allocation33_spill] sm:$0xff] }
  0xda   : > { %v16926_v60 = vpop.f32.mrf.mxu1 }
  0xdb   : > { %22056 = vst [vmem:[#allocation42_spill] sm:$0xff] %v16926_v60  ;;  %v14188_v62 = vpop.f32.mrf.mxu0  ;;  %14483 = vmatmul.mubr.msk.f32.gmra.mxu0 %vm414_vm1, %v22058_v32 }
  0xdc   : > { %v16928_v0 = vpop.f32.mrf.mxu1  ;;  %14512 = vmatmul.mubr.msk.f32.gmra.mxu1 %vm414_vm1, %v22059_v3  ;;  %14485 = vmatprep.mubr.msk.f32.mxu0 %vm414_vm1, %v22060_v6 }
  0xdd   : > { %22057 = vst [vmem:[#allocation15_spill] sm:$0xff] %v16928_v0  ;;  %14514 = vmatprep.mubr.msk.f32.mxu1 %vm414_vm1, %v22061_v14  ;;  %v631_v5 = vpop.f32.mrf.mxu0 }
  0xde   : > { %v16938_v7 = vpop.f32.mrf.mxu1 }
  0xdf   : > { %22062 = vst [vmem:[#allocation16_spill] sm:$0xff] %v16938_v7  ;;  %v14191_v9 = vpop.f32.mrf.mxu0  ;;  %14486 = vmatmul.mubr.msk.f32.gmra.mxu0 %vm414_vm1, %v22064_v16  ;;  %v22076_v16 = vld [vmem:[#allocation11_spill] sm:$0xff] }
  0xe0   : > { %v16940_v15 = vpop.f32.mrf.mxu1  ;;  %14515 = vmatmul.mubr.msk.f32.gmra.mxu1 %vm414_vm1, %v22065_v19  ;;  %14488 = vmatprep.mubr.msk.f32.mxu0 %vm414_vm1, %v22066_v21  ;;  %v22077_v19 = vld [vmem:[#allocation34_spill] sm:$0xff]  ;;  %v22078_v21 = vld [vmem:[#allocation12_spill] sm:$0xff] }
  0xe1   : > { %22063 = vst [vmem:[#allocation17_spill] sm:$0xff] %v16940_v15  ;;  %14517 = vmatprep.mubr.msk.f32.mxu1 %vm414_vm1, %v22067_v23  ;;  %v641_v29 = vpop.f32.mrf.mxu0  ;;  %v22079_v23 = vld [vmem:[#allocation35_spill] sm:$0xff] }
  0xe2   : > { %v16950_v31 = vpop.f32.mrf.mxu1 }
  0xe3   : > { %22068 = vst [vmem:[#allocation18_spill] sm:$0xff] %v16950_v31  ;;  %v16952_v33 = vpop.f32.mrf.mxu0  ;;  %14489 = vmatmul.mubr.msk.f32.gmra.mxu0 %vm414_vm1, %v22070_v46  ;;  %v17002_v31 = vld [vmem:[%s16093_s14 + $0x1c9] sm:$0xff] }
  0xe4   : > { %v16954_v40 = vpop.f32.mrf.mxu1  ;;  %14518 = vmatmul.mubr.msk.f32.gmra.mxu1 %vm414_vm1, %v22071_v48  ;;  %14491 = vmatprep.mubr.msk.f32.mxu0 %vm414_vm1, %v22072_v54  ;;  %22086 = vst [vmem:[#allocation22_spill] sm:$0xff] %v17002_v31 }
  0xe5   : > { %22069 = vst [vmem:[#allocation19_spill] sm:$0xff] %v16954_v40  ;;  %14520 = vmatprep.mubr.msk.f32.mxu1 %vm414_vm1, %v22073_v56  ;;  %v16964_v32 = vpop.f32.mrf.mxu0 }
  0xe6   : > { %v16966_v3 = vpop.f32.mrf.mxu1 }
  0xe7   : > { %22074 = vst [vmem:[#allocation20_spill] sm:$0xff] %v16966_v3  ;;  %v16968_v6 = vpop.f32.mrf.mxu0  ;;  %14492 = vmatmul.mubr.msk.f32.gmra.mxu0 %vm414_vm1, %v22076_v16  ;;  %v22082_v16 = vld [vmem:[#allocation36_spill] sm:$0xff]  ;;  %v16997_v3 = vld [vmem:[%s16093_s14 + $0x1c1] sm:$0xff] }
  0xe8   : > { %v16970_v14 = vpop.f32.mrf.mxu1  ;;  %14521 = vmatmul.mubr.msk.f32.gmra.mxu1 %vm414_vm1, %v22077_v19  ;;  %14494 = vmatprep.mubr.msk.f32.mxu0 %vm414_vm1, %v22078_v21  ;;  %v22083_v21 = vld [vmem:[#allocation14_spill] sm:$0xff]  ;;  %22085 = vst [vmem:[#allocation24_spill] sm:$0xff] %v16997_v3 }
  0xe9   : > { %22075 = vst [vmem:[#allocation23_spill] sm:$0xff] %v16970_v14  ;;  %14523 = vmatprep.mubr.msk.f32.mxu1 %vm414_vm1, %v22079_v23  ;;  %v16980_v46 = vpop.f32.mrf.mxu0  ;;  %v22081_v14 = vld [vmem:[#allocation13_spill] sm:$0xff] }
  0xea   : > { %v16982_v48 = vpop.f32.mrf.mxu1  ;;  %v22084_v23 = vld [vmem:[#allocation37_spill] sm:$0xff] }
  0xeb   : > { %22080 = vst [vmem:[#allocation21_spill] sm:$0xff] %v16982_v48  ;;  %v16984_v54 = vpop.f32.mrf.mxu0  ;;  %14495 = vmatmul.mubr.msk.f32.gmra.mxu0 %vm414_vm1, %v22081_v14 }
  0xec   : > { %v14247_v56 = vpop.f32.mrf.mxu1  ;;  %14524 = vmatmul.mubr.msk.f32.gmra.mxu1 %vm414_vm1, %v22082_v16  ;;  %14497 = vmatprep.mubr.msk.f32.mxu0 %vm414_vm1, %v22083_v21  ;;  %v22088_v21 = vld [vmem:[#allocation39_spill] sm:$0xff] }
  0xed   : > { %v16990_v19 = vadd.f32 %v14247_v56, %v14182_v25  ;;  %14526 = vmatprep.mubr.msk.f32.mxu1 %vm414_vm1, %v22084_v23  ;;  %v16999_v48 = vpop.f32.mrf.mxu0  ;;  %v22087_v25 = vld [vmem:[#allocation38_spill] sm:$0xff]  ;;  %v17019_v23 = vld [vmem:[%s16093_s14 + $0x1d1] sm:$0xff] }
  0xee   : > { %v1015_v40 = vpop.f32.mrf.mxu1  ;;  %22089 = vst [vmem:[#allocation25_spill] sm:$0xff] %v17019_v23 }
  0xef   : > { %v17004_v14 = vadd.f32 %v1015_v40, %v611_v36  ;;  %v17006_v15 = vpop.f32.mrf.mxu0  ;;  %14498 = vmatmul.mubr.msk.f32.gmra.mxu0 %vm414_vm1, %v16997_v3 }
  0xf0   : > { %v14250_v16 = vpop.f32.mrf.mxu1  ;;  %14527 = vmatmul.mubr.msk.f32.gmra.mxu1 %vm414_vm1, %v22087_v25  ;;  %14500 = vmatprep.mubr.msk.f32.mxu0 %vm414_vm1, %v17002_v31  ;;  %v22091_v25 = vld [vmem:[#allocation41_spill] sm:$0xff] }
  0xf1   : > { %v17012_v56 = vadd.f32 %v14250_v16, %v14185_v42  ;;  %14529 = vmatprep.mubr.msk.f32.mxu1 %vm414_vm1, %v22088_v21  ;;  %v17021_v36 = vpop.f32.mrf.mxu0  ;;  %v22090_v42 = vld [vmem:[#allocation40_spill] sm:$0xff] }
  0xf2   : > { %v1025_v40 = vpop.f32.mrf.mxu1 }
  0xf3   : > { %v17023_v7 = vadd.f32 %v1025_v40, %v621_v58  ;;  %v17025_v0 = vpop.f32.mrf.mxu0  ;;  %14501 = vmatmul.mubr.msk.f32.gmra.mxu0 %vm414_vm1, %v17019_v23  ;;  %v22092_v23 = vld [vmem:[#allocation43_spill] sm:$0xff] }
  0xf4   : > { %v14253_v3 = vpop.f32.mrf.mxu1  ;;  %14530 = vmatmul.mubr.msk.f32.gmra.mxu1 %vm414_vm1, %v22090_v42  ;;  %14570 = vmatprep.mubr.msk.f32.mxu0 %vm414_vm1, %v16282_v43  ;;  %v17056_v43 = vld [vmem:[%s21827_s3 + $0x4] sm:$0xf] }
  0xf5   : > { %v17031_v16 = vadd.f32 %v14253_v3, %v14188_v62  ;;  %14532 = vmatprep.mubr.msk.f32.mxu1 %vm414_vm1, %v22091_v25  ;;  %v17037_v21 = vpop.f32.mrf.mxu0 }
  0xf6   : > { %v1035_v58 = vpop.f32.mrf.mxu1 }
  0xf7   : > { %v17039_v40 = vadd.f32 %v1035_v58, %v631_v5  ;;  %v17041_v31 = vpop.f32.mrf.mxu0  ;;  %14571 = vmatmul.mubr.msk.f32.vlgmr.msra.gmra.mxu0 %vm414_vm1, %v16296_v45  ;;  %v22094_v58 = vld [vmem:[#allocation45_spill] sm:$0xff] }
  0xf8   : > { %v14256_v60 = vpop.f32.mrf.mxu1  ;;  %14533 = vmatmul.mubr.msk.f32.gmra.mxu1 %vm414_vm1, %v22092_v23  ;;  %14573 = vmatprep.mubr.msk.f32.mxu0 %vm414_vm1, %v16302_v47  ;;  %v22093_v47 = vld [vmem:[#allocation44_spill] sm:$0xff] }
  0xf9   : > { %v17047_v62 = vadd.f32 %v14256_v60, %v14191_v9  ;;  %14535 = vmatprep.mubr.msk.f32.mxu1 %vm414_vm1, %v16636_v20  ;;  %v17058_v5 = vpop.f32.mrf.mxu0  ;;  %14699 = vmatpush3.msk.msra.mxu0 %vm541_vm0, %v16792_v39 }
  0xfa   : > { %v1045_v3 = vpop.f32.mrf.mxu1  ;;  %14828 = vmatprep.subr.msk.mxu0 %vm541_vm0, %v17056_v43 }
  0xfb   : > { %v17062_v45 = vadd.f32 %v1045_v3, %v641_v29  ;;  %v17066_v20 = vpop.f32.mrf.mxu0  ;;  %14574 = vmatmul.mubr.msk.f32.gmra.mxu0 %vm414_vm1, %v16316_v49 }
  0xfc   : > { %v14259_v60 = vpop.f32.mrf.mxu1  ;;  %14536 = vmatmul.mubr.msk.f32.gmra.mxu1 %vm414_vm1, %v22093_v47  ;;  %14576 = vmatprep.mubr.msk.f32.mxu0 %vm414_vm1, %v16322_v51  ;;  %v22096_v47 = vld [vmem:[#allocation47_spill] sm:$0xff] }
  0xfd   : > { %v17073_v9 = vadd.f32 %v14259_v60, %v16952_v33  ;;  %14538 = vmatprep.mubr.msk.f32.mxu1 %vm414_vm1, %v16650_v52  ;;  %v17079_v39 = vpop.f32.mrf.mxu0 }
  0xfe   : > { %v1055_v29 = vpop.f32.mrf.mxu1 }
  0xff   : > { %v17082_v23 = vadd.f32 %v1055_v29, %v16964_v32  ;;  %v17084_v42 = vpop.f32.mrf.mxu0  ;;  %14577 = vmatmul.mubr.msk.f32.gmra.mxu0 %vm414_vm1, %v16336_v53 }
 0x100   : > { %v14262_v25 = vpop.f32.mrf.mxu1  ;;  %14539 = vmatmul.mubr.msk.f32.gmra.mxu1 %vm414_vm1, %v16653_v11  ;;  %14579 = vmatprep.mubr.msk.f32.mxu0 %vm414_vm1, %v16342_v55 }
 0x101   : > { %v17091_v49 = vadd.f32 %v14262_v25, %v16968_v6  ;;  %14541 = vmatprep.mubr.msk.f32.mxu1 %vm414_vm1, %v16669_v37  ;;  %v17097_v51 = vpop.f32.mrf.mxu0  ;;  %v22095_v37 = vld [vmem:[#allocation46_spill] sm:$0xff] }
 0x102   : > { %v1065_v52 = vpop.f32.mrf.mxu1 }
 0x103   : > { %v17100_v33 = vadd.f32 %v1065_v52, %v16980_v46  ;;  %v17102_v32 = vpop.f32.mrf.mxu0  ;;  %14580 = vmatmul.mubr.msk.f32.gmra.mxu0 %vm414_vm1, %v16356_v57 }
 0x104   : > { %v14265_v11 = vpop.f32.mrf.mxu1  ;;  %14542 = vmatmul.mubr.msk.f32.gmra.mxu1 %vm414_vm1, %v22094_v58  ;;  %14582 = vmatprep.mubr.msk.f32.mxu0 %vm414_vm1, %v16362_v59 }
 0x105   : > { %v17109_v53 = vadd.f32 %v14265_v11, %v16984_v54  ;;  %14544 = vmatprep.mubr.msk.f32.mxu1 %vm414_vm1, %v22095_v37  ;;  %v17115_v55 = vpop.f32.mrf.mxu0  ;;  %v22097_v54 = vld [vmem:[#allocation48_spill] sm:$0xff]  ;;  %v22098_v11 = vld [vmem:[#allocation49_spill] sm:$0xff] }
 0x106   : > { %v1075_v6 = vpop.f32.mrf.mxu1 }
 0x107   : > { %v17118_v46 = vadd.f32 %v1075_v6, %v16999_v48  ;;  %v17120_v3 = vpop.f32.mrf.mxu0  ;;  %14583 = vmatmul.mubr.msk.f32.gmra.mxu0 %vm414_vm1, %v16376_v61 }
 0x108   : > { %v14268_v60 = vpop.f32.mrf.mxu1  ;;  %14545 = vmatmul.mubr.msk.f32.gmra.mxu1 %vm414_vm1, %v22096_v47  ;;  %14585 = vmatprep.mubr.msk.f32.mxu0 %vm414_vm1, %v16382_v63 }
 0x109   : > { %v17127_v57 = vadd.f32 %v14268_v60, %v17006_v15  ;;  %14547 = vmatprep.mubr.msk.f32.mxu1 %vm414_vm1, %v22097_v54  ;;  %v17133_v59 = vpop.f32.mrf.mxu0  ;;  %v22099_v15 = vld [vmem:[#allocation50_spill] sm:$0xff]  ;;  %v22100_v60 = vld [vmem:[#allocation51_spill] sm:$0xff] }
 0x10a   : > { %v1085_v48 = vpop.f32.mrf.mxu1 }
 0x10b   : > { %v17136_v29 = vadd.f32 %v1085_v48, %v17021_v36  ;;  %v17138_v25 = vpop.f32.mrf.mxu0  ;;  %14586 = vmatmul.mubr.msk.f32.gmra.mxu0 %vm414_vm1, %v16396_v1 }
 0x10c   : > { %v14271_v52 = vpop.f32.mrf.mxu1  ;;  %14548 = vmatmul.mubr.msk.f32.gmra.mxu1 %vm414_vm1, %v22098_v11  ;;  %14588 = vmatprep.mubr.msk.f32.mxu0 %vm414_vm1, %v16399_v2  ;;  %v22101_v2 = vld [vmem:[#allocation52_spill] sm:$0xff] }
 0x10d   : > { %v17145_v61 = vadd.f32 %v14271_v52, %v17025_v0  ;;  %14550 = vmatprep.mubr.msk.f32.mxu1 %vm414_vm1, %v22099_v15  ;;  %v17151_v63 = vpop.f32.mrf.mxu0  ;;  %v22102_v52 = vld [vmem:[#allocation53_spill] sm:$0xff] }
 0x10e   : > { %v1095_v36 = vpop.f32.mrf.mxu1 }
 0x10f   : > { %v17154_v58 = vadd.f32 %v1095_v36, %v17037_v21  ;;  %v14312_v6 = vpop.f32.mrf.mxu0  ;;  %14589 = vmatmul.mubr.msk.f32.gmra.mxu0 %vm414_vm1, %v16410_v4  ;;  %v22103_v36 = vld [vmem:[#allocation54_spill] sm:$0xff] }
 0x110   : > { %v14274_v37 = vpop.f32.mrf.mxu1  ;;  %14551 = vmatmul.mubr.msk.f32.gmra.mxu1 %vm414_vm1, %v22100_v60  ;;  %v17164_v0 = vadd.f32 %v14312_v6, %v16990_v19  ;;  %14591 = vmatprep.mubr.msk.f32.mxu0 %vm414_vm1, %v16414_v8  ;;  %v17234_v6 = vld [vmem:[%s16093_s14 + $0x1ca] sm:$0xff] }
 0x111   : > { %v17161_v1 = vadd.f32 %v14274_v37, %v17041_v31  ;;  %14553 = vmatprep.mubr.msk.f32.mxu1 %vm414_vm1, %v22101_v2  ;;  %v1463_v47 = vpop.f32.mrf.mxu0 }
 0x112   : > { %v1105_v21 = vpop.f32.mrf.mxu1  ;;  %v17174_v48 = vadd.f32 %v1463_v47, %v17004_v14 }
 0x113   : > { %v17171_v54 = vadd.f32 %v1105_v21, %v17058_v5  ;;  %v14315_v31 = vpop.f32.mrf.mxu0  ;;  %14592 = vmatmul.mubr.msk.f32.gmra.mxu0 %vm414_vm1, %v16429_v34 }
 0x114   : > { %v14277_v4 = vpop.f32.mrf.mxu1  ;;  %14554 = vmatmul.mubr.msk.f32.gmra.mxu1 %vm414_vm1, %v22102_v52  ;;  %v17184_v8 = vadd.f32 %v14315_v31, %v17012_v56  ;;  %14594 = vmatprep.mubr.msk.f32.mxu0 %vm414_vm1, %v16435_v28  ;;  %v12029_v31 = vld [vmem:[%s16093_s14 + $0x140] sm:$0xff] }
 0x115   : > { %v17181_v19 = vadd.f32 %v14277_v4, %v17066_v20  ;;  %14556 = vmatprep.mubr.msk.f32.mxu1 %vm414_vm1, %v16743_v35  ;;  %v1473_v5 = vpop.f32.mrf.mxu0 }
 0x116   : > { %v1115_v14 = vpop.f32.mrf.mxu1  ;;  %v17194_v15 = vadd.f32 %v1473_v5, %v17023_v7 }
 0x117   : > { %v17191_v11 = vadd.f32 %v1115_v14, %v17079_v39  ;;  %v14318_v20 = vpop.f32.mrf.mxu0  ;;  %14595 = vmatmul.mubr.msk.f32.gmra.mxu0 %vm414_vm1, %v16453_v30 }
 0x118   : > { %v14280_v34 = vpop.f32.mrf.mxu1  ;;  %14557 = vmatmul.mubr.msk.f32.gmra.mxu1 %vm414_vm1, %v22103_v36  ;;  %v17204_v28 = vadd.f32 %v14318_v20, %v17031_v16  ;;  %14597 = vmatprep.mubr.msk.f32.mxu0 %vm414_vm1, %v16459_v26  ;;  %v22104_v16 = vld [vmem:[#allocation55_spill] sm:$0xff] }
 0x119   : > { %v17201_v35 = vadd.f32 %v14280_v34, %v17084_v42  ;;  %14559 = vmatprep.mubr.msk.f32.mxu1 %vm414_vm1, %v16757_v41  ;;  %v1483_v56 = vpop.f32.mrf.mxu0 }
 0x11a   : > { %v1125_v7 = vpop.f32.mrf.mxu1  ;;  %v17214_v30 = vadd.f32 %v1483_v56, %v17039_v40  ;;  %v17231_v40 = vld [vmem:[%s16093_s14 + $0x1c2] sm:$0xff] }
 0x11b   : > { %v17211_v39 = vadd.f32 %v1125_v7, %v17097_v51  ;;  %v14321_v37 = vpop.f32.mrf.mxu0  ;;  %14598 = vmatmul.mubr.msk.f32.gmra.mxu0 %vm414_vm1, %v16473_v22  ;;  %v12027_v22 = vld [vmem:[%s16093_s14 + $0x128] sm:$0xff]  ;;  %v12031_v7 = vld [vmem:[%s16093_s14 + $0x150] sm:$0xff] }
 0x11c   : > { %v14283_v42 = vpop.f32.mrf.mxu1  ;;  %14560 = vmatmul.mubr.msk.f32.gmra.mxu1 %vm414_vm1, %v16760_v50  ;;  %v17224_v41 = vadd.f32 %v14321_v37, %v17047_v62  ;;  %14600 = vmatprep.mubr.msk.f32.mxu0 %vm414_vm1, %v16479_v18 }
 0x11d   : > { %v17221_v26 = vadd.f32 %v14283_v42, %v17102_v32  ;;  %14562 = vmatprep.mubr.msk.f32.mxu1 %vm414_vm1, %v22104_v16  ;;  %v1493_v51 = vpop.f32.mrf.mxu0  ;;  %v17292_v42 = vld [vmem:[%s21827_s3 + $0x8] sm:$0xf] }
 0x11e   : > { %v1135_v50 = vpop.f32.mrf.mxu1  ;;  %v17241_v32 = vadd.f32 %v1493_v51, %v17062_v45  ;;  %v17257_v45 = vld [vmem:[%s16093_s14 + $0x1d2] sm:$0xff] }
 0x11f   : > { %v17238_v62 = vadd.f32 %v1135_v50, %v17115_v55  ;;  %v14324_v2 = vpop.f32.mrf.mxu0  ;;  %14601 = vmatmul.mubr.msk.f32.gmra.mxu0 %vm414_vm1, %v16493_v13  ;;  %v12028_v55 = vld [vmem:[%s16093_s14 + $0x130] sm:$0xff]  ;;  %v12091_v13 = vld [vmem:[%s16093_s14 + $0x41] sm:$0xff] }
 0x120   : > { %v14286_v60 = vpop.f32.mrf.mxu1  ;;  %14563 = vmatmul.mubr.msk.f32.gmra.mxu1 %vm414_vm1, %v17231_v40  ;;  %v17251_v21 = vadd.f32 %v14324_v2, %v17073_v9  ;;  %14603 = vmatprep.mubr.msk.f32.mxu0 %vm414_vm1, %v12027_v22  ;;  %v12094_v50 = vld [vmem:[%s16093_s14 + $0x61] sm:$0xff]  ;;  %v12095_v2 = vld [vmem:[%s16093_s14 + $0x69] sm:$0xff] }
 0x121   : > { %v17248_v18 = vadd.f32 %v14286_v60, %v17120_v3  ;;  %14565 = vmatprep.mubr.msk.f32.mxu1 %vm414_vm1, %v17234_v6  ;;  %v1503_v4 = vpop.f32.mrf.mxu0  ;;  %v12033_v60 = vld [vmem:[%s16093_s14 + $0x168] sm:$0xff] }
 0x122   : > { %v1145_v47 = vpop.f32.mrf.mxu1  ;;  %v17266_v9 = vadd.f32 %v1503_v4, %v17082_v23  ;;  %v12030_v23 = vld [vmem:[%s16093_s14 + $0x148] sm:$0xff]  ;;  %v12034_v4 = vld [vmem:[%s16093_s14 + $0x170] sm:$0xff] }
 0x123   : > { %v17263_v3 = vadd.f32 %v1145_v47, %v17133_v59  ;;  %v14327_v14 = vpop.f32.mrf.mxu0  ;;  %14604 = vmatmul.mubr.msk.f32.gmra.mxu0 %vm414_vm1, %v12028_v55  ;;  %v12092_v59 = vld [vmem:[%s16093_s14 + $0x49] sm:$0xff] }
 0x124   : > { %v14289_v52 = vpop.f32.mrf.mxu1  ;;  %14566 = vmatmul.mubr.msk.f32.gmra.mxu1 %vm414_vm1, %v17257_v45  ;;  %v17275_v34 = vadd.f32 %v14327_v14, %v17091_v49  ;;  %14606 = vmatprep.mubr.msk.f32.mxu0 %vm414_vm1, %v12029_v31  ;;  %v12093_v49 = vld [vmem:[%s16093_s14 + $0x51] sm:$0xff]  ;;  %v12097_v14 = vld [vmem:[%s16093_s14 + $0x81] sm:$0xff] }
 0x125   : > { %v17272_v5 = vadd.f32 %v14289_v52, %v17138_v25  ;;  %14635 = vmatprep.mubr.msk.f32.mxu1 %vm414_vm1, %v12091_v13  ;;  %v1513_v36 = vpop.f32.mrf.mxu0  ;;  %v12096_v31 = vld [vmem:[%s16093_s14 + $0x71] sm:$0xff]  ;;  %v12035_v52 = vld [vmem:[%s16093_s14 + $0x180] sm:$0xff] }
 0x126   : > { %v1155_v20 = vpop.f32.mrf.mxu1  ;;  %v17286_v25 = vadd.f32 %v1513_v36, %v17100_v33  ;;  %v12032_v33 = vld [vmem:[%s16093_s14 + $0x160] sm:$0xff]  ;;  %v12036_v36 = vld [vmem:[%s16093_s14 + $0x188] sm:$0xff] }
 0x127   : > { %v17283_v56 = vadd.f32 %v1155_v20, %v17151_v63  ;;  %v14330_v16 = vpop.f32.mrf.mxu0  ;;  %14607 = vmatmul.mubr.msk.f32.gmra.mxu0 %vm414_vm1, %v12030_v23 }
 0x128   : > { %v17294_v37 = vpop.f32.mrf.mxu1  ;;  %14636 = vmatmul.mubr.msk.f32.vlgmr.msra.gmra.mxu1 %vm414_vm1, %v12092_v59  ;;  %v17299_v63 = vadd.f32 %v14330_v16, %v17109_v53  ;;  %14609 = vmatprep.mubr.msk.f32.mxu0 %vm414_vm1, %v12031_v7  ;;  %v12098_v7 = vld [vmem:[%s16093_s14 + $0x89] sm:$0xff] }
 0x129   : > { %14764 = vmatpush3.msk.msra.mxu1 %vm541_vm0, %v16898_v24  ;;  %v1523_v22 = vpop.f32.mrf.mxu0  ;;  %14638 = vmatprep.mubr.msk.f32.mxu1 %vm414_vm1, %v12093_v49  ;;  %v12037_v16 = vld [vmem:[%s16093_s14 + $0x190] sm:$0xff] }
 0x12a   : > { %v17306_v51 = vpop.f32.mrf.mxu1  ;;  %14893 = vmatprep.subr.msk.mxu1 %vm541_vm0, %v17292_v42  ;;  %v17314_v24 = vadd.f32 %v1523_v22, %v17118_v46 }
 0x12b   : > { %v14333_v55 = vpop.f32.mrf.mxu0  ;;  %14610 = vmatmul.mubr.msk.f32.gmra.mxu0 %vm414_vm1, %v12032_v33  ;;  %v12099_v33 = vld [vmem:[%s16093_s14 + $0x91] sm:$0xff] }
 0x12c   : > { %v17316_v53 = vpop.f32.mrf.mxu1  ;;  %14639 = vmatmul.mubr.msk.f32.gmra.mxu1 %vm414_vm1, %v12094_v50  ;;  %v17321_v47 = vadd.f32 %v14333_v55, %v17127_v57  ;;  %14612 = vmatprep.mubr.msk.f32.mxu0 %vm414_vm1, %v12033_v60  ;;  %v12100_v55 = vld [vmem:[%s16093_s14 + $0xa1] sm:$0xff] }
 0x12d   : > { %14641 = vmatprep.mubr.msk.f32.mxu1 %vm414_vm1, %v12095_v2  ;;  %v1533_v13 = vpop.f32.mrf.mxu0  ;;  %v12038_v2 = vld [vmem:[%s16093_s14 + $0x1a0] sm:$0xff] }
 0x12e   : > { %v17327_v46 = vpop.f32.mrf.mxu1  ;;  %v17332_v23 = vadd.f32 %v1533_v13, %v17136_v29  ;;  %v12101_v13 = vld [vmem:[%s16093_s14 + $0xa9] sm:$0xff] }
 0x12f   : > { %v14336_v59 = vpop.f32.mrf.mxu0  ;;  %14613 = vmatmul.mubr.msk.f32.gmra.mxu0 %vm414_vm1, %v12034_v4 }
 0x130   : > { %v17334_v57 = vpop.f32.mrf.mxu1  ;;  %14642 = vmatmul.mubr.msk.f32.gmra.mxu1 %vm414_vm1, %v12096_v31  ;;  %v17339_v20 = vadd.f32 %v14336_v59, %v17145_v61  ;;  %14615 = vmatprep.mubr.msk.f32.mxu0 %vm414_vm1, %v12035_v52  ;;  %v12039_v31 = vld [vmem:[%s16093_s14 + $0x1a8] sm:$0xff] }
 0x131   : > { %14644 = vmatprep.mubr.msk.f32.mxu1 %vm414_vm1, %v12097_v14  ;;  %v1543_v49 = vpop.f32.mrf.mxu0 }
 0x132   : > { %v17345_v29 = vpop.f32.mrf.mxu1  ;;  %v17350_v50 = vadd.f32 %v1543_v49, %v17154_v58 }
 0x133   : > { %v14339_v22 = vpop.f32.mrf.mxu0  ;;  %14616 = vmatmul.mubr.msk.f32.gmra.mxu0 %vm414_vm1, %v12036_v36  ;;  %v12040_v36 = vld [vmem:[%s16093_s14 + $0x1b0] sm:$0xff] }
 0x134   : > { %v17352_v61 = vpop.f32.mrf.mxu1  ;;  %14645 = vmatmul.mubr.msk.f32.gmra.mxu1 %vm414_vm1, %v12098_v7  ;;  %v17357_v60 = vadd.f32 %v14339_v22, %v17161_v1  ;;  %14618 = vmatprep.mubr.msk.f32.mxu0 %vm414_vm1, %v12037_v16  ;;  %v12102_v7 = vld [vmem:[%s16093_s14 + $0xb1] sm:$0xff]  ;;  %v12103_v16 = vld [vmem:[%s16093_s14 + $0xc1] sm:$0xff] }
 0x135   : > { %14647 = vmatprep.mubr.msk.f32.mxu1 %vm414_vm1, %v12099_v33  ;;  %v1553_v4 = vpop.f32.mrf.mxu0 }
 0x136   : > { %v17363_v58 = vpop.f32.mrf.mxu1  ;;  %v17368_v52 = vadd.f32 %v1553_v4, %v17171_v54 }
 0x137   : > { %v14342_v1 = vpop.f32.mrf.mxu0  ;;  %14619 = vmatmul.mubr.msk.f32.gmra.mxu0 %vm414_vm1, %v12038_v2 }
 0x138   : > { %v17370_v14 = vpop.f32.mrf.mxu1  ;;  %14648 = vmatmul.mubr.msk.f32.gmra.mxu1 %vm414_vm1, %v12100_v55  ;;  %v17375_v59 = vadd.f32 %v14342_v1, %v17181_v19  ;;  %14621 = vmatprep.mubr.msk.f32.mxu0 %vm414_vm1, %v12039_v31  ;;  %v12104_v55 = vld [vmem:[%s16093_s14 + $0xc9] sm:$0xff]  ;;  %v12105_v31 = vld [vmem:[%s16093_s14 + $0xd1] sm:$0xff] }
 0x139   : > { %14650 = vmatprep.mubr.msk.f32.mxu1 %vm414_vm1, %v12101_v13  ;;  %v1563_v49 = vpop.f32.mrf.mxu0 }
 0x13a   : > { %v17381_v54 = vpop.f32.mrf.mxu1  ;;  %v17385_v33 = vadd.f32 %v1563_v49, %v17191_v11 }
 0x13b   : > { %v14345_v2 = vpop.f32.mrf.mxu0  ;;  %14622 = vmatmul.mubr.msk.f32.gmra.mxu0 %vm414_vm1, %v12040_v36 }
 0x13c   : > { %v17387_v22 = vpop.f32.mrf.mxu1  ;;  %14651 = vmatmul.mubr.msk.f32.gmra.mxu1 %vm414_vm1, %v12102_v7  ;;  %v17392_v19 = vadd.f32 %v14345_v2, %v17201_v35  ;;  %14624 = vmatprep.mubr.msk.f32.mxu0 %vm414_vm1, %v16871_v10  ;;  %v12106_v7 = vld [vmem:[%s16093_s14 + $0xe1] sm:$0xff]  ;;  %v12107_v2 = vld [vmem:[%s16093_s14 + $0xe9] sm:$0xff] }
 0x13d   : > { %14653 = vmatprep.mubr.msk.f32.mxu1 %vm414_vm1, %v12103_v16  ;;  %v1573_v4 = vpop.f32.mrf.mxu0 }
 0x13e   : > { %v17398_v11 = vpop.f32.mrf.mxu1  ;;  %v17402_v13 = vadd.f32 %v1573_v4, %v17211_v39  ;;  %v12044_v39 = vld [vmem:[%s16093_s14 + $0x1e0] sm:$0xff] }
 0x13f   : > { %v14348_v1 = vpop.f32.mrf.mxu0  ;;  %14625 = vmatmul.mubr.msk.f32.gmra.mxu0 %vm414_vm1, %v16874_v12  ;;  %v12045_v12 = vld [vmem:[%s16093_s14 + $0x1e8] sm:$0xff] }
 0x140   : > { %v14377_v35 = vpop.f32.mrf.mxu1  ;;  %14654 = vmatmul.mubr.msk.f32.gmra.mxu1 %vm414_vm1, %v12104_v55  ;;  %v17408_v10 = vadd.f32 %v14348_v1, %v17221_v26  ;;  %14627 = vmatprep.mubr.msk.f32.mxu0 %vm414_vm1, %v16885_v17 }
 0x141   : > { %v17411_v36 = vadd.f32 %v14377_v35, %v17164_v0  ;;  %14656 = vmatprep.mubr.msk.f32.mxu1 %vm414_vm1, %v12105_v31  ;;  %v1583_v49 = vpop.f32.mrf.mxu0 }
 0x142   : > { %v1956_v16 = vpop.f32.mrf.mxu1  ;;  %v17421_v26 = vadd.f32 %v1583_v49, %v17238_v62  ;;  %v12046_v62 = vld [vmem:[%s16093_s14 + $0x1f0] sm:$0xff]  ;;  %v12109_v49 = vld [vmem:[%s16093_s14 + $0x101] sm:$0xff] }
 0x143   : > { %v17424_v0 = vadd.f32 %v1956_v16, %v17174_v48  ;;  %v14351_v55 = vpop.f32.mrf.mxu0  ;;  %14628 = vmatmul.mubr.msk.f32.gmra.mxu0 %vm414_vm1, %v12044_v39  ;;  %v12108_v48 = vld [vmem:[%s16093_s14 + $0xf1] sm:$0xff]  ;;  %v12177_v39 = vld [vmem:[%s16093_s14 + $0x42] sm:$0xff] }
 0x144   : > { %v14380_v17 = vpop.f32.mrf.mxu1  ;;  %14657 = vmatmul.mubr.msk.f32.gmra.mxu1 %vm414_vm1, %v12106_v7  ;;  %v17429_v4 = vadd.f32 %v14351_v55, %v17248_v18  ;;  %14630 = vmatprep.mubr.msk.f32.mxu0 %vm414_vm1, %v12045_v12  ;;  %v12178_v55 = vld [vmem:[%s16093_s14 + $0x4a] sm:$0xff] }
 0x145   : > { %v17432_v31 = vadd.f32 %v14380_v17, %v17184_v8  ;;  %14659 = vmatprep.mubr.msk.f32.mxu1 %vm414_vm1, %v12107_v2  ;;  %v1593_v1 = vpop.f32.mrf.mxu0 }
 0x146   : > { %v1966_v35 = vpop.f32.mrf.mxu1  ;;  %v17441_v18 = vadd.f32 %v1593_v1, %v17263_v3  ;;  %v12110_v3 = vld [vmem:[%s16093_s14 + $0x109] sm:$0xff]  ;;  %v12111_v1 = vld [vmem:[%s16093_s14 + $0x111] sm:$0xff] }
 0x147   : > { %v17444_v8 = vadd.f32 %v1966_v35, %v17194_v15  ;;  %v14354_v7 = vpop.f32.mrf.mxu0  ;;  %14631 = vmatmul.mubr.msk.f32.gmra.mxu0 %vm414_vm1, %v12046_v62  ;;  %v12179_v62 = vld [vmem:[%s16093_s14 + $0x52] sm:$0xff] }
 0x148   : > { %v14383_v16 = vpop.f32.mrf.mxu1  ;;  %14660 = vmatmul.mubr.msk.f32.gmra.mxu1 %vm414_vm1, %v12108_v48  ;;  %v17449_v12 = vadd.f32 %v14354_v7, %v17272_v5  ;;  %14700 = vmatprep.mubr.msk.f32.mxu0 %vm414_vm1, %v12177_v39  ;;  %v1171_v48 = vadd.f32 %v17294_v37, %v16900_v27  ;;  %v1166_v39 = vadd.f32 %v17306_v51, %v16910_v38  ;;  %v17484_v37 = vld [vmem:[%s21827_s3 + $0xc] sm:$0xf] }
 0x149   : > { %v17452_v2 = vadd.f32 %v14383_v16, %v17204_v28  ;;  %14662 = vmatprep.mubr.msk.f32.mxu1 %vm414_vm1, %v12109_v49  ;;  %v1603_v15 = vpop.f32.mrf.mxu0  ;;  %v12181_v38 = vld [vmem:[%s16093_s14 + $0x6a] sm:$0xff] }
 0x14a   : > { %v1976_v17 = vpop.f32.mrf.mxu1  ;;  %v17463_v5 = vadd.f32 %v1603_v15, %v17283_v56  ;;  %v12180_v56 = vld [vmem:[%s16093_s14 + $0x62] sm:$0xff] }
 0x14b   : > { %v17466_v28 = vadd.f32 %v1976_v17, %v17214_v30  ;;  %v14357_v35 = vpop.f32.mrf.mxu0  ;;  %14701 = vmatmul.mubr.msk.f32.vlgmr.msra.gmra.mxu0 %vm414_vm1, %v12178_v55  ;;  %v12112_v30 = vld [vmem:[%s16093_s14 + $0x121] sm:$0xff]  ;;  %v12113_v55 = vld [vmem:[%s16093_s14 + $0x129] sm:$0xff] }
 0x14c   : > { %v14386_v49 = vpop.f32.mrf.mxu1  ;;  %14663 = vmatmul.mubr.msk.f32.gmra.mxu1 %vm414_vm1, %v12110_v3  ;;  %v17472_v7 = vadd.f32 %v14357_v35, %v1171_v48  ;;  %14703 = vmatprep.mubr.msk.f32.mxu0 %vm414_vm1, %v12179_v62  ;;  %v12182_v48 = vld [vmem:[%s16093_s14 + $0x72] sm:$0xff] }
 0x14d   : > { %v17475_v27 = vadd.f32 %v14386_v49, %v17224_v41  ;;  %14665 = vmatprep.mubr.msk.f32.mxu1 %vm414_vm1, %v12111_v1  ;;  %v1613_v16 = vpop.f32.mrf.mxu0  ;;  %14829 = vmatpush3.msk.msra.mxu0 %vm541_vm0, %v17056_v43  ;;  %v1181_v41 = vadd.f32 %v17316_v53, %v16916_v44  ;;  %v22105_v43 = vld [vmem:[#allocation42_spill] sm:$0xff] }
 0x14e   : > { %v1986_v3 = vpop.f32.mrf.mxu1  ;;  %v17492_v51 = vadd.f32 %v1613_v16, %v1166_v39  ;;  %14958 = vmatprep.subr.msk.mxu0 %vm541_vm0, %v17484_v37  ;;  %v1176_v62 = vadd.f32 %v17327_v46, %v22105_v43  ;;  %v12115_v39 = vld [vmem:[%s16093_s14 + $0x141] sm:$0xff] }
 0x14f   : > { %v17495_v15 = vadd.f32 %v1986_v3, %v17241_v32  ;;  %v14360_v17 = vpop.f32.mrf.mxu0  ;;  %14704 = vmatmul.mubr.msk.f32.gmra.mxu0 %vm414_vm1, %v12180_v56  ;;  %v12114_v32 = vld [vmem:[%s16093_s14 + $0x131] sm:$0xff] }
 0x150   : > { %v14389_v1 = vpop.f32.mrf.mxu1  ;;  %14666 = vmatmul.mubr.msk.f32.gmra.mxu1 %vm414_vm1, %v12112_v30  ;;  %v17503_v44 = vadd.f32 %v14360_v17, %v1181_v41  ;;  %14706 = vmatprep.mubr.msk.f32.mxu0 %vm414_vm1, %v12181_v38  ;;  %v12183_v30 = vld [vmem:[%s16093_s14 + $0x82] sm:$0xff]  ;;  %v22106_v56 = vld [vmem:[#allocation15_spill] sm:$0xff]  ;;  %v22107_v38 = vld [vmem:[#allocation16_spill] sm:$0xff] }
 0x151   : > { %v17506_v53 = vadd.f32 %v14389_v1, %v17251_v21  ;;  %14668 = vmatprep.mubr.msk.f32.mxu1 %vm414_vm1, %v12113_v55  ;;  %v1623_v35 = vpop.f32.mrf.mxu0  ;;  %v1191_v46 = vadd.f32 %v17334_v57, %v22106_v56  ;;  %v1186_v41 = vadd.f32 %v17345_v29, %v22107_v38  ;;  %v12184_v1 = vld [vmem:[%s16093_s14 + $0x8a] sm:$0xff] }
 0x152   : > { %v1996_v49 = vpop.f32.mrf.mxu1  ;;  %v17516_v16 = vadd.f32 %v1623_v35, %v1176_v62  ;;  %v22108_v35 = vld [vmem:[#allocation17_spill] sm:$0xff]  ;;  %v22109_v56 = vld [vmem:[#allocation18_spill] sm:$0xff] }
 0x153   : > { %v17519_v21 = vadd.f32 %v1996_v49, %v17266_v9  ;;  %v14363_v3 = vpop.f32.mrf.mxu0  ;;  %14707 = vmatmul.mubr.msk.f32.gmra.mxu0 %vm414_vm1, %v12182_v48  ;;  %v12116_v9 = vld [vmem:[%s16093_s14 + $0x149] sm:$0xff]  ;;  %v12185_v48 = vld [vmem:[%s16093_s14 + $0x92] sm:$0xff]  ;;  %v1201_v29 = vadd.f32 %v17352_v61, %v22108_v35 }
 0x154   : > { %v14392_v55 = vpop.f32.mrf.mxu1  ;;  %14669 = vmatmul.mubr.msk.f32.gmra.mxu1 %vm414_vm1, %v12114_v32  ;;  %v17525_v17 = vadd.f32 %v14363_v3, %v1191_v46  ;;  %14709 = vmatprep.mubr.msk.f32.mxu0 %vm414_vm1, %v12183_v30  ;;  %v12117_v32 = vld [vmem:[%s16093_s14 + $0x151] sm:$0xff]  ;;  %v1196_v46 = vadd.f32 %v17363_v58, %v22109_v56 }
 0x155   : > { %v17528_v57 = vadd.f32 %v14392_v55, %v17275_v34  ;;  %14671 = vmatprep.mubr.msk.f32.mxu1 %vm414_vm1, %v12115_v39  ;;  %v1633_v43 = vpop.f32.mrf.mxu0  ;;  %v12186_v55 = vld [vmem:[%s16093_s14 + $0xa2] sm:$0xff]  ;;  %v22111_v35 = vld [vmem:[#allocation20_spill] sm:$0xff] }
 0x156   : > { %v2006_v62 = vpop.f32.mrf.mxu1  ;;  %v17538_v49 = vadd.f32 %v1633_v43, %v1186_v41  ;;  %v22110_v43 = vld [vmem:[#allocation19_spill] sm:$0xff] }
 0x157   : > { %v17541_v34 = vadd.f32 %v2006_v62, %v17286_v25  ;;  %v14366_v39 = vpop.f32.mrf.mxu0  ;;  %14710 = vmatmul.mubr.msk.f32.gmra.mxu0 %vm414_vm1, %v12184_v1  ;;  %v12118_v25 = vld [vmem:[%s16093_s14 + $0x161] sm:$0xff]  ;;  %v12187_v1 = vld [vmem:[%s16093_s14 + $0xaa] sm:$0xff]  ;;  %v1211_v58 = vadd.f32 %v17370_v14, %v22110_v43 }
 0x158   : > { %v14395_v30 = vpop.f32.mrf.mxu1  ;;  %14672 = vmatmul.mubr.msk.f32.gmra.mxu1 %vm414_vm1, %v12116_v9  ;;  %v17547_v3 = vadd.f32 %v14366_v39, %v1201_v29  ;;  %14712 = vmatprep.mubr.msk.f32.mxu0 %vm414_vm1, %v12185_v48  ;;  %v12119_v9 = vld [vmem:[%s16093_s14 + $0x169] sm:$0xff]  ;;  %v1206_v29 = vadd.f32 %v17381_v54, %v22111_v35  ;;  %v22113_v43 = vld [vmem:[#allocation21_spill] sm:$0xff] }
 0x159   : > { %v17550_v61 = vadd.f32 %v14395_v30, %v17299_v63  ;;  %14674 = vmatprep.mubr.msk.f32.mxu1 %vm414_vm1, %v12117_v32  ;;  %v1643_v38 = vpop.f32.mrf.mxu0  ;;  %v12188_v30 = vld [vmem:[%s16093_s14 + $0xb2] sm:$0xff] }
 0x15a   : > { %v2016_v41 = vpop.f32.mrf.mxu1  ;;  %v17560_v62 = vadd.f32 %v1643_v38, %v1196_v46  ;;  %v22112_v38 = vld [vmem:[#allocation23_spill] sm:$0xff] }
 0x15b   : > { %v17563_v63 = vadd.f32 %v2016_v41, %v17314_v24  ;;  %v14369_v32 = vpop.f32.mrf.mxu0  ;;  %14713 = vmatmul.mubr.msk.f32.gmra.mxu0 %vm414_vm1, %v12186_v55  ;;  %v12120_v24 = vld [vmem:[%s16093_s14 + $0x171] sm:$0xff]  ;;  %v12189_v55 = vld [vmem:[%s16093_s14 + $0xc2] sm:$0xff]  ;;  %v1221_v54 = vadd.f32 %v17387_v22, %v22112_v38 }
 0x15c   : > { %v14398_v48 = vpop.f32.mrf.mxu1  ;;  %14675 = vmatmul.mubr.msk.f32.gmra.mxu1 %vm414_vm1, %v12118_v25  ;;  %v17569_v39 = vadd.f32 %v14369_v32, %v1211_v58  ;;  %14715 = vmatprep.mubr.msk.f32.mxu0 %vm414_vm1, %v12187_v1  ;;  %v12121_v25 = vld [vmem:[%s16093_s14 + $0x181] sm:$0xff]  ;;  %v1216_v58 = vadd.f32 %v17398_v11, %v22113_v43  ;;  %v12193_v43 = vld [vmem:[%s16093_s14 + $0xea] sm:$0xff] }
 0x15d   : > { %v17572_v14 = vadd.f32 %v14398_v48, %v17321_v47  ;;  %14677 = vmatprep.mubr.msk.f32.mxu1 %vm414_vm1, %v12119_v9  ;;  %v1653_v56 = vpop.f32.mrf.mxu0  ;;  %v12190_v48 = vld [vmem:[%s16093_s14 + $0xca] sm:$0xff]  ;;  %v12124_v38 = vld [vmem:[%s16093_s14 + $0x1a1] sm:$0xff] }
 0x15e   : > { %v2026_v46 = vpop.f32.mrf.mxu1  ;;  %v17582_v41 = vadd.f32 %v1653_v56, %v1206_v29 }
 0x15f   : > { %v17585_v47 = vadd.f32 %v2026_v46, %v17332_v23  ;;  %v14372_v9 = vpop.f32.mrf.mxu0  ;;  %14716 = vmatmul.mubr.msk.f32.gmra.mxu0 %vm414_vm1, %v12188_v30  ;;  %v12122_v23 = vld [vmem:[%s16093_s14 + $0x189] sm:$0xff]  ;;  %v12191_v30 = vld [vmem:[%s16093_s14 + $0xd2] sm:$0xff] }
 0x160   : > { %v14401_v1 = vpop.f32.mrf.mxu1  ;;  %14678 = vmatmul.mubr.msk.f32.gmra.mxu1 %vm414_vm1, %v12120_v24  ;;  %v17591_v32 = vadd.f32 %v14372_v9, %v1221_v54  ;;  %14718 = vmatprep.mubr.msk.f32.mxu0 %vm414_vm1, %v12189_v55  ;;  %v12123_v24 = vld [vmem:[%s16093_s14 + $0x191] sm:$0xff] }
 0x161   : > { %v17594_v22 = vadd.f32 %v14401_v1, %v17339_v20  ;;  %14680 = vmatprep.mubr.msk.f32.mxu1 %vm414_vm1, %v12121_v25  ;;  %v1663_v35 = vpop.f32.mrf.mxu0  ;;  %v12125_v1 = vld [vmem:[%s16093_s14 + $0x1a9] sm:$0xff] }
 0x162   : > { %v2036_v29 = vpop.f32.mrf.mxu1  ;;  %v17602_v11 = vadd.f32 %v1663_v35, %v1216_v58 }
 0x163   : > { %v17605_v56 = vadd.f32 %v2036_v29, %v17350_v50  ;;  %v14442_v46 = vpop.f32.mrf.mxu0  ;;  %14719 = vmatmul.mubr.msk.f32.gmra.mxu0 %vm414_vm1, %v12190_v48  ;;  %v12192_v50 = vld [vmem:[%s16093_s14 + $0xe2] sm:$0xff] }
 0x164   : > { %v14404_v20 = vpop.f32.mrf.mxu1  ;;  %14681 = vmatmul.mubr.msk.f32.gmra.mxu1 %vm414_vm1, %v12122_v23  ;;  %v17613_v55 = vadd.f32 %v14442_v46, %v17411_v36  ;;  %14721 = vmatprep.mubr.msk.f32.mxu0 %vm414_vm1, %v12191_v30  ;;  %v12195_v30 = vld [vmem:[%s16093_s14 + $0x102] sm:$0xff] }
 0x165   : > { %v17610_v25 = vadd.f32 %v14404_v20, %v17357_v60  ;;  %14683 = vmatprep.mubr.msk.f32.mxu1 %vm414_vm1, %v12123_v24  ;;  %v2446_v9 = vpop.f32.mrf.mxu0 }
 0x166   : > { %v2046_v54 = vpop.f32.mrf.mxu1  ;;  %v17625_v60 = vadd.f32 %v2446_v9, %v17424_v0  ;;  %v12194_v0 = vld [vmem:[%s16093_s14 + $0xf2] sm:$0xff] }
 0x167   : > { %v17622_v58 = vadd.f32 %v2046_v54, %v17368_v52  ;;  %v14445_v23 = vpop.f32.mrf.mxu0  ;;  %14722 = vmatmul.mubr.msk.f32.gmra.mxu0 %vm414_vm1, %v12192_v50  ;;  %v12126_v52 = vld [vmem:[%s16093_s14 + $0x1b1] sm:$0xff] }
 0x168   : > { %v14407_v36 = vpop.f32.mrf.mxu1  ;;  %14684 = vmatmul.mubr.msk.f32.gmra.mxu1 %vm414_vm1, %v12124_v38  ;;  %v17633_v35 = vadd.f32 %v14445_v23, %v17432_v31  ;;  %14724 = vmatprep.mubr.msk.f32.mxu0 %vm414_vm1, %v12193_v43  ;;  %v22114_v54 = vld [vmem:[#allocation24_spill] sm:$0xff]  ;;  %v22115_v23 = vld [vmem:[#allocation22_spill] sm:$0xff] }
 0x169   : > { %v17630_v48 = vadd.f32 %v14407_v36, %v17375_v59  ;;  %14686 = vmatprep.mubr.msk.f32.mxu1 %vm414_vm1, %v12125_v1  ;;  %v2456_v24 = vpop.f32.mrf.mxu0  ;;  %v12197_v1 = vld [vmem:[%s16093_s14 + $0x112] sm:$0xff] }
 0x16a   : > { %v2056_v29 = vpop.f32.mrf.mxu1  ;;  %v17644_v59 = vadd.f32 %v2456_v24, %v17444_v8 }
 0x16b   : > { %v17641_v20 = vadd.f32 %v2056_v29, %v17385_v33  ;;  %v14448_v31 = vpop.f32.mrf.mxu0  ;;  %14725 = vmatmul.mubr.msk.f32.gmra.mxu0 %vm414_vm1, %v12194_v0  ;;  %v12196_v33 = vld [vmem:[%s16093_s14 + $0x10a] sm:$0xff]  ;;  %v22116_v29 = vld [vmem:[#allocation25_spill] sm:$0xff] }
 0x16c   : > { %v14410_v46 = vpop.f32.mrf.mxu1  ;;  %14687 = vmatmul.mubr.msk.f32.gmra.mxu1 %vm414_vm1, %v12126_v52  ;;  %v17652_v50 = vadd.f32 %v14448_v31, %v17452_v2  ;;  %14727 = vmatprep.mubr.msk.f32.mxu0 %vm414_vm1, %v12195_v30  ;;  %v12199_v31 = vld [vmem:[%s16093_s14 + $0x12a] sm:$0xff] }
 0x16d   : > { %v17649_v38 = vadd.f32 %v14410_v46, %v17392_v19  ;;  %14689 = vmatprep.mubr.msk.f32.mxu1 %vm414_vm1, %v22114_v54  ;;  %v2466_v9 = vpop.f32.mrf.mxu0  ;;  %v12131_v46 = vld [vmem:[%s16093_s14 + $0x1e9] sm:$0xff] }
 0x16e   : > { %v2066_v8 = vpop.f32.mrf.mxu1  ;;  %v17663_v19 = vadd.f32 %v2466_v9, %v17466_v28  ;;  %v12198_v28 = vld [vmem:[%s16093_s14 + $0x122] sm:$0xff] }
 0x16f   : > { %v17660_v43 = vadd.f32 %v2066_v8, %v17402_v13  ;;  %v14451_v36 = vpop.f32.mrf.mxu0  ;;  %14728 = vmatmul.mubr.msk.f32.gmra.mxu0 %vm414_vm1, %v12196_v33  ;;  %v12130_v13 = vld [vmem:[%s16093_s14 + $0x1e1] sm:$0xff] }
 0x170   : > { %v14413_v2 = vpop.f32.mrf.mxu1  ;;  %14690 = vmatmul.mubr.msk.f32.gmra.mxu1 %vm414_vm1, %v22115_v23  ;;  %v17672_v0 = vadd.f32 %v14451_v36, %v17475_v27  ;;  %14730 = vmatprep.mubr.msk.f32.mxu0 %vm414_vm1, %v12197_v1  ;;  %v12201_v36 = vld [vmem:[%s16093_s14 + $0x142] sm:$0xff] }
 0x171   : > { %v17669_v52 = vadd.f32 %v14413_v2, %v17408_v10  ;;  %14692 = vmatprep.mubr.msk.f32.mxu1 %vm414_vm1, %v22116_v29  ;;  %v2476_v30 = vpop.f32.mrf.mxu0  ;;  %v4661_v23 = vld [vmem:[%s17686_s20] sm:$0xff] }
 0x172   : > { %v2076_v24 = vpop.f32.mrf.mxu1  ;;  %v17692_v27 = vadd.f32 %v2476_v30, %v17495_v15  ;;  %v12200_v15 = vld [vmem:[%s16093_s14 + $0x132] sm:$0xff] }
 0x173   : > { %v17689_v10 = vadd.f32 %v2076_v24, %v17421_v26  ;;  %v14454_v33 = vpop.f32.mrf.mxu0  ;;  %14731 = vmatmul.mubr.msk.f32.gmra.mxu0 %vm414_vm1, %v12198_v28  ;;  %v12132_v26 = vld [vmem:[%s16093_s14 + $0x1f1] sm:$0xff] }
 0x174   : > { %v14416_v54 = vpop.f32.mrf.mxu1  ;;  %14693 = vmatmul.mubr.msk.f32.gmra.mxu1 %vm414_vm1, %v12130_v13  ;;  %v17700_v9 = vadd.f32 %v14454_v33, %v17506_v53  ;;  %14733 = vmatprep.mubr.msk.f32.mxu0 %vm414_vm1, %v12199_v31  ;;  %v12203_v31 = vld [vmem:[%s16093_s14 + $0x152] sm:$0xff] }
 0x175   : > { %v17697_v8 = vadd.f32 %v14416_v54, %v17429_v4  ;;  %14695 = vmatprep.mubr.msk.f32.mxu1 %vm414_vm1, %v12131_v46  ;;  %v2486_v2 = vpop.f32.mrf.mxu0  ;;  %v17737_v33 = vld [vmem:[%s21827_s3 + $0x10] sm:$0xf] }
 0x176   : > { %v2086_v1 = vpop.f32.mrf.mxu1  ;;  %v17712_v4 = vadd.f32 %v2486_v2, %v17519_v21  ;;  %v4662_v21 = vld [vmem:[%s17686_s20 + $0x8] sm:$0xff]  ;;  %v17752_v2 = vld [vmem:[%s17686_s20 + $0x20] sm:$0xff] }
 0x177   : > { %v17709_v29 = vadd.f32 %v2086_v1, %v17441_v18  ;;  %v14457_v13 = vpop.f32.mrf.mxu0  ;;  %14734 = vmatmul.mubr.msk.f32.gmra.mxu0 %vm414_vm1, %v12200_v15  ;;  %v12202_v18 = vld [vmem:[%s16093_s14 + $0x14a] sm:$0xff]  ;;  %v12204_v1 = vld [vmem:[%s16093_s14 + $0x162] sm:$0xff] }
 0x178   : > { %v14419_v53 = vpop.f32.mrf.mxu1  ;;  %14696 = vmatmul.mubr.msk.f32.gmra.mxu1 %vm414_vm1, %v12132_v26  ;;  %v17720_v24 = vadd.f32 %v14457_v13, %v17528_v57  ;;  %14736 = vmatprep.mubr.msk.f32.mxu0 %vm414_vm1, %v12201_v36  ;;  %v4663_v57 = vld [vmem:[%s17686_s20 + $0x10] sm:$0xff] }
 0x179   : > { %v17717_v28 = vadd.f32 %v14419_v53, %v17449_v12  ;;  %14765 = vmatprep.mubr.msk.f32.mxu1 %vm414_vm1, %v4661_v23  ;;  %v2496_v46 = vpop.f32.mrf.mxu0  ;;  %v12205_v53 = vld [vmem:[%s16093_s14 + $0x16a] sm:$0xff] }
 0x17a   : > { %v2096_v30 = vpop.f32.mrf.mxu1  ;;  %v17731_v12 = vadd.f32 %v2496_v46, %v17541_v34 }
 0x17b   : > { %v17728_v54 = vadd.f32 %v2096_v30, %v17463_v5  ;;  %v14460_v15 = vpop.f32.mrf.mxu0  ;;  %14737 = vmatmul.mubr.msk.f32.gmra.mxu0 %vm414_vm1, %v12202_v18 }
 0x17c   : > { %v14422_v26 = vpop.f32.mrf.mxu1  ;;  %14766 = vmatmul.mubr.msk.f32.vlgmr.msra.gmra.mxu1 %vm414_vm1, %v4662_v21  ;;  %v17745_v34 = vadd.f32 %v14460_v15, %v17550_v61  ;;  %14739 = vmatprep.mubr.msk.f32.mxu0 %vm414_vm1, %v12203_v31 }
 0x17d   : > { %v17742_v5 = vadd.f32 %v14422_v26, %v17472_v7  ;;  %14894 = vmatpush3.msk.msra.mxu1 %vm541_vm0, %v17292_v42  ;;  %v2506_v23 = vpop.f32.mrf.mxu0  ;;  %14768 = vmatprep.mubr.msk.f32.mxu1 %vm414_vm1, %v4663_v57  ;;  %v17757_v7 = vld [vmem:[%s17686_s20 + $0x28] sm:$0xff]  ;;  %v17785_v26 = vld [vmem:[%s17686_s20 + $0x40] sm:$0xff] }
 0x17e   : > { %v2106_v36 = vpop.f32.mrf.mxu1  ;;  %15023 = vmatprep.subr.msk.mxu1 %vm541_vm0, %v17737_v33  ;;  %v17765_v61 = vadd.f32 %v2506_v23, %v17563_v63  ;;  %v17781_v63 = vld [vmem:[%s17686_s20 + $0x30] sm:$0xff]  ;;  %v12207_v57 = vld [vmem:[%s16093_s14 + $0x182] sm:$0xff] }
 0x17f   : > { %v17762_v42 = vadd.f32 %v2106_v36, %v17492_v51  ;;  %v14463_v18 = vpop.f32.mrf.mxu0  ;;  %14740 = vmatmul.mubr.msk.f32.gmra.mxu0 %vm414_vm1, %v12204_v1  ;;  %v12206_v51 = vld [vmem:[%s16093_s14 + $0x172] sm:$0xff] }
 0x180   : > { %v14425_v13 = vpop.f32.mrf.mxu1  ;;  %14769 = vmatmul.mubr.msk.f32.gmra.mxu1 %vm414_vm1, %v17752_v2  ;;  %v17774_v30 = vadd.f32 %v14463_v18, %v17572_v14  ;;  %14742 = vmatprep.mubr.msk.f32.mxu0 %vm414_vm1, %v12205_v53  ;;  %v12209_v18 = vld [vmem:[%s16093_s14 + $0x192] sm:$0xff] }
 0x181   : > { %v17771_v21 = vadd.f32 %v14425_v13, %v17503_v44  ;;  %14771 = vmatprep.mubr.msk.f32.mxu1 %vm414_vm1, %v17757_v7  ;;  %v2516_v31 = vpop.f32.mrf.mxu0 }
 0x182   : > { %v2116_v46 = vpop.f32.mrf.mxu1  ;;  %v17791_v14 = vadd.f32 %v2516_v31, %v17585_v47  ;;  %v17807_v47 = vld [vmem:[%s17686_s20 + $0x48] sm:$0xff] }
 0x183   : > { %v17788_v44 = vadd.f32 %v2116_v46, %v17516_v16  ;;  %v14466_v1 = vpop.f32.mrf.mxu0  ;;  %14743 = vmatmul.mubr.msk.f32.gmra.mxu0 %vm414_vm1, %v12206_v51  ;;  %v12208_v16 = vld [vmem:[%s16093_s14 + $0x18a] sm:$0xff] }
 0x184   : > { %v14428_v15 = vpop.f32.mrf.mxu1  ;;  %14772 = vmatmul.mubr.msk.f32.gmra.mxu1 %vm414_vm1, %v17781_v63  ;;  %v17800_v23 = vadd.f32 %v14466_v1, %v17594_v22  ;;  %14745 = vmatprep.mubr.msk.f32.mxu0 %vm414_vm1, %v12207_v57  ;;  %v17811_v51 = vld [vmem:[%s17686_s20 + $0x50] sm:$0xff] }
 0x185   : > { %v17797_v36 = vadd.f32 %v14428_v15, %v17525_v17  ;;  %14774 = vmatprep.mubr.msk.f32.mxu1 %vm414_vm1, %v17785_v26  ;;  %v2526_v13 = vpop.f32.mrf.mxu0  ;;  %22117 = vst [vmem:[#allocation3_spill] sm:$0xff] %v17811_v51 }
 0x186   : > { %v2126_v53 = vpop.f32.mrf.mxu1  ;;  %v17817_v22 = vadd.f32 %v2526_v13, %v17605_v56  ;;  %v17833_v56 = vld [vmem:[%s17686_s20 + $0x60] sm:$0xff]  ;;  %v17837_v13 = vld [vmem:[%s17686_s20 + $0x68] sm:$0xff] }
 0x187   : > { %v17814_v17 = vadd.f32 %v2126_v53, %v17538_v49  ;;  %v14469_v31 = vpop.f32.mrf.mxu0  ;;  %14746 = vmatmul.mubr.msk.f32.gmra.mxu0 %vm414_vm1, %v12208_v16  ;;  %v12210_v49 = vld [vmem:[%s16093_s14 + $0x1a2] sm:$0xff]  ;;  %v12211_v53 = vld [vmem:[%s16093_s14 + $0x1aa] sm:$0xff]  ;;  %22118 = vst [vmem:[#allocation26_spill] sm:$0xff] %v17837_v13 }
 0x188   : > { %v14431_v46 = vpop.f32.mrf.mxu1  ;;  %14775 = vmatmul.mubr.msk.f32.gmra.mxu1 %vm414_vm1, %v17807_v47  ;;  %v17826_v15 = vadd.f32 %v14469_v31, %v17610_v25  ;;  %14748 = vmatprep.mubr.msk.f32.mxu0 %vm414_vm1, %v12209_v18 }
 0x189   : > { %v17823_v57 = vadd.f32 %v14431_v46, %v17547_v3  ;;  %14777 = vmatprep.mubr.msk.f32.mxu1 %vm414_vm1, %v17811_v51  ;;  %v2536_v16 = vpop.f32.mrf.mxu0 }
 0x18a   : > { %v2136_v1 = vpop.f32.mrf.mxu1  ;;  %v17843_v25 = vadd.f32 %v2536_v16, %v17622_v58  ;;  %v17859_v58 = vld [vmem:[%s17686_s20 + $0x70] sm:$0xff]  ;;  %v17862_v16 = vld [vmem:[%s17686_s20 + $0x80] sm:$0xff] }
 0x18b   : > { %v17840_v3 = vadd.f32 %v2136_v1, %v17560_v62  ;;  %v14472_v46 = vpop.f32.mrf.mxu0  ;;  %14749 = vmatmul.mubr.msk.f32.gmra.mxu0 %vm414_vm1, %v12210_v49  ;;  %v12212_v62 = vld [vmem:[%s16093_s14 + $0x1b2] sm:$0xff] }
 0x18c   : > { %v14434_v18 = vpop.f32.mrf.mxu1  ;;  %14778 = vmatmul.mubr.msk.f32.gmra.mxu1 %vm414_vm1, %v17833_v56  ;;  %v17852_v51 = vadd.f32 %v14472_v46, %v17630_v48  ;;  %14751 = vmatprep.mubr.msk.f32.mxu0 %vm414_vm1, %v12211_v53 }
 0x18d   : > { %v17849_v31 = vadd.f32 %v14434_v18, %v17569_v39  ;;  %14780 = vmatprep.mubr.msk.f32.mxu1 %vm414_vm1, %v17837_v13  ;;  %v2546_v49 = vpop.f32.mrf.mxu0 }
 0x18e   : > { %v2146_v1 = vpop.f32.mrf.mxu1  ;;  %v17868_v48 = vadd.f32 %v2546_v49, %v17641_v20 }
 0x18f   : > { %v17865_v39 = vadd.f32 %v2146_v1, %v17582_v41  ;;  %v14475_v53 = vpop.f32.mrf.mxu0  ;;  %14752 = vmatmul.mubr.msk.f32.gmra.mxu0 %vm414_vm1, %v12212_v62  ;;  %v17884_v41 = vld [vmem:[%s17686_s20 + $0x88] sm:$0xff]  ;;  %v17887_v1 = vld [vmem:[%s17686_s20 + $0x90] sm:$0xff] }
 0x190   : > { %v14437_v18 = vpop.f32.mrf.mxu1  ;;  %14781 = vmatmul.mubr.msk.f32.gmra.mxu1 %vm414_vm1, %v17859_v58  ;;  %v17877_v13 = vadd.f32 %v14475_v53, %v17649_v38  ;;  %14754 = vmatprep.mubr.msk.f32.mxu0 %vm414_vm1, %v17231_v40  ;;  %22119 = vst [vmem:[#allocation4_spill] sm:$0xff] %v17884_v41  ;;  %22120 = vst [vmem:[#allocation27_spill] sm:$0xff] %v17887_v1 }
 0x191   : > { %v17874_v46 = vadd.f32 %v14437_v18, %v17591_v32  ;;  %14783 = vmatprep.mubr.msk.f32.mxu1 %vm414_vm1, %v17862_v16  ;;  %v2556_v62 = vpop.f32.mrf.mxu0 }
 0x192   : > { %v2156_v20 = vpop.f32.mrf.mxu1  ;;  %v17893_v38 = vadd.f32 %v2556_v62, %v17660_v43  ;;  %v17911_v43 = vld [vmem:[%s17686_s20 + $0xa0] sm:$0xff]  ;;  %v12217_v62 = vld [vmem:[%s16093_s14 + $0x1ea] sm:$0xff] }
 0x193   : > { %v17890_v32 = vadd.f32 %v2156_v20, %v17602_v11  ;;  %v14478_v40 = vpop.f32.mrf.mxu0  ;;  %14755 = vmatmul.mubr.msk.f32.gmra.mxu0 %vm414_vm1, %v17234_v6  ;;  %v12216_v11 = vld [vmem:[%s16093_s14 + $0x1e2] sm:$0xff]  ;;  %22121 = vst [vmem:[#allocation5_spill] sm:$0xff] %v17911_v43 }
 0x194   : > { %v14507_v49 = vpop.f32.mrf.mxu1  ;;  %14784 = vmatmul.mubr.msk.f32.gmra.mxu1 %vm414_vm1, %v17884_v41  ;;  %v17900_v18 = vadd.f32 %v14478_v40, %v17669_v52  ;;  %14757 = vmatprep.mubr.msk.f32.mxu0 %vm414_vm1, %v17257_v45  ;;  %v17915_v52 = vld [vmem:[%s17686_s20 + $0xa8] sm:$0xff] }
 0x195   : > { %v17903_v53 = vadd.f32 %v14507_v49, %v17613_v55  ;;  %14786 = vmatprep.mubr.msk.f32.mxu1 %vm414_vm1, %v17887_v1  ;;  %v2566_v6 = vpop.f32.mrf.mxu0  ;;  %22122 = vst [vmem:[#allocation28_spill] sm:$0xff] %v17915_v52 }
 0x196   : > { %v2936_v20 = vpop.f32.mrf.mxu1  ;;  %v17918_v55 = vadd.f32 %v2566_v6, %v17689_v10  ;;  %v17937_v10 = vld [vmem:[%s17686_s20 + $0xb0] sm:$0xff] }
 0x197   : > { %v17921_v45 = vadd.f32 %v2936_v20, %v17625_v60  ;;  %v14481_v40 = vpop.f32.mrf.mxu0  ;;  %14758 = vmatmul.mubr.msk.f32.gmra.mxu0 %vm414_vm1, %v12216_v11  ;;  %v12218_v60 = vld [vmem:[%s16093_s14 + $0x1f2] sm:$0xff]  ;;  %22123 = vst [vmem:[#allocation6_spill] sm:$0xff] %v17937_v10  ;;  %v17940_v20 = vld [vmem:[%s17686_s20 + $0xc0] sm:$0xff] }
 0x198   : > { %v14510_v49 = vpop.f32.mrf.mxu1  ;;  %14787 = vmatmul.mubr.msk.f32.gmra.mxu1 %vm414_vm1, %v17911_v43  ;;  %v17927_v1 = vadd.f32 %v14481_v40, %v17697_v8  ;;  %14760 = vmatprep.mubr.msk.f32.mxu0 %vm414_vm1, %v12217_v62  ;;  %22124 = vst [vmem:[#allocation29_spill] sm:$0xff] %v17940_v20  ;;  %v5150_v8 = vld [vmem:[%s17686_s20 + $0x1] sm:$0xff] }
 0x199   : > { %v17930_v41 = vadd.f32 %v14510_v49, %v17633_v35  ;;  %14789 = vmatprep.mubr.msk.f32.mxu1 %vm414_vm1, %v17915_v52  ;;  %v2576_v11 = vpop.f32.mrf.mxu0 }
 0x19a   : > { %v2946_v6 = vpop.f32.mrf.mxu1  ;;  %v17944_v35 = vadd.f32 %v2576_v11, %v17709_v29  ;;  %v5151_v29 = vld [vmem:[%s17686_s20 + $0x9] sm:$0xff] }
 0x19b   : > { %v17947_v62 = vadd.f32 %v2946_v6, %v17644_v59  ;;  %v14484_v40 = vpop.f32.mrf.mxu0  ;;  %14761 = vmatmul.mubr.msk.f32.gmra.mxu0 %vm414_vm1, %v12218_v60  ;;  %v17962_v59 = vld [vmem:[%s17686_s20 + $0xc8] sm:$0xff]  ;;  %v17966_v6 = vld [vmem:[%s17686_s20 + $0xd0] sm:$0xff] }
 0x19c   : > { %v14513_v49 = vpop.f32.mrf.mxu1  ;;  %14790 = vmatmul.mubr.msk.f32.gmra.mxu1 %vm414_vm1, %v17937_v10  ;;  %v17953_v52 = vadd.f32 %v14484_v40, %v17717_v28  ;;  %14830 = vmatprep.mubr.msk.f32.mxu0 %vm414_vm1, %v5150_v8  ;;  %22125 = vst [vmem:[#allocation7_spill] sm:$0xff] %v17962_v59  ;;  %22126 = vst [vmem:[#allocation30_spill] sm:$0xff] %v17966_v6  ;;  %v5152_v10 = vld [vmem:[%s17686_s20 + $0x11] sm:$0xff] }
 0x19d   : > { %v17956_v43 = vadd.f32 %v14513_v49, %v17652_v50  ;;  %14792 = vmatprep.mubr.msk.f32.mxu1 %vm414_vm1, %v17940_v20  ;;  %v2586_v60 = vpop.f32.mrf.mxu0 }
 0x19e   : > { %v2956_v11 = vpop.f32.mrf.mxu1  ;;  %v17970_v28 = vadd.f32 %v2586_v60, %v17728_v54  ;;  %v5153_v54 = vld [vmem:[%s17686_s20 + $0x21] sm:$0xff]  ;;  %v17994_v60 = vld [vmem:[%s21827_s3 + $0x14] sm:$0xf] }
 0x19f   : > { %v17973_v50 = vadd.f32 %v2956_v11, %v17663_v19  ;;  %v14487_v40 = vpop.f32.mrf.mxu0  ;;  %14831 = vmatmul.mubr.msk.f32.vlgmr.msra.gmra.mxu0 %vm414_vm1, %v5151_v29  ;;  %v17988_v19 = vld [vmem:[%s17686_s20 + $0xe0] sm:$0xff]  ;;  %v17997_v11 = vld [vmem:[%s17686_s20 + $0xe8] sm:$0xff] }
 0x1a0   : > { %v14516_v8 = vpop.f32.mrf.mxu1  ;;  %14793 = vmatmul.mubr.msk.f32.gmra.mxu1 %vm414_vm1, %v17962_v59  ;;  %v17979_v49 = vadd.f32 %v14487_v40, %v17742_v5  ;;  %14833 = vmatprep.mubr.msk.f32.mxu0 %vm414_vm1, %v5152_v10  ;;  %22127 = vst [vmem:[#allocation8_spill] sm:$0xff] %v17988_v19  ;;  %22128 = vst [vmem:[#allocation31_spill] sm:$0xff] %v17997_v11  ;;  %v18027_v59 = vld [vmem:[%s17686_s20 + $0x100] sm:$0xff] }
 0x1a1   : > { %v17982_v20 = vadd.f32 %v14516_v8, %v17672_v0  ;;  %14795 = vmatprep.mubr.msk.f32.mxu1 %vm414_vm1, %v17966_v6  ;;  %v2596_v29 = vpop.f32.mrf.mxu0  ;;  %v5154_v0 = vld [vmem:[%s17686_s20 + $0x29] sm:$0xff]  ;;  %14959 = vmatpush3.msk.msra.mxu0 %vm541_vm0, %v17484_v37  ;;  %22130 = vst [vmem:[#allocation32_spill] sm:$0xff] %v18027_v59 }
 0x1a2   : > { %v2966_v5 = vpop.f32.mrf.mxu1  ;;  %v18003_v10 = vadd.f32 %v2596_v29, %v17762_v42  ;;  %15088 = vmatprep.subr.msk.mxu0 %vm541_vm0, %v17994_v60  ;;  %v5155_v29 = vld [vmem:[%s17686_s20 + $0x31] sm:$0xff] }
 0x1a3   : > { %v18006_v40 = vadd.f32 %v2966_v5, %v17692_v27  ;;  %v14490_v8 = vpop.f32.mrf.mxu0  ;;  %14834 = vmatmul.mubr.msk.f32.gmra.mxu0 %vm414_vm1, %v5153_v54  ;;  %v18023_v27 = vld [vmem:[%s17686_s20 + $0xf0] sm:$0xff] }
 0x1a4   : > { %v14519_v6 = vpop.f32.mrf.mxu1  ;;  %14796 = vmatmul.mubr.msk.f32.gmra.mxu1 %vm414_vm1, %v17988_v19  ;;  %v18014_v37 = vadd.f32 %v14490_v8, %v17771_v21  ;;  %14836 = vmatprep.mubr.msk.f32.mxu0 %vm414_vm1, %v5154_v0  ;;  %22129 = vst [vmem:[#allocation9_spill] sm:$0xff] %v18023_v27  ;;  %v5156_v21 = vld [vmem:[%s17686_s20 + $0x41] sm:$0xff] }
 0x1a5   : > { %v18017_v42 = vadd.f32 %v14519_v6, %v17700_v9  ;;  %14798 = vmatprep.mubr.msk.f32.mxu1 %vm414_vm1, %v17997_v11  ;;  %v2606_v5 = vpop.f32.mrf.mxu0 }
 0x1a6   : > { %v2976_v19 = vpop.f32.mrf.mxu1  ;;  %v18031_v9 = vadd.f32 %v2606_v5, %v17788_v44  ;;  %v5157_v44 = vld [vmem:[%s17686_s20 + $0x49] sm:$0xff] }
 0x1a7   : > { %v18034_v6 = vadd.f32 %v2976_v19, %v17712_v4  ;;  %v14493_v54 = vpop.f32.mrf.mxu0  ;;  %14837 = vmatmul.mubr.msk.f32.gmra.mxu0 %vm414_vm1, %v5155_v29  ;;  %v18049_v4 = vld [vmem:[%s17686_s20 + $0x108] sm:$0xff] }
 0x1a8   : > { %v14522_v0 = vpop.f32.mrf.mxu1  ;;  %14799 = vmatmul.mubr.msk.f32.gmra.mxu1 %vm414_vm1, %v18023_v27  ;;  %v18040_v8 = vadd.f32 %v14493_v54, %v17797_v36  ;;  %14839 = vmatprep.mubr.msk.f32.mxu0 %vm414_vm1, %v5156_v21  ;;  %22131 = vst [vmem:[#allocation10_spill] sm:$0xff] %v18049_v4  ;;  %v18053_v27 = vld [vmem:[%s17686_s20 + $0x110] sm:$0xff] }
 0x1a9   : > { %v18043_v11 = vadd.f32 %v14522_v0, %v17720_v24  ;;  %14801 = vmatprep.mubr.msk.f32.mxu1 %vm414_vm1, %v18027_v59  ;;  %v2616_v19 = vpop.f32.mrf.mxu0  ;;  %22132 = vst [vmem:[#allocation33_spill] sm:$0xff] %v18053_v27  ;;  %v5158_v36 = vld [vmem:[%s17686_s20 + $0x51] sm:$0xff] }
 0x1aa   : > { %v2986_v5 = vpop.f32.mrf.mxu1  ;;  %v18057_v24 = vadd.f32 %v2616_v19, %v17814_v17  ;;  %v5159_v17 = vld [vmem:[%s17686_s20 + $0x61] sm:$0xff] }
 0x1ab   : > { %v18060_v29 = vadd.f32 %v2986_v5, %v17731_v12  ;;  %v14496_v54 = vpop.f32.mrf.mxu0  ;;  %14840 = vmatmul.mubr.msk.f32.gmra.mxu0 %vm414_vm1, %v5157_v44  ;;  %v18075_v12 = vld [vmem:[%s17686_s20 + $0x120] sm:$0xff] }
 0x1ac   : > { %v14525_v21 = vpop.f32.mrf.mxu1  ;;  %14802 = vmatmul.mubr.msk.f32.gmra.mxu1 %vm414_vm1, %v18049_v4  ;;  %v18066_v0 = vadd.f32 %v14496_v54, %v17823_v57  ;;  %14842 = vmatprep.mubr.msk.f32.mxu0 %vm414_vm1, %v5158_v36  ;;  %22133 = vst [vmem:[#allocation11_spill] sm:$0xff] %v18075_v12  ;;  %v18079_v4 = vld [vmem:[%s17686_s20 + $0x128] sm:$0xff] }
 0x1ad   : > { %v18069_v59 = vadd.f32 %v14525_v21, %v17745_v34  ;;  %14804 = vmatprep.mubr.msk.f32.mxu1 %vm414_vm1, %v18053_v27  ;;  %v2626_v19 = vpop.f32.mrf.mxu0  ;;  %22134 = vst [vmem:[#allocation34_spill] sm:$0xff] %v18079_v4  ;;  %v5160_v57 = vld [vmem:[%s17686_s20 + $0x69] sm:$0xff] }
 0x1ae   : > { %v2996_v5 = vpop.f32.mrf.mxu1  ;;  %v18083_v34 = vadd.f32 %v2626_v19, %v17840_v3  ;;  %v5161_v3 = vld [vmem:[%s17686_s20 + $0x71] sm:$0xff] }
 0x1af   : > { %v18086_v44 = vadd.f32 %v2996_v5, %v17765_v61  ;;  %v14499_v54 = vpop.f32.mrf.mxu0  ;;  %14843 = vmatmul.mubr.msk.f32.gmra.mxu0 %vm414_vm1, %v5159_v17  ;;  %v18101_v61 = vld [vmem:[%s17686_s20 + $0x130] sm:$0xff] }
 0x1b0   : > { %v14528_v36 = vpop.f32.mrf.mxu1  ;;  %14805 = vmatmul.mubr.msk.f32.gmra.mxu1 %vm414_vm1, %v18075_v12  ;;  %v18092_v21 = vadd.f32 %v14499_v54, %v17849_v31  ;;  %14845 = vmatprep.mubr.msk.f32.mxu0 %vm414_vm1, %v5160_v57  ;;  %22135 = vst [vmem:[#allocation12_spill] sm:$0xff] %v18101_v61  ;;  %v18105_v12 = vld [vmem:[%s17686_s20 + $0x140] sm:$0xff] }
 0x1b1   : > { %v18095_v27 = vadd.f32 %v14528_v36, %v17774_v30  ;;  %14807 = vmatprep.mubr.msk.f32.mxu1 %vm414_vm1, %v18079_v4  ;;  %v2636_v19 = vpop.f32.mrf.mxu0  ;;  %22136 = vst [vmem:[#allocation35_spill] sm:$0xff] %v18105_v12  ;;  %v5162_v31 = vld [vmem:[%s17686_s20 + $0x81] sm:$0xff] }
 0x1b2   : > { %v3006_v5 = vpop.f32.mrf.mxu1  ;;  %v18109_v30 = vadd.f32 %v2636_v19, %v17865_v39  ;;  %v5163_v39 = vld [vmem:[%s17686_s20 + $0x89] sm:$0xff] }
 0x1b3   : > { %v18112_v17 = vadd.f32 %v3006_v5, %v17791_v14  ;;  %v14502_v54 = vpop.f32.mrf.mxu0  ;;  %14846 = vmatmul.mubr.msk.f32.gmra.mxu0 %vm414_vm1, %v5161_v3  ;;  %v18127_v14 = vld [vmem:[%s17686_s20 + $0x148] sm:$0xff] }
 0x1b4   : > { %v14531_v57 = vpop.f32.mrf.mxu1  ;;  %14808 = vmatmul.mubr.msk.f32.gmra.mxu1 %vm414_vm1, %v18101_v61  ;;  %v18118_v36 = vadd.f32 %v14502_v54, %v17874_v46  ;;  %14848 = vmatprep.mubr.msk.f32.mxu0 %vm414_vm1, %v5162_v31  ;;  %22137 = vst [vmem:[#allocation13_spill] sm:$0xff] %v18127_v14  ;;  %v18131_v61 = vld [vmem:[%s17686_s20 + $0x150] sm:$0xff] }
 0x1b5   : > { %v18121_v4 = vadd.f32 %v14531_v57, %v17800_v23  ;;  %14810 = vmatprep.mubr.msk.f32.mxu1 %vm414_vm1, %v18105_v12  ;;  %v2646_v19 = vpop.f32.mrf.mxu0  ;;  %22138 = vst [vmem:[#allocation36_spill] sm:$0xff] %v18131_v61  ;;  %v5164_v46 = vld [vmem:[%s17686_s20 + $0x91] sm:$0xff] }
 0x1b6   : > { %v3016_v5 = vpop.f32.mrf.mxu1  ;;  %v18135_v23 = vadd.f32 %v2646_v19, %v17890_v32  ;;  %v5165_v32 = vld [vmem:[%s17686_s20 + $0xa1] sm:$0xff] }
 0x1b7   : > { %v18138_v3 = vadd.f32 %v3016_v5, %v17817_v22  ;;  %v14572_v31 = vpop.f32.mrf.mxu0  ;;  %14849 = vmatmul.mubr.msk.f32.gmra.mxu0 %vm414_vm1, %v5163_v39  ;;  %v18153_v22 = vld [vmem:[%s17686_s20 + $0x160] sm:$0xff] }
 0x1b8   : > { %v14534_v54 = vpop.f32.mrf.mxu1  ;;  %14811 = vmatmul.mubr.msk.f32.gmra.mxu1 %vm414_vm1, %v18127_v14  ;;  %v18147_v12 = vadd.f32 %v14572_v31, %v17903_v53  ;;  %14851 = vmatprep.mubr.msk.f32.mxu0 %vm414_vm1, %v5164_v46  ;;  %22139 = vst [vmem:[#allocation14_spill] sm:$0xff] %v18153_v22  ;;  %v18157_v14 = vld [vmem:[%s17686_s20 + $0x168] sm:$0xff] }
 0x1b9   : > { %v18144_v57 = vadd.f32 %v14534_v54, %v17826_v15  ;;  %14813 = vmatprep.mubr.msk.f32.mxu1 %vm414_vm1, %v18131_v61  ;;  %v3429_v5 = vpop.f32.mrf.mxu0  ;;  %22140 = vst [vmem:[#allocation37_spill] sm:$0xff] %v18157_v14  ;;  %v5166_v15 = vld [vmem:[%s17686_s20 + $0xa9] sm:$0xff] }
 0x1ba   : > { %v3026_v19 = vpop.f32.mrf.mxu1  ;;  %v18164_v39 = vadd.f32 %v3429_v5, %v17921_v45  ;;  %v5167_v45 = vld [vmem:[%s17686_s20 + $0xb1] sm:$0xff] }
 0x1bb   : > { %v18161_v53 = vadd.f32 %v3026_v19, %v17843_v25  ;;  %v14575_v46 = vpop.f32.mrf.mxu0  ;;  %14852 = vmatmul.mubr.msk.f32.gmra.mxu0 %vm414_vm1, %v5165_v32  ;;  %v18179_v25 = vld [vmem:[%s17686_s20 + $0x170] sm:$0xff] }
 0x1bc   : > { %v14537_v54 = vpop.f32.mrf.mxu1  ;;  %14814 = vmatmul.mubr.msk.f32.gmra.mxu1 %vm414_vm1, %v18153_v22  ;;  %v18173_v61 = vadd.f32 %v14575_v46, %v17930_v41  ;;  %14854 = vmatprep.mubr.msk.f32.mxu0 %vm414_vm1, %v5166_v15  ;;  %22141 = vst [vmem:[#allocation38_spill] sm:$0xff] %v18179_v25  ;;  %v18183_v22 = vld [vmem:[%s17686_s20 + $0x180] sm:$0xff] }
 0x1bd   : > { %v18170_v31 = vadd.f32 %v14537_v54, %v17852_v51  ;;  %14816 = vmatprep.mubr.msk.f32.mxu1 %vm414_vm1, %v18157_v14  ;;  %v3439_v5 = vpop.f32.mrf.mxu0  ;;  %22142 = vst [vmem:[#allocation39_spill] sm:$0xff] %v18183_v22  ;;  %v5168_v51 = vld [vmem:[%s17686_s20 + $0xc1] sm:$0xff] }
 0x1be   : > { %v3036_v19 = vpop.f32.mrf.mxu1  ;;  %v18190_v32 = vadd.f32 %v3439_v5, %v17947_v62  ;;  %v5169_v62 = vld [vmem:[%s17686_s20 + $0xc9] sm:$0xff] }
 0x1bf   : > { %v18187_v41 = vadd.f32 %v3036_v19, %v17868_v48  ;;  %v14578_v15 = vpop.f32.mrf.mxu0  ;;  %14855 = vmatmul.mubr.msk.f32.gmra.mxu0 %vm414_vm1, %v5167_v45  ;;  %v18205_v48 = vld [vmem:[%s17686_s20 + $0x188] sm:$0xff] }
 0x1c0   : > { %v14540_v54 = vpop.f32.mrf.mxu1  ;;  %14817 = vmatmul.mubr.msk.f32.gmra.mxu1 %vm414_vm1, %v18179_v25  ;;  %v18199_v14 = vadd.f32 %v14578_v15, %v17956_v43  ;;  %14857 = vmatprep.mubr.msk.f32.mxu0 %vm414_vm1, %v5168_v51  ;;  %22143 = vst [vmem:[#allocation40_spill] sm:$0xff] %v18205_v48  ;;  %v18209_v25 = vld [vmem:[%s17686_s20 + $0x190] sm:$0xff] }
 0x1c1   : > { %v18196_v46 = vadd.f32 %v14540_v54, %v17877_v13  ;;  %14819 = vmatprep.mubr.msk.f32.mxu1 %vm414_vm1, %v18183_v22  ;;  %v3449_v5 = vpop.f32.mrf.mxu0  ;;  %22144 = vst [vmem:[#allocation41_spill] sm:$0xff] %v18209_v25  ;;  %v5170_v13 = vld [vmem:[%s17686_s20 + $0xd1] sm:$0xff] }
 0x1c2   : > { %v3046_v19 = vpop.f32.mrf.mxu1  ;;  %v18216_v45 = vadd.f32 %v3449_v5, %v17973_v50  ;;  %v5171_v50 = vld [vmem:[%s17686_s20 + $0xe1] sm:$0xff] }
 0x1c3   : > { %v18213_v43 = vadd.f32 %v3046_v19, %v17893_v38  ;;  %v14581_v51 = vpop.f32.mrf.mxu0  ;;  %14858 = vmatmul.mubr.msk.f32.gmra.mxu0 %vm414_vm1, %v5169_v62  ;;  %v18231_v38 = vld [vmem:[%s17686_s20 + $0x1a0] sm:$0xff] }
 0x1c4   : > { %v14543_v54 = vpop.f32.mrf.mxu1  ;;  %14820 = vmatmul.mubr.msk.f32.gmra.mxu1 %vm414_vm1, %v18205_v48  ;;  %v18225_v22 = vadd.f32 %v14581_v51, %v17982_v20  ;;  %14860 = vmatprep.mubr.msk.f32.mxu0 %vm414_vm1, %v5170_v13  ;;  %22145 = vst [vmem:[#allocation43_spill] sm:$0xff] %v18231_v38  ;;  %v18235_v48 = vld [vmem:[%s17686_s20 + $0x1a8] sm:$0xff] }
 0x1c5   : > { %v18222_v15 = vadd.f32 %v14543_v54, %v17900_v18  ;;  %14822 = vmatprep.mubr.msk.f32.mxu1 %vm414_vm1, %v18209_v25  ;;  %v3459_v5 = vpop.f32.mrf.mxu0  ;;  %22146 = vst [vmem:[#allocation44_spill] sm:$0xff] %v18235_v48  ;;  %v5172_v18 = vld [vmem:[%s17686_s20 + $0xe9] sm:$0xff] }
 0x1c6   : > { %v3056_v19 = vpop.f32.mrf.mxu1  ;;  %v18242_v62 = vadd.f32 %v3459_v5, %v18006_v40  ;;  %v5173_v40 = vld [vmem:[%s17686_s20 + $0xf1] sm:$0xff] }
 0x1c7   : > { %v18239_v20 = vadd.f32 %v3056_v19, %v17918_v55  ;;  %v14584_v13 = vpop.f32.mrf.mxu0  ;;  %14861 = vmatmul.mubr.msk.f32.gmra.mxu0 %vm414_vm1, %v5171_v50  ;;  %v18257_v55 = vld [vmem:[%s17686_s20 + $0x1b0] sm:$0xff]  ;;  %v5640_v50 = vld [vmem:[%s17686_s20 + $0x2] sm:$0xff] }
 0x1c8   : > { %v14546_v54 = vpop.f32.mrf.mxu1  ;;  %14823 = vmatmul.mubr.msk.f32.gmra.mxu1 %vm414_vm1, %v18231_v38  ;;  %v18251_v25 = vadd.f32 %v14584_v13, %v18017_v42  ;;  %14863 = vmatprep.mubr.msk.f32.mxu0 %vm414_vm1, %v5172_v18  ;;  %22147 = vst [vmem:[#allocation45_spill] sm:$0xff] %v18257_v55  ;;  %v5174_v38 = vld [vmem:[%s17686_s20 + $0x101] sm:$0xff] }
 0x1c9   : > { %v18248_v51 = vadd.f32 %v14546_v54, %v17927_v1  ;;  %14825 = vmatprep.mubr.msk.f32.mxu1 %vm414_vm1, %v18235_v48  ;;  %v3469_v5 = vpop.f32.mrf.mxu0 }
 0x1ca   : > { %v3066_v19 = vpop.f32.mrf.mxu1  ;;  %v18266_v42 = vadd.f32 %v3469_v5, %v18034_v6  ;;  %v5641_v6 = vld [vmem:[%s17686_s20 + $0xa] sm:$0xff] }
 0x1cb   : > { %v18263_v1 = vadd.f32 %v3066_v19, %v17944_v35  ;;  %v14587_v13 = vpop.f32.mrf.mxu0  ;;  %14864 = vmatmul.mubr.msk.f32.gmra.mxu0 %vm414_vm1, %v5173_v40  ;;  %v18280_v35 = vld [vmem:[%s17686_s20 + $0x109] sm:$0xff] }
 0x1cc   : > { %v14549_v54 = vpop.f32.mrf.mxu1  ;;  %14826 = vmatmul.mubr.msk.f32.gmra.mxu1 %vm414_vm1, %v18257_v55  ;;  %v18275_v48 = vadd.f32 %v14587_v13, %v18043_v11  ;;  %14866 = vmatprep.mubr.msk.f32.mxu0 %vm414_vm1, %v5174_v38  ;;  %22148 = vst [vmem:[#allocation46_spill] sm:$0xff] %v18280_v35  ;;  %v18284_v55 = vld [vmem:[%s17686_s20 + $0x111] sm:$0xff]  ;;  %v18312_v13 = vld [vmem:[%s17686_s20 + $0x121] sm:$0xff] }
 0x1cd   : > { %v18272_v18 = vadd.f32 %v14549_v54, %v17953_v52  ;;  %14895 = vmatprep.mubr.msk.f32.mxu1 %vm414_vm1, %v5640_v50  ;;  %v3479_v5 = vpop.f32.mrf.mxu0  ;;  %22149 = vst [vmem:[#allocation47_spill] sm:$0xff] %v18284_v55  ;;  %v5642_v11 = vld [vmem:[%s17686_s20 + $0x12] sm:$0xff]  ;;  %22150 = vst [vmem:[#allocation48_spill] sm:$0xff] %v18312_v13 }
 0x1ce   : > { %v3076_v19 = vpop.f32.mrf.mxu1  ;;  %v18290_v52 = vadd.f32 %v3479_v5, %v18060_v29  ;;  %v18296_v38 = vld [vmem:[%s21827_s3 + $0x18] sm:$0xf] }
 0x1cf   : > { %v18287_v40 = vadd.f32 %v3076_v19, %v17970_v28  ;;  %v14590_v54 = vpop.f32.mrf.mxu0  ;;  %14867 = vmatmul.mubr.msk.f32.gmra.mxu0 %vm414_vm1, %v18280_v35  ;;  %v18315_v19 = vld [vmem:[%s17686_s20 + $0x22] sm:$0xff] }
 0x1d0   : > { %v14552_v50 = vpop.f32.mrf.mxu1  ;;  %14896 = vmatmul.mubr.msk.f32.vlgmr.msra.gmra.mxu1 %vm414_vm1, %v5641_v6  ;;  %v18305_v29 = vadd.f32 %v14590_v54, %v18069_v59  ;;  %14869 = vmatprep.mubr.msk.f32.mxu0 %vm414_vm1, %v18284_v55  ;;  %22151 = vst [vmem:[#allocation49_spill] sm:$0xff] %v18315_v19  ;;  %v18322_v59 = vld [vmem:[%s17686_s20 + $0x2a] sm:$0xff] }
 0x1d1   : > { %v18302_v28 = vadd.f32 %v14552_v50, %v17979_v49  ;;  %15024 = vmatpush3.msk.msra.mxu1 %vm541_vm0, %v17737_v33  ;;  %v3489_v35 = vpop.f32.mrf.mxu0  ;;  %14898 = vmatprep.mubr.msk.f32.mxu1 %vm414_vm1, %v5642_v11  ;;  %v18319_v49 = vld [vmem:[%s17686_s20 + $0x129] sm:$0xff]  ;;  %22153 = vst [vmem:[#allocation51_spill] sm:$0xff] %v18322_v59 }
 0x1d2   : > { %v3086_v5 = vpop.f32.mrf.mxu1  ;;  %22152 = vst [vmem:[#allocation50_spill] sm:$0xff] %v18319_v49  ;;  %15153 = vmatprep.subr.msk.mxu1 %vm541_vm0, %v18296_v38  ;;  %v18330_v6 = vadd.f32 %v3489_v35, %v18086_v44  ;;  %v18350_v44 = vld [vmem:[%s17686_s20 + $0x32] sm:$0xff] }
 0x1d3   : > { %v18327_v33 = vadd.f32 %v3086_v5, %v18003_v10  ;;  %v14593_v54 = vpop.f32.mrf.mxu0  ;;  %14870 = vmatmul.mubr.msk.f32.gmra.mxu0 %vm414_vm1, %v18312_v13  ;;  %v18347_v10 = vld [vmem:[%s17686_s20 + $0x131] sm:$0xff]  ;;  %22155 = vst [vmem:[#allocation53_spill] sm:$0xff] %v18350_v44  ;;  %v18353_v13 = vld [vmem:[%s17686_s20 + $0x141] sm:$0xff] }
 0x1d4   : > { %v14555_v50 = vpop.f32.mrf.mxu1  ;;  %14899 = vmatmul.mubr.msk.f32.gmra.mxu1 %vm414_vm1, %v18315_v19  ;;  %v18340_v55 = vadd.f32 %v14593_v54, %v18095_v27  ;;  %14872 = vmatprep.mubr.msk.f32.mxu0 %vm414_vm1, %v18319_v49  ;;  %22154 = vst [vmem:[#allocation52_spill] sm:$0xff] %v18347_v10  ;;  %22156 = vst [vmem:[#allocation54_spill] sm:$0xff] %v18353_v13 }
 0x1d5   : > { %v18337_v11 = vadd.f32 %v14555_v50, %v18014_v37  ;;  %14901 = vmatprep.mubr.msk.f32.mxu1 %vm414_vm1, %v18322_v59  ;;  %v3499_v5 = vpop.f32.mrf.mxu0  ;;  %v18356_v37 = vld [vmem:[%s17686_s20 + $0x42] sm:$0xff] }
 0x1d6   : > { %v3096_v35 = vpop.f32.mrf.mxu1  ;;  %22157 = vst [vmem:[#allocation55_spill] sm:$0xff] %v18356_v37  ;;  %v18362_v50 = vadd.f32 %v3499_v5, %v18112_v17  ;;  %v18382_v17 = vld [vmem:[%s17686_s20 + $0x4a] sm:$0xff] }
 0x1d7   : > { %v18359_v27 = vadd.f32 %v3096_v35, %v18031_v9  ;;  %v14596_v49 = vpop.f32.mrf.mxu0  ;;  %14873 = vmatmul.mubr.msk.f32.gmra.mxu0 %vm414_vm1, %v18347_v10  ;;  %v18379_v9 = vld [vmem:[%s17686_s20 + $0x149] sm:$0xff]  ;;  %22159 = vst [vmem:[#allocation15_spill] sm:$0xff] %v18382_v17  ;;  %v18385_v10 = vld [vmem:[%s17686_s20 + $0x151] sm:$0xff] }
 0x1d8   : > { %v14558_v54 = vpop.f32.mrf.mxu1  ;;  %14902 = vmatmul.mubr.msk.f32.gmra.mxu1 %vm414_vm1, %v18350_v44  ;;  %v18372_v19 = vadd.f32 %v14596_v49, %v18121_v4  ;;  %14875 = vmatprep.mubr.msk.f32.mxu0 %vm414_vm1, %v18353_v13  ;;  %22158 = vst [vmem:[#allocation42_spill] sm:$0xff] %v18379_v9  ;;  %22160 = vst [vmem:[#allocation16_spill] sm:$0xff] %v18385_v10 }
 0x1d9   : > { %v18369_v59 = vadd.f32 %v14558_v54, %v18040_v8  ;;  %14904 = vmatprep.mubr.msk.f32.mxu1 %vm414_vm1, %v18356_v37  ;;  %v3509_v5 = vpop.f32.mrf.mxu0  ;;  %v18388_v8 = vld [vmem:[%s17686_s20 + $0x52] sm:$0xff] }
 0x1da   : > { %v3106_v35 = vpop.f32.mrf.mxu1  ;;  %22161 = vst [vmem:[#allocation17_spill] sm:$0xff] %v18388_v8  ;;  %v18394_v49 = vadd.f32 %v3509_v5, %v18138_v3  ;;  %v18414_v3 = vld [vmem:[%s17686_s20 + $0x62] sm:$0xff] }
 0x1db   : > { %v18391_v4 = vadd.f32 %v3106_v35, %v18057_v24  ;;  %v14599_v13 = vpop.f32.mrf.mxu0  ;;  %14876 = vmatmul.mubr.msk.f32.gmra.mxu0 %vm414_vm1, %v18379_v9  ;;  %v18411_v24 = vld [vmem:[%s17686_s20 + $0x161] sm:$0xff]  ;;  %22163 = vst [vmem:[#allocation19_spill] sm:$0xff] %v18414_v3  ;;  %v18417_v9 = vld [vmem:[%s17686_s20 + $0x169] sm:$0xff] }
 0x1dc   : > { %v14561_v54 = vpop.f32.mrf.mxu1  ;;  %14905 = vmatmul.mubr.msk.f32.gmra.mxu1 %vm414_vm1, %v18382_v17  ;;  %v18404_v44 = vadd.f32 %v14599_v13, %v18144_v57  ;;  %14878 = vmatprep.mubr.msk.f32.mxu0 %vm414_vm1, %v18385_v10  ;;  %22162 = vst [vmem:[#allocation18_spill] sm:$0xff] %v18411_v24  ;;  %22164 = vst [vmem:[#allocation20_spill] sm:$0xff] %v18417_v9 }
 0x1dd   : > { %v18401_v37 = vadd.f32 %v14561_v54, %v18066_v0  ;;  %14907 = vmatprep.mubr.msk.f32.mxu1 %vm414_vm1, %v18388_v8  ;;  %v3519_v5 = vpop.f32.mrf.mxu0  ;;  %v18420_v0 = vld [vmem:[%s17686_s20 + $0x6a] sm:$0xff] }
 0x1de   : > { %v3116_v35 = vpop.f32.mrf.mxu1  ;;  %22165 = vst [vmem:[#allocation23_spill] sm:$0xff] %v18420_v0  ;;  %v18426_v13 = vadd.f32 %v3519_v5, %v18161_v53  ;;  %v18446_v53 = vld [vmem:[%s17686_s20 + $0x72] sm:$0xff] }
 0x1df   : > { %v18423_v57 = vadd.f32 %v3116_v35, %v18083_v34  ;;  %v14602_v10 = vpop.f32.mrf.mxu0  ;;  %14879 = vmatmul.mubr.msk.f32.gmra.mxu0 %vm414_vm1, %v18411_v24  ;;  %v18443_v34 = vld [vmem:[%s17686_s20 + $0x171] sm:$0xff]  ;;  %22167 = vst [vmem:[#allocation24_spill] sm:$0xff] %v18446_v53  ;;  %v18449_v24 = vld [vmem:[%s17686_s20 + $0x181] sm:$0xff] }
 0x1e0   : > { %v14564_v54 = vpop.f32.mrf.mxu1  ;;  %14908 = vmatmul.mubr.msk.f32.gmra.mxu1 %vm414_vm1, %v18414_v3  ;;  %v18436_v17 = vadd.f32 %v14602_v10, %v18170_v31  ;;  %14881 = vmatprep.mubr.msk.f32.mxu0 %vm414_vm1, %v18417_v9  ;;  %22166 = vst [vmem:[#allocation21_spill] sm:$0xff] %v18443_v34  ;;  %22168 = vst [vmem:[#allocation22_spill] sm:$0xff] %v18449_v24 }
 0x1e1   : > { %v18433_v8 = vadd.f32 %v14564_v54, %v18092_v21  ;;  %14910 = vmatprep.mubr.msk.f32.mxu1 %vm414_vm1, %v18420_v0  ;;  %v3529_v5 = vpop.f32.mrf.mxu0  ;;  %v18452_v21 = vld [vmem:[%s17686_s20 + $0x82] sm:$0xff] }
 0x1e2   : > { %v3126_v35 = vpop.f32.mrf.mxu1  ;;  %22169 = vst [vmem:[#allocation25_spill] sm:$0xff] %v18452_v21  ;;  %v18458_v10 = vadd.f32 %v3529_v5, %v18187_v41  ;;  %v18478_v41 = vld [vmem:[%s17686_s20 + $0x8a] sm:$0xff] }
 0x1e3   : > { %v18455_v31 = vadd.f32 %v3126_v35, %v18109_v30  ;;  %v14605_v9 = vpop.f32.mrf.mxu0  ;;  %14882 = vmatmul.mubr.msk.f32.gmra.mxu0 %vm414_vm1, %v18443_v34  ;;  %v18475_v30 = vld [vmem:[%s17686_s20 + $0x189] sm:$0xff]  ;;  %22171 = vst [vmem:[#allocation57_spill] sm:$0xff] %v18478_v41  ;;  %v18481_v34 = vld [vmem:[%s17686_s20 + $0x191] sm:$0xff] }
 0x1e4   : > { %v14567_v54 = vpop.f32.mrf.mxu1  ;;  %14911 = vmatmul.mubr.msk.f32.gmra.mxu1 %vm414_vm1, %v18446_v53  ;;  %v18468_v3 = vadd.f32 %v14605_v9, %v18196_v46  ;;  %14884 = vmatprep.mubr.msk.f32.mxu0 %vm414_vm1, %v18449_v24  ;;  %22170 = vst [vmem:[#allocation56_spill] sm:$0xff] %v18475_v30  ;;  %22172 = vst [vmem:[#allocation58_spill] sm:$0xff] %v18481_v34 }
 0x1e5   : > { %v18465_v0 = vadd.f32 %v14567_v54, %v18118_v36  ;;  %14913 = vmatprep.mubr.msk.f32.mxu1 %vm414_vm1, %v18452_v21  ;;  %v3539_v5 = vpop.f32.mrf.mxu0  ;;  %v18484_v36 = vld [vmem:[%s17686_s20 + $0x92] sm:$0xff] }
 0x1e6   : > { %v3136_v35 = vpop.f32.mrf.mxu1  ;;  %22173 = vst [vmem:[#allocation59_spill] sm:$0xff] %v18484_v36  ;;  %v18490_v9 = vadd.f32 %v3539_v5, %v18213_v43  ;;  %v18510_v43 = vld [vmem:[%s17686_s20 + $0xa2] sm:$0xff] }
 0x1e7   : > { %v18487_v46 = vadd.f32 %v3136_v35, %v18135_v23  ;;  %v14608_v54 = vpop.f32.mrf.mxu0  ;;  %14885 = vmatmul.mubr.msk.f32.gmra.mxu0 %vm414_vm1, %v18475_v30  ;;  %v18507_v23 = vld [vmem:[%s17686_s20 + $0x1a1] sm:$0xff]  ;;  %v18513_v30 = vld [vmem:[%s17686_s20 + $0x1a9] sm:$0xff] }
 0x1e8   : > { %v14637_v24 = vpop.f32.mrf.mxu1  ;;  %14914 = vmatmul.mubr.msk.f32.gmra.mxu1 %vm414_vm1, %v18478_v41  ;;  %v18497_v21 = vadd.f32 %v14608_v54, %v18222_v15  ;;  %14887 = vmatprep.mubr.msk.f32.mxu0 %vm414_vm1, %v18481_v34  ;;  %22174 = vst [vmem:[#allocation60_spill] sm:$0xff] %v18507_v23  ;;  %22175 = vst [vmem:[#allocation61_spill] sm:$0xff] %v18513_v30  ;;  %v18516_v15 = vld [vmem:[%s17686_s20 + $0xaa] sm:$0xff] }
 0x1e9   : > { %v18500_v53 = vadd.f32 %v14637_v24, %v18147_v12  ;;  %14916 = vmatprep.mubr.msk.f32.mxu1 %vm414_vm1, %v18484_v36  ;;  %v3549_v35 = vpop.f32.mrf.mxu0  ;;  %22176 = vst [vmem:[#allocation62_spill] sm:$0xff] %v18516_v15 }
 0x1ea   : > { %v3919_v5 = vpop.f32.mrf.mxu1  ;;  %v18519_v12 = vadd.f32 %v3549_v35, %v18239_v20  ;;  %v18542_v20 = vld [vmem:[%s17686_s20 + $0xb2] sm:$0xff] }
 0x1eb   : > { %v18522_v24 = vadd.f32 %v3919_v5, %v18164_v39  ;;  %v14611_v54 = vpop.f32.mrf.mxu0  ;;  %14888 = vmatmul.mubr.msk.f32.gmra.mxu0 %vm414_vm1, %v18507_v23  ;;  %v18539_v39 = vld [vmem:[%s17686_s20 + $0x1b1] sm:$0xff]  ;;  %v18545_v23 = vld [vmem:[%s17686_s20 + $0xc2] sm:$0xff] }
 0x1ec   : > { %v14640_v34 = vpop.f32.mrf.mxu1  ;;  %14917 = vmatmul.mubr.msk.f32.gmra.mxu1 %vm414_vm1, %v18510_v43  ;;  %v18529_v36 = vadd.f32 %v14611_v54, %v18248_v51  ;;  %14890 = vmatprep.mubr.msk.f32.mxu0 %vm414_vm1, %v18513_v30  ;;  %22177 = vst [vmem:[#allocation63_spill] sm:$0xff] %v18539_v39 }
 0x1ed   : > { %v18532_v41 = vadd.f32 %v14640_v34, %v18173_v61  ;;  %14919 = vmatprep.mubr.msk.f32.mxu1 %vm414_vm1, %v18516_v15  ;;  %v3559_v35 = vpop.f32.mrf.mxu0 }
 0x1ee   : > { %v3929_v5 = vpop.f32.mrf.mxu1  ;;  %v18548_v51 = vadd.f32 %v3559_v35, %v18263_v1 }
 0x1ef   : > { %v18551_v61 = vadd.f32 %v3929_v5, %v18190_v32  ;;  %v14614_v34 = vpop.f32.mrf.mxu0  ;;  %14891 = vmatmul.mubr.msk.f32.gmra.mxu0 %vm414_vm1, %v18539_v39  ;;  %v18568_v32 = vld [vmem:[%s17686_s20 + $0xca] sm:$0xff]  ;;  %v18571_v5 = vld [vmem:[%s17686_s20 + $0xd2] sm:$0xff] }
 0x1f0   : > { %v14643_v54 = vpop.f32.mrf.mxu1  ;;  %14920 = vmatmul.mubr.msk.f32.gmra.mxu1 %vm414_vm1, %v18542_v20  ;;  %v18558_v30 = vadd.f32 %v14614_v34, %v18272_v18  ;;  %14960 = vmatprep.mubr.msk.f32.mxu0 %vm414_vm1, %v17752_v2 }
 0x1f1   : > { %v18561_v15 = vadd.f32 %v14643_v54, %v18199_v14  ;;  %14922 = vmatprep.mubr.msk.f32.mxu1 %vm414_vm1, %v18545_v23  ;;  %v3569_v1 = vpop.f32.mrf.mxu0 }
 0x1f2   : > { %v3939_v35 = vpop.f32.mrf.mxu1  ;;  %v18574_v18 = vadd.f32 %v3569_v1, %v18287_v40  ;;  %v18599_v40 = vld [vmem:[%s21827_s3 + $0x1c] sm:$0xf]  ;;  %v18602_v1 = vld [vmem:[%s17686_s20 + $0xea] sm:$0xff] }
 0x1f3   : > { %v18577_v14 = vadd.f32 %v3939_v35, %v18216_v45  ;;  %v14617_v34 = vpop.f32.mrf.mxu0  ;;  %14961 = vmatmul.mubr.msk.f32.vlgmr.msra.gmra.mxu0 %vm414_vm1, %v17757_v7  ;;  %v18594_v45 = vld [vmem:[%s17686_s20 + $0xe2] sm:$0xff]  ;;  %22178 = vst [vmem:[#allocation64_spill] sm:$0xff] %v18602_v1 }
 0x1f4   : > { %v14646_v54 = vpop.f32.mrf.mxu1  ;;  %14923 = vmatmul.mubr.msk.f32.gmra.mxu1 %vm414_vm1, %v18568_v32  ;;  %v18584_v2 = vadd.f32 %v14617_v34, %v18302_v28  ;;  %14963 = vmatprep.mubr.msk.f32.mxu0 %vm414_vm1, %v17781_v63 }
 0x1f5   : > { %v18587_v39 = vadd.f32 %v14646_v54, %v18225_v22  ;;  %14925 = vmatprep.mubr.msk.f32.mxu1 %vm414_vm1, %v18571_v5  ;;  %v3579_v7 = vpop.f32.mrf.mxu0  ;;  %15089 = vmatpush3.msk.msra.mxu0 %vm541_vm0, %v17994_v60 }
 0x1f6   : > { %v3949_v28 = vpop.f32.mrf.mxu1  ;;  %v18607_v22 = vadd.f32 %v3579_v7, %v18327_v33  ;;  %15218 = vmatprep.subr.msk.mxu0 %vm541_vm0, %v18599_v40 }
 0x1f7   : > { %v18610_v63 = vadd.f32 %v3949_v28, %v18242_v62  ;;  %v14620_v35 = vpop.f32.mrf.mxu0  ;;  %14964 = vmatmul.mubr.msk.f32.gmra.mxu0 %vm414_vm1, %v17785_v26  ;;  %v18629_v62 = vld [vmem:[%s17686_s20 + $0xf2] sm:$0xff]  ;;  %v18632_v28 = vld [vmem:[%s17686_s20 + $0x102] sm:$0xff] }
 0x1f8   : > { %v14649_v34 = vpop.f32.mrf.mxu1  ;;  %14926 = vmatmul.mubr.msk.f32.gmra.mxu1 %vm414_vm1, %v18594_v45  ;;  %v18619_v54 = vadd.f32 %v14620_v35, %v18337_v11  ;;  %14966 = vmatprep.mubr.msk.f32.mxu0 %vm414_vm1, %v17807_v47  ;;  %22179 = vst [vmem:[#allocation65_spill] sm:$0xff] %v18632_v28 }
 0x1f9   : > { %v18622_v60 = vadd.f32 %v14649_v34, %v18251_v25  ;;  %14928 = vmatprep.mubr.msk.f32.mxu1 %vm414_vm1, %v18602_v1  ;;  %v3589_v33 = vpop.f32.mrf.mxu0  ;;  %v22180_v34 = vld [vmem:[#allocation3_spill] sm:$0xff] }
 0x1fa   : > { %v3959_v7 = vpop.f32.mrf.mxu1  ;;  %v18635_v26 = vadd.f32 %v3589_v33, %v18359_v27 }
 0x1fb   : > { %v18638_v25 = vadd.f32 %v3959_v7, %v18266_v42  ;;  %v14623_v11 = vpop.f32.mrf.mxu0  ;;  %14967 = vmatmul.mubr.msk.f32.gmra.mxu0 %vm414_vm1, %v22180_v34  ;;  %v18655_v42 = vld [vmem:[%s17686_s20 + $0x10a] sm:$0xff]  ;;  %v18658_v7 = vld [vmem:[%s17686_s20 + $0x112] sm:$0xff] }
 0x1fc   : > { %v14652_v35 = vpop.f32.mrf.mxu1  ;;  %14929 = vmatmul.mubr.msk.f32.gmra.mxu1 %vm414_vm1, %v18629_v62  ;;  %v18645_v47 = vadd.f32 %v14623_v11, %v18369_v59  ;;  %14969 = vmatprep.mubr.msk.f32.mxu0 %vm414_vm1, %v17833_v56  ;;  %22181 = vst [vmem:[#allocation3_spill] sm:$0xff] %v18658_v7  ;;  %v22182_v34 = vld [vmem:[#allocation26_spill] sm:$0xff] }
 0x1fd   : > { %v18648_v1 = vadd.f32 %v14652_v35, %v18275_v48  ;;  %14931 = vmatprep.mubr.msk.f32.mxu1 %vm414_vm1, %v18632_v28  ;;  %v3599_v27 = vpop.f32.mrf.mxu0 }
 0x1fe   : > { %v3969_v33 = vpop.f32.mrf.mxu1  ;;  %v18661_v59 = vadd.f32 %v3599_v27, %v18391_v4 }
 0x1ff   : > { %v18664_v48 = vadd.f32 %v3969_v33, %v18290_v52  ;;  %v14626_v11 = vpop.f32.mrf.mxu0  ;;  %14970 = vmatmul.mubr.msk.f32.gmra.mxu0 %vm414_vm1, %v22182_v34  ;;  %v18681_v52 = vld [vmem:[%s17686_s20 + $0x122] sm:$0xff]  ;;  %v18684_v33 = vld [vmem:[%s17686_s20 + $0x12a] sm:$0xff] }
 0x200   : > { %v14655_v35 = vpop.f32.mrf.mxu1  ;;  %14932 = vmatmul.mubr.msk.f32.gmra.mxu1 %vm414_vm1, %v18655_v42  ;;  %v18671_v56 = vadd.f32 %v14626_v11, %v18401_v37  ;;  %14972 = vmatprep.mubr.msk.f32.mxu0 %vm414_vm1, %v17859_v58  ;;  %22183 = vst [vmem:[#allocation26_spill] sm:$0xff] %v18681_v52  ;;  %22184 = vst [vmem:[#allocation66_spill] sm:$0xff] %v18684_v33 }
 0x201   : > { %v18674_v28 = vadd.f32 %v14655_v35, %v18305_v29  ;;  %14934 = vmatprep.mubr.msk.f32.mxu1 %vm414_vm1, %v18658_v7  ;;  %v3609_v4 = vpop.f32.mrf.mxu0  ;;  %v22212_v7 = vld [vmem:[#allocation11_spill] sm:$0xff] }
 0x202   : > { %v3979_v27 = vpop.f32.mrf.mxu1  ;;  %v18687_v37 = vadd.f32 %v3609_v4, %v18423_v57  ;;  %v22185_v57 = vld [vmem:[#allocation4_spill] sm:$0xff] }
 0x203   : > { %v18690_v29 = vadd.f32 %v3979_v27, %v18330_v6  ;;  %v14629_v11 = vpop.f32.mrf.mxu0  ;;  %14973 = vmatmul.mubr.msk.f32.gmra.mxu0 %vm414_vm1, %v17862_v16  ;;  %v18707_v6 = vld [vmem:[%s17686_s20 + $0x132] sm:$0xff] }
 0x204   : > { %v14658_v35 = vpop.f32.mrf.mxu1  ;;  %14935 = vmatmul.mubr.msk.f32.gmra.mxu1 %vm414_vm1, %v18681_v52  ;;  %v18697_v58 = vadd.f32 %v14629_v11, %v18433_v8  ;;  %14975 = vmatprep.mubr.msk.f32.mxu0 %vm414_vm1, %v22185_v57  ;;  %22186 = vst [vmem:[#allocation4_spill] sm:$0xff] %v18707_v6  ;;  %v18710_v52 = vld [vmem:[%s17686_s20 + $0x142] sm:$0xff] }
 0x205   : > { %v18700_v34 = vadd.f32 %v14658_v35, %v18340_v55  ;;  %14937 = vmatprep.mubr.msk.f32.mxu1 %vm414_vm1, %v18684_v33  ;;  %v3619_v4 = vpop.f32.mrf.mxu0  ;;  %22187 = vst [vmem:[#allocation67_spill] sm:$0xff] %v18710_v52  ;;  %v22188_v35 = vld [vmem:[#allocation27_spill] sm:$0xff] }
 0x206   : > { %v3989_v27 = vpop.f32.mrf.mxu1  ;;  %v18713_v16 = vadd.f32 %v3619_v4, %v18455_v31  ;;  %v22189_v31 = vld [vmem:[#allocation5_spill] sm:$0xff] }
 0x207   : > { %v18716_v55 = vadd.f32 %v3989_v27, %v18362_v50  ;;  %v14632_v8 = vpop.f32.mrf.mxu0  ;;  %14976 = vmatmul.mubr.msk.f32.gmra.mxu0 %vm414_vm1, %v22188_v35  ;;  %v18733_v50 = vld [vmem:[%s17686_s20 + $0x14a] sm:$0xff]  ;;  %v22192_v35 = vld [vmem:[#allocation28_spill] sm:$0xff] }
 0x208   : > { %v14661_v11 = vpop.f32.mrf.mxu1  ;;  %14938 = vmatmul.mubr.msk.f32.gmra.mxu1 %vm414_vm1, %v18707_v6  ;;  %v18723_v57 = vadd.f32 %v14632_v8, %v18465_v0  ;;  %14978 = vmatprep.mubr.msk.f32.mxu0 %vm414_vm1, %v22189_v31  ;;  %22190 = vst [vmem:[#allocation27_spill] sm:$0xff] %v18733_v50  ;;  %v18736_v6 = vld [vmem:[%s17686_s20 + $0x152] sm:$0xff] }
 0x209   : > { %v18726_v33 = vadd.f32 %v14661_v11, %v18372_v19  ;;  %14940 = vmatprep.mubr.msk.f32.mxu1 %vm414_vm1, %v18710_v52  ;;  %v3629_v4 = vpop.f32.mrf.mxu0  ;;  %22191 = vst [vmem:[#allocation5_spill] sm:$0xff] %v18736_v6 }
 0x20a   : > { %v3999_v27 = vpop.f32.mrf.mxu1  ;;  %v18739_v0 = vadd.f32 %v3629_v4, %v18487_v46  ;;  %v22193_v46 = vld [vmem:[#allocation6_spill] sm:$0xff] }
 0x20b   : > { %v18742_v19 = vadd.f32 %v3999_v27, %v18394_v49  ;;  %v14702_v11 = vpop.f32.mrf.mxu0  ;;  %14979 = vmatmul.mubr.msk.f32.gmra.mxu0 %vm414_vm1, %v22192_v35  ;;  %v18759_v49 = vld [vmem:[%s17686_s20 + $0x162] sm:$0xff] }
 0x20c   : > { %v14664_v8 = vpop.f32.mrf.mxu1  ;;  %14941 = vmatmul.mubr.msk.f32.gmra.mxu1 %vm414_vm1, %v18733_v50  ;;  %v18752_v52 = vadd.f32 %v14702_v11, %v18500_v53  ;;  %14981 = vmatprep.mubr.msk.f32.mxu0 %vm414_vm1, %v22193_v46  ;;  %22194 = vst [vmem:[#allocation28_spill] sm:$0xff] %v18759_v49  ;;  %v18762_v50 = vld [vmem:[%s17686_s20 + $0x16a] sm:$0xff]  ;;  %v22196_v35 = vld [vmem:[#allocation29_spill] sm:$0xff] }
 0x20d   : > { %v18749_v31 = vadd.f32 %v14664_v8, %v18404_v44  ;;  %14943 = vmatprep.mubr.msk.f32.mxu1 %vm414_vm1, %v18736_v6  ;;  %v4409_v27 = vpop.f32.mrf.mxu0  ;;  %22195 = vst [vmem:[#allocation6_spill] sm:$0xff] %v18762_v50 }
 0x20e   : > { %v4009_v4 = vpop.f32.mrf.mxu1  ;;  %v18768_v53 = vadd.f32 %v4409_v27, %v18522_v24  ;;  %v18785_v24 = vld [vmem:[%s17686_s20 + $0x172] sm:$0xff] }
 0x20f   : > { %v18765_v44 = vadd.f32 %v4009_v4, %v18426_v13  ;;  %v14705_v11 = vpop.f32.mrf.mxu0  ;;  %14982 = vmatmul.mubr.msk.f32.gmra.mxu0 %vm414_vm1, %v22196_v35  ;;  %v22197_v13 = vld [vmem:[#allocation7_spill] sm:$0xff]  ;;  %22198 = vst [vmem:[#allocation29_spill] sm:$0xff] %v18785_v24  ;;  %v22200_v35 = vld [vmem:[#allocation30_spill] sm:$0xff] }
 0x210   : > { %v14667_v8 = vpop.f32.mrf.mxu1  ;;  %14944 = vmatmul.mubr.msk.f32.gmra.mxu1 %vm414_vm1, %v18759_v49  ;;  %v18778_v6 = vadd.f32 %v14705_v11, %v18532_v41  ;;  %14984 = vmatprep.mubr.msk.f32.mxu0 %vm414_vm1, %v22197_v13  ;;  %v18788_v49 = vld [vmem:[%s17686_s20 + $0x182] sm:$0xff] }
 0x211   : > { %v18775_v46 = vadd.f32 %v14667_v8, %v18436_v17  ;;  %14946 = vmatprep.mubr.msk.f32.mxu1 %vm414_vm1, %v18762_v50  ;;  %v4419_v27 = vpop.f32.mrf.mxu0  ;;  %22199 = vst [vmem:[#allocation7_spill] sm:$0xff] %v18788_v49 }
 0x212   : > { %v4019_v4 = vpop.f32.mrf.mxu1  ;;  %v18794_v41 = vadd.f32 %v4419_v27, %v18551_v61  ;;  %v18811_v61 = vld [vmem:[%s17686_s20 + $0x18a] sm:$0xff] }
 0x213   : > { %v18791_v17 = vadd.f32 %v4019_v4, %v18458_v10  ;;  %v14708_v11 = vpop.f32.mrf.mxu0  ;;  %14985 = vmatmul.mubr.msk.f32.gmra.mxu0 %vm414_vm1, %v22200_v35  ;;  %v22201_v10 = vld [vmem:[#allocation8_spill] sm:$0xff]  ;;  %22202 = vst [vmem:[#allocation30_spill] sm:$0xff] %v18811_v61  ;;  %v22204_v35 = vld [vmem:[#allocation31_spill] sm:$0xff] }
 0x214   : > { %v14670_v8 = vpop.f32.mrf.mxu1  ;;  %14947 = vmatmul.mubr.msk.f32.gmra.mxu1 %vm414_vm1, %v18785_v24  ;;  %v18804_v50 = vadd.f32 %v14708_v11, %v18561_v15  ;;  %14987 = vmatprep.mubr.msk.f32.mxu0 %vm414_vm1, %v22201_v10  ;;  %v18814_v24 = vld [vmem:[%s17686_s20 + $0x192] sm:$0xff] }
 0x215   : > { %v18801_v13 = vadd.f32 %v14670_v8, %v18468_v3  ;;  %14949 = vmatprep.mubr.msk.f32.mxu1 %vm414_vm1, %v18788_v49  ;;  %v4429_v27 = vpop.f32.mrf.mxu0  ;;  %22203 = vst [vmem:[#allocation8_spill] sm:$0xff] %v18814_v24 }
 0x216   : > { %v4029_v4 = vpop.f32.mrf.mxu1  ;;  %v18820_v15 = vadd.f32 %v4429_v27, %v18577_v14  ;;  %v18837_v14 = vld [vmem:[%s17686_s20 + $0x1a2] sm:$0xff] }
 0x217   : > { %v18817_v3 = vadd.f32 %v4029_v4, %v18490_v9  ;;  %v14711_v11 = vpop.f32.mrf.mxu0  ;;  %14988 = vmatmul.mubr.msk.f32.gmra.mxu0 %vm414_vm1, %v22204_v35  ;;  %v22205_v9 = vld [vmem:[#allocation9_spill] sm:$0xff]  ;;  %22206 = vst [vmem:[#allocation31_spill] sm:$0xff] %v18837_v14  ;;  %v22208_v35 = vld [vmem:[#allocation32_spill] sm:$0xff] }
 0x218   : > { %v14673_v8 = vpop.f32.mrf.mxu1  ;;  %14950 = vmatmul.mubr.msk.f32.gmra.mxu1 %vm414_vm1, %v18811_v61  ;;  %v18830_v49 = vadd.f32 %v14711_v11, %v18587_v39  ;;  %14990 = vmatprep.mubr.msk.f32.mxu0 %vm414_vm1, %v22205_v9  ;;  %v18840_v61 = vld [vmem:[%s17686_s20 + $0x1aa] sm:$0xff] }
 0x219   : > { %v18827_v10 = vadd.f32 %v14673_v8, %v18497_v21  ;;  %14952 = vmatprep.mubr.msk.f32.mxu1 %vm414_vm1, %v18814_v24  ;;  %v4439_v27 = vpop.f32.mrf.mxu0  ;;  %22207 = vst [vmem:[#allocation9_spill] sm:$0xff] %v18840_v61 }
 0x21a   : > { %v4039_v4 = vpop.f32.mrf.mxu1  ;;  %v18846_v39 = vadd.f32 %v4439_v27, %v18610_v63  ;;  %v18863_v63 = vld [vmem:[%s17686_s20 + $0x1b2] sm:$0xff] }
 0x21b   : > { %v18843_v21 = vadd.f32 %v4039_v4, %v18519_v12  ;;  %v14714_v11 = vpop.f32.mrf.mxu0  ;;  %14991 = vmatmul.mubr.msk.f32.gmra.mxu0 %vm414_vm1, %v22208_v35  ;;  %v22209_v12 = vld [vmem:[#allocation10_spill] sm:$0xff]  ;;  %22210 = vst [vmem:[#allocation32_spill] sm:$0xff] %v18863_v63 }
 0x21c   : > { %v14676_v8 = vpop.f32.mrf.mxu1  ;;  %14953 = vmatmul.mubr.msk.f32.gmra.mxu1 %vm414_vm1, %v18837_v14  ;;  %v18856_v24 = vadd.f32 %v14714_v11, %v18622_v60  ;;  %14993 = vmatprep.mubr.msk.f32.mxu0 %vm414_vm1, %v22209_v12  ;;  %v12480_v14 = vld [vmem:[%s17686_s20 + $0x21] sm:$0xff] }
 0x21d   : > { %v18853_v9 = vadd.f32 %v14676_v8, %v18529_v36  ;;  %14955 = vmatprep.mubr.msk.f32.mxu1 %vm414_vm1, %v18840_v61  ;;  %v4449_v27 = vpop.f32.mrf.mxu0  ;;  %v22211_v11 = vld [vmem:[#allocation33_spill] sm:$0xff] }
 0x21e   : > { %v4049_v4 = vpop.f32.mrf.mxu1  ;;  %v18870_v36 = vadd.f32 %v4449_v27, %v18638_v25 }
 0x21f   : > { %v18867_v35 = vadd.f32 %v4049_v4, %v18548_v51  ;;  %v14717_v8 = vpop.f32.mrf.mxu0  ;;  %14994 = vmatmul.mubr.msk.f32.gmra.mxu0 %vm414_vm1, %v22211_v11  ;;  %v12481_v51 = vld [vmem:[%s17686_s20 + $0x29] sm:$0xff] }
 0x220   : > { %v14679_v60 = vpop.f32.mrf.mxu1  ;;  %14956 = vmatmul.mubr.msk.f32.gmra.mxu1 %vm414_vm1, %v18863_v63  ;;  %v18880_v61 = vadd.f32 %v14717_v8, %v18648_v1  ;;  %14996 = vmatprep.mubr.msk.f32.mxu0 %vm414_vm1, %v22212_v7  ;;  %v18896_v1 = vld [vmem:[%s21827_s3 + $0x20] sm:$0xf] }
 0x221   : > { %v18877_v12 = vadd.f32 %v14679_v60, %v18558_v30  ;;  %15025 = vmatprep.mubr.msk.f32.mxu1 %vm414_vm1, %v12480_v14  ;;  %v4459_v4 = vpop.f32.mrf.mxu0  ;;  %v12482_v30 = vld [vmem:[%s17686_s20 + $0x31] sm:$0xff]  ;;  %v22213_v14 = vld [vmem:[#allocation34_spill] sm:$0xff] }
 0x222   : > { %v4059_v25 = vpop.f32.mrf.mxu1  ;;  %v18890_v11 = vadd.f32 %v4459_v4, %v18664_v48  ;;  %v22214_v48 = vld [vmem:[#allocation12_spill] sm:$0xff] }
 0x223   : > { %v18887_v27 = vadd.f32 %v4059_v25, %v18574_v18  ;;  %v14720_v60 = vpop.f32.mrf.mxu0  ;;  %14997 = vmatmul.mubr.msk.f32.gmra.mxu0 %vm414_vm1, %v22213_v14  ;;  %v18912_v25 = vld [vmem:[%s17686_s20 + $0x41] sm:$0xff] }
 0x224   : > { %v14682_v7 = vpop.f32.mrf.mxu1  ;;  %15026 = vmatmul.mubr.msk.f32.vlgmr.msra.gmra.mxu1 %vm414_vm1, %v12481_v51  ;;  %v18905_v8 = vadd.f32 %v14720_v60, %v18674_v28  ;;  %14999 = vmatprep.mubr.msk.f32.mxu0 %vm414_vm1, %v22214_v48  ;;  %22215 = vst [vmem:[#allocation10_spill] sm:$0xff] %v18912_v25  ;;  %v18916_v51 = vld [vmem:[%s17686_s20 + $0x49] sm:$0xff]  ;;  %v22218_v48 = vld [vmem:[#allocation13_spill] sm:$0xff] }
 0x225   : > { %v18902_v18 = vadd.f32 %v14682_v7, %v18584_v2  ;;  %15154 = vmatpush3.msk.msra.mxu1 %vm541_vm0, %v18296_v38  ;;  %v4469_v63 = vpop.f32.mrf.mxu0  ;;  %15028 = vmatprep.mubr.msk.f32.mxu1 %vm414_vm1, %v12482_v30  ;;  %22216 = vst [vmem:[#allocation33_spill] sm:$0xff] %v18916_v51  ;;  %v22217_v60 = vld [vmem:[#allocation35_spill] sm:$0xff] }
 0x226   : > { %v4069_v4 = vpop.f32.mrf.mxu1  ;;  %15283 = vmatprep.subr.msk.mxu1 %vm541_vm0, %v18896_v1  ;;  %v18924_v38 = vadd.f32 %v4469_v63, %v18690_v29 }
 0x227   : > { %v18921_v2 = vadd.f32 %v4069_v4, %v18607_v22  ;;  %v14723_v7 = vpop.f32.mrf.mxu0  ;;  %15000 = vmatmul.mubr.msk.f32.gmra.mxu0 %vm414_vm1, %v22217_v60  ;;  %v18941_v22 = vld [vmem:[%s17686_s20 + $0x51] sm:$0xff]  ;;  %v18944_v4 = vld [vmem:[%s17686_s20 + $0x61] sm:$0xff] }
 0x228   : > { %v14685_v28 = vpop.f32.mrf.mxu1  ;;  %15029 = vmatmul.mubr.msk.f32.gmra.mxu1 %vm414_vm1, %v18912_v25  ;;  %v18934_v14 = vadd.f32 %v14723_v7, %v18700_v34  ;;  %15002 = vmatprep.mubr.msk.f32.mxu0 %vm414_vm1, %v22218_v48  ;;  %22219 = vst [vmem:[#allocation11_spill] sm:$0xff] %v18941_v22  ;;  %22220 = vst [vmem:[#allocation34_spill] sm:$0xff] %v18944_v4  ;;  %v22221_v60 = vld [vmem:[#allocation36_spill] sm:$0xff]  ;;  %v22222_v25 = vld [vmem:[#allocation14_spill] sm:$0xff] }
 0x229   : > { %v18931_v30 = vadd.f32 %v14685_v28, %v18619_v54  ;;  %15031 = vmatprep.mubr.msk.f32.mxu1 %vm414_vm1, %v18916_v51  ;;  %v4479_v63 = vpop.f32.mrf.mxu0 }
 0x22a   : > { %v4079_v29 = vpop.f32.mrf.mxu1  ;;  %v18950_v34 = vadd.f32 %v4479_v63, %v18716_v55  ;;  %v18970_v63 = vld [vmem:[%s17686_s20 + $0x71] sm:$0xff] }
 0x22b   : > { %v18947_v54 = vadd.f32 %v4079_v29, %v18635_v26  ;;  %v14726_v7 = vpop.f32.mrf.mxu0  ;;  %15003 = vmatmul.mubr.msk.f32.gmra.mxu0 %vm414_vm1, %v22221_v60  ;;  %v18967_v26 = vld [vmem:[%s17686_s20 + $0x69] sm:$0xff]  ;;  %22224 = vst [vmem:[#allocation35_spill] sm:$0xff] %v18970_v63 }
 0x22c   : > { %v14688_v28 = vpop.f32.mrf.mxu1  ;;  %15032 = vmatmul.mubr.msk.f32.gmra.mxu1 %vm414_vm1, %v18941_v22  ;;  %v18960_v51 = vadd.f32 %v14726_v7, %v18726_v33  ;;  %15005 = vmatprep.mubr.msk.f32.mxu0 %vm414_vm1, %v22222_v25  ;;  %22223 = vst [vmem:[#allocation12_spill] sm:$0xff] %v18967_v26  ;;  %v22225_v25 = vld [vmem:[#allocation37_spill] sm:$0xff]  ;;  %v22226_v22 = vld [vmem:[#allocation38_spill] sm:$0xff] }
 0x22d   : > { %v18957_v48 = vadd.f32 %v14688_v28, %v18645_v47  ;;  %15034 = vmatprep.mubr.msk.f32.mxu1 %vm414_vm1, %v18944_v4  ;;  %v4489_v29 = vpop.f32.mrf.mxu0 }
 0x22e   : > { %v4089_v55 = vpop.f32.mrf.mxu1  ;;  %v18976_v33 = vadd.f32 %v4489_v29, %v18742_v19  ;;  %v18996_v29 = vld [vmem:[%s17686_s20 + $0x89] sm:$0xff] }
 0x22f   : > { %v18973_v47 = vadd.f32 %v4089_v55, %v18661_v59  ;;  %v14729_v7 = vpop.f32.mrf.mxu0  ;;  %15006 = vmatmul.mubr.msk.f32.gmra.mxu0 %vm414_vm1, %v22225_v25  ;;  %v18993_v59 = vld [vmem:[%s17686_s20 + $0x81] sm:$0xff]  ;;  %22228 = vst [vmem:[#allocation36_spill] sm:$0xff] %v18996_v29 }
 0x230   : > { %v14691_v28 = vpop.f32.mrf.mxu1  ;;  %15035 = vmatmul.mubr.msk.f32.gmra.mxu1 %vm414_vm1, %v18967_v26  ;;  %v18986_v4 = vadd.f32 %v14729_v7, %v18749_v31  ;;  %15008 = vmatprep.mubr.msk.f32.mxu0 %vm414_vm1, %v22226_v22  ;;  %22227 = vst [vmem:[#allocation13_spill] sm:$0xff] %v18993_v59  ;;  %v22229_v22 = vld [vmem:[#allocation39_spill] sm:$0xff]  ;;  %v22230_v26 = vld [vmem:[#allocation40_spill] sm:$0xff] }
 0x231   : > { %v18983_v60 = vadd.f32 %v14691_v28, %v18671_v56  ;;  %15037 = vmatprep.mubr.msk.f32.mxu1 %vm414_vm1, %v18970_v63  ;;  %v4499_v55 = vpop.f32.mrf.mxu0 }
 0x232   : > { %v4099_v19 = vpop.f32.mrf.mxu1  ;;  %v19002_v31 = vadd.f32 %v4499_v55, %v18765_v44  ;;  %v19022_v55 = vld [vmem:[%s17686_s20 + $0xa1] sm:$0xff] }
 0x233   : > { %v18999_v56 = vadd.f32 %v4099_v19, %v18687_v37  ;;  %v14732_v7 = vpop.f32.mrf.mxu0  ;;  %15009 = vmatmul.mubr.msk.f32.gmra.mxu0 %vm414_vm1, %v22229_v22  ;;  %v19019_v37 = vld [vmem:[%s17686_s20 + $0x91] sm:$0xff]  ;;  %22232 = vst [vmem:[#allocation37_spill] sm:$0xff] %v19022_v55 }
 0x234   : > { %v14694_v28 = vpop.f32.mrf.mxu1  ;;  %15038 = vmatmul.mubr.msk.f32.gmra.mxu1 %vm414_vm1, %v18993_v59  ;;  %v19012_v63 = vadd.f32 %v14732_v7, %v18775_v46  ;;  %15011 = vmatprep.mubr.msk.f32.mxu0 %vm414_vm1, %v22230_v26  ;;  %22231 = vst [vmem:[#allocation14_spill] sm:$0xff] %v19019_v37  ;;  %v22233_v26 = vld [vmem:[#allocation41_spill] sm:$0xff]  ;;  %v22234_v59 = vld [vmem:[#allocation43_spill] sm:$0xff] }
 0x235   : > { %v19009_v25 = vadd.f32 %v14694_v28, %v18697_v58  ;;  %15040 = vmatprep.mubr.msk.f32.mxu1 %vm414_vm1, %v18996_v29  ;;  %v4509_v19 = vpop.f32.mrf.mxu0 }
 0x236   : > { %v4109_v44 = vpop.f32.mrf.mxu1  ;;  %v19028_v46 = vadd.f32 %v4509_v19, %v18791_v17  ;;  %v19048_v19 = vld [vmem:[%s17686_s20 + $0xb1] sm:$0xff] }
 0x237   : > { %v19025_v58 = vadd.f32 %v4109_v44, %v18713_v16  ;;  %v14735_v7 = vpop.f32.mrf.mxu0  ;;  %15012 = vmatmul.mubr.msk.f32.gmra.mxu0 %vm414_vm1, %v22233_v26  ;;  %v19045_v16 = vld [vmem:[%s17686_s20 + $0xa9] sm:$0xff]  ;;  %22236 = vst [vmem:[#allocation39_spill] sm:$0xff] %v19048_v19 }
 0x238   : > { %v14697_v28 = vpop.f32.mrf.mxu1  ;;  %15041 = vmatmul.mubr.msk.f32.gmra.mxu1 %vm414_vm1, %v19019_v37  ;;  %v19038_v29 = vadd.f32 %v14735_v7, %v18801_v13  ;;  %15014 = vmatprep.mubr.msk.f32.mxu0 %vm414_vm1, %v22234_v59  ;;  %22235 = vst [vmem:[#allocation38_spill] sm:$0xff] %v19045_v16  ;;  %v22237_v7 = vld [vmem:[#allocation44_spill] sm:$0xff]  ;;  %v22238_v37 = vld [vmem:[#allocation45_spill] sm:$0xff] }
 0x239   : > { %v19035_v22 = vadd.f32 %v14697_v28, %v18723_v57  ;;  %15043 = vmatprep.mubr.msk.f32.mxu1 %vm414_vm1, %v19022_v55  ;;  %v4519_v44 = vpop.f32.mrf.mxu0 }
 0x23a   : > { %v4119_v17 = vpop.f32.mrf.mxu1  ;;  %v19054_v13 = vadd.f32 %v4519_v44, %v18817_v3  ;;  %v19074_v3 = vld [vmem:[%s17686_s20 + $0xc1] sm:$0xff] }
 0x23b   : > { %v19051_v57 = vadd.f32 %v4119_v17, %v18739_v0  ;;  %v14738_v59 = vpop.f32.mrf.mxu0  ;;  %15015 = vmatmul.mubr.msk.f32.gmra.mxu0 %vm414_vm1, %v22237_v7  ;;  %v19071_v0 = vld [vmem:[%s17686_s20 + $0x1c0] sm:$0xff]  ;;  %v19077_v7 = vld [vmem:[%s17686_s20 + $0x1c8] sm:$0xff] }
 0x23c   : > { %v14767_v28 = vpop.f32.mrf.mxu1  ;;  %15044 = vmatmul.mubr.msk.f32.gmra.mxu1 %vm414_vm1, %v19045_v16  ;;  %v19061_v26 = vadd.f32 %v14738_v59, %v18827_v10  ;;  %15017 = vmatprep.mubr.msk.f32.mxu0 %vm414_vm1, %v22238_v37  ;;  %22239 = vst [vmem:[#allocation40_spill] sm:$0xff] %v19071_v0  ;;  %22240 = vst [vmem:[#allocation41_spill] sm:$0xff] %v19077_v7  ;;  %v19080_v10 = vld [vmem:[%s17686_s20 + $0xc9] sm:$0xff] }
 0x23d   : > { %v19064_v55 = vadd.f32 %v14767_v28, %v18752_v52  ;;  %15046 = vmatprep.mubr.msk.f32.mxu1 %vm414_vm1, %v19048_v19  ;;  %v4529_v17 = vpop.f32.mrf.mxu0  ;;  %22241 = vst [vmem:[#allocation43_spill] sm:$0xff] %v19080_v10 }
 0x23e   : > { %v4899_v44 = vpop.f32.mrf.mxu1  ;;  %v19083_v52 = vadd.f32 %v4529_v17, %v18843_v21  ;;  %v19106_v21 = vld [vmem:[%s17686_s20 + $0xd1] sm:$0xff] }
 0x23f   : > { %v19086_v37 = vadd.f32 %v4899_v44, %v18768_v53  ;;  %v14741_v59 = vpop.f32.mrf.mxu0  ;;  %15018 = vmatmul.mubr.msk.f32.gmra.mxu0 %vm414_vm1, %v19071_v0  ;;  %v19103_v53 = vld [vmem:[%s17686_s20 + $0x1d0] sm:$0xff]  ;;  %22243 = vst [vmem:[#allocation45_spill] sm:$0xff] %v19106_v21  ;;  %v19109_v0 = vld [vmem:[%s17686_s20 + $0xe1] sm:$0xff] }
 0x240   : > { %v14770_v28 = vpop.f32.mrf.mxu1  ;;  %15047 = vmatmul.mubr.msk.f32.gmra.mxu1 %vm414_vm1, %v19074_v3  ;;  %v19093_v19 = vadd.f32 %v14741_v59, %v18853_v9  ;;  %15020 = vmatprep.mubr.msk.f32.mxu0 %vm414_vm1, %v19077_v7  ;;  %22242 = vst [vmem:[#allocation44_spill] sm:$0xff] %v19103_v53  ;;  %22244 = vst [vmem:[#allocation68_spill] sm:$0xff] %v19109_v0 }
 0x241   : > { %v19096_v16 = vadd.f32 %v14770_v28, %v18778_v6  ;;  %15049 = vmatprep.mubr.msk.f32.mxu1 %vm414_vm1, %v19080_v10  ;;  %v4539_v17 = vpop.f32.mrf.mxu0 }
 0x242   : > { %v4909_v44 = vpop.f32.mrf.mxu1  ;;  %v19112_v9 = vadd.f32 %v4539_v17, %v18867_v35  ;;  %v22245_v35 = vld [vmem:[#allocation49_spill] sm:$0xff] }
 0x243   : > { %v19115_v6 = vadd.f32 %v4909_v44, %v18794_v41  ;;  %v14744_v59 = vpop.f32.mrf.mxu0  ;;  %15021 = vmatmul.mubr.msk.f32.gmra.mxu0 %vm414_vm1, %v19103_v53  ;;  %v19132_v41 = vld [vmem:[%s17686_s20 + $0xe9] sm:$0xff]  ;;  %v19135_v53 = vld [vmem:[%s17686_s20 + $0xf1] sm:$0xff] }
 0x244   : > { %v14773_v28 = vpop.f32.mrf.mxu1  ;;  %15050 = vmatmul.mubr.msk.f32.gmra.mxu1 %vm414_vm1, %v19106_v21  ;;  %v19122_v7 = vadd.f32 %v14744_v59, %v18877_v12  ;;  %15090 = vmatprep.mubr.msk.f32.mxu0 %vm414_vm1, %v22245_v35  ;;  %22246 = vst [vmem:[#allocation49_spill] sm:$0xff] %v19135_v53 }
 0x245   : > { %v19125_v10 = vadd.f32 %v14773_v28, %v18804_v50  ;;  %15052 = vmatprep.mubr.msk.f32.mxu1 %vm414_vm1, %v19109_v0  ;;  %v4549_v17 = vpop.f32.mrf.mxu0  ;;  %v22247_v28 = vld [vmem:[#allocation51_spill] sm:$0xff] }
 0x246   : > { %v4919_v44 = vpop.f32.mrf.mxu1  ;;  %v19138_v21 = vadd.f32 %v4549_v17, %v18887_v27  ;;  %v22248_v27 = vld [vmem:[#allocation53_spill] sm:$0xff] }
 0x247   : > { %v19141_v12 = vadd.f32 %v4919_v44, %v18820_v15  ;;  %v14747_v50 = vpop.f32.mrf.mxu0  ;;  %15091 = vmatmul.mubr.msk.f32.vlgmr.msra.gmra.mxu0 %vm414_vm1, %v22247_v28  ;;  %v19158_v15 = vld [vmem:[%s17686_s20 + $0x101] sm:$0xff] }
 0x248   : > { %v14776_v59 = vpop.f32.mrf.mxu1  ;;  %15053 = vmatmul.mubr.msk.f32.gmra.mxu1 %vm414_vm1, %v19132_v41  ;;  %v19148_v35 = vadd.f32 %v14747_v50, %v18902_v18  ;;  %15093 = vmatprep.mubr.msk.f32.mxu0 %vm414_vm1, %v22248_v27  ;;  %22249 = vst [vmem:[#allocation51_spill] sm:$0xff] %v19158_v15 }
 0x249   : > { %v19151_v0 = vadd.f32 %v14776_v59, %v18830_v49  ;;  %15055 = vmatprep.mubr.msk.f32.mxu1 %vm414_vm1, %v19135_v53  ;;  %v4559_v17 = vpop.f32.mrf.mxu0  ;;  %15219 = vmatpush3.msk.msra.mxu0 %vm541_vm0, %v18599_v40  ;;  %v22250_v59 = vld [vmem:[#allocation55_spill] sm:$0xff]  ;;  %v22251_v40 = vld [vmem:[#allocation46_spill] sm:$0xff] }
 0x24a   : > { %v4929_v44 = vpop.f32.mrf.mxu1  ;;  %v19163_v28 = vadd.f32 %v4559_v17, %v18921_v2  ;;  %v22252_v2 = vld [vmem:[#allocation15_spill] sm:$0xff] }
 0x24b   : > { %v19166_v18 = vadd.f32 %v4929_v44, %v18846_v39  ;;  %v14750_v49 = vpop.f32.mrf.mxu0  ;;  %15094 = vmatmul.mubr.msk.f32.gmra.mxu0 %vm414_vm1, %v22250_v59 }
 0x24c   : > { %v14779_v50 = vpop.f32.mrf.mxu1  ;;  %15056 = vmatmul.mubr.msk.f32.gmra.mxu1 %vm414_vm1, %v19158_v15  ;;  %v19173_v27 = vadd.f32 %v14750_v49, %v18931_v30  ;;  %15096 = vmatprep.mubr.msk.f32.mxu0 %vm414_vm1, %v22252_v2  ;;  %v22253_v49 = vld [vmem:[#allocation47_spill] sm:$0xff]  ;;  %v22255_v2 = vld [vmem:[#allocation48_spill] sm:$0xff] }
 0x24d   : > { %v19176_v53 = vadd.f32 %v14779_v50, %v18856_v24  ;;  %15058 = vmatprep.mubr.msk.f32.mxu1 %vm414_vm1, %v22251_v40  ;;  %v4569_v39 = vpop.f32.mrf.mxu0  ;;  %v22254_v24 = vld [vmem:[#allocation17_spill] sm:$0xff] }
 0x24e   : > { %v4939_v17 = vpop.f32.mrf.mxu1  ;;  %v19183_v44 = vadd.f32 %v4569_v39, %v18947_v54  ;;  %v22256_v54 = vld [vmem:[#allocation19_spill] sm:$0xff] }
 0x24f   : > { %v19186_v15 = vadd.f32 %v4939_v17, %v18870_v36  ;;  %v14753_v59 = vpop.f32.mrf.mxu0  ;;  %15097 = vmatmul.mubr.msk.f32.gmra.mxu0 %vm414_vm1, %v22254_v24 }
 0x250   : > { %v14782_v30 = vpop.f32.mrf.mxu1  ;;  %15059 = vmatmul.mubr.msk.f32.gmra.mxu1 %vm414_vm1, %v22253_v49  ;;  %v19193_v50 = vadd.f32 %v14753_v59, %v18957_v48  ;;  %15099 = vmatprep.mubr.msk.f32.mxu0 %vm414_vm1, %v22256_v54  ;;  %v22257_v59 = vld [vmem:[#allocation50_spill] sm:$0xff]  ;;  %v22259_v54 = vld [vmem:[#allocation52_spill] sm:$0xff] }
 0x251   : > { %v19196_v40 = vadd.f32 %v14782_v30, %v18880_v61  ;;  %15061 = vmatprep.mubr.msk.f32.mxu1 %vm414_vm1, %v22255_v2  ;;  %v4579_v36 = vpop.f32.mrf.mxu0  ;;  %v22258_v61 = vld [vmem:[#allocation23_spill] sm:$0xff] }
 0x252   : > { %v4949_v39 = vpop.f32.mrf.mxu1  ;;  %v19203_v17 = vadd.f32 %v4579_v36, %v18973_v47  ;;  %v22260_v47 = vld [vmem:[#allocation24_spill] sm:$0xff] }
 0x253   : > { %v19206_v49 = vadd.f32 %v4949_v39, %v18890_v11  ;;  %v14756_v24 = vpop.f32.mrf.mxu0  ;;  %15100 = vmatmul.mubr.msk.f32.gmra.mxu0 %vm414_vm1, %v22258_v61 }
 0x254   : > { %v14785_v48 = vpop.f32.mrf.mxu1  ;;  %15062 = vmatmul.mubr.msk.f32.gmra.mxu1 %vm414_vm1, %v22257_v59  ;;  %v19213_v30 = vadd.f32 %v14756_v24, %v18983_v60  ;;  %15102 = vmatprep.mubr.msk.f32.mxu0 %vm414_vm1, %v22260_v47  ;;  %v22261_v24 = vld [vmem:[#allocation54_spill] sm:$0xff] }
 0x255   : > { %v19216_v2 = vadd.f32 %v14785_v48, %v18905_v8  ;;  %15064 = vmatprep.mubr.msk.f32.mxu1 %vm414_vm1, %v22259_v54  ;;  %v4589_v11 = vpop.f32.mrf.mxu0  ;;  %v22262_v8 = vld [vmem:[#allocation25_spill] sm:$0xff]  ;;  %v22263_v47 = vld [vmem:[#allocation42_spill] sm:$0xff] }
 0x256   : > { %v4959_v36 = vpop.f32.mrf.mxu1  ;;  %v19223_v39 = vadd.f32 %v4589_v11, %v18999_v56  ;;  %v22264_v56 = vld [vmem:[#allocation57_spill] sm:$0xff] }
 0x257   : > { %v19226_v59 = vadd.f32 %v4959_v36, %v18924_v38  ;;  %v14759_v61 = vpop.f32.mrf.mxu0  ;;  %15103 = vmatmul.mubr.msk.f32.gmra.mxu0 %vm414_vm1, %v22262_v8 }
 0x258   : > { %v14788_v60 = vpop.f32.mrf.mxu1  ;;  %15065 = vmatmul.mubr.msk.f32.gmra.mxu1 %vm414_vm1, %v22261_v24  ;;  %v19233_v48 = vadd.f32 %v14759_v61, %v19009_v25  ;;  %15105 = vmatprep.mubr.msk.f32.mxu0 %vm414_vm1, %v22264_v56  ;;  %v22265_v61 = vld [vmem:[#allocation16_spill] sm:$0xff]  ;;  %v22267_v56 = vld [vmem:[#allocation18_spill] sm:$0xff] }
 0x259   : > { %v19236_v54 = vadd.f32 %v14788_v60, %v18934_v14  ;;  %15067 = vmatprep.mubr.msk.f32.mxu1 %vm414_vm1, %v22263_v47  ;;  %v4599_v38 = vpop.f32.mrf.mxu0  ;;  %v22266_v14 = vld [vmem:[#allocation59_spill] sm:$0xff] }
 0x25a   : > { %v4969_v11 = vpop.f32.mrf.mxu1  ;;  %v19243_v36 = vadd.f32 %v4599_v38, %v19025_v58 }
 0x25b   : > { %v19246_v24 = vadd.f32 %v4969_v11, %v18950_v34  ;;  %v14762_v8 = vpop.f32.mrf.mxu0  ;;  %15106 = vmatmul.mubr.msk.f32.gmra.mxu0 %vm414_vm1, %v22266_v14  ;;  %v22270_v14 = vld [vmem:[#allocation21_spill] sm:$0xff] }
 0x25c   : > { %v14791_v25 = vpop.f32.mrf.mxu1  ;;  %15068 = vmatmul.mubr.msk.f32.gmra.mxu1 %vm414_vm1, %v22265_v61  ;;  %v19253_v60 = vadd.f32 %v14762_v8, %v19035_v22  ;;  %15108 = vmatprep.mubr.msk.f32.mxu0 %vm414_vm1, %v18510_v43  ;;  %v22268_v8 = vld [vmem:[#allocation20_spill] sm:$0xff] }
 0x25d   : > { %v19256_v47 = vadd.f32 %v14791_v25, %v18960_v51  ;;  %15070 = vmatprep.mubr.msk.f32.mxu1 %vm414_vm1, %v22267_v56  ;;  %v4609_v34 = vpop.f32.mrf.mxu0  ;;  %v22269_v51 = vld [vmem:[#allocation62_spill] sm:$0xff] }
 0x25e   : > { %v4979_v58 = vpop.f32.mrf.mxu1  ;;  %v19263_v38 = vadd.f32 %v4609_v34, %v19051_v57 }
 0x25f   : > { %v19266_v11 = vadd.f32 %v4979_v58, %v18976_v33  ;;  %v14832_v22 = vpop.f32.mrf.mxu0  ;;  %15109 = vmatmul.mubr.msk.f32.gmra.mxu0 %vm414_vm1, %v22269_v51 }
 0x260   : > { %v14794_v61 = vpop.f32.mrf.mxu1  ;;  %15071 = vmatmul.mubr.msk.f32.gmra.mxu1 %vm414_vm1, %v22268_v8  ;;  %v19276_v43 = vadd.f32 %v14832_v22, %v19064_v55  ;;  %15111 = vmatprep.mubr.msk.f32.mxu0 %vm414_vm1, %v18542_v20  ;;  %v22272_v22 = vld [vmem:[#allocation56_spill] sm:$0xff] }
 0x261   : > { %v19273_v25 = vadd.f32 %v14794_v61, %v18986_v4  ;;  %15073 = vmatprep.mubr.msk.f32.mxu1 %vm414_vm1, %v22270_v14  ;;  %v5389_v57 = vpop.f32.mrf.mxu0  ;;  %v22271_v61 = vld [vmem:[#allocation22_spill] sm:$0xff] }
 0x262   : > { %v4989_v33 = vpop.f32.mrf.mxu1  ;;  %v19286_v34 = vadd.f32 %v5389_v57, %v19086_v37  ;;  %v22273_v14 = vld [vmem:[#allocation58_spill] sm:$0xff] }
 0x263   : > { %v19283_v56 = vadd.f32 %v4989_v33, %v19002_v31  ;;  %v14835_v4 = vpop.f32.mrf.mxu0  ;;  %15112 = vmatmul.mubr.msk.f32.gmra.mxu0 %vm414_vm1, %v18545_v23 }
 0x264   : > { %v14797_v58 = vpop.f32.mrf.mxu1  ;;  %15074 = vmatmul.mubr.msk.f32.gmra.mxu1 %vm414_vm1, %v22271_v61  ;;  %v19296_v20 = vadd.f32 %v14835_v4, %v19096_v16  ;;  %15114 = vmatprep.mubr.msk.f32.mxu0 %vm414_vm1, %v18568_v32  ;;  %v22275_v4 = vld [vmem:[#allocation61_spill] sm:$0xff] }
 0x265   : > { %v19293_v55 = vadd.f32 %v14797_v58, %v19012_v63  ;;  %15076 = vmatprep.mubr.msk.f32.mxu1 %vm414_vm1, %v22272_v22  ;;  %v5399_v37 = vpop.f32.mrf.mxu0  ;;  %v22277_v22 = vld [vmem:[#allocation63_spill] sm:$0xff] }
 0x266   : > { %v4999_v31 = vpop.f32.mrf.mxu1  ;;  %v19306_v51 = vadd.f32 %v5399_v37, %v19115_v6  ;;  %v19346_v37 = vld [vmem:[%s17686_s20 + $0x1c9] sm:$0xff] }
 0x267   : > { %v19303_v8 = vadd.f32 %v4999_v31, %v19028_v46  ;;  %v14838_v63 = vpop.f32.mrf.mxu0  ;;  %15115 = vmatmul.mubr.msk.f32.gmra.mxu0 %vm414_vm1, %v18571_v5  ;;  %v22274_v46 = vld [vmem:[#allocation60_spill] sm:$0xff] }
 0x268   : > { %v14800_v23 = vpop.f32.mrf.mxu1  ;;  %15077 = vmatmul.mubr.msk.f32.gmra.mxu1 %vm414_vm1, %v22273_v14  ;;  %v19316_v32 = vadd.f32 %v14838_v63, %v19125_v10  ;;  %15117 = vmatprep.mubr.msk.f32.mxu0 %vm414_vm1, %v18594_v45  ;;  %v22276_v10 = vld [vmem:[#allocation64_spill] sm:$0xff]  ;;  %v22278_v14 = vld [vmem:[#allocation65_spill] sm:$0xff] }
 0x269   : > { %v19313_v16 = vadd.f32 %v14800_v23, %v19038_v29  ;;  %15079 = vmatprep.mubr.msk.f32.mxu1 %vm414_vm1, %v22274_v46  ;;  %v5409_v33 = vpop.f32.mrf.mxu0 }
 0x26a   : > { %v5009_v6 = vpop.f32.mrf.mxu1  ;;  %v19326_v5 = vadd.f32 %v5409_v33, %v19141_v12  ;;  %v12652_v33 = vld [vmem:[%s17686_s20 + $0x40] sm:$0xff] }
 0x26b   : > { %v19323_v57 = vadd.f32 %v5009_v6, %v19054_v13  ;;  %v14841_v58 = vpop.f32.mrf.mxu0  ;;  %15118 = vmatmul.mubr.msk.f32.gmra.mxu0 %vm414_vm1, %v22276_v10  ;;  %v19343_v13 = vld [vmem:[%s17686_s20 + $0x1c1] sm:$0xff] }
 0x26c   : > { %v14803_v29 = vpop.f32.mrf.mxu1  ;;  %15080 = vmatmul.mubr.msk.f32.gmra.mxu1 %vm414_vm1, %v22275_v4  ;;  %v19336_v45 = vadd.f32 %v14841_v58, %v19151_v0  ;;  %15120 = vmatprep.mubr.msk.f32.mxu0 %vm414_vm1, %v18629_v62  ;;  %v22279_v4 = vld [vmem:[#allocation3_spill] sm:$0xff] }
 0x26d   : > { %v19333_v61 = vadd.f32 %v14803_v29, %v19061_v26  ;;  %15082 = vmatprep.mubr.msk.f32.mxu1 %vm414_vm1, %v22277_v22  ;;  %v5419_v31 = vpop.f32.mrf.mxu0  ;;  %v22280_v22 = vld [vmem:[#allocation26_spill] sm:$0xff] }
 0x26e   : > { %v5019_v12 = vpop.f32.mrf.mxu1  ;;  %v19352_v0 = vadd.f32 %v5419_v31, %v19166_v18 }
 0x26f   : > { %v19349_v26 = vadd.f32 %v5019_v12, %v19083_v52  ;;  %v14844_v63 = vpop.f32.mrf.mxu0  ;;  %15121 = vmatmul.mubr.msk.f32.gmra.mxu0 %vm414_vm1, %v22278_v14  ;;  %v19369_v52 = vld [vmem:[%s17686_s20 + $0x1d1] sm:$0xff]  ;;  %v22281_v14 = vld [vmem:[#allocation66_spill] sm:$0xff] }
 0x270   : > { %v14806_v23 = vpop.f32.mrf.mxu1  ;;  %15083 = vmatmul.mubr.msk.f32.gmra.mxu1 %vm414_vm1, %v19343_v13  ;;  %v19362_v46 = vadd.f32 %v14844_v63, %v19176_v53  ;;  %15123 = vmatprep.mubr.msk.f32.mxu0 %vm414_vm1, %v18655_v42 }
 0x271   : > { %v19359_v62 = vadd.f32 %v14806_v23, %v19093_v19  ;;  %15085 = vmatprep.mubr.msk.f32.mxu1 %vm414_vm1, %v19346_v37  ;;  %v5429_v6 = vpop.f32.mrf.mxu0 }
 0x272   : > { %v5029_v18 = vpop.f32.mrf.mxu1  ;;  %v19376_v19 = vadd.f32 %v5429_v6, %v19186_v15 }
 0x273   : > { %v19373_v29 = vadd.f32 %v5029_v18, %v19112_v9  ;;  %v14847_v58 = vpop.f32.mrf.mxu0  ;;  %15124 = vmatmul.mubr.msk.f32.gmra.mxu0 %vm414_vm1, %v22279_v4  ;;  %v12653_v9 = vld [vmem:[%s17686_s20 + $0x48] sm:$0xff] }
 0x274   : > { %v14809_v53 = vpop.f32.mrf.mxu1  ;;  %15086 = vmatmul.mubr.msk.f32.gmra.mxu1 %vm414_vm1, %v19369_v52  ;;  %v19386_v10 = vadd.f32 %v14847_v58, %v19196_v40  ;;  %15126 = vmatprep.mubr.msk.f32.mxu0 %vm414_vm1, %v22280_v22  ;;  %v12656_v58 = vld [vmem:[%s17686_s20 + $0x68] sm:$0xff] }
 0x275   : > { %v19383_v42 = vadd.f32 %v14809_v53, %v19122_v7  ;;  %15155 = vmatprep.mubr.msk.f32.mxu1 %vm414_vm1, %v12652_v33  ;;  %v5439_v12 = vpop.f32.mrf.mxu0  ;;  %v12654_v7 = vld [vmem:[%s17686_s20 + $0x50] sm:$0xff] }
 0x276   : > { %v5039_v15 = vpop.f32.mrf.mxu1  ;;  %v19396_v23 = vadd.f32 %v5439_v12, %v19206_v49  ;;  %v12655_v49 = vld [vmem:[%s17686_s20 + $0x60] sm:$0xff]  ;;  %v22284_v12 = vld [vmem:[#allocation27_spill] sm:$0xff] }
 0x277   : > { %v19393_v31 = vadd.f32 %v5039_v15, %v19138_v21  ;;  %v14850_v40 = vpop.f32.mrf.mxu0  ;;  %15127 = vmatmul.mubr.msk.f32.gmra.mxu0 %vm414_vm1, %v22281_v14  ;;  %v22282_v21 = vld [vmem:[#allocation4_spill] sm:$0xff] }
 0x278   : > { %v14812_v63 = vpop.f32.mrf.mxu1  ;;  %15156 = vmatmul.mubr.msk.f32.vlgmr.msra.gmra.mxu1 %vm414_vm1, %v12653_v9  ;;  %v19406_v6 = vadd.f32 %v14850_v40, %v19216_v2  ;;  %15129 = vmatprep.mubr.msk.f32.mxu0 %vm414_vm1, %v22282_v21  ;;  %v22285_v21 = vld [vmem:[#allocation5_spill] sm:$0xff] }
 0x279   : > { %v19403_v18 = vadd.f32 %v14812_v63, %v19148_v35  ;;  %15284 = vmatpush3.msk.msra.mxu1 %vm541_vm0, %v18896_v1  ;;  %v5449_v53 = vpop.f32.mrf.mxu0  ;;  %15158 = vmatprep.mubr.msk.f32.mxu1 %vm414_vm1, %v12654_v7  ;;  %v22283_v1 = vld [vmem:[#allocation67_spill] sm:$0xff]  ;;  %v12658_v63 = vld [vmem:[%s17686_s20 + $0x80] sm:$0xff] }
 0x27a   : > { %v5049_v33 = vpop.f32.mrf.mxu1  ;;  %v19419_v2 = vadd.f32 %v5449_v53, %v19226_v59  ;;  %v22286_v53 = vld [vmem:[#allocation28_spill] sm:$0xff] }
 0x27b   : > { %v19416_v35 = vadd.f32 %v5049_v33, %v19163_v28  ;;  %v14853_v22 = vpop.f32.mrf.mxu0  ;;  %15130 = vmatmul.mubr.msk.f32.gmra.mxu0 %vm414_vm1, %v22283_v1  ;;  %v12657_v28 = vld [vmem:[%s17686_s20 + $0x70] sm:$0xff] }
 0x27c   : > { %v14815_v4 = vpop.f32.mrf.mxu1  ;;  %15159 = vmatmul.mubr.msk.f32.gmra.mxu1 %vm414_vm1, %v12655_v49  ;;  %v19428_v15 = vadd.f32 %v14853_v22, %v19236_v54  ;;  %15132 = vmatprep.mubr.msk.f32.mxu0 %vm414_vm1, %v22284_v12  ;;  %v22287_v12 = vld [vmem:[#allocation6_spill] sm:$0xff] }
 0x27d   : > { %v19425_v9 = vadd.f32 %v14815_v4, %v19173_v27  ;;  %15161 = vmatprep.mubr.msk.f32.mxu1 %vm414_vm1, %v12656_v58  ;;  %v5459_v7 = vpop.f32.mrf.mxu0  ;;  %v12660_v4 = vld [vmem:[%s17686_s20 + $0x90] sm:$0xff] }
 0x27e   : > { %v5059_v59 = vpop.f32.mrf.mxu1  ;;  %v19439_v27 = vadd.f32 %v5459_v7, %v19246_v24  ;;  %v22288_v7 = vld [vmem:[#allocation29_spill] sm:$0xff] }
 0x27f   : > { %v19436_v40 = vadd.f32 %v5059_v59, %v19183_v44  ;;  %v14856_v54 = vpop.f32.mrf.mxu0  ;;  %15133 = vmatmul.mubr.msk.f32.gmra.mxu0 %vm414_vm1, %v22285_v21  ;;  %v12659_v44 = vld [vmem:[%s17686_s20 + $0x88] sm:$0xff] }
 0x280   : > { %v14818_v14 = vpop.f32.mrf.mxu1  ;;  %15162 = vmatmul.mubr.msk.f32.gmra.mxu1 %vm414_vm1, %v12657_v28  ;;  %v19448_v33 = vadd.f32 %v14856_v54, %v19256_v47  ;;  %15135 = vmatprep.mubr.msk.f32.mxu0 %vm414_vm1, %v22286_v53  ;;  %v22289_v53 = vld [vmem:[#allocation7_spill] sm:$0xff] }
 0x281   : > { %v19445_v49 = vadd.f32 %v14818_v14, %v19193_v50  ;;  %15164 = vmatprep.mubr.msk.f32.mxu1 %vm414_vm1, %v12658_v63  ;;  %v5469_v58 = vpop.f32.mrf.mxu0  ;;  %v12662_v14 = vld [vmem:[%s17686_s20 + $0xa8] sm:$0xff] }
 0x282   : > { %v5069_v24 = vpop.f32.mrf.mxu1  ;;  %v19459_v50 = vadd.f32 %v5469_v58, %v19266_v11  ;;  %v22290_v58 = vld [vmem:[#allocation30_spill] sm:$0xff] }
 0x283   : > { %v19456_v22 = vadd.f32 %v5069_v24, %v19203_v17  ;;  %v14859_v47 = vpop.f32.mrf.mxu0  ;;  %15136 = vmatmul.mubr.msk.f32.gmra.mxu0 %vm414_vm1, %v22287_v12  ;;  %v12661_v17 = vld [vmem:[%s17686_s20 + $0xa0] sm:$0xff] }
 0x284   : > { %v14821_v1 = vpop.f32.mrf.mxu1  ;;  %15165 = vmatmul.mubr.msk.f32.gmra.mxu1 %vm414_vm1, %v12659_v44  ;;  %v19468_v59 = vadd.f32 %v14859_v47, %v19273_v25  ;;  %15138 = vmatprep.mubr.msk.f32.mxu0 %vm414_vm1, %v22288_v7  ;;  %v22291_v7 = vld [vmem:[#allocation8_spill] sm:$0xff] }
 0x285   : > { %v19465_v28 = vadd.f32 %v14821_v1, %v19213_v30  ;;  %15167 = vmatprep.mubr.msk.f32.mxu1 %vm414_vm1, %v12660_v4  ;;  %v5479_v63 = vpop.f32.mrf.mxu0  ;;  %v12664_v1 = vld [vmem:[%s17686_s20 + $0xc0] sm:$0xff] }
 0x286   : > { %v5079_v11 = vpop.f32.mrf.mxu1  ;;  %v19479_v30 = vadd.f32 %v5479_v63, %v19283_v56  ;;  %v22292_v63 = vld [vmem:[#allocation31_spill] sm:$0xff] }
 0x287   : > { %v19476_v54 = vadd.f32 %v5079_v11, %v19223_v39  ;;  %v14862_v25 = vpop.f32.mrf.mxu0  ;;  %15139 = vmatmul.mubr.msk.f32.gmra.mxu0 %vm414_vm1, %v22289_v53  ;;  %v12663_v39 = vld [vmem:[%s17686_s20 + $0xb0] sm:$0xff] }
 0x288   : > { %v14824_v21 = vpop.f32.mrf.mxu1  ;;  %15168 = vmatmul.mubr.msk.f32.gmra.mxu1 %vm414_vm1, %v12661_v17  ;;  %v19488_v24 = vadd.f32 %v14862_v25, %v19293_v55  ;;  %15141 = vmatprep.mubr.msk.f32.mxu0 %vm414_vm1, %v22290_v58  ;;  %v22293_v58 = vld [vmem:[#allocation9_spill] sm:$0xff] }
 0x289   : > { %v19485_v44 = vadd.f32 %v14824_v21, %v19233_v48  ;;  %15170 = vmatprep.mubr.msk.f32.mxu1 %vm414_vm1, %v12662_v14  ;;  %v5489_v4 = vpop.f32.mrf.mxu0  ;;  %v12666_v21 = vld [vmem:[%s17686_s20 + $0xd0] sm:$0xff] }
 0x28a   : > { %v5089_v56 = vpop.f32.mrf.mxu1  ;;  %v19499_v48 = vadd.f32 %v5489_v4, %v19303_v8  ;;  %v22294_v4 = vld [vmem:[#allocation32_spill] sm:$0xff] }
 0x28b   : > { %v19496_v47 = vadd.f32 %v5089_v56, %v19243_v36  ;;  %v14865_v55 = vpop.f32.mrf.mxu0  ;;  %15142 = vmatmul.mubr.msk.f32.gmra.mxu0 %vm414_vm1, %v22291_v7  ;;  %v12665_v36 = vld [vmem:[%s17686_s20 + $0xc8] sm:$0xff] }
 0x28c   : > { %v14827_v12 = vpop.f32.mrf.mxu1  ;;  %15171 = vmatmul.mubr.msk.f32.gmra.mxu1 %vm414_vm1, %v12663_v39  ;;  %v19508_v11 = vadd.f32 %v14865_v55, %v19313_v16  ;;  %15144 = vmatprep.mubr.msk.f32.mxu0 %vm414_vm1, %v22292_v63  ;;  %v19538_v55 = vld [vmem:[%s17686_s20 + $0x1ca] sm:$0xff] }
 0x28d   : > { %v19505_v17 = vadd.f32 %v14827_v12, %v19253_v60  ;;  %15173 = vmatprep.mubr.msk.f32.mxu1 %vm414_vm1, %v12664_v1  ;;  %v5499_v14 = vpop.f32.mrf.mxu0 }
 0x28e   : > { %v5099_v8 = vpop.f32.mrf.mxu1  ;;  %v19519_v60 = vadd.f32 %v5499_v14, %v19323_v57  ;;  %v12667_v57 = vld [vmem:[%s17686_s20 + $0xe0] sm:$0xff] }
 0x28f   : > { %v19516_v25 = vadd.f32 %v5099_v8, %v19263_v38  ;;  %v14868_v16 = vpop.f32.mrf.mxu0  ;;  %15145 = vmatmul.mubr.msk.f32.gmra.mxu0 %vm414_vm1, %v22293_v58  ;;  %v19534_v38 = vld [vmem:[%s17686_s20 + $0x1c2] sm:$0xff] }
 0x290   : > { %v14897_v53 = vpop.f32.mrf.mxu1  ;;  %15174 = vmatmul.mubr.msk.f32.gmra.mxu1 %vm414_vm1, %v12665_v36  ;;  %v19525_v39 = vadd.f32 %v14868_v16, %v19333_v61  ;;  %15147 = vmatprep.mubr.msk.f32.mxu0 %vm414_vm1, %v22294_v4  ;;  %v12668_v61 = vld [vmem:[%s17686_s20 + $0xe8] sm:$0xff] }
 0x291   : > { %v19528_v56 = vadd.f32 %v14897_v53, %v19276_v43  ;;  %15176 = vmatprep.mubr.msk.f32.mxu1 %vm414_vm1, %v12666_v21  ;;  %v5509_v1 = vpop.f32.mrf.mxu0  ;;  %v12670_v53 = vld [vmem:[%s17686_s20 + $0x100] sm:$0xff] }
 0x292   : > { %v5879_v12 = vpop.f32.mrf.mxu1  ;;  %v19542_v7 = vadd.f32 %v5509_v1, %v19349_v26  ;;  %v12669_v26 = vld [vmem:[%s17686_s20 + $0xf0] sm:$0xff] }
 0x293   : > { %v19545_v43 = vadd.f32 %v5879_v12, %v19286_v34  ;;  %v14871_v63 = vpop.f32.mrf.mxu0  ;;  %15148 = vmatmul.mubr.msk.f32.gmra.mxu0 %vm414_vm1, %v19534_v38  ;;  %v19560_v34 = vld [vmem:[%s17686_s20 + $0x1d2] sm:$0xff] }
 0x294   : > { %v14900_v36 = vpop.f32.mrf.mxu1  ;;  %15177 = vmatmul.mubr.msk.f32.gmra.mxu1 %vm414_vm1, %v12667_v57  ;;  %v19551_v8 = vadd.f32 %v14871_v63, %v19359_v62  ;;  %15150 = vmatprep.mubr.msk.f32.mxu0 %vm414_vm1, %v19538_v55  ;;  %v12672_v63 = vld [vmem:[%s17686_s20 + $0x110] sm:$0xff] }
 0x295   : > { %v19554_v14 = vadd.f32 %v14900_v36, %v19296_v20  ;;  %15179 = vmatprep.mubr.msk.f32.mxu1 %vm414_vm1, %v12668_v61  ;;  %v5519_v21 = vpop.f32.mrf.mxu0 }
 0x296   : > { %v5889_v16 = vpop.f32.mrf.mxu1  ;;  %v19565_v58 = vadd.f32 %v5519_v21, %v19373_v29  ;;  %v22295_v29 = vld [vmem:[#allocation10_spill] sm:$0xff]  ;;  %v22296_v21 = vld [vmem:[#allocation33_spill] sm:$0xff] }
 0x297   : > { %v19568_v62 = vadd.f32 %v5889_v16, %v19306_v51  ;;  %v14874_v20 = vpop.f32.mrf.mxu0  ;;  %15151 = vmatmul.mubr.msk.f32.gmra.mxu0 %vm414_vm1, %v19560_v34  ;;  %v12671_v51 = vld [vmem:[%s17686_s20 + $0x108] sm:$0xff] }
 0x298   : > { %v14903_v4 = vpop.f32.mrf.mxu1  ;;  %15180 = vmatmul.mubr.msk.f32.gmra.mxu1 %vm414_vm1, %v12669_v26  ;;  %v19574_v57 = vadd.f32 %v14874_v20, %v19383_v42  ;;  %15220 = vmatprep.mubr.msk.f32.mxu0 %vm414_vm1, %v22295_v29  ;;  %v12674_v29 = vld [vmem:[%s17686_s20 + $0x128] sm:$0xff] }
 0x299   : > { %v19577_v1 = vadd.f32 %v14903_v4, %v19316_v32  ;;  %15182 = vmatprep.mubr.msk.f32.mxu1 %vm414_vm1, %v12670_v53  ;;  %v5529_v12 = vpop.f32.mrf.mxu0 }
 0x29a   : > { %v5899_v61 = vpop.f32.mrf.mxu1  ;;  %v19585_v36 = vadd.f32 %v5529_v12, %v19393_v31  ;;  %v22297_v31 = vld [vmem:[#allocation11_spill] sm:$0xff] }
 0x29b   : > { %v19588_v42 = vadd.f32 %v5899_v61, %v19326_v5  ;;  %v14877_v26 = vpop.f32.mrf.mxu0  ;;  %15221 = vmatmul.mubr.msk.f32.vlgmr.msra.gmra.mxu0 %vm414_vm1, %v22296_v21  ;;  %v12673_v5 = vld [vmem:[%s17686_s20 + $0x120] sm:$0xff]  ;;  %v22298_v61 = vld [vmem:[#allocation34_spill] sm:$0xff] }
 0x29c   : > { %v14906_v32 = vpop.f32.mrf.mxu1  ;;  %15183 = vmatmul.mubr.msk.f32.gmra.mxu1 %vm414_vm1, %v12671_v51  ;;  %v19594_v16 = vadd.f32 %v14877_v26, %v19403_v18  ;;  %15223 = vmatprep.mubr.msk.f32.mxu0 %vm414_vm1, %v22297_v31  ;;  %v12676_v31 = vld [vmem:[%s17686_s20 + $0x140] sm:$0xff] }
 0x29d   : > { %v19597_v53 = vadd.f32 %v14906_v32, %v19336_v45  ;;  %15185 = vmatprep.mubr.msk.f32.mxu1 %vm414_vm1, %v12672_v63  ;;  %v5539_v20 = vpop.f32.mrf.mxu0 }
 0x29e   : > { %v5909_v4 = vpop.f32.mrf.mxu1  ;;  %v19605_v51 = vadd.f32 %v5539_v20, %v19416_v35  ;;  %v22299_v35 = vld [vmem:[#allocation12_spill] sm:$0xff] }
 0x29f   : > { %v19608_v18 = vadd.f32 %v5909_v4, %v19352_v0  ;;  %v14880_v12 = vpop.f32.mrf.mxu0  ;;  %15224 = vmatmul.mubr.msk.f32.gmra.mxu0 %vm414_vm1, %v22298_v61  ;;  %v12675_v0 = vld [vmem:[%s17686_s20 + $0x130] sm:$0xff] }
 0x2a0   : > { %v14909_v45 = vpop.f32.mrf.mxu1  ;;  %15186 = vmatmul.mubr.msk.f32.gmra.mxu1 %vm414_vm1, %v12673_v5  ;;  %v19614_v63 = vadd.f32 %v14880_v12, %v19425_v9  ;;  %15226 = vmatprep.mubr.msk.f32.mxu0 %vm414_vm1, %v22299_v35  ;;  %v22300_v4 = vld [vmem:[#allocation35_spill] sm:$0xff] }
 0x2a1   : > { %v19617_v26 = vadd.f32 %v14909_v45, %v19362_v46  ;;  %15188 = vmatprep.mubr.msk.f32.mxu1 %vm414_vm1, %v12674_v29  ;;  %v5549_v32 = vpop.f32.mrf.mxu0  ;;  %v12678_v35 = vld [vmem:[%s17686_s20 + $0x150] sm:$0xff] }
 0x2a2   : > { %v5919_v21 = vpop.f32.mrf.mxu1  ;;  %v19625_v5 = vadd.f32 %v5549_v32, %v19436_v40  ;;  %v22301_v40 = vld [vmem:[#allocation13_spill] sm:$0xff] }
 0x2a3   : > { %v19628_v9 = vadd.f32 %v5919_v21, %v19376_v19  ;;  %v14883_v20 = vpop.f32.mrf.mxu0  ;;  %15227 = vmatmul.mubr.msk.f32.gmra.mxu0 %vm414_vm1, %v22300_v4  ;;  %v12677_v19 = vld [vmem:[%s17686_s20 + $0x148] sm:$0xff]  ;;  %v22302_v21 = vld [vmem:[#allocation36_spill] sm:$0xff] }
 0x2a4   : > { %v14912_v46 = vpop.f32.mrf.mxu1  ;;  %15189 = vmatmul.mubr.msk.f32.gmra.mxu1 %vm414_vm1, %v12675_v0  ;;  %v19634_v29 = vadd.f32 %v14883_v20, %v19445_v49  ;;  %15229 = vmatprep.mubr.msk.f32.mxu0 %vm414_vm1, %v22301_v40  ;;  %v12680_v40 = vld [vmem:[%s17686_s20 + $0x168] sm:$0xff] }
 0x2a5   : > { %v19637_v12 = vadd.f32 %v14912_v46, %v19386_v10  ;;  %15191 = vmatprep.mubr.msk.f32.mxu1 %vm414_vm1, %v12676_v31  ;;  %v5559_v45 = vpop.f32.mrf.mxu0 }
 0x2a6   : > { %v5929_v61 = vpop.f32.mrf.mxu1  ;;  %v19645_v0 = vadd.f32 %v5559_v45, %v19456_v22  ;;  %v22303_v22 = vld [vmem:[#allocation14_spill] sm:$0xff] }
 0x2a7   : > { %v19648_v49 = vadd.f32 %v5929_v61, %v19396_v23  ;;  %v14886_v32 = vpop.f32.mrf.mxu0  ;;  %15230 = vmatmul.mubr.msk.f32.gmra.mxu0 %vm414_vm1, %v22302_v21  ;;  %v12679_v23 = vld [vmem:[%s17686_s20 + $0x160] sm:$0xff] }
 0x2a8   : > { %v14915_v10 = vpop.f32.mrf.mxu1  ;;  %15192 = vmatmul.mubr.msk.f32.gmra.mxu1 %vm414_vm1, %v12677_v19  ;;  %v19654_v31 = vadd.f32 %v14886_v32, %v19465_v28  ;;  %15232 = vmatprep.mubr.msk.f32.mxu0 %vm414_vm1, %v22303_v22  ;;  %v22304_v61 = vld [vmem:[#allocation37_spill] sm:$0xff] }
 0x2a9   : > { %v19657_v20 = vadd.f32 %v14915_v10, %v19406_v6  ;;  %15194 = vmatprep.mubr.msk.f32.mxu1 %vm414_vm1, %v12678_v35  ;;  %v5569_v46 = vpop.f32.mrf.mxu0  ;;  %v12682_v22 = vld [vmem:[%s17686_s20 + $0x180] sm:$0xff] }
 0x2aa   : > { %v5939_v4 = vpop.f32.mrf.mxu1  ;;  %v19665_v19 = vadd.f32 %v5569_v46, %v19476_v54  ;;  %v22305_v54 = vld [vmem:[#allocation38_spill] sm:$0xff] }
 0x2ab   : > { %v19668_v28 = vadd.f32 %v5939_v4, %v19419_v2  ;;  %v14889_v45 = vpop.f32.mrf.mxu0  ;;  %15233 = vmatmul.mubr.msk.f32.gmra.mxu0 %vm414_vm1, %v22304_v61  ;;  %v12681_v2 = vld [vmem:[%s17686_s20 + $0x170] sm:$0xff] }
 0x2ac   : > { %v14918_v6 = vpop.f32.mrf.mxu1  ;;  %15195 = vmatmul.mubr.msk.f32.gmra.mxu1 %vm414_vm1, %v12679_v23  ;;  %v19674_v35 = vadd.f32 %v14889_v45, %v19485_v44  ;;  %15235 = vmatprep.mubr.msk.f32.mxu0 %vm414_vm1, %v22305_v54  ;;  %v22306_v4 = vld [vmem:[#allocation39_spill] sm:$0xff] }
 0x2ad   : > { %v19677_v32 = vadd.f32 %v14918_v6, %v19428_v15  ;;  %15197 = vmatprep.mubr.msk.f32.mxu1 %vm414_vm1, %v12680_v40  ;;  %v5579_v10 = vpop.f32.mrf.mxu0  ;;  %v12684_v61 = vld [vmem:[%s17686_s20 + $0x190] sm:$0xff] }
 0x2ae   : > { %v5949_v21 = vpop.f32.mrf.mxu1  ;;  %v19685_v23 = vadd.f32 %v5579_v10, %v19496_v47  ;;  %v22307_v10 = vld [vmem:[#allocation43_spill] sm:$0xff] }
 0x2af   : > { %v19688_v44 = vadd.f32 %v5949_v21, %v19439_v27  ;;  %v14892_v46 = vpop.f32.mrf.mxu0  ;;  %15236 = vmatmul.mubr.msk.f32.gmra.mxu0 %vm414_vm1, %v22306_v4  ;;  %v12683_v27 = vld [vmem:[%s17686_s20 + $0x188] sm:$0xff] }
 0x2b0   : > { %v14921_v15 = vpop.f32.mrf.mxu1  ;;  %15198 = vmatmul.mubr.msk.f32.gmra.mxu1 %vm414_vm1, %v12681_v2  ;;  %v19694_v40 = vadd.f32 %v14892_v46, %v19505_v17  ;;  %15238 = vmatprep.mubr.msk.f32.mxu0 %vm414_vm1, %v19074_v3 }
 0x2b1   : > { %v19697_v45 = vadd.f32 %v14921_v15, %v19448_v33  ;;  %15200 = vmatprep.mubr.msk.f32.mxu1 %vm414_vm1, %v12682_v22  ;;  %v5589_v47 = vpop.f32.mrf.mxu0  ;;  %v12686_v15 = vld [vmem:[%s17686_s20 + $0x1a8] sm:$0xff] }
 0x2b2   : > { %v5959_v6 = vpop.f32.mrf.mxu1  ;;  %v19705_v54 = vadd.f32 %v5589_v47, %v19516_v25  ;;  %v22308_v25 = vld [vmem:[#allocation45_spill] sm:$0xff] }
 0x2b3   : > { %v19708_v17 = vadd.f32 %v5959_v6, %v19459_v50  ;;  %v14962_v33 = vpop.f32.mrf.mxu0  ;;  %15239 = vmatmul.mubr.msk.f32.gmra.mxu0 %vm414_vm1, %v22307_v10  ;;  %v12685_v50 = vld [vmem:[%s17686_s20 + $0x1a0] sm:$0xff] }
 0x2b4   : > { %v14924_v2 = vpop.f32.mrf.mxu1  ;;  %15201 = vmatmul.mubr.msk.f32.gmra.mxu1 %vm414_vm1, %v12683_v27  ;;  %v19717_v21 = vadd.f32 %v14962_v33, %v19528_v56  ;;  %15241 = vmatprep.mubr.msk.f32.mxu0 %vm414_vm1, %v22308_v25  ;;  %v22310_v56 = vld [vmem:[#allocation68_spill] sm:$0xff] }
 0x2b5   : > { %v19714_v3 = vadd.f32 %v14924_v2, %v19468_v59  ;;  %15203 = vmatprep.mubr.msk.f32.mxu1 %vm414_vm1, %v12684_v61  ;;  %v6370_v46 = vpop.f32.mrf.mxu0 }
 0x2b6   : > { %v5969_v22 = vpop.f32.mrf.mxu1  ;;  %v19728_v27 = vadd.f32 %v6370_v46, %v19545_v43 }
 0x2b7   : > { %v19725_v4 = vadd.f32 %v5969_v22, %v19479_v30  ;;  %v14965_v47 = vpop.f32.mrf.mxu0  ;;  %15242 = vmatmul.mubr.msk.f32.gmra.mxu0 %vm414_vm1, %v22310_v56  ;;  %v12687_v30 = vld [vmem:[%s17686_s20 + $0x1b0] sm:$0xff]  ;;  %v22313_v22 = vld [vmem:[#allocation40_spill] sm:$0xff] }
 0x2b8   : > { %v14927_v59 = vpop.f32.mrf.mxu1  ;;  %15204 = vmatmul.mubr.msk.f32.gmra.mxu1 %vm414_vm1, %v12685_v50  ;;  %v19737_v61 = vadd.f32 %v14965_v47, %v19554_v14  ;;  %15244 = vmatprep.mubr.msk.f32.mxu0 %vm414_vm1, %v19132_v41  ;;  %v22312_v14 = vld [vmem:[#allocation49_spill] sm:$0xff] }
 0x2b9   : > { %22309 = vst [vmem:[#allocation53_spill] sm:$0xff] %v19725_v4  ;;  %v19734_v6 = vadd.f32 %v14927_v59, %v19488_v24  ;;  %15206 = vmatprep.mubr.msk.f32.mxu1 %vm414_vm1, %v12686_v15  ;;  %v6380_v2 = vpop.f32.mrf.mxu0  ;;  %v12758_v59 = vld [vmem:[%s17686_s20 + $0x111] sm:$0xff] }
 0x2ba   : > { %v5979_v43 = vpop.f32.mrf.mxu1  ;;  %v19747_v10 = vadd.f32 %v6380_v2, %v19568_v62  ;;  %v12757_v62 = vld [vmem:[%s17686_s20 + $0x109] sm:$0xff] }
 0x2bb   : > { %v19744_v33 = vadd.f32 %v5979_v43, %v19499_v48  ;;  %v14968_v25 = vpop.f32.mrf.mxu0  ;;  %15245 = vmatmul.mubr.msk.f32.gmra.mxu0 %vm414_vm1, %v22312_v14  ;;  %v22314_v48 = vld [vmem:[#allocation51_spill] sm:$0xff] }
 0x2bc   : > { %v14930_v24 = vpop.f32.mrf.mxu1  ;;  %15207 = vmatmul.mubr.msk.f32.gmra.mxu1 %vm414_vm1, %v12687_v30  ;;  %v19756_v41 = vadd.f32 %v14968_v25, %v19577_v1  ;;  %15247 = vmatprep.mubr.msk.f32.mxu0 %vm414_vm1, %v22314_v48  ;;  %v22316_v30 = vld [vmem:[#allocation41_spill] sm:$0xff]  ;;  %v12760_v48 = vld [vmem:[%s17686_s20 + $0x129] sm:$0xff] }
 0x2bd   : > { %22311 = vst [vmem:[#allocation55_spill] sm:$0xff] %v19744_v33  ;;  %v19753_v50 = vadd.f32 %v14930_v24, %v19508_v11  ;;  %15209 = vmatprep.mubr.msk.f32.mxu1 %vm414_vm1, %v22313_v22  ;;  %v6390_v15 = vpop.f32.mrf.mxu0  ;;  %v22317_v24 = vld [vmem:[#allocation44_spill] sm:$0xff]  ;;  %v12692_v22 = vld [vmem:[%s17686_s20 + $0x1e8] sm:$0xff] }
 0x2be   : > { %v5989_v46 = vpop.f32.mrf.mxu1  ;;  %v19768_v1 = vadd.f32 %v6390_v15, %v19588_v42  ;;  %v12759_v42 = vld [vmem:[%s17686_s20 + $0x121] sm:$0xff] }
 0x2bf   : > { %v19765_v11 = vadd.f32 %v5989_v46, %v19519_v60  ;;  %v14971_v56 = vpop.f32.mrf.mxu0  ;;  %15248 = vmatmul.mubr.msk.f32.gmra.mxu0 %vm414_vm1, %v12757_v62  ;;  %v12691_v60 = vld [vmem:[%s17686_s20 + $0x1e0] sm:$0xff] }
 0x2c0   : > { %v14933_v47 = vpop.f32.mrf.mxu1  ;;  %15210 = vmatmul.mubr.msk.f32.gmra.mxu1 %vm414_vm1, %v22316_v30  ;;  %v19777_v2 = vadd.f32 %v14971_v56, %v19597_v53  ;;  %15250 = vmatprep.mubr.msk.f32.mxu0 %vm414_vm1, %v12758_v59  ;;  %v12762_v30 = vld [vmem:[%s17686_s20 + $0x141] sm:$0xff] }
 0x2c1   : > { %22315 = vst [vmem:[#allocation46_spill] sm:$0xff] %v19765_v11  ;;  %v19774_v43 = vadd.f32 %v14933_v47, %v19525_v39  ;;  %15212 = vmatprep.mubr.msk.f32.mxu1 %vm414_vm1, %v22317_v24  ;;  %v6400_v14 = vpop.f32.mrf.mxu0  ;;  %v12824_v24 = vld [vmem:[%s17686_s20 + $0x42] sm:$0xff] }
 0x2c2   : > { %v5999_v25 = vpop.f32.mrf.mxu1  ;;  %v19790_v53 = vadd.f32 %v6400_v14, %v19608_v18  ;;  %v12761_v18 = vld [vmem:[%s17686_s20 + $0x131] sm:$0xff] }
 0x2c3   : > { %v19787_v39 = vadd.f32 %v5999_v25, %v19542_v7  ;;  %v14974_v46 = vpop.f32.mrf.mxu0  ;;  %15251 = vmatmul.mubr.msk.f32.gmra.mxu0 %vm414_vm1, %v12759_v42  ;;  %v12693_v7 = vld [vmem:[%s17686_s20 + $0x1f0] sm:$0xff] }
 0x2c4   : > { %v14936_v62 = vpop.f32.mrf.mxu1  ;;  %15213 = vmatmul.mubr.msk.f32.gmra.mxu1 %vm414_vm1, %v12691_v60  ;;  %v19798_v59 = vadd.f32 %v14974_v46, %v19617_v26  ;;  %15253 = vmatprep.mubr.msk.f32.mxu0 %vm414_vm1, %v12760_v48  ;;  %v12826_v46 = vld [vmem:[%s17686_s20 + $0x52] sm:$0xff] }
 0x2c5   : > { %22318 = vst [vmem:[#allocation15_spill] sm:$0xff] %v19787_v39  ;;  %v19795_v15 = vadd.f32 %v14936_v62, %v19551_v8  ;;  %15215 = vmatprep.mubr.msk.f32.mxu1 %vm414_vm1, %v12692_v22  ;;  %v6410_v56 = vpop.f32.mrf.mxu0  ;;  %v12764_v62 = vld [vmem:[%s17686_s20 + $0x151] sm:$0xff] }
 0x2c6   : > { %v6009_v47 = vpop.f32.mrf.mxu1  ;;  %v19810_v26 = vadd.f32 %v6410_v56, %v19628_v9  ;;  %v12825_v9 = vld [vmem:[%s17686_s20 + $0x4a] sm:$0xff] }
 0x2c7   : > { %v19807_v8 = vadd.f32 %v6009_v47, %v19565_v58  ;;  %v14977_v42 = vpop.f32.mrf.mxu0  ;;  %15254 = vmatmul.mubr.msk.f32.gmra.mxu0 %vm414_vm1, %v12761_v18  ;;  %v12763_v58 = vld [vmem:[%s17686_s20 + $0x149] sm:$0xff] }
 0x2c8   : > { %v14939_v60 = vpop.f32.mrf.mxu1  ;;  %15216 = vmatmul.mubr.msk.f32.gmra.mxu1 %vm414_vm1, %v12693_v7  ;;  %v19818_v14 = vadd.f32 %v14977_v42, %v19637_v12  ;;  %15256 = vmatprep.mubr.msk.f32.mxu0 %vm414_vm1, %v12762_v30  ;;  %v12828_v42 = vld [vmem:[%s17686_s20 + $0x6a] sm:$0xff] }
 0x2c9   : > { %22319 = vst [vmem:[#allocation47_spill] sm:$0xff] %v19807_v8  ;;  %v19815_v25 = vadd.f32 %v14939_v60, %v19574_v57  ;;  %15285 = vmatprep.mubr.msk.f32.mxu1 %vm414_vm1, %v12824_v24  ;;  %v6420_v48 = vpop.f32.mrf.mxu0  ;;  %v12766_v60 = vld [vmem:[%s17686_s20 + $0x169] sm:$0xff] }
 0x2ca   : > { %v6019_v22 = vpop.f32.mrf.mxu1  ;;  %v19830_v12 = vadd.f32 %v6420_v48, %v19648_v49  ;;  %v12827_v49 = vld [vmem:[%s17686_s20 + $0x62] sm:$0xff] }
 0x2cb   : > { %v19827_v57 = vadd.f32 %v6019_v22, %v19585_v36  ;;  %v14980_v18 = vpop.f32.mrf.mxu0  ;;  %15257 = vmatmul.mubr.msk.f32.gmra.mxu0 %vm414_vm1, %v12763_v58  ;;  %v12765_v36 = vld [vmem:[%s17686_s20 + $0x161] sm:$0xff] }
 0x2cc   : > { %v14942_v7 = vpop.f32.mrf.mxu1  ;;  %15286 = vmatmul.mubr.msk.f32.vlgmr.msra.gmra.mxu1 %vm414_vm1, %v12825_v9  ;;  %v19838_v56 = vadd.f32 %v14980_v18, %v19657_v20  ;;  %15259 = vmatprep.mubr.msk.f32.mxu0 %vm414_vm1, %v12764_v62  ;;  %v12830_v18 = vld [vmem:[%s17686_s20 + $0x82] sm:$0xff] }
 0x2cd   : > { %22320 = vst [vmem:[#allocation17_spill] sm:$0xff] %v19827_v57  ;;  %v19835_v47 = vadd.f32 %v14942_v7, %v19594_v16  ;;  %15288 = vmatprep.mubr.msk.f32.mxu1 %vm414_vm1, %v12826_v46  ;;  %v6430_v24 = vpop.f32.mrf.mxu0  ;;  %v12768_v7 = vld [vmem:[%s17686_s20 + $0x181] sm:$0xff]  ;;  %v12913_v57 = vld [vmem:[%s21829_s5 + $0x90] sm:$0xff] }
 0x2ce   : > { %v6029_v30 = vpop.f32.mrf.mxu1  ;;  %v19850_v20 = vadd.f32 %v6430_v24, %v19668_v28  ;;  %v12829_v28 = vld [vmem:[%s17686_s20 + $0x72] sm:$0xff]  ;;  %v12769_v24 = vld [vmem:[%s17686_s20 + $0x189] sm:$0xff] }
 0x2cf   : > { %v19847_v16 = vadd.f32 %v6029_v30, %v19605_v51  ;;  %v14983_v9 = vpop.f32.mrf.mxu0  ;;  %15260 = vmatmul.mubr.msk.f32.gmra.mxu0 %vm414_vm1, %v12765_v36  ;;  %v12767_v51 = vld [vmem:[%s17686_s20 + $0x171] sm:$0xff] }
 0x2d0   : > { %v14945_v58 = vpop.f32.mrf.mxu1  ;;  %15289 = vmatmul.mubr.msk.f32.gmra.mxu1 %vm414_vm1, %v12827_v49  ;;  %v19858_v48 = vadd.f32 %v14983_v9, %v19677_v32  ;;  %15262 = vmatprep.mubr.msk.f32.mxu0 %vm414_vm1, %v12766_v60  ;;  %v12832_v9 = vld [vmem:[%s17686_s20 + $0x92] sm:$0xff] }
 0x2d1   : > { %22321 = vst [vmem:[#allocation48_spill] sm:$0xff] %v19847_v16  ;;  %v19855_v22 = vadd.f32 %v14945_v58, %v19614_v63  ;;  %15291 = vmatprep.mubr.msk.f32.mxu1 %vm414_vm1, %v12828_v42  ;;  %v19864_v46 = vpop.f32.mrf.mxu0  ;;  %v12770_v58 = vld [vmem:[%s17686_s20 + $0x191] sm:$0xff] }
 0x2d2   : > { %v6039_v62 = vpop.f32.mrf.mxu1 }
 0x2d3   : > { %v19869_v63 = vadd.f32 %v6039_v62, %v19625_v5  ;;  %v14986_v36 = vpop.f32.mrf.mxu0  ;;  %15263 = vmatmul.mubr.msk.f32.gmra.mxu0 %vm414_vm1, %v12767_v51  ;;  %v12831_v5 = vld [vmem:[%s17686_s20 + $0x8a] sm:$0xff] }
 0x2d4   : > { %v14948_v32 = vpop.f32.mrf.mxu1  ;;  %15292 = vmatmul.mubr.msk.f32.gmra.mxu1 %vm414_vm1, %v12829_v28  ;;  %v19877_v30 = vadd.f32 %v14986_v36, %v19697_v45  ;;  %15265 = vmatprep.mubr.msk.f32.mxu0 %vm414_vm1, %v12768_v7  ;;  %v12771_v7 = vld [vmem:[%s17686_s20 + $0x1a1] sm:$0xff]  ;;  %v12772_v36 = vld [vmem:[%s17686_s20 + $0x1a9] sm:$0xff] }
 0x2d5   : > { %22322 = vst [vmem:[#allocation19_spill] sm:$0xff] %v19869_v63  ;;  %v19874_v49 = vadd.f32 %v14948_v32, %v19634_v29  ;;  %15294 = vmatprep.mubr.msk.f32.mxu1 %vm414_vm1, %v12830_v18  ;;  %v19883_v42 = vpop.f32.mrf.mxu0 }
 0x2d6   : > { %v6049_v60 = vpop.f32.mrf.mxu1  ;;  %22323 = vst [vmem:[#allocation50_spill] sm:$0xff] %v19883_v42 }
 0x2d7   : > { %v19888_v29 = vadd.f32 %v6049_v60, %v19645_v0  ;;  %v14989_v51 = vpop.f32.mrf.mxu0  ;;  %15266 = vmatmul.mubr.msk.f32.gmra.mxu0 %vm414_vm1, %v12769_v24  ;;  %v12833_v0 = vld [vmem:[%s17686_s20 + $0xa2] sm:$0xff]  ;;  %v12834_v24 = vld [vmem:[%s17686_s20 + $0xaa] sm:$0xff] }
 0x2d8   : > { %v14951_v45 = vpop.f32.mrf.mxu1  ;;  %15295 = vmatmul.mubr.msk.f32.gmra.mxu1 %vm414_vm1, %v12831_v5  ;;  %v19896_v62 = vadd.f32 %v14989_v51, %v19714_v3  ;;  %15268 = vmatprep.mubr.msk.f32.mxu0 %vm414_vm1, %v12770_v58 }
 0x2d9   : > { %22324 = vst [vmem:[#allocation23_spill] sm:$0xff] %v19888_v29  ;;  %v19893_v28 = vadd.f32 %v14951_v45, %v19654_v31  ;;  %15297 = vmatprep.mubr.msk.f32.mxu1 %vm414_vm1, %v12832_v9  ;;  %v19902_v32 = vpop.f32.mrf.mxu0  ;;  %v12773_v9 = vld [vmem:[%s17686_s20 + $0x1b1] sm:$0xff] }
 0x2da   : > { %v6059_v18 = vpop.f32.mrf.mxu1  ;;  %22325 = vst [vmem:[#allocation52_spill] sm:$0xff] %v19902_v32  ;;  %v12856_v29 = vld [vmem:[%s17686_s20 + $0x192] sm:$0xff] }
 0x2db   : > { %v19907_v31 = vadd.f32 %v6059_v18, %v19665_v19  ;;  %v14992_v3 = vpop.f32.mrf.mxu0  ;;  %15269 = vmatmul.mubr.msk.f32.gmra.mxu0 %vm414_vm1, %v12771_v7  ;;  %v12835_v19 = vld [vmem:[%s17686_s20 + $0xb2] sm:$0xff]  ;;  %v12836_v7 = vld [vmem:[%s17686_s20 + $0xc2] sm:$0xff] }
 0x2dc   : > { %v14954_v5 = vpop.f32.mrf.mxu1  ;;  %15298 = vmatmul.mubr.msk.f32.gmra.mxu1 %vm414_vm1, %v12833_v0  ;;  %v19915_v58 = vadd.f32 %v14992_v3, %v19734_v6  ;;  %15271 = vmatprep.mubr.msk.f32.mxu0 %vm414_vm1, %v12772_v36 }
 0x2dd   : > { %22326 = vst [vmem:[#allocation24_spill] sm:$0xff] %v19907_v31  ;;  %v19912_v60 = vadd.f32 %v14954_v5, %v19674_v35  ;;  %15300 = vmatprep.mubr.msk.f32.mxu1 %vm414_vm1, %v12834_v24  ;;  %v19921_v51 = vpop.f32.mrf.mxu0  ;;  %v12837_v24 = vld [vmem:[%s17686_s20 + $0xca] sm:$0xff] }
 0x2de   : > { %v6069_v45 = vpop.f32.mrf.mxu1  ;;  %22327 = vst [vmem:[#allocation54_spill] sm:$0xff] %v19921_v51 }
 0x2df   : > { %v19925_v0 = vadd.f32 %v6069_v45, %v19685_v23  ;;  %v14995_v18 = vpop.f32.mrf.mxu0  ;;  %15272 = vmatmul.mubr.msk.f32.gmra.mxu0 %vm414_vm1, %v12773_v9  ;;  %v12926_v23 = vld [vmem:[%s21829_s5 + $0xf8] sm:$0xff] }
 0x2e0   : > { %v14957_v35 = vpop.f32.mrf.mxu1  ;;  %15301 = vmatmul.mubr.msk.f32.gmra.mxu1 %vm414_vm1, %v12835_v19  ;;  %v19933_v36 = vadd.f32 %v14995_v18, %v19753_v50  ;;  %15274 = vmatprep.mubr.msk.f32.mxu0 %vm414_vm1, %v19343_v13  ;;  %v12778_v18 = vld [vmem:[%s17686_s20 + $0x1e9] sm:$0xff] }
 0x2e1   : > { %22328 = vst [vmem:[#allocation25_spill] sm:$0xff] %v19925_v0  ;;  %v19930_v6 = vadd.f32 %v14957_v35, %v19694_v40  ;;  %15303 = vmatprep.mubr.msk.f32.mxu1 %vm414_vm1, %v12836_v7  ;;  %v19942_v3 = vpop.f32.mrf.mxu0  ;;  %v12838_v40 = vld [vmem:[%s17686_s20 + $0xd2] sm:$0xff]  ;;  %15348 = vmatprep.subr.mxu0 %v12926_v23  ;;  %v12839_v7 = vld [vmem:[%s17686_s20 + $0xe2] sm:$0xff] }
 0x2e2   : > { %v6079_v5 = vpop.f32.mrf.mxu1  ;;  %22329 = vst [vmem:[#allocation42_spill] sm:$0xff] %v19942_v3  ;;  %15349 = vmatpush3.msra.mxu0 %v12926_v23 }
 0x2e3   : > { %v19946_v50 = vadd.f32 %v6079_v5, %v19705_v54  ;;  %v14998_v13 = vpop.f32.mrf.mxu0  ;;  %15275 = vmatmul.mubr.msk.f32.gmra.mxu0 %vm414_vm1, %v19346_v37  ;;  %v12777_v54 = vld [vmem:[%s17686_s20 + $0x1e1] sm:$0xff] }
 0x2e4   : > { %v15027_v9 = vpop.f32.mrf.mxu1  ;;  %15304 = vmatmul.mubr.msk.f32.gmra.mxu1 %vm414_vm1, %v12837_v24  ;;  %v19952_v19 = vadd.f32 %v14998_v13, %v19774_v43  ;;  %15277 = vmatprep.mubr.msk.f32.mxu0 %vm414_vm1, %v19369_v52  ;;  %v12840_v24 = vld [vmem:[%s17686_s20 + $0xea] sm:$0xff]  ;;  %v12841_v13 = vld [vmem:[%s17686_s20 + $0xf2] sm:$0xff] }
 0x2e5   : > { %22330 = vst [vmem:[#allocation57_spill] sm:$0xff] %v19946_v50  ;;  %v19955_v45 = vadd.f32 %v15027_v9, %v19717_v21  ;;  %15306 = vmatprep.mubr.msk.f32.mxu1 %vm414_vm1, %v12838_v40  ;;  %v19962_v35 = vpop.f32.mrf.mxu0  ;;  %v12925_v21 = vld [vmem:[%s21829_s5 + $0xf0] sm:$0xff]  ;;  %v9244_v50 = vld [vmem:[%s21829_s5 + $0x78] sm:$0xff] }
 0x2e6   : > { %22331 = vst [vmem:[#allocation16_spill] sm:$0xff] %v19962_v35  ;;  %v6860_v37 = vpop.f32.mrf.mxu1  ;;  %15350 = vmatprep.subr.mxu0 %v12925_v21  ;;  %15416 = vmatprep.subr.mxu1 %v9244_v50 }
 0x2e7   : > { %v19967_v43 = vadd.f32 %v6860_v37, %v19728_v27  ;;  %v15001_v52 = vpop.f32.mrf.mxu0  ;;  %15278 = vmatmul.mubr.msk.f32.gmra.mxu0 %vm414_vm1, %v12777_v54  ;;  %v12779_v27 = vld [vmem:[%s17686_s20 + $0x1f1] sm:$0xff]  ;;  %v12842_v54 = vld [vmem:[%s17686_s20 + $0x102] sm:$0xff]  ;;  %15417 = vmatpush3.msra.mxu1 %v9244_v50 }
 0x2e8   : > { %v15030_v23 = vpop.f32.mrf.mxu1  ;;  %15307 = vmatmul.mubr.msk.f32.gmra.mxu1 %vm414_vm1, %v12839_v7  ;;  %v19975_v5 = vadd.f32 %v15001_v52, %v19795_v15  ;;  %15280 = vmatprep.mubr.msk.f32.mxu0 %vm414_vm1, %v12778_v18  ;;  %v12843_v52 = vld [vmem:[%s17686_s20 + $0x10a] sm:$0xff] }
 0x2e9   : > { %v19978_v40 = vadd.f32 %v15030_v23, %v19737_v61  ;;  %15309 = vmatprep.mubr.msk.f32.mxu1 %vm414_vm1, %v12840_v24  ;;  %v19984_v9 = vpop.f32.mrf.mxu0  ;;  %15351 = vmatpush3.msra.mxu0 %v12925_v21  ;;  %v9242_v50 = vld [vmem:[%s21829_s5 + $0x68] sm:$0xff] }
 0x2ea   : > { %22332 = vst [vmem:[#allocation59_spill] sm:$0xff] %v19984_v9  ;;  %v6870_v37 = vpop.f32.mrf.mxu1 }
 0x2eb   : > { %v19988_v7 = vadd.f32 %v6870_v37, %v19747_v10  ;;  %v15004_v15 = vpop.f32.mrf.mxu0  ;;  %15281 = vmatmul.mubr.msk.f32.gmra.mxu0 %vm414_vm1, %v12779_v27  ;;  %v12924_v10 = vld [vmem:[%s21829_s5 + $0xe8] sm:$0xff]  ;;  %v12844_v27 = vld [vmem:[%s17686_s20 + $0x112] sm:$0xff] }
 0x2ec   : > { %v15033_v61 = vpop.f32.mrf.mxu1  ;;  %15310 = vmatmul.mubr.msk.f32.gmra.mxu1 %vm414_vm1, %v12841_v13  ;;  %v19993_v18 = vadd.f32 %v15004_v15, %v19815_v25  ;;  %15352 = vmatprep.subr.mxu0 %v12924_v10  ;;  %v12845_v15 = vld [vmem:[%s17686_s20 + $0x122] sm:$0xff] }
 0x2ed   : > { %v19996_v24 = vadd.f32 %v15033_v61, %v19756_v41  ;;  %15312 = vmatprep.mubr.msk.f32.mxu1 %vm414_vm1, %v12842_v54  ;;  %v20003_v21 = vpop.f32.mrf.mxu0  ;;  %15353 = vmatpush3.msra.mxu0 %v12924_v10 }
 0x2ee   : > { %22333 = vst [vmem:[#allocation18_spill] sm:$0xff] %v20003_v21  ;;  %v6880_v23 = vpop.f32.mrf.mxu1 }
 0x2ef   : > { %v20007_v25 = vadd.f32 %v6880_v23, %v19768_v1  ;;  %v15007_v41 = vpop.f32.mrf.mxu0  ;;  %v12923_v1 = vld [vmem:[%s21829_s5 + $0xe0] sm:$0xff]  ;;  %v12846_v23 = vld [vmem:[%s17686_s20 + $0x12a] sm:$0xff] }
 0x2f0   : > { %v15036_v13 = vpop.f32.mrf.mxu1  ;;  %15313 = vmatmul.mubr.msk.f32.gmra.mxu1 %vm414_vm1, %v12843_v52  ;;  %v20011_v37 = vadd.f32 %v15007_v41, %v19835_v47  ;;  %15354 = vmatprep.subr.mxu0 %v12923_v1 }
 0x2f1   : > { %v20014_v54 = vadd.f32 %v15036_v13, %v19777_v2  ;;  %15315 = vmatprep.mubr.msk.f32.mxu1 %vm414_vm1, %v12844_v27  ;;  %v20021_v61 = vpop.f32.mrf.mxu0  ;;  %15355 = vmatpush3.msra.mxu0 %v12923_v1  ;;  %v12847_v13 = vld [vmem:[%s17686_s20 + $0x132] sm:$0xff] }
 0x2f2   : > { %22334 = vst [vmem:[#allocation20_spill] sm:$0xff] %v20021_v61  ;;  %v6890_v10 = vpop.f32.mrf.mxu1 }
 0x2f3   : > { %v20025_v47 = vadd.f32 %v6890_v10, %v19790_v53  ;;  %v15010_v2 = vpop.f32.mrf.mxu0  ;;  %v12848_v10 = vld [vmem:[%s17686_s20 + $0x142] sm:$0xff] }
 0x2f4   : > { %v15039_v52 = vpop.f32.mrf.mxu1  ;;  %15316 = vmatmul.mubr.msk.f32.gmra.mxu1 %vm414_vm1, %v12845_v15  ;;  %v20029_v27 = vadd.f32 %v15010_v2, %v19855_v22  ;;  %v9243_v22 = vld [vmem:[%s21829_s5 + $0x70] sm:$0xff] }
 0x2f5   : > { %v20032_v41 = vadd.f32 %v15039_v52, %v19798_v59  ;;  %15318 = vmatprep.mubr.msk.f32.mxu1 %vm414_vm1, %v12846_v23  ;;  %v20039_v53 = vpop.f32.mrf.mxu0  ;;  %v12922_v59 = vld [vmem:[%s21829_s5 + $0xd8] sm:$0xff]  ;;  %15418 = vmatprep.subr.mxu1 %v9243_v22 }
 0x2f6   : > { %22335 = vst [vmem:[#allocation62_spill] sm:$0xff] %v20039_v53  ;;  %v6900_v1 = vpop.f32.mrf.mxu1  ;;  %15356 = vmatprep.subr.mxu0 %v12922_v59  ;;  %15419 = vmatpush3.msra.mxu1 %v9243_v22  ;;  %v9240_v22 = vld [vmem:[%s21829_s5 + $0x58] sm:$0xff]  ;;  %v12858_v53 = vld [vmem:[%s17686_s20 + $0x1aa] sm:$0xff] }
 0x2f7   : > { %v20043_v15 = vadd.f32 %v6900_v1, %v19810_v26  ;;  %v15013_v23 = vpop.f32.mrf.mxu0  ;;  %v12849_v1 = vld [vmem:[%s17686_s20 + $0x14a] sm:$0xff]  ;;  %15357 = vmatpush3.msra.mxu0 %v12922_v59  ;;  %15420 = vmatprep.subr.mxu1 %v9242_v50 }
 0x2f8   : > { %v15042_v2 = vpop.f32.mrf.mxu1  ;;  %15319 = vmatmul.mubr.msk.f32.gmra.mxu1 %vm414_vm1, %v12847_v13  ;;  %v20053_v52 = vadd.f32 %v15013_v23, %v19874_v49  ;;  %v12850_v13 = vld [vmem:[%s17686_s20 + $0x152] sm:$0xff] }
 0x2f9   : > { %v20056_v26 = vadd.f32 %v15042_v2, %v19818_v14  ;;  %15321 = vmatprep.mubr.msk.f32.mxu1 %vm414_vm1, %v12848_v10  ;;  %v20063_v0 = vpop.f32.mrf.mxu0  ;;  %v9241_v14 = vld [vmem:[%s21829_s5 + $0x60] sm:$0xff]  ;;  %15421 = vmatpush3.msra.mxu1 %v9242_v50  ;;  %v9239_v50 = vld [vmem:[%s21829_s5 + $0x50] sm:$0xff] }
 0x2fa   : > { %22336 = vst [vmem:[#allocation21_spill] sm:$0xff] %v20063_v0  ;;  %v6910_v31 = vpop.f32.mrf.mxu1  ;;  %15422 = vmatprep.subr.mxu1 %v9241_v14 }
 0x2fb   : > { %v20067_v49 = vadd.f32 %v6910_v31, %v19830_v12  ;;  %v15016_v10 = vpop.f32.mrf.mxu0  ;;  %v12851_v12 = vld [vmem:[%s17686_s20 + $0x162] sm:$0xff]  ;;  %v12921_v31 = vld [vmem:[%s21829_s5 + $0xd0] sm:$0xff]  ;;  %15423 = vmatpush3.msra.mxu1 %v9241_v14 }
 0x2fc   : > { %v15045_v59 = vpop.f32.mrf.mxu1  ;;  %15322 = vmatmul.mubr.msk.f32.gmra.mxu1 %vm414_vm1, %v12849_v1  ;;  %v20074_v23 = vadd.f32 %v15016_v10, %v19893_v28  ;;  %v12852_v10 = vld [vmem:[%s17686_s20 + $0x16a] sm:$0xff]  ;;  %15358 = vmatprep.subr.mxu0 %v12921_v31 }
 0x2fd   : > { %v20077_v2 = vadd.f32 %v15045_v59, %v19838_v56  ;;  %15324 = vmatprep.mubr.msk.f32.mxu1 %vm414_vm1, %v12850_v13  ;;  %v20087_v1 = vpop.f32.mrf.mxu0  ;;  %15359 = vmatpush3.msra.mxu0 %v12921_v31  ;;  %v12920_v14 = vld [vmem:[%s21829_s5 + $0xc8] sm:$0xff] }
 0x2fe   : > { %22337 = vst [vmem:[#allocation22_spill] sm:$0xff] %v20087_v1  ;;  %v6920_v28 = vpop.f32.mrf.mxu1  ;;  %15424 = vmatprep.subr.mxu1 %v9240_v22  ;;  %v9238_v31 = vld [vmem:[%s21829_s5 + $0x48] sm:$0xff]  ;;  %15360 = vmatprep.subr.mxu0 %v12920_v14 }
 0x2ff   : > { %v20091_v56 = vadd.f32 %v6920_v28, %v19850_v20  ;;  %v15019_v13 = vpop.f32.mrf.mxu0  ;;  %v12853_v20 = vld [vmem:[%s17686_s20 + $0x172] sm:$0xff]  ;;  %15425 = vmatpush3.msra.mxu1 %v9240_v22  ;;  %v12854_v28 = vld [vmem:[%s17686_s20 + $0x182] sm:$0xff]  ;;  %15361 = vmatpush3.msra.mxu0 %v12920_v14 }
 0x300   : > { %v15048_v59 = vpop.f32.mrf.mxu1  ;;  %15325 = vmatmul.mubr.msk.f32.gmra.mxu1 %vm414_vm1, %v12851_v12  ;;  %v20098_v1 = vadd.f32 %v15019_v13, %v19912_v60  ;;  %15426 = vmatprep.subr.mxu1 %v9239_v50 }
 0x301   : > { %v20101_v0 = vadd.f32 %v15048_v59, %v19858_v48  ;;  %15327 = vmatprep.mubr.msk.f32.mxu1 %vm414_vm1, %v12852_v10  ;;  %v20111_v12 = vpop.f32.mrf.mxu0  ;;  %15427 = vmatpush3.msra.mxu1 %v9239_v50  ;;  %v9237_v48 = vld [vmem:[%s21829_s5 + $0x40] sm:$0xff] }
 0x302   : > { %22338 = vst [vmem:[#allocation56_spill] sm:$0xff] %v20111_v12  ;;  %v20113_v60 = vpop.f32.mrf.mxu1  ;;  %15428 = vmatprep.subr.mxu1 %v9238_v31  ;;  %v12855_v12 = vld [vmem:[%s17686_s20 + $0x18a] sm:$0xff] }
 0x303   : > { %v15022_v22 = vpop.f32.mrf.mxu0  ;;  %15429 = vmatpush3.msra.mxu1 %v9238_v31 }
 0x304   : > { %v15051_v10 = vpop.f32.mrf.mxu1  ;;  %15328 = vmatmul.mubr.msk.f32.gmra.mxu1 %vm414_vm1, %v12853_v20  ;;  %v20121_v13 = vadd.f32 %v15022_v22, %v19930_v6  ;;  %15430 = vmatprep.subr.mxu1 %v9237_v48  ;;  %v12919_v6 = vld [vmem:[%s21829_s5 + $0xc0] sm:$0xff] }
 0x305   : > { %v20124_v59 = vadd.f32 %v15051_v10, %v19877_v30  ;;  %15330 = vmatprep.mubr.msk.f32.mxu1 %vm414_vm1, %v12854_v28  ;;  %v20128_v50 = vpop.f32.mrf.mxu0  ;;  %15431 = vmatpush3.msra.mxu1 %v9237_v48  ;;  %v9236_v30 = vld [vmem:[%s21829_s5 + $0x38] sm:$0xff]  ;;  %v12857_v10 = vld [vmem:[%s17686_s20 + $0x1a2] sm:$0xff] }
 0x306   : > { %22339 = vst [vmem:[#allocation58_spill] sm:$0xff] %v20128_v50  ;;  %v20130_v14 = vpop.f32.mrf.mxu1  ;;  %15362 = vmatprep.subr.mxu0 %v12919_v6  ;;  %15432 = vmatprep.subr.mxu1 %v9236_v30 }
 0x307   : > { %22340 = vst [vmem:[#allocation60_spill] sm:$0xff] %v20130_v14  ;;  %v15092_v28 = vpop.f32.mrf.mxu0  ;;  %15363 = vmatpush3.msra.mxu0 %v12919_v6  ;;  %15433 = vmatpush3.msra.mxu1 %v9236_v30  ;;  %v9234_v30 = vld [vmem:[%s21829_s5 + $0x28] sm:$0xff] }
 0x308   : > { %v15054_v20 = vpop.f32.mrf.mxu1  ;;  %15331 = vmatmul.mubr.msk.f32.gmra.mxu1 %vm414_vm1, %v12855_v12  ;;  %v20144_v22 = vadd.f32 %v15092_v28, %v19955_v45  ;;  %v12918_v12 = vld [vmem:[%s21829_s5 + $0xb8] sm:$0xff] }
 0x309   : > { %v20141_v31 = vadd.f32 %v15054_v20, %v19896_v62  ;;  %15333 = vmatprep.mubr.msk.f32.mxu1 %vm414_vm1, %v12856_v29  ;;  %v20150_v50 = vpop.f32.mrf.mxu0  ;;  %v9235_v62 = vld [vmem:[%s21829_s5 + $0x30] sm:$0xff]  ;;  %15364 = vmatprep.subr.mxu0 %v12918_v12 }
 0x30a   : > { %v20148_v48 = vpop.f32.mrf.mxu1  ;;  %v12859_v28 = vld [vmem:[%s17686_s20 + $0x1b2] sm:$0xff]  ;;  %15365 = vmatpush3.msra.mxu0 %v12918_v12  ;;  %15434 = vmatprep.subr.mxu1 %v9235_v62 }
 0x30b   : > { %22341 = vst [vmem:[#allocation61_spill] sm:$0xff] %v20148_v48  ;;  %v15095_v29 = vpop.f32.mrf.mxu0  ;;  %15435 = vmatpush3.msra.mxu1 %v9235_v62 }
 0x30c   : > { %v15057_v45 = vpop.f32.mrf.mxu1  ;;  %15334 = vmatmul.mubr.msk.f32.gmra.mxu1 %vm414_vm1, %v12857_v10  ;;  %v20164_v20 = vadd.f32 %v15095_v29, %v19978_v40  ;;  %15436 = vmatprep.subr.mxu1 %v9234_v30  ;;  %v12917_v29 = vld [vmem:[%s21829_s5 + $0xb0] sm:$0xff] }
 0x30d   : > { %v20161_v6 = vadd.f32 %v15057_v45, %v19915_v58  ;;  %15336 = vmatprep.mubr.msk.f32.mxu1 %vm414_vm1, %v12858_v53  ;;  %v20173_v61 = vpop.f32.mrf.mxu0  ;;  %v9233_v58 = vld [vmem:[%s21829_s5 + $0x20] sm:$0xff]  ;;  %15437 = vmatpush3.msra.mxu1 %v9234_v30 }
 0x30e   : > { %v20171_v63 = vpop.f32.mrf.mxu1  ;;  %15438 = vmatprep.subr.mxu1 %v9233_v58  ;;  %15366 = vmatprep.subr.mxu0 %v12917_v29 }
 0x30f   : > { %22342 = vst [vmem:[#allocation64_spill] sm:$0xff] %v20171_v63  ;;  %v15098_v10 = vpop.f32.mrf.mxu0  ;;  %15439 = vmatpush3.msra.mxu1 %v9233_v58  ;;  %15367 = vmatpush3.msra.mxu0 %v12917_v29  ;;  %v12863_v58 = vld [vmem:[%s17686_s20 + $0x1e2] sm:$0xff] }
 0x310   : > { %v15060_v40 = vpop.f32.mrf.mxu1  ;;  %15337 = vmatmul.mubr.msk.f32.gmra.mxu1 %vm414_vm1, %v12859_v28  ;;  %v20183_v12 = vadd.f32 %v15098_v10, %v19996_v24  ;;  %v12916_v28 = vld [vmem:[%s21829_s5 + $0xa8] sm:$0xff] }
 0x311   : > { %v20180_v53 = vadd.f32 %v15060_v40, %v19933_v36  ;;  %15339 = vmatprep.mubr.msk.f32.mxu1 %vm414_vm1, %v19534_v38  ;;  %v20189_v45 = vpop.f32.mrf.mxu0  ;;  %v9232_v36 = vld [vmem:[%s21829_s5 + $0x18] sm:$0xff]  ;;  %15368 = vmatprep.subr.mxu0 %v12916_v28 }
 0x312   : > { %v20187_v62 = vpop.f32.mrf.mxu1  ;;  %15369 = vmatpush3.msra.mxu0 %v12916_v28  ;;  %15440 = vmatprep.subr.mxu1 %v9232_v36 }
 0x313   : > { %22343 = vst [vmem:[#allocation63_spill] sm:$0xff] %v20187_v62  ;;  %v15101_v38 = vpop.f32.mrf.mxu0  ;;  %15441 = vmatpush3.msra.mxu1 %v9232_v36  ;;  %v12865_v36 = vld [vmem:[%s17686_s20 + $0x1f2] sm:$0xff] }
 0x314   : > { %v15063_v24 = vpop.f32.mrf.mxu1  ;;  %15340 = vmatmul.mubr.msk.f32.gmra.mxu1 %vm414_vm1, %v19538_v55  ;;  %v20206_v40 = vadd.f32 %v15101_v38, %v20014_v54  ;;  %v12864_v55 = vld [vmem:[%s17686_s20 + $0x1ea] sm:$0xff] }
 0x315   : > { %v20203_v30 = vadd.f32 %v15063_v24, %v19952_v19  ;;  %15342 = vmatprep.mubr.msk.f32.mxu1 %vm414_vm1, %v19560_v34  ;;  %v20213_v16 = vpop.f32.mrf.mxu0  ;;  %v12915_v19 = vld [vmem:[%s21829_s5 + $0xa0] sm:$0xff]  ;;  %v9231_v54 = vld [vmem:[%s21829_s5 + $0x10] sm:$0xff]  ;;  %v12914_v24 = vld [vmem:[%s21829_s5 + $0x98] sm:$0xff] }
 0x316   : > { %v20211_v10 = vpop.f32.mrf.mxu1  ;;  %15370 = vmatprep.subr.mxu0 %v12915_v19  ;;  %v9230_v38 = vld [vmem:[%s21829_s5 + $0x8] sm:$0xff]  ;;  %15442 = vmatprep.subr.mxu1 %v9231_v54 }
 0x317   : > { %22344 = vst [vmem:[#allocation65_spill] sm:$0xff] %v20211_v10  ;;  %v15104_v29 = vpop.f32.mrf.mxu0  ;;  %15371 = vmatpush3.msra.mxu0 %v12915_v19  ;;  %15443 = vmatpush3.msra.mxu1 %v9231_v54 }
 0x318   : > { %v15066_v34 = vpop.f32.mrf.mxu1  ;;  %15343 = vmatmul.mubr.msk.f32.gmra.mxu1 %vm414_vm1, %v12863_v58  ;;  %v20233_v21 = vadd.f32 %v15104_v29, %v20032_v41  ;;  %15372 = vmatprep.subr.mxu0 %v12914_v24 }
 0x319   : > { %v20230_v28 = vadd.f32 %v15066_v34, %v19975_v5  ;;  %15345 = vmatprep.mubr.msk.f32.mxu1 %vm414_vm1, %v12864_v55  ;;  %v20239_v19 = vpop.f32.mrf.mxu0  ;;  %15373 = vmatpush3.msra.mxu0 %v12914_v24  ;;  %v9229_v5 = vld [vmem:[%s21829_s5] sm:$0xff]  ;;  %v12912_v34 = vld [vmem:[%s21829_s5 + $0x88] sm:$0xff] }
 0x31a   : > { %v20237_v58 = vpop.f32.mrf.mxu1  ;;  %15444 = vmatprep.subr.mxu1 %v9230_v38  ;;  %15374 = vmatprep.subr.mxu0 %v12913_v57 }
 0x31b   : > { %22345 = vst [vmem:[#allocation3_spill] sm:$0xff] %v20237_v58  ;;  %v15107_v55 = vpop.f32.mrf.mxu0  ;;  %15445 = vmatpush3.msra.mxu1 %v9230_v38  ;;  %15375 = vmatpush3.msra.mxu0 %v12913_v57 }
 0x31c   : > { %v15069_v41 = vpop.f32.mrf.mxu1  ;;  %15346 = vmatmul.mubr.msk.f32.gmra.mxu1 %vm414_vm1, %v12865_v36  ;;  %v20255_v29 = vadd.f32 %v15107_v55, %v20056_v26  ;;  %15446 = vmatprep.subr.mxu1 %v9229_v5  ;;  %v12911_v36 = vld [vmem:[%s21829_s5 + $0x80] sm:$0xff] }
 0x31d   : > { %v20252_v54 = vadd.f32 %v15069_v41, %v19993_v18  ;;  %v20259_v58 = vpop.f32.mrf.mxu0  ;;  %15376 = vmatprep.subr.mxu0 %v12912_v34  ;;  %15447 = vmatpush3.msra.mxu1 %v9229_v5 }
 0x31e   : > { %v20257_v24 = vpop.f32.mrf.mxu1  ;;  %15377 = vmatpush3.msra.mxu0 %v12912_v34 }
 0x31f   : > { %22346 = vst [vmem:[#allocation26_spill] sm:$0xff] %v20257_v24  ;;  %v15110_v18 = vpop.f32.mrf.mxu0  ;;  %15378 = vmatprep.subr.mxu0 %v12911_v36 }
 0x320   : > { %v15072_v9 = vpop.f32.mrf.mxu1  ;;  %v20266_v38 = vadd.f32 %v15110_v18, %v20077_v2  ;;  %15379 = vmatpush3.msra.mxu0 %v12911_v36 }
 0x321   : > { %v7100_v26 = vadd.f32 %v15072_v9, %v20011_v37  ;;  %v20270_v41 = vpop.f32.mrf.mxu0 }
 0x322   : > { %v20268_v57 = vpop.f32.mrf.mxu1 }
 0x323   : > { %22347 = vst [vmem:[#allocation66_spill] sm:$0xff] %v20268_v57  ;;  %v15113_v24 = vpop.f32.mrf.mxu0 }
 0x324   : > { %v15075_v55 = vpop.f32.mrf.mxu1  ;;  %v20274_v5 = vadd.f32 %v15113_v24, %v20101_v0 }
 0x325   : > { %v7102_v8 = vadd.f32 %v15075_v55, %v20029_v27  ;;  %v20278_v10 = vpop.f32.mrf.mxu0 }
 0x326   : > { %v20276_v34 = vpop.f32.mrf.mxu1  ;;  %22349 = vst [vmem:[#allocation67_spill] sm:$0xff] %v20278_v10 }
 0x327   : > { %22348 = vst [vmem:[#allocation4_spill] sm:$0xff] %v20276_v34  ;;  %v15116_v37 = vpop.f32.mrf.mxu0 }
 0x328   : > { %v15078_v9 = vpop.f32.mrf.mxu1  ;;  %v20282_v36 = vadd.f32 %v15116_v37, %v20124_v59 }
 0x329   : > { %v7104_v2 = vadd.f32 %v15078_v9, %v20053_v52  ;;  %v20286_v57 = vpop.f32.mrf.mxu0 }
 0x32a   : > { %v20284_v18 = vpop.f32.mrf.mxu1  ;;  %22351 = vst [vmem:[#allocation5_spill] sm:$0xff] %v20286_v57 }
 0x32b   : > { %22350 = vst [vmem:[#allocation27_spill] sm:$0xff] %v20284_v18  ;;  %v15119_v27 = vpop.f32.mrf.mxu0 }
 0x32c   : > { %v15081_v35 = vpop.f32.mrf.mxu1  ;;  %v20290_v24 = vadd.f32 %v15119_v27, %v20141_v31 }
 0x32d   : > { %v7106_v0 = vadd.f32 %v15081_v35, %v20074_v23  ;;  %v20294_v34 = vpop.f32.mrf.mxu0 }
 0x32e   : > { %v20292_v55 = vpop.f32.mrf.mxu1  ;;  %22353 = vst [vmem:[#allocation6_spill] sm:$0xff] %v20294_v34 }
 0x32f   : > { %22352 = vst [vmem:[#allocation28_spill] sm:$0xff] %v20292_v55  ;;  %v15122_v52 = vpop.f32.mrf.mxu0 }
 0x330   : > { %v15084_v39 = vpop.f32.mrf.mxu1  ;;  %v20298_v9 = vadd.f32 %v15122_v52, %v20161_v6 }
 0x331   : > { %v7108_v59 = vadd.f32 %v15084_v39, %v20098_v1  ;;  %v20302_v18 = vpop.f32.mrf.mxu0 }
 0x332   : > { %v20300_v37 = vpop.f32.mrf.mxu1  ;;  %22355 = vst [vmem:[#allocation7_spill] sm:$0xff] %v20302_v18 }
 0x333   : > { %22354 = vst [vmem:[#allocation29_spill] sm:$0xff] %v20300_v37  ;;  %v15125_v35 = vpop.f32.mrf.mxu0 }
 0x334   : > { %v15087_v62 = vpop.f32.mrf.mxu1  ;;  %v20306_v31 = vadd.f32 %v15125_v35, %v20180_v53 }
 0x335   : > { %v7110_v23 = vadd.f32 %v15087_v62, %v20121_v13  ;;  %v20310_v55 = vpop.f32.mrf.mxu0  ;;  %v20325_v13 = vld [vmem:[%s21829_s5 + $0x178] sm:$0xff] }
 0x336   : > { %v20308_v27 = vpop.f32.mrf.mxu1  ;;  %22357 = vst [vmem:[#allocation8_spill] sm:$0xff] %v20310_v55  ;;  %15484 = vmatprep.subr.mxu0 %v20325_v13 }
 0x337   : > { %22356 = vst [vmem:[#allocation30_spill] sm:$0xff] %v20308_v27  ;;  %v15128_v3 = vpop.f32.mrf.mxu0 }
 0x338   : > { %v15157_v39 = vpop.f32.mrf.mxu1  ;;  %v20313_v1 = vadd.f32 %v15128_v3, %v20203_v30  ;;  %v20331_v3 = vld [vmem:[%s21829_s5 + $0x1f8] sm:$0xff] }
 0x339   : > { %v20316_v6 = vadd.f32 %v15157_v39, %v20144_v22  ;;  %v20318_v52 = vpop.f32.mrf.mxu0  ;;  %15552 = vmatprep.subr.mxu1 %v20331_v3 }
 0x33a   : > { %22358 = vst [vmem:[#allocation31_spill] sm:$0xff] %v20318_v52  ;;  %v20320_v37 = vpop.f32.mrf.mxu1 }
 0x33b   : > { %v15131_v53 = vpop.f32.mrf.mxu0 }
 0x33c   : > { %v15160_v62 = vpop.f32.mrf.mxu1  ;;  %v20334_v22 = vadd.f32 %v15131_v53, %v20230_v28 }
 0x33d   : > { %v20337_v30 = vadd.f32 %v15160_v62, %v20164_v20  ;;  %v20340_v35 = vpop.f32.mrf.mxu0 }
 0x33e   : > { %22359 = vst [vmem:[#allocation9_spill] sm:$0xff] %v20340_v35  ;;  %v20342_v39 = vpop.f32.mrf.mxu1 }
 0x33f   : > { %v15134_v27 = vpop.f32.mrf.mxu0 }
 0x340   : > { %v15163_v52 = vpop.f32.mrf.mxu1  ;;  %v20345_v55 = vadd.f32 %v15134_v27, %v20252_v54 }
 0x341   : > { %v20348_v18 = vadd.f32 %v15163_v52, %v20183_v12  ;;  %v20350_v11 = vpop.f32.mrf.mxu0 }
 0x342   : > { %22360 = vst [vmem:[#allocation32_spill] sm:$0xff] %v20350_v11  ;;  %v20352_v28 = vpop.f32.mrf.mxu1 }
 0x343   : > { %v15137_v20 = vpop.f32.mrf.mxu0 }
 0x344   : > { %v15166_v53 = vpop.f32.mrf.mxu1  ;;  %v20354_v62 = vadd.f32 %v15137_v20, %v7100_v26 }
 0x345   : > { %v20357_v35 = vadd.f32 %v15166_v53, %v20206_v40  ;;  %v20359_v63 = vpop.f32.mrf.mxu0 }
 0x346   : > { %22361 = vst [vmem:[#allocation10_spill] sm:$0xff] %v20359_v63  ;;  %v20361_v34 = vpop.f32.mrf.mxu1 }
 0x347   : > { %v15140_v54 = vpop.f32.mrf.mxu0 }
 0x348   : > { %v15169_v27 = vpop.f32.mrf.mxu1  ;;  %v20363_v51 = vadd.f32 %v15140_v54, %v7102_v8 }
 0x349   : > { %v20366_v12 = vadd.f32 %v15169_v27, %v20233_v21  ;;  %v20368_v52 = vpop.f32.mrf.mxu0 }
 0x34a   : > { %22362 = vst [vmem:[#allocation33_spill] sm:$0xff] %v20368_v52  ;;  %v20370_v11 = vpop.f32.mrf.mxu1 }
 0x34b   : > { %v15143_v26 = vpop.f32.mrf.mxu0 }
 0x34c   : > { %v15172_v20 = vpop.f32.mrf.mxu1  ;;  %v20372_v33 = vadd.f32 %v15143_v26, %v7104_v2 }
 0x34d   : > { %v20375_v40 = vadd.f32 %v15172_v20, %v20255_v29  ;;  %v20377_v53 = vpop.f32.mrf.mxu0 }
 0x34e   : > { %22363 = vst [vmem:[#allocation11_spill] sm:$0xff] %v20377_v53  ;;  %v20379_v63 = vpop.f32.mrf.mxu1 }
 0x34f   : > { %v15146_v8 = vpop.f32.mrf.mxu0 }
 0x350   : > { %v15175_v54 = vpop.f32.mrf.mxu1  ;;  %v20381_v48 = vadd.f32 %v15146_v8, %v7106_v0 }
 0x351   : > { %v20384_v21 = vadd.f32 %v15175_v54, %v20266_v38  ;;  %v20386_v27 = vpop.f32.mrf.mxu0 }
 0x352   : > { %22364 = vst [vmem:[#allocation34_spill] sm:$0xff] %v20386_v27  ;;  %v20388_v52 = vpop.f32.mrf.mxu1 }
 0x353   : > { %v15149_v2 = vpop.f32.mrf.mxu0 }
 0x354   : > { %v15178_v26 = vpop.f32.mrf.mxu1  ;;  %v7598_v57 = vadd.f32 %v15149_v2, %v7108_v59 }
 0x355   : > { %v20391_v29 = vadd.f32 %v15178_v26, %v20274_v5  ;;  %v20393_v20 = vpop.f32.mrf.mxu0 }
 0x356   : > { %22366 = vst [vmem:[#allocation35_spill] sm:$0xff] %v20393_v20  ;;  %v20395_v53 = vpop.f32.mrf.mxu1 }
 0x357   : > { %22365 = vst [vmem:[#allocation12_spill] sm:$0xff] %v20391_v29  ;;  %22367 = vst [vmem:[#allocation13_spill] sm:$0xff] %v20395_v53  ;;  %v15152_v32 = vpop.f32.mrf.mxu0 }
 0x358   : > { %v15181_v0 = vpop.f32.mrf.mxu1  ;;  %v7600_v8 = vadd.f32 %v15152_v32, %v7110_v23 }
 0x359   : > { %v20398_v38 = vadd.f32 %v15181_v0, %v20282_v36  ;;  %v20400_v54 = vpop.f32.mrf.mxu0 }
 0x35a   : > { %22369 = vst [vmem:[#allocation14_spill] sm:$0xff] %v20400_v54  ;;  %v20402_v27 = vpop.f32.mrf.mxu1 }
 0x35b   : > { %22368 = vst [vmem:[#allocation36_spill] sm:$0xff] %v20398_v38  ;;  %22370 = vst [vmem:[#allocation37_spill] sm:$0xff] %v20402_v27  ;;  %v15222_v14 = vpop.f32.mrf.mxu0 }
 0x35c   : > { %v15184_v4 = vpop.f32.mrf.mxu1 }
 0x35d   : > { %v20405_v59 = vadd.f32 %v15184_v4, %v20290_v24  ;;  %v8331_v2 = vpop.f32.mrf.mxu0 }
 0x35e   : > { %v20407_v5 = vpop.f32.mrf.mxu1 }
 0x35f   : > { %22371 = vst [vmem:[#allocation38_spill] sm:$0xff] %v20405_v59  ;;  %22372 = vst [vmem:[#allocation39_spill] sm:$0xff] %v20407_v5  ;;  %v20409_v20 = vpop.f32.mrf.mxu0 }
 0x360   : > { %v15187_v26 = vpop.f32.mrf.mxu1 }
 0x361   : > { %v20412_v32 = vadd.f32 %v15187_v26, %v20298_v9  ;;  %v20416_v23 = vpop.f32.mrf.mxu0 }
 0x362   : > { %v20414_v36 = vpop.f32.mrf.mxu1 }
 0x363   : > { %22373 = vst [vmem:[#allocation43_spill] sm:$0xff] %v20412_v32  ;;  %22374 = vst [vmem:[#allocation45_spill] sm:$0xff] %v20414_v36  ;;  %v20418_v54 = vpop.f32.mrf.mxu0 }
 0x364   : > { %v15190_v0 = vpop.f32.mrf.mxu1 }
 0x365   : > { %v20421_v38 = vadd.f32 %v15190_v0, %v20306_v31  ;;  %v20425_v24 = vpop.f32.mrf.mxu0 }
 0x366   : > { %v20423_v4 = vpop.f32.mrf.mxu1 }
 0x367   : > { %22375 = vst [vmem:[#allocation68_spill] sm:$0xff] %v20421_v38  ;;  %22376 = vst [vmem:[#allocation49_spill] sm:$0xff] %v20423_v4  ;;  %v20427_v5 = vpop.f32.mrf.mxu0 }
 0x368   : > { %v15193_v59 = vpop.f32.mrf.mxu1 }
 0x369   : > { %v20430_v9 = vadd.f32 %v15193_v59, %v20313_v1  ;;  %v20434_v32 = vpop.f32.mrf.mxu0 }
 0x36a   : > { %v20432_v26 = vpop.f32.mrf.mxu1 }
 0x36b   : > { %22377 = vst [vmem:[#allocation40_spill] sm:$0xff] %v20430_v9  ;;  %22378 = vst [vmem:[#allocation51_spill] sm:$0xff] %v20432_v26  ;;  %v20436_v27 = vpop.f32.mrf.mxu0 }
 0x36c   : > { %v15196_v36 = vpop.f32.mrf.mxu1 }
 0x36d   : > { %v20439_v31 = vadd.f32 %v15196_v36, %v20334_v22  ;;  %v20443_v38 = vpop.f32.mrf.mxu0 }
 0x36e   : > { %v20441_v0 = vpop.f32.mrf.mxu1 }
 0x36f   : > { %22379 = vst [vmem:[#allocation41_spill] sm:$0xff] %v20439_v31  ;;  %22380 = vst [vmem:[#allocation44_spill] sm:$0xff] %v20441_v0  ;;  %v20445_v29 = vpop.f32.mrf.mxu0 }
 0x370   : > { %v15199_v4 = vpop.f32.mrf.mxu1 }
 0x371   : > { %v20448_v1 = vadd.f32 %v15199_v4, %v20345_v55  ;;  %v20452_v9 = vpop.f32.mrf.mxu0 }
 0x372   : > { %v20450_v59 = vpop.f32.mrf.mxu1 }
 0x373   : > { %22381 = vst [vmem:[#allocation69_spill] sm:$0xff] %v20448_v1  ;;  %22382 = vst [vmem:[#allocation70_spill] sm:$0xff] %v20450_v59  ;;  %v20454_v53 = vpop.f32.mrf.mxu0 }
 0x374   : > { %v15202_v26 = vpop.f32.mrf.mxu1 }
 0x375   : > { %v20457_v22 = vadd.f32 %v15202_v26, %v20354_v62  ;;  %v20461_v31 = vpop.f32.mrf.mxu0 }
 0x376   : > { %v20459_v36 = vpop.f32.mrf.mxu1  ;;  %22385 = vst [vmem:[#allocation73_spill] sm:$0xff] %v20461_v31 }
 0x377   : > { %22383 = vst [vmem:[#allocation71_spill] sm:$0xff] %v20457_v22  ;;  %22384 = vst [vmem:[#allocation72_spill] sm:$0xff] %v20459_v36  ;;  %v20463_v10 = vpop.f32.mrf.mxu0 }
 0x378   : > { %v15205_v0 = vpop.f32.mrf.mxu1 }
 0x379   : > { %v20466_v55 = vadd.f32 %v15205_v0, %v20363_v51  ;;  %v20470_v1 = vpop.f32.mrf.mxu0 }
 0x37a   : > { %v20468_v4 = vpop.f32.mrf.mxu1  ;;  %22388 = vst [vmem:[#allocation76_spill] sm:$0xff] %v20470_v1 }
 0x37b   : > { %22386 = vst [vmem:[#allocation74_spill] sm:$0xff] %v20466_v55  ;;  %22387 = vst [vmem:[#allocation75_spill] sm:$0xff] %v20468_v4  ;;  %v20472_v42 = vpop.f32.mrf.mxu0 }
 0x37c   : > { %v15208_v59 = vpop.f32.mrf.mxu1  ;;  %22389 = vst [vmem:[#allocation77_spill] sm:$0xff] %v20472_v42 }
 0x37d   : > { %v20475_v62 = vadd.f32 %v15208_v59, %v20372_v33  ;;  %v20479_v22 = vpop.f32.mrf.mxu0 }
 0x37e   : > { %v20477_v26 = vpop.f32.mrf.mxu1 }
 0x37f   : > { %22390 = vst [vmem:[#allocation78_spill] sm:$0xff] %v20475_v62  ;;  %22391 = vst [vmem:[#allocation79_spill] sm:$0xff] %v20477_v26  ;;  %v20481_v31 = vpop.f32.mrf.mxu0  ;;  %v7559_v62 = vadd.f32 %v20150_v50, %v19967_v43 }
 0x380   : > { %v15211_v36 = vpop.f32.mrf.mxu1  ;;  %22392 = vst [vmem:[#allocation80_spill] sm:$0xff] %v20481_v31 }
 0x381   : > { %v20484_v51 = vadd.f32 %v15211_v36, %v20381_v48  ;;  %v20488_v55 = vpop.f32.mrf.mxu0  ;;  %v8050_v36 = vadd.f32 %v20320_v37, %v7559_v62  ;;  %v8543_v37 = vadd.f32 %v20409_v20, %v20337_v30  ;;  %v7563_v62 = vadd.f32 %v20189_v45, %v20007_v25 }
 0x382   : > { %v20486_v0 = vpop.f32.mrf.mxu1  ;;  %v8545_v30 = vadd.f32 %v20418_v54, %v20348_v18  ;;  %v7565_v45 = vadd.f32 %v20213_v16, %v20025_v47  ;;  %v12957_v18 = vld [vmem:[%s21829_s5 + $0x1f0] sm:$0xff]  ;;  %v8547_v16 = vadd.f32 %v20427_v5, %v20357_v35 }
 0x383   : > { %22393 = vst [vmem:[#allocation81_spill] sm:$0xff] %v20484_v51  ;;  %v20492_v42 = vpop.f32.mrf.mxu0  ;;  %v8541_v51 = vadd.f32 %v15222_v14, %v20316_v6  ;;  %v8540_v43 = vadd.f32 %v8331_v2, %v8050_v36 }
 0x384   : > { %v15214_v4 = vpop.f32.mrf.mxu1  ;;  %v8056_v54 = vadd.f32 %v20361_v34, %v7565_v45  ;;  %v12956_v34 = vld [vmem:[%s21829_s5 + $0x1e8] sm:$0xff]  ;;  %v8551_v45 = vadd.f32 %v20445_v29, %v20375_v40  ;;  %v12941_v40 = vld [vmem:[%s21829_s5 + $0x170] sm:$0xff] }
 0x385   : > { %v20490_v1 = vadd.f32 %v15214_v4, %v7598_v57  ;;  %v20500_v31 = vpop.f32.mrf.mxu0  ;;  %v20509_v4 = vld [vmem:[%s21828_s4] ss:$0 sm:$0xff] }
 0x386   : > { %v20494_v33 = vpop.f32.mrf.mxu1  ;;  %v8546_v35 = vadd.f32 %v20434_v32, %v8056_v54 }
 0x387   : > { %22394 = vst [vmem:[#allocation82_spill] sm:$0xff] %v20490_v1  ;;  %22395 = vst [vmem:[#allocation83_spill] sm:$0xff] %v20494_v33  ;;  %v7561_v1 = vadd.f32 %v20173_v61, %v19988_v7 }
 0x388   : > { %v15217_v59 = vpop.f32.mrf.mxu1 }
 0x389   : > { %v20498_v26 = vadd.f32 %v15217_v59, %v7600_v8  ;;  %v20513_v8 = vpop.f32.mrf.mxu0 }
 0x38a   : > { %v20502_v48 = vpop.f32.mrf.mxu1 }
 0x38b   : > { %22396 = vst [vmem:[#allocation84_spill] sm:$0xff] %v20498_v26  ;;  %22397 = vst [vmem:[#allocation85_spill] sm:$0xff] %v20502_v48  ;;  %v8052_v26 = vadd.f32 %v20342_v39, %v7561_v1  ;;  %v20524_v36 = vpop.f32.mrf.mxu0 }
 0x38c   : > { %v15287_v57 = vpop.f32.mrf.mxu1 }
 0x38d   : > { %v9031_v50 = vadd.f32 %v15287_v57, %v8541_v51  ;;  %v8542_v33 = vadd.f32 %v20416_v23, %v8052_v26  ;;  %v8054_v51 = vadd.f32 %v20352_v28, %v7563_v62 }
 0x38e   : > { %v8821_v59 = vpop.f32.mrf.mxu1 }
 0x38f   : > { %v9080_v14 = vadd.f32 %v20509_v4, %v9031_v50  ;;  %v9030_v6 = vadd.f32 %v8821_v59, %v8540_v43  ;;  %v8544_v26 = vadd.f32 %v20425_v24, %v8054_v51  ;;  %v7567_v59 = vadd.f32 %v20239_v19, %v20043_v15 }
 0x390   : > { %v15290_v48 = vpop.f32.mrf.mxu1  ;;  %v8549_v15 = vadd.f32 %v20436_v27, %v20366_v12  ;;  %v7569_v51 = vadd.f32 %v20259_v58, %v20067_v49 }
 0x391   : > { %v9122_v7 = vmax.f32 %v9080_v14, 0.0  ;;  %v9079_v61 = vadd.f32 %v20509_v4, %v9030_v6  ;;  %v9033_v2 = vadd.f32 %v15290_v48, %v8543_v37  ;;  %v8058_v62 = vadd.f32 %v20370_v11, %v7567_v59  ;;  %v12954_v11 = vld [vmem:[%s21829_s5 + $0x1d8] sm:$0xff] }
 0x392   : > { %v8831_v39 = vpop.f32.mrf.mxu1  ;;  %v8060_v49 = vadd.f32 %v20379_v63, %v7569_v51  ;;  %v7571_v63 = vadd.f32 %v20270_v41, %v20091_v56 }
 0x393   : > { %9164 = vst [vmem:[#allocation2 + $0x8] sm:$0xff] %v9122_v7  ;;  %v9121_v20 = vmax.f32 %v9079_v61, 0.0  ;;  %v9082_v1 = vadd.f32 %v20509_v4, %v9033_v2  ;;  %v9032_v25 = vadd.f32 %v8831_v39, %v8542_v33  ;;  %v20539_v33 = vpop.f32.mrf.mxu0 }
 0x394   : > { %v15293_v23 = vpop.f32.mrf.mxu1  ;;  %v8550_v29 = vadd.f32 %v20452_v9, %v8060_v49  ;;  %v8062_v56 = vadd.f32 %v20388_v52, %v7571_v63 }
 0x395   : > { %9163 = vst [vmem:[#allocation2] sm:$0xff] %v9121_v20  ;;  %v20532_v48 = vmax.f32 %v9082_v1, 0.0  ;;  %v9081_v28 = vadd.f32 %v20509_v4, %v9032_v25  ;;  %v9035_v57 = vadd.f32 %v15293_v23, %v8545_v30  ;;  %15448 = vmatprep.mubr.f32.mxu1 %v9121_v20  ;;  %v8548_v20 = vadd.f32 %v20443_v38, %v8058_v62 }
 0x396   : > { %v8841_v43 = vpop.f32.mrf.mxu1  ;;  %15449 = vmatmul.mubr.f32.vlgmr.msra.gmra.mxu1 %v9122_v7  ;;  %v20558_v7 = vpop.f32.mrf.mxu0 }
 0x397   : > { %9166 = vst [vmem:[#allocation2 + $0x18] sm:$0xff] %v20532_v48  ;;  %v9123_v47 = vmax.f32 %v9081_v28, 0.0  ;;  %v9084_v24 = vadd.f32 %v20509_v4, %v9035_v57  ;;  %v9034_v50 = vadd.f32 %v8841_v43, %v8544_v26  ;;  %15451 = vmatprep.mubr.f32.mxu1 %v20532_v48  ;;  %15553 = vmatpush3.msra.mxu1 %v20331_v3  ;;  %v12955_v3 = vld [vmem:[%s21829_s5 + $0x1e0] sm:$0xff] }
 0x398   : > { %v15296_v37 = vpop.f32.mrf.mxu1  ;;  %15554 = vmatprep.subr.mxu1 %v12957_v18  ;;  %v20577_v58 = vpop.f32.mrf.mxu0  ;;  %v6593_v28 = vadd.f32 %v19864_v46, %v19688_v44  ;;  %v12953_v44 = vld [vmem:[%s21829_s5 + $0x1d0] sm:$0xff] }
 0x399   : > { %9165 = vst [vmem:[#allocation2 + $0x10] sm:$0xff] %v9123_v47  ;;  %v9126_v5 = vmax.f32 %v9084_v24, 0.0  ;;  %v9083_v14 = vadd.f32 %v20509_v4, %v9034_v50  ;;  %v9037_v6 = vadd.f32 %v15296_v37, %v8547_v16  ;;  %15555 = vmatpush3.msra.mxu1 %v12957_v18  ;;  %v12940_v47 = vld [vmem:[%s21829_s5 + $0x168] sm:$0xff]  ;;  %v8553_v24 = vadd.f32 %v20454_v53, %v20384_v21  ;;  %v22400_v21 = vld [vmem:[#allocation73_spill] sm:$0xff] }
 0x39a   : > { %v8851_v61 = vpop.f32.mrf.mxu1  ;;  %15556 = vmatprep.subr.mxu1 %v12956_v34  ;;  %v7083_v46 = vadd.f32 %v20113_v60, %v6593_v28  ;;  %v20603_v41 = vpop.f32.mrf.mxu0  ;;  %v12952_v53 = vld [vmem:[%s21829_s5 + $0x1c8] sm:$0xff]  ;;  %v22406_v28 = vld [vmem:[#allocation5_spill] sm:$0xff] }
 0x39b   : > { %9168 = vst [vmem:[#allocation2 + $0x28] sm:$0xff] %v9126_v5  ;;  %v20562_v19 = vmax.f32 %v9083_v14, 0.0  ;;  %v9086_v32 = vadd.f32 %v20509_v4, %v9037_v6  ;;  %v9036_v2 = vadd.f32 %v8851_v61, %v8546_v35  ;;  %15557 = vmatpush3.msra.mxu1 %v12956_v34  ;;  %v22398_v34 = vld [vmem:[#allocation50_spill] sm:$0xff]  ;;  %v8552_v6 = vadd.f32 %v22400_v21, %v8062_v56  ;;  %v22408_v56 = vld [vmem:[#allocation61_spill] sm:$0xff] }
 0x39c   : > { %v15299_v39 = vpop.f32.mrf.mxu1  ;;  %v9245_v30 = vld [vmem:[#allocation2 + $0x1] sm:$0xff]  ;;  %15558 = vmatprep.subr.mxu1 %v12955_v3  ;;  %v6595_v59 = vadd.f32 %v22398_v34, %v19708_v17 }
 0x39d   : > { %9167 = vst [vmem:[#allocation2 + $0x20] sm:$0xff] %v20562_v19  ;;  %v20572_v12 = vmax.f32 %v9086_v32, 0.0  ;;  %v9085_v27 = vadd.f32 %v20509_v4, %v9036_v2  ;;  %v9039_v1 = vadd.f32 %v15299_v39, %v8549_v15  ;;  %15380 = vmatprep.mubr.f32.mxu0 %v9245_v30  ;;  %15452 = vmatmul.mubr.f32.gmra.mxu1 %v20562_v19  ;;  %v12939_v17 = vld [vmem:[%s21829_s5 + $0x160] sm:$0xff]  ;;  %v22401_v15 = vld [vmem:[#allocation60_spill] sm:$0xff]  ;;  %v20628_v39 = vpop.f32.mrf.mxu0 }
 0x39e   : > { %v8861_v25 = vpop.f32.mrf.mxu1  ;;  %15559 = vmatpush3.msra.mxu1 %v12955_v3  ;;  %v7085_v32 = vadd.f32 %v22401_v15, %v6595_v59  ;;  %v22402_v2 = vld [vmem:[#allocation13_spill] sm:$0xff] }
 0x39f   : > { %9170 = vst [vmem:[#allocation2 + $0x38] sm:$0xff] %v20572_v12  ;;  %v20582_v38 = vmax.f32 %v9085_v27, 0.0  ;;  %v9088_v23 = vadd.f32 %v20509_v4, %v9039_v1  ;;  %v9038_v26 = vadd.f32 %v8861_v25, %v8548_v20  ;;  %15560 = vmatprep.subr.mxu1 %v12954_v11  ;;  %v12951_v25 = vld [vmem:[%s21829_s5 + $0x1c0] sm:$0xff] }
 0x3a0   : > { %v15302_v57 = vpop.f32.mrf.mxu1  ;;  %v9246_v18 = vld [vmem:[#allocation2 + $0x9] sm:$0xff]  ;;  %15561 = vmatpush3.msra.mxu1 %v12954_v11  ;;  %v22403_v11 = vld [vmem:[#allocation12_spill] sm:$0xff]  ;;  %v7575_v63 = vadd.f32 %v22406_v28, %v7085_v32  ;;  %v22411_v34 = vld [vmem:[#allocation77_spill] sm:$0xff] }
 0x3a1   : > { %9169 = vst [vmem:[#allocation2 + $0x30] sm:$0xff] %v20582_v38  ;;  %v20594_v54 = vmax.f32 %v9088_v23, 0.0  ;;  %v9087_v43 = vadd.f32 %v20509_v4, %v9038_v26  ;;  %v9041_v16 = vadd.f32 %v15302_v57, %v8551_v45  ;;  %15381 = vmatmul.mubr.f32.vlgmr.msra.gmra.mxu0 %v9246_v18  ;;  %15454 = vmatprep.mubr.f32.mxu1 %v20582_v38  ;;  %v22404_v45 = vld [vmem:[#allocation53_spill] sm:$0xff]  ;;  %v22405_v23 = vld [vmem:[#allocation52_spill] sm:$0xff] }
 0x3a2   : > { %v8871_v9 = vpop.f32.mrf.mxu1  ;;  %15455 = vmatmul.mubr.f32.gmra.mxu1 %v20572_v12  ;;  %15485 = vmatpush3.msra.mxu0 %v20325_v13  ;;  %v22399_v13 = vld [vmem:[#allocation67_spill] sm:$0xff]  ;;  %v8555_v20 = vadd.f32 %v20463_v10, %v22403_v11  ;;  %v6597_v26 = vadd.f32 %v22405_v23, %v22404_v45  ;;  %v12938_v10 = vld [vmem:[%s21829_s5 + $0x158] sm:$0xff] }
 0x3a3   : > { %9172 = vst [vmem:[#allocation2 + $0x48] sm:$0xff] %v20594_v54  ;;  %v9129_v50 = vmax.f32 %v9087_v43, 0.0  ;;  %v9090_v60 = vadd.f32 %v20509_v4, %v9041_v16  ;;  %v9040_v52 = vadd.f32 %v8871_v9, %v8550_v29  ;;  %15457 = vmatprep.mubr.f32.mxu1 %v20594_v54  ;;  %15486 = vmatprep.subr.mxu0 %v12941_v40  ;;  %v22418_v45 = vld [vmem:[#allocation80_spill] sm:$0xff] }
 0x3a4   : > { %v7573_v37 = vadd.f32 %v22399_v13, %v7083_v46  ;;  %v15305_v35 = vpop.f32.mrf.mxu1  ;;  %v9247_v5 = vld [vmem:[#allocation2 + $0x19] sm:$0xff]  ;;  %v9248_v14 = vld [vmem:[#allocation2 + $0x21] sm:$0xff]  ;;  %15487 = vmatpush3.msra.mxu0 %v12941_v40  ;;  %15562 = vmatprep.subr.mxu1 %v12953_v44  ;;  %v7087_v9 = vadd.f32 %v22408_v56, %v6597_v26 }
 0x3a5   : > { %9171 = vst [vmem:[#allocation2 + $0x40] sm:$0xff] %v9129_v50  ;;  %v9132_v3 = vmax.f32 %v9090_v60, 0.0  ;;  %v9089_v62 = vadd.f32 %v20509_v4, %v9040_v52  ;;  %v9043_v61 = vadd.f32 %v15305_v35, %v8553_v24  ;;  %15383 = vmatprep.mubr.f32.mxu0 %v9247_v5  ;;  %15488 = vmatprep.subr.mxu0 %v12940_v47  ;;  %v22407_v40 = vld [vmem:[#allocation76_spill] sm:$0xff]  ;;  %v20655_v50 = vpop.f32.mrf.mxu0  ;;  %v12937_v5 = vld [vmem:[%s21829_s5 + $0x150] sm:$0xff] }
 0x3a6   : > { %v8064_v51 = vadd.f32 %v22402_v2, %v7573_v37  ;;  %v8881_v30 = vpop.f32.mrf.mxu1  ;;  %15384 = vmatmul.mubr.f32.gmra.mxu0 %v9248_v14  ;;  %15563 = vmatpush3.msra.mxu1 %v12953_v44  ;;  %v12950_v46 = vld [vmem:[%s21829_s5 + $0x1b8] sm:$0xff]  ;;  %v22412_v14 = vld [vmem:[#allocation55_spill] sm:$0xff] }
 0x3a7   : > { %9174 = vst [vmem:[#allocation2 + $0x58] sm:$0xff] %v9132_v3  ;;  %v20632_v27 = vmax.f32 %v9089_v62, 0.0  ;;  %v9092_v1 = vadd.f32 %v20509_v4, %v9043_v61  ;;  %v9042_v49 = vadd.f32 %v8881_v30, %v8552_v6  ;;  %15489 = vmatpush3.msra.mxu0 %v12940_v47  ;;  %15564 = vmatprep.subr.mxu1 %v12952_v53  ;;  %v22409_v47 = vld [vmem:[#allocation37_spill] sm:$0xff]  ;;  %v22410_v52 = vld [vmem:[#allocation36_spill] sm:$0xff]  ;;  %v22414_v6 = vld [vmem:[#allocation6_spill] sm:$0xff] }
 0x3a8   : > { %v15308_v57 = vpop.f32.mrf.mxu1  ;;  %v9249_v18 = vld [vmem:[#allocation2 + $0x31] sm:$0xff]  ;;  %15490 = vmatprep.subr.mxu0 %v12939_v17  ;;  %15565 = vmatpush3.msra.mxu1 %v12952_v53  ;;  %v8554_v29 = vadd.f32 %v22407_v40, %v8064_v51  ;;  %v8066_v24 = vadd.f32 %v22409_v47, %v7575_v63  ;;  %v8557_v59 = vadd.f32 %v22411_v34, %v22410_v52  ;;  %v22413_v53 = vld [vmem:[#allocation54_spill] sm:$0xff] }
 0x3a9   : > { %9173 = vst [vmem:[#allocation2 + $0x50] sm:$0xff] %v20632_v27  ;;  %v20646_v43 = vmax.f32 %v9092_v1, 0.0  ;;  %v9091_v16 = vadd.f32 %v20509_v4, %v9042_v49  ;;  %v9045_v44 = vadd.f32 %v15308_v57, %v8555_v20  ;;  %15386 = vmatprep.mubr.f32.mxu0 %v9249_v18  ;;  %15458 = vmatmul.mubr.f32.gmra.mxu1 %v20632_v27  ;;  %v12936_v51 = vld [vmem:[%s21829_s5 + $0x148] sm:$0xff]  ;;  %v22415_v30 = vld [vmem:[#allocation64_spill] sm:$0xff]  ;;  %v22416_v20 = vld [vmem:[#allocation39_spill] sm:$0xff]  ;;  %v20680_v49 = vpop.f32.mrf.mxu0 }
 0x3aa   : > { %v8891_v60 = vpop.f32.mrf.mxu1  ;;  %15491 = vmatpush3.msra.mxu0 %v12939_v17  ;;  %15566 = vmatprep.subr.mxu1 %v12951_v25  ;;  %v6599_v21 = vadd.f32 %v22413_v53, %v22412_v14  ;;  %v7577_v3 = vadd.f32 %v22414_v6, %v7087_v9  ;;  %v8556_v17 = vadd.f32 %v20479_v22, %v8066_v24  ;;  %v12935_v57 = vld [vmem:[%s21829_s5 + $0x140] sm:$0xff]  ;;  %v22419_v18 = vld [vmem:[#allocation46_spill] sm:$0xff]  ;;  %v12949_v47 = vld [vmem:[%s21829_s5 + $0x1b0] sm:$0xff] }
 0x3ab   : > { %9176 = vst [vmem:[#allocation2 + $0x68] sm:$0xff] %v20646_v43  ;;  %v20660_v13 = vmax.f32 %v9091_v16, 0.0  ;;  %v9094_v37 = vadd.f32 %v20509_v4, %v9045_v44  ;;  %v9044_v35 = vadd.f32 %v8891_v60, %v8554_v29  ;;  %15492 = vmatprep.subr.mxu0 %v12938_v10  ;;  %15567 = vmatpush3.msra.mxu1 %v12951_v25  ;;  %v22417_v25 = vld [vmem:[#allocation38_spill] sm:$0xff]  ;;  %v22421_v29 = vld [vmem:[#allocation7_spill] sm:$0xff]  ;;  %v20709_v14 = vpop.f32.mrf.mxu0 }
 0x3ac   : > { %v15311_v62 = vpop.f32.mrf.mxu1  ;;  %v9250_v61 = vld [vmem:[#allocation2 + $0x39] sm:$0xff]  ;;  %15493 = vmatpush3.msra.mxu0 %v12938_v10  ;;  %15568 = vmatprep.subr.mxu1 %v12950_v46  ;;  %v7089_v11 = vadd.f32 %v22415_v30, %v6599_v21  ;;  %v8068_v1 = vadd.f32 %v22416_v20, %v7577_v3  ;;  %v8559_v23 = vadd.f32 %v22418_v45, %v22417_v25  ;;  %v22420_v10 = vld [vmem:[#allocation42_spill] sm:$0xff] }
 0x3ad   : > { %9175 = vst [vmem:[#allocation2 + $0x60] sm:$0xff] %v20660_v13  ;;  %v20671_v15 = vmax.f32 %v9094_v37, 0.0  ;;  %v9093_v32 = vadd.f32 %v20509_v4, %v9044_v35  ;;  %v9047_v2 = vadd.f32 %v15311_v62, %v8557_v59  ;;  %15387 = vmatmul.mubr.f32.gmra.mxu0 %v9250_v61  ;;  %15460 = vmatprep.mubr.f32.mxu1 %v20660_v13  ;;  %v12934_v59 = vld [vmem:[%s21829_s5 + $0x138] sm:$0xff]  ;;  %v22422_v37 = vld [vmem:[#allocation63_spill] sm:$0xff]  ;;  %v22423_v35 = vld [vmem:[#allocation45_spill] sm:$0xff] }
 0x3ae   : > { %v8901_v22 = vpop.f32.mrf.mxu1  ;;  %15461 = vmatmul.mubr.f32.gmra.mxu1 %v20646_v43  ;;  %15494 = vmatprep.subr.mxu0 %v12937_v5  ;;  %v6601_v40 = vadd.f32 %v22420_v10, %v22419_v18  ;;  %v7579_v16 = vadd.f32 %v22421_v29, %v7089_v11  ;;  %v8558_v24 = vadd.f32 %v20488_v55, %v8068_v1  ;;  %v22424_v55 = vld [vmem:[#allocation43_spill] sm:$0xff]  ;;  %v12948_v61 = vld [vmem:[%s21829_s5 + $0x1a8] sm:$0xff]  ;;  %v22430_v10 = vld [vmem:[#allocation68_spill] sm:$0xff] }
 0x3af   : > { %9178 = vst [vmem:[#allocation2 + $0x78] sm:$0xff] %v20671_v15  ;;  %v9135_v26 = vmax.f32 %v9093_v32, 0.0  ;;  %v9096_v28 = vadd.f32 %v20509_v4, %v9047_v2  ;;  %v9046_v63 = vadd.f32 %v8901_v22, %v8556_v17  ;;  %15463 = vmatprep.mubr.f32.mxu1 %v20671_v15  ;;  %15495 = vmatpush3.msra.mxu0 %v12937_v5  ;;  %v22425_v17 = vld [vmem:[#allocation15_spill] sm:$0xff]  ;;  %v22426_v32 = vld [vmem:[#allocation16_spill] sm:$0xff] }
 0x3b0   : > { %v15314_v44 = vpop.f32.mrf.mxu1  ;;  %v20694_v56 = vld [vmem:[#allocation2 + $0x49] sm:$0xff]  ;;  %v20696_v9 = vld [vmem:[#allocation2 + $0x51] sm:$0xff]  ;;  %15496 = vmatprep.subr.mxu0 %v12936_v51  ;;  %15569 = vmatpush3.msra.mxu1 %v12950_v46  ;;  %v7091_v46 = vadd.f32 %v22422_v37, %v6601_v40  ;;  %v8070_v5 = vadd.f32 %v22423_v35, %v7579_v16  ;;  %v8561_v21 = vadd.f32 %v20492_v42, %v22424_v55  ;;  %v12931_v55 = vld [vmem:[%s21829_s5 + $0x120] sm:$0xff] }
 0x3b1   : > { %9177 = vst [vmem:[#allocation2 + $0x70] sm:$0xff] %v9135_v26  ;;  %v9138_v60 = vmax.f32 %v9096_v28, 0.0  ;;  %v9095_v52 = vadd.f32 %v20509_v4, %v9046_v63  ;;  %v9049_v34 = vadd.f32 %v15314_v44, %v8559_v23  ;;  %15389 = vmatprep.mubr.f32.mxu0 %v20694_v56  ;;  %15497 = vmatpush3.msra.mxu0 %v12936_v51  ;;  %v22427_v51 = vld [vmem:[#allocation8_spill] sm:$0xff]  ;;  %v12933_v42 = vld [vmem:[%s21829_s5 + $0x130] sm:$0xff]  ;;  %v12947_v23 = vld [vmem:[%s21829_s5 + $0x1a0] sm:$0xff] }
 0x3b2   : > { %v8911_v53 = vpop.f32.mrf.mxu1  ;;  %15390 = vmatmul.mubr.f32.gmra.mxu0 %v20696_v9  ;;  %15498 = vmatprep.subr.mxu0 %v12935_v57  ;;  %v6603_v2 = vadd.f32 %v22426_v32, %v22425_v17  ;;  %v7581_v30 = vadd.f32 %v22427_v51, %v7091_v46  ;;  %v8560_v1 = vadd.f32 %v20500_v31, %v8070_v5  ;;  %v22428_v26 = vld [vmem:[#allocation65_spill] sm:$0xff]  ;;  %v20740_v31 = vpop.f32.mrf.mxu0  ;;  %v22436_v32 = vld [vmem:[#allocation40_spill] sm:$0xff] }
 0x3b3   : > { %9180 = vst [vmem:[#allocation2 + $0x88] sm:$0xff] %v9138_v60  ;;  %v20714_v6 = vmax.f32 %v9095_v52, 0.0  ;;  %v9098_v3 = vadd.f32 %v20509_v4, %v9049_v34  ;;  %v9048_v62 = vadd.f32 %v8911_v53, %v8558_v24  ;;  %15499 = vmatpush3.msra.mxu0 %v12935_v57  ;;  %15570 = vmatprep.subr.mxu1 %v12949_v47  ;;  %v22429_v63 = vld [vmem:[#allocation49_spill] sm:$0xff]  ;;  %v22431_v24 = vld [vmem:[#allocation47_spill] sm:$0xff] }
 0x3b4   : > { %v15317_v11 = vpop.f32.mrf.mxu1  ;;  %v20723_v20 = vld [vmem:[#allocation2 + $0x61] sm:$0xff]  ;;  %15500 = vmatprep.subr.mxu0 %v12934_v59  ;;  %15571 = vmatpush3.msra.mxu1 %v12949_v47  ;;  %v7093_v28 = vadd.f32 %v22428_v26, %v6603_v2  ;;  %v8072_v57 = vadd.f32 %v22429_v63, %v7581_v30  ;;  %v8563_v40 = vadd.f32 %v20513_v8, %v22430_v10  ;;  %v22432_v60 = vld [vmem:[#allocation59_spill] sm:$0xff] }
 0x3b5   : > { %9179 = vst [vmem:[#allocation2 + $0x80] sm:$0xff] %v20714_v6  ;;  %v20730_v22 = vmax.f32 %v9098_v3, 0.0  ;;  %v9097_v25 = vadd.f32 %v20509_v4, %v9048_v62  ;;  %v9051_v45 = vadd.f32 %v15317_v11, %v8561_v21  ;;  %15392 = vmatprep.mubr.f32.mxu0 %v20723_v20  ;;  %15464 = vmatmul.mubr.f32.gmra.mxu1 %v20714_v6  ;;  %v12932_v47 = vld [vmem:[%s21829_s5 + $0x128] sm:$0xff]  ;;  %v22433_v34 = vld [vmem:[#allocation31_spill] sm:$0xff]  ;;  %v22439_v26 = vld [vmem:[#allocation9_spill] sm:$0xff] }
 0x3b6   : > { %v8921_v18 = vpop.f32.mrf.mxu1  ;;  %15501 = vmatpush3.msra.mxu0 %v12934_v59  ;;  %15572 = vmatprep.subr.mxu1 %v12948_v61  ;;  %v6605_v52 = vadd.f32 %v22432_v60, %v22431_v24  ;;  %v7583_v59 = vadd.f32 %v22433_v34, %v7093_v28  ;;  %v8562_v46 = vadd.f32 %v20524_v36, %v8072_v57  ;;  %v22434_v21 = vld [vmem:[#allocation3_spill] sm:$0xff]  ;;  %v20768_v36 = vpop.f32.mrf.mxu0  ;;  %v22440_v24 = vld [vmem:[#allocation26_spill] sm:$0xff]  ;;  %v22441_v60 = vld [vmem:[#allocation44_spill] sm:$0xff] }
 0x3b7   : > { %9182 = vst [vmem:[#allocation2 + $0x98] sm:$0xff] %v20730_v22  ;;  %v20745_v29 = vmax.f32 %v9097_v25, 0.0  ;;  %v9100_v16 = vadd.f32 %v20509_v4, %v9051_v45  ;;  %v9050_v44 = vadd.f32 %v8921_v18, %v8560_v1  ;;  %15502 = vmatprep.subr.mxu0 %v12933_v42  ;;  %15573 = vmatpush3.msra.mxu1 %v12948_v61  ;;  %v22435_v62 = vld [vmem:[#allocation51_spill] sm:$0xff]  ;;  %v22437_v1 = vld [vmem:[#allocation17_spill] sm:$0xff]  ;;  %v22438_v25 = vld [vmem:[#allocation18_spill] sm:$0xff] }
 0x3b8   : > { %v15320_v37 = vpop.f32.mrf.mxu1  ;;  %v20754_v8 = vld [vmem:[#allocation2 + $0x69] sm:$0xff]  ;;  %15503 = vmatpush3.msra.mxu0 %v12933_v42  ;;  %15574 = vmatprep.subr.mxu1 %v12947_v23  ;;  %v7095_v3 = vadd.f32 %v22434_v21, %v6605_v52  ;;  %v8074_v61 = vadd.f32 %v22435_v62, %v7583_v59  ;;  %v8565_v2 = vadd.f32 %v20539_v33, %v22436_v32  ;;  %v12930_v42 = vld [vmem:[%s21829_s5 + $0x118] sm:$0xff]  ;;  %v20797_v34 = vpop.f32.mrf.mxu0 }
 0x3b9   : > { %9181 = vst [vmem:[#allocation2 + $0x90] sm:$0xff] %v20745_v29  ;;  %v20758_v35 = vmax.f32 %v9100_v16, 0.0  ;;  %v9099_v5 = vadd.f32 %v20509_v4, %v9050_v44  ;;  %v9053_v53 = vadd.f32 %v15320_v37, %v8563_v40  ;;  %15393 = vmatmul.mubr.f32.gmra.mxu0 %v20754_v8  ;;  %15466 = vmatprep.mubr.f32.mxu1 %v20745_v29  ;;  %v12946_v18 = vld [vmem:[%s21829_s5 + $0x198] sm:$0xff] }
 0x3ba   : > { %v8931_v17 = vpop.f32.mrf.mxu1  ;;  %15467 = vmatmul.mubr.f32.gmra.mxu1 %v20730_v22  ;;  %15504 = vmatprep.subr.mxu0 %v12932_v47  ;;  %v6607_v45 = vadd.f32 %v22438_v25, %v22437_v1  ;;  %v7585_v28 = vadd.f32 %v22439_v26, %v7095_v3  ;;  %v8564_v10 = vadd.f32 %v20558_v7, %v8074_v61  ;;  %v22442_v7 = vld [vmem:[#allocation41_spill] sm:$0xff]  ;;  %v22443_v21 = vld [vmem:[#allocation48_spill] sm:$0xff]  ;;  %v12944_v1 = vld [vmem:[%s21829_s5 + $0x188] sm:$0xff] }
 0x3bb   : > { %9184 = vst [vmem:[#allocation2 + $0xa8] sm:$0xff] %v20758_v35  ;;  %v9141_v51 = vmax.f32 %v9099_v5, 0.0  ;;  %v9102_v30 = vadd.f32 %v20509_v4, %v9053_v53  ;;  %v9052_v11 = vadd.f32 %v8931_v17, %v8562_v46  ;;  %15469 = vmatprep.mubr.f32.mxu1 %v20758_v35  ;;  %15505 = vmatpush3.msra.mxu0 %v12932_v47  ;;  %v12929_v47 = vld [vmem:[%s21829_s5 + $0x110] sm:$0xff]  ;;  %v22444_v3 = vld [vmem:[#allocation20_spill] sm:$0xff]  ;;  %v22446_v25 = vld [vmem:[#allocation66_spill] sm:$0xff] }
 0x3bc   : > { %v15323_v63 = vpop.f32.mrf.mxu1  ;;  %v20782_v33 = vld [vmem:[#allocation2 + $0x79] sm:$0xff]  ;;  %v20784_v57 = vld [vmem:[#allocation2 + $0x81] sm:$0xff]  ;;  %15506 = vmatprep.subr.mxu0 %v12931_v55  ;;  %15575 = vmatpush3.msra.mxu1 %v12947_v23  ;;  %v7097_v23 = vadd.f32 %v22440_v24, %v6607_v45  ;;  %v8076_v52 = vadd.f32 %v22441_v60, %v7585_v28  ;;  %v8567_v37 = vadd.f32 %v20577_v58, %v22442_v7 }
 0x3bd   : > { %9183 = vst [vmem:[#allocation2 + $0xa0] sm:$0xff] %v9141_v51  ;;  %v9144_v40 = vmax.f32 %v9102_v30, 0.0  ;;  %v9101_v16 = vadd.f32 %v20509_v4, %v9052_v11  ;;  %v9055_v44 = vadd.f32 %v15323_v63, %v8565_v2  ;;  %15395 = vmatprep.mubr.f32.mxu0 %v20782_v33  ;;  %15507 = vmatpush3.msra.mxu0 %v12931_v55  ;;  %v12945_v55 = vld [vmem:[%s21829_s5 + $0x190] sm:$0xff]  ;;  %v22445_v61 = vld [vmem:[#allocation32_spill] sm:$0xff]  ;;  %v12928_v58 = vld [vmem:[%s21829_s5 + $0x108] sm:$0xff] }
 0x3be   : > { %v8941_v59 = vpop.f32.mrf.mxu1  ;;  %15396 = vmatmul.mubr.f32.gmra.mxu0 %v20784_v57  ;;  %15508 = vmatprep.subr.mxu0 %v12930_v42  ;;  %v6609_v62 = vadd.f32 %v22444_v3, %v22443_v21  ;;  %v7587_v17 = vadd.f32 %v22445_v61, %v7097_v23  ;;  %v8566_v51 = vadd.f32 %v20603_v41, %v8076_v52  ;;  %v22447_v26 = vld [vmem:[#allocation70_spill] sm:$0xff]  ;;  %v20828_v41 = vpop.f32.mrf.mxu0  ;;  %v12927_v24 = vld [vmem:[%s21829_s5 + $0x100] sm:$0xff]  ;;  %v22449_v23 = vld [vmem:[#allocation19_spill] sm:$0xff] }
 0x3bf   : > { %9186 = vst [vmem:[#allocation2 + $0xb8] sm:$0xff] %v9144_v40  ;;  %v20802_v46 = vmax.f32 %v9101_v16, 0.0  ;;  %v9104_v5 = vadd.f32 %v20509_v4, %v9055_v44  ;;  %v9054_v53 = vadd.f32 %v8941_v59, %v8564_v10  ;;  %15509 = vmatpush3.msra.mxu0 %v12930_v42  ;;  %15576 = vmatprep.subr.mxu1 %v12946_v18  ;;  %v22450_v60 = vld [vmem:[#allocation62_spill] sm:$0xff]  ;;  %v12943_v21 = vld [vmem:[%s21829_s5 + $0x180] sm:$0xff]  ;;  %v22452_v3 = vld [vmem:[#allocation4_spill] sm:$0xff] }
 0x3c0   : > { %v15326_v32 = vpop.f32.mrf.mxu1  ;;  %v20811_v2 = vld [vmem:[#allocation2 + $0x91] sm:$0xff]  ;;  %15510 = vmatprep.subr.mxu0 %v12929_v47  ;;  %15577 = vmatpush3.msra.mxu1 %v12946_v18  ;;  %v7099_v45 = vadd.f32 %v22446_v25, %v6609_v62  ;;  %v8078_v28 = vadd.f32 %v22447_v26, %v7587_v17  ;;  %v22448_v18 = vld [vmem:[#allocation69_spill] sm:$0xff]  ;;  %v22451_v52 = vld [vmem:[#allocation10_spill] sm:$0xff] }
 0x3c1   : > { %9185 = vst [vmem:[#allocation2 + $0xb0] sm:$0xff] %v20802_v46  ;;  %v20818_v30 = vmax.f32 %v9104_v5, 0.0  ;;  %v9103_v11 = vadd.f32 %v20509_v4, %v9054_v53  ;;  %v9057_v42 = vadd.f32 %v15326_v32, %v8567_v37  ;;  %15398 = vmatprep.mubr.f32.mxu0 %v20811_v2  ;;  %15470 = vmatmul.mubr.f32.gmra.mxu1 %v20802_v46  ;;  %v22453_v61 = vld [vmem:[#allocation72_spill] sm:$0xff]  ;;  %v22455_v26 = vld [vmem:[#allocation23_spill] sm:$0xff] }
 0x3c2   : > { %v8951_v63 = vpop.f32.mrf.mxu1  ;;  %15511 = vmatpush3.msra.mxu0 %v12929_v47  ;;  %15578 = vmatprep.subr.mxu1 %v12945_v55  ;;  %v8569_v10 = vadd.f32 %v20628_v39, %v22448_v18  ;;  %v6611_v47 = vadd.f32 %v22450_v60, %v22449_v23  ;;  %v7589_v59 = vadd.f32 %v22451_v52, %v7099_v45  ;;  %v20867_v45 = vld [vmem:[%s21829_s5 + $0x278] sm:$0xff]  ;;  %v22457_v18 = vld [vmem:[#allocation33_spill] sm:$0xff] }
 0x3c3   : > { %9188 = vst [vmem:[#allocation2 + $0xc8] sm:$0xff] %v20818_v30  ;;  %v20833_v40 = vmax.f32 %v9103_v11, 0.0  ;;  %v9106_v16 = vadd.f32 %v20509_v4, %v9057_v42  ;;  %v9056_v44 = vadd.f32 %v8951_v63, %v8566_v51  ;;  %15512 = vmatprep.subr.mxu0 %v12928_v58  ;;  %15579 = vmatpush3.msra.mxu1 %v12945_v55 }
 0x3c4   : > { %v15329_v7 = vpop.f32.mrf.mxu1  ;;  %v20842_v39 = vld [vmem:[#allocation2 + $0x99] sm:$0xff]  ;;  %15513 = vmatpush3.msra.mxu0 %v12928_v58  ;;  %15580 = vmatprep.subr.mxu1 %v12944_v1  ;;  %v8568_v37 = vadd.f32 %v20655_v50, %v8078_v28  ;;  %v7101_v62 = vadd.f32 %v22452_v3, %v6611_v47  ;;  %v8080_v17 = vadd.f32 %v22453_v61, %v7589_v59  ;;  %v20856_v50 = vpop.f32.mrf.mxu0  ;;  %v22454_v58 = vld [vmem:[#allocation71_spill] sm:$0xff]  ;;  %v22460_v3 = vld [vmem:[#allocation74_spill] sm:$0xff] }
 0x3c5   : > { %9187 = vst [vmem:[#allocation2 + $0xc0] sm:$0xff] %v20833_v40  ;;  %v20846_v5 = vmax.f32 %v9106_v16, 0.0  ;;  %v9105_v53 = vadd.f32 %v20509_v4, %v9056_v44  ;;  %v9059_v55 = vadd.f32 %v15329_v7, %v8569_v10  ;;  %15399 = vmatmul.mubr.f32.gmra.mxu0 %v20842_v39  ;;  %15472 = vmatprep.mubr.f32.mxu1 %v20833_v40  ;;  %v22456_v28 = vld [vmem:[#allocation21_spill] sm:$0xff]  ;;  %v22458_v59 = vld [vmem:[#allocation27_spill] sm:$0xff] }
 0x3c6   : > { %v8961_v32 = vpop.f32.mrf.mxu1  ;;  %15473 = vmatmul.mubr.f32.gmra.mxu1 %v20818_v30  ;;  %15514 = vmatprep.subr.mxu0 %v12927_v24  ;;  %v8571_v51 = vadd.f32 %v20680_v49, %v22454_v58  ;;  %v6613_v63 = vadd.f32 %v22456_v28, %v22455_v26  ;;  %v7591_v10 = vadd.f32 %v22457_v18, %v7101_v62  ;;  %v22464_v18 = vld [vmem:[#allocation28_spill] sm:$0xff] }
 0x3c7   : > { %9190 = vst [vmem:[#allocation2 + $0xd8] sm:$0xff] %v20846_v5  ;;  %v9147_v11 = vmax.f32 %v9105_v53, 0.0  ;;  %v9108_v42 = vadd.f32 %v20509_v4, %v9059_v55  ;;  %v9058_v25 = vadd.f32 %v8961_v32, %v8568_v37  ;;  %15475 = vmatprep.mubr.f32.mxu1 %v20846_v5  ;;  %15581 = vmatpush3.msra.mxu1 %v12944_v1  ;;  %v20879_v1 = vld [vmem:[%s21829_s5 + $0x2f8] sm:$0xff]  ;;  %v22459_v37 = vld [vmem:[#allocation75_spill] sm:$0xff]  ;;  %v8511_v53 = vpop.f32.mrf.mxu0  ;;  %v22462_v32 = vld [vmem:[#allocation22_spill] sm:$0xff] }
 0x3c8   : > { %v15332_v49 = vpop.f32.mrf.mxu1  ;;  %v20872_v16 = vld [vmem:[#allocation2 + $0xa9] sm:$0xff]  ;;  %v20874_v44 = vld [vmem:[#allocation2 + $0xb1] sm:$0xff]  ;;  %15515 = vmatpush3.msra.mxu0 %v12927_v24  ;;  %15582 = vmatprep.subr.mxu1 %v12943_v21  ;;  %v8570_v23 = vadd.f32 %v20709_v14, %v8080_v17  ;;  %v7103_v7 = vadd.f32 %v22458_v59, %v6613_v63  ;;  %v8082_v24 = vadd.f32 %v22459_v37, %v7591_v10 }
 0x3c9   : > { %9189 = vst [vmem:[#allocation2 + $0xd0] sm:$0xff] %v9147_v11  ;;  %v9150_v60 = vmax.f32 %v9108_v42, 0.0  ;;  %v9107_v47 = vadd.f32 %v20509_v4, %v9058_v25  ;;  %v9061_v52 = vadd.f32 %v15332_v49, %v8571_v51  ;;  %15401 = vmatprep.mubr.f32.mxu0 %v20872_v16  ;;  %15583 = vmatpush3.msra.mxu1 %v12943_v21  ;;  %v22461_v21 = vld [vmem:[#allocation24_spill] sm:$0xff]  ;;  %v22463_v51 = vld [vmem:[#allocation11_spill] sm:$0xff] }
 0x3ca   : > { %v8971_v55 = vpop.f32.mrf.mxu1  ;;  %15402 = vmatmul.mubr.f32.gmra.mxu0 %v20874_v44  ;;  %15620 = vmatprep.subr.mxu0 %v20867_v45  ;;  %v8573_v14 = vadd.f32 %v20740_v31, %v22460_v3  ;;  %v6615_v58 = vadd.f32 %v22462_v32, %v22461_v21  ;;  %v7593_v11 = vadd.f32 %v22463_v51, %v7103_v7  ;;  %v22465_v49 = vld [vmem:[#allocation79_spill] sm:$0xff] }
 0x3cb   : > { %9192 = vst [vmem:[#allocation2 + $0xe8] sm:$0xff] %v9150_v60  ;;  %v20890_v62 = vmax.f32 %v9107_v47, 0.0  ;;  %v9110_v61 = vadd.f32 %v20509_v4, %v9061_v52  ;;  %v9060_v17 = vadd.f32 %v8971_v55, %v8570_v23  ;;  %15688 = vmatprep.subr.mxu1 %v20879_v1  ;;  %v8572_v26 = vadd.f32 %v20768_v36, %v8082_v24  ;;  %v15279_v60 = vpop.f32.mrf.mxu0  ;;  %v22466_v52 = vld [vmem:[#allocation78_spill] sm:$0xff]  ;;  %v22467_v24 = vld [vmem:[#allocation25_spill] sm:$0xff]  ;;  %v22468_v55 = vld [vmem:[#allocation56_spill] sm:$0xff] }
 0x3cc   : > { %v15335_v42 = vpop.f32.mrf.mxu1  ;;  %v20897_v25 = vld [vmem:[#allocation2 + $0xc1] sm:$0xff]  ;;  %v7105_v10 = vadd.f32 %v22464_v18, %v6615_v58  ;;  %v8084_v23 = vadd.f32 %v22465_v49, %v7593_v11  ;;  %v8575_v36 = vadd.f32 %v20797_v34, %v22466_v52  ;;  %v6617_v3 = vadd.f32 %v22468_v55, %v22467_v24 }
 0x3cd   : > { %9191 = vst [vmem:[#allocation2 + $0xe0] sm:$0xff] %v20890_v62  ;;  %v20901_v31 = vmax.f32 %v9110_v61, 0.0  ;;  %v9109_v28 = vadd.f32 %v20509_v4, %v9060_v17  ;;  %v9063_v63 = vadd.f32 %v15335_v42, %v8573_v14  ;;  %15404 = vmatprep.mubr.f32.mxu0 %v20897_v25  ;;  %15476 = vmatmul.mubr.f32.gmra.mxu1 %v20890_v62  ;;  %v22469_v14 = vld [vmem:[#allocation34_spill] sm:$0xff]  ;;  %v22470_v11 = vld [vmem:[#allocation29_spill] sm:$0xff] }
 0x3ce   : > { %v8981_v47 = vpop.f32.mrf.mxu1  ;;  %v7595_v61 = vadd.f32 %v22469_v14, %v7105_v10  ;;  %v8574_v32 = vadd.f32 %v20828_v41, %v8084_v23  ;;  %v7107_v42 = vadd.f32 %v22470_v11, %v6617_v3  ;;  %v22471_v41 = vld [vmem:[#allocation81_spill] sm:$0xff]  ;;  %v22473_v52 = vld [vmem:[#allocation58_spill] sm:$0xff] }
 0x3cf   : > { %9194 = vst [vmem:[#allocation2 + $0xf8] sm:$0xff] %v20901_v31  ;;  %v20911_v59 = vmax.f32 %v9109_v28, 0.0  ;;  %v9112_v7 = vadd.f32 %v20509_v4, %v9063_v63  ;;  %v9062_v37 = vadd.f32 %v8981_v47, %v8572_v26  ;;  %v8521_v28 = vpop.f32.mrf.mxu0  ;;  %v8577_v18 = vadd.f32 %v20856_v50, %v22471_v41  ;;  %v22472_v47 = vld [vmem:[#allocation57_spill] sm:$0xff] }
 0x3d0   : > { %v15338_v17 = vpop.f32.mrf.mxu1  ;;  %v20917_v21 = vld [vmem:[#allocation2 + $0xc9] sm:$0xff]  ;;  %v8086_v26 = vadd.f32 %v20486_v0, %v7595_v61 }
 0x3d1   : > { %9193 = vst [vmem:[#allocation2 + $0xf0] sm:$0xff] %v20911_v59  ;;  %v20921_v34 = vmax.f32 %v9112_v7, 0.0  ;;  %v9111_v58 = vadd.f32 %v20509_v4, %v9062_v37  ;;  %v9065_v51 = vadd.f32 %v15338_v17, %v8575_v36  ;;  %15405 = vmatmul.mubr.f32.gmra.mxu0 %v20917_v21  ;;  %15478 = vmatprep.mubr.f32.mxu1 %v20911_v59  ;;  %v22474_v7 = vld [vmem:[#allocation35_spill] sm:$0xff]  ;;  %v22475_v17 = vld [vmem:[#allocation30_spill] sm:$0xff]  ;;  %v15282_v11 = vpop.f32.mrf.mxu0 }
 0x3d2   : > { %v8991_v63 = vpop.f32.mrf.mxu1  ;;  %15479 = vmatmul.mubr.f32.gmra.mxu1 %v20901_v31  ;;  %v6619_v36 = vadd.f32 %v22473_v52, %v22472_v47  ;;  %v7597_v0 = vadd.f32 %v22474_v7, %v7107_v42  ;;  %v8576_v3 = vadd.f32 %v8511_v53, %v8086_v26  ;;  %v22477_v42 = vld [vmem:[#allocation82_spill] sm:$0xff] }
 0x3d3   : > { %9196 = vst [vmem:[#allocation2 + $0x108] sm:$0xff] %v20921_v34  ;;  %v9153_v10 = vmax.f32 %v9111_v58, 0.0  ;;  %v9114_v49 = vadd.f32 %v20509_v4, %v9065_v51  ;;  %v9064_v23 = vadd.f32 %v8991_v63, %v8574_v32  ;;  %15481 = vmatprep.mubr.f32.mxu1 %v20921_v34  ;;  %v22476_v58 = vld [vmem:[#allocation83_spill] sm:$0xff]  ;;  %v8579_v41 = vadd.f32 %v15279_v60, %v22477_v42 }
 0x3d4   : > { %v15341_v37 = vpop.f32.mrf.mxu1  ;;  %v20937_v24 = vld [vmem:[#allocation2 + $0xd9] sm:$0xff]  ;;  %v20939_v55 = vld [vmem:[#allocation2 + $0xe1] sm:$0xff]  ;;  %v7109_v32 = vadd.f32 %v22475_v17, %v6619_v36  ;;  %v8088_v51 = vadd.f32 %v22476_v58, %v7597_v0 }
 0x3d5   : > { %9195 = vst [vmem:[#allocation2 + $0x100] sm:$0xff] %v9153_v10  ;;  %v9156_v50 = vmax.f32 %v9114_v49, 0.0  ;;  %v9113_v14 = vadd.f32 %v20509_v4, %v9064_v23  ;;  %v9067_v61 = vadd.f32 %v15341_v37, %v8577_v18  ;;  %15407 = vmatprep.mubr.f32.mxu0 %v20937_v24  ;;  %v22478_v18 = vld [vmem:[#allocation14_spill] sm:$0xff]  ;;  %v22479_v0 = vld [vmem:[#allocation85_spill] sm:$0xff] }
 0x3d6   : > { %v9001_v63 = vpop.f32.mrf.mxu1  ;;  %15408 = vmatmul.mubr.f32.gmra.mxu0 %v20939_v55  ;;  %v7599_v10 = vadd.f32 %v22478_v18, %v7109_v32  ;;  %v8578_v52 = vadd.f32 %v8521_v28, %v8088_v51 }
 0x3d7   : > { %9198 = vst [vmem:[#allocation2 + $0x118] sm:$0xff] %v9156_v50  ;;  %v20947_v47 = vmax.f32 %v9113_v14, 0.0  ;;  %v20950_v53 = vadd.f32 %v20509_v4, %v9067_v61  ;;  %v9066_v26 = vadd.f32 %v9001_v63, %v8576_v3  ;;  %v8531_v3 = vpop.f32.mrf.mxu0  ;;  %v22480_v14 = vld [vmem:[#allocation84_spill] sm:$0xff]  ;;  %v12989_v63 = vld [vmem:[%s21829_s5 + $0x2f0] sm:$0xff] }
 0x3d8   : > { %v15344_v49 = vpop.f32.mrf.mxu1  ;;  %v20953_v23 = vld [vmem:[#allocation2 + $0xf1] sm:$0xff]  ;;  %v8090_v37 = vadd.f32 %v22479_v0, %v7599_v10  ;;  %v8581_v28 = vadd.f32 %v15282_v11, %v22480_v14  ;;  %v21009_v14 = vld [vmem:[#allocation2 + $0x22] sm:$0xff] }
 0x3d9   : > { %9197 = vst [vmem:[#allocation2 + $0x110] sm:$0xff] %v20947_v47  ;;  %v9158_v36 = vmax.f32 %v20950_v53, 0.0  ;;  %v20958_v7 = vadd.f32 %v20509_v4, %v9066_v26  ;;  %v9069_v60 = vadd.f32 %v15344_v49, %v8579_v41  ;;  %15410 = vmatprep.mubr.f32.mxu0 %v20953_v23  ;;  %15482 = vmatmul.mubr.f32.gmra.mxu1 %v20947_v47  ;;  %v10158_v53 = vld [vmem:[#allocation2 + $0x21] sm:$0xff] }
 0x3da   : > { %v9011_v50 = vpop.f32.mrf.mxu1  ;;  %15584 = vmatprep.mubr.f32.mxu1 %v20532_v48  ;;  %v8580_v42 = vadd.f32 %v8531_v3, %v8090_v37  ;;  %v12987_v37 = vld [vmem:[%s21829_s5 + $0x2e0] sm:$0xff] }
 0x3db   : > { %9200 = vst [vmem:[#allocation2 + $0x128] sm:$0xff] %v9158_v36  ;;  %v9157_v61 = vmax.f32 %v20958_v7, 0.0  ;;  %v9118_v17 = vadd.f32 %v20509_v4, %v9069_v60  ;;  %v9068_v32 = vadd.f32 %v9011_v50, %v8578_v52  ;;  %v12972_v50 = vld [vmem:[%s21829_s5 + $0x268] sm:$0xff]  ;;  %v12975_v7 = vld [vmem:[%s21829_s5 + $0x280] sm:$0xff] }
 0x3dc   : > { %v15347_v58 = vpop.f32.mrf.mxu1  ;;  %v20969_v51 = vld [vmem:[#allocation2 + $0xf9] sm:$0xff] }
 0x3dd   : > { %9199 = vst [vmem:[#allocation2 + $0x120] sm:$0xff] %v9157_v61  ;;  %v9160_v48 = vmax.f32 %v9118_v17, 0.0  ;;  %v9117_v11 = vadd.f32 %v20509_v4, %v9068_v32  ;;  %v9071_v41 = vadd.f32 %v15347_v58, %v8581_v28  ;;  %15411 = vmatmul.mubr.f32.gmra.mxu0 %v20969_v51  ;;  %15585 = vmatmul.mubr.f32.vlgmr.msra.gmra.mxu1 %v20562_v19  ;;  %v12988_v19 = vld [vmem:[%s21829_s5 + $0x2e8] sm:$0xff]  ;;  %v21023_v28 = vld [vmem:[#allocation2 + $0x3a] sm:$0xff]  ;;  %v21037_v32 = vld [vmem:[#allocation2 + $0x52] sm:$0xff] }
 0x3de   : > { %v9021_v26 = vpop.f32.mrf.mxu1  ;;  %15587 = vmatprep.mubr.f32.mxu1 %v20582_v38  ;;  %15689 = vmatpush3.msra.mxu1 %v20879_v1  ;;  %v9656_v1 = vld [vmem:[#allocation2 + $0x2] sm:$0xff]  ;;  %v21030_v17 = vld [vmem:[#allocation2 + $0x4a] sm:$0xff] }
 0x3df   : > { %9202 = vst [vmem:[#allocation2 + $0x138] sm:$0xff] %v9160_v48  ;;  %v9159_v18 = vmax.f32 %v9117_v11, 0.0  ;;  %v9120_v10 = vadd.f32 %v20509_v4, %v9071_v41  ;;  %v9070_v49 = vadd.f32 %v9021_v26, %v8580_v42  ;;  %15690 = vmatprep.subr.mxu1 %v12989_v63  ;;  %v21044_v58 = vld [vmem:[#allocation2 + $0x62] sm:$0xff]  ;;  %v21058_v42 = vld [vmem:[#allocation2 + $0x7a] sm:$0xff]  ;;  %v12965_v48 = vld [vmem:[%s21829_s5 + $0x230] sm:$0xff] }
 0x3e0   : > { %v20982_v52 = vld [vmem:[#allocation2 + $0x109] sm:$0xff]  ;;  %v20984_v60 = vld [vmem:[#allocation2 + $0x111] sm:$0xff]  ;;  %15691 = vmatpush3.msra.mxu1 %v12989_v63  ;;  %v21081_v26 = vld [vmem:[#allocation2 + $0x9a] sm:$0xff] }
 0x3e1   : > { %9201 = vst [vmem:[#allocation2 + $0x130] sm:$0xff] %v9159_v18  ;;  %v9162_v0 = vmax.f32 %v9120_v10, 0.0  ;;  %v9119_v38 = vadd.f32 %v20509_v4, %v9070_v49  ;;  %15413 = vmatprep.mubr.f32.mxu0 %v20982_v52  ;;  %15588 = vmatmul.mubr.f32.gmra.mxu1 %v20572_v12  ;;  %v9657_v4 = vld [vmem:[#allocation2 + $0xa] sm:$0xff]  ;;  %v21071_v11 = vld [vmem:[#allocation2 + $0x92] sm:$0xff]  ;;  %v12983_v18 = vld [vmem:[%s21829_s5 + $0x2c0] sm:$0xff] }
 0x3e2   : > { %15414 = vmatmul.mubr.f32.gmra.mxu0 %v20984_v60  ;;  %15590 = vmatprep.mubr.f32.mxu1 %v20594_v54  ;;  %v12973_v12 = vld [vmem:[%s21829_s5 + $0x270] sm:$0xff]  ;;  %v21001_v54 = vld [vmem:[#allocation2 + $0x1a] sm:$0xff]  ;;  %v12984_v41 = vld [vmem:[%s21829_s5 + $0x2c8] sm:$0xff] }
 0x3e3   : > { %9204 = vst [vmem:[#allocation2 + $0x148] sm:$0xff] %v9162_v0  ;;  %v9161_v3 = vmax.f32 %v9119_v38, 0.0  ;;  %15516 = vmatprep.mubr.f32.mxu0 %v9656_v1  ;;  %15692 = vmatprep.subr.mxu1 %v12988_v19  ;;  %v21054_v63 = vld [vmem:[#allocation2 + $0x6a] sm:$0xff]  ;;  %v21097_v49 = vld [vmem:[#allocation2 + $0xb2] sm:$0xff] }
 0x3e4   : > { %15693 = vmatpush3.msra.mxu1 %v12988_v19  ;;  %v21088_v10 = vld [vmem:[#allocation2 + $0xaa] sm:$0xff]  ;;  %v21100_v19 = vld [vmem:[#allocation2 + $0xc2] sm:$0xff]  ;;  %v12962_v1 = vld [vmem:[%s21829_s5 + $0x218] sm:$0xff] }
 0x3e5   : > { %9203 = vst [vmem:[#allocation2 + $0x140] sm:$0xff] %v9161_v3  ;;  %15591 = vmatmul.mubr.f32.gmra.mxu1 %v20632_v27  ;;  %15694 = vmatprep.subr.mxu1 %v12987_v37  ;;  %v12971_v27 = vld [vmem:[%s21829_s5 + $0x260] sm:$0xff]  ;;  %v12981_v0 = vld [vmem:[%s21829_s5 + $0x2b0] sm:$0xff] }
 0x3e6   : > { %15517 = vmatmul.mubr.f32.vlgmr.msra.gmra.mxu0 %v9657_v4  ;;  %15593 = vmatprep.mubr.f32.mxu1 %v20660_v13  ;;  %v21016_v13 = vld [vmem:[#allocation2 + $0x32] sm:$0xff]  ;;  %v21108_v38 = vld [vmem:[#allocation2 + $0xca] sm:$0xff]  ;;  %v21124_v3 = vld [vmem:[#allocation2 + $0xe2] sm:$0xff] }
 0x3e7   : > { %15621 = vmatpush3.msra.mxu0 %v20867_v45  ;;  %15519 = vmatprep.mubr.f32.mxu0 %v21001_v54  ;;  %v12970_v45 = vld [vmem:[%s21829_s5 + $0x258] sm:$0xff]  ;;  %v12961_v4 = vld [vmem:[%s21829_s5 + $0x210] sm:$0xff] }
 0x3e8   : > { %15622 = vmatprep.subr.mxu0 %v12973_v12  ;;  %15695 = vmatpush3.msra.mxu1 %v12987_v37  ;;  %v21117_v37 = vld [vmem:[#allocation2 + $0xda] sm:$0xff] }
 0x3e9   : > { %15623 = vmatpush3.msra.mxu0 %v12973_v12  ;;  %15594 = vmatmul.mubr.f32.gmra.mxu1 %v20646_v43  ;;  %v12969_v43 = vld [vmem:[%s21829_s5 + $0x250] sm:$0xff] }
 0x3ea   : > { %15520 = vmatmul.mubr.f32.gmra.mxu0 %v21009_v14  ;;  %15624 = vmatprep.subr.mxu0 %v12972_v50  ;;  %v21131_v12 = vld [vmem:[#allocation2 + $0xf2] sm:$0xff] }
 0x3eb   : > { %15522 = vmatprep.mubr.f32.mxu0 %v21016_v13  ;;  %15625 = vmatpush3.msra.mxu0 %v12972_v50  ;;  %v12960_v50 = vld [vmem:[%s21829_s5 + $0x208] sm:$0xff] }
 0x3ec   : > { %15626 = vmatprep.subr.mxu0 %v12971_v27  ;;  %15596 = vmatprep.mubr.f32.mxu1 %v20671_v15  ;;  %v12968_v15 = vld [vmem:[%s21829_s5 + $0x248] sm:$0xff] }
 0x3ed   : > { %15627 = vmatpush3.msra.mxu0 %v12971_v27  ;;  %15597 = vmatmul.mubr.f32.gmra.mxu1 %v20714_v6  ;;  %v12967_v6 = vld [vmem:[%s21829_s5 + $0x240] sm:$0xff]  ;;  %v12977_v27 = vld [vmem:[%s21829_s5 + $0x290] sm:$0xff] }
 0x3ee   : > { %15523 = vmatmul.mubr.f32.gmra.mxu0 %v21023_v28  ;;  %15628 = vmatprep.subr.mxu0 %v12970_v45 }
 0x3ef   : > { %15525 = vmatprep.mubr.f32.mxu0 %v21030_v17  ;;  %15629 = vmatpush3.msra.mxu0 %v12970_v45  ;;  %v21149_v45 = vld [vmem:[#allocation2 + $0x10a] sm:$0xff] }
 0x3f0   : > { %15630 = vmatprep.subr.mxu0 %v12969_v43  ;;  %15599 = vmatprep.mubr.f32.mxu1 %v20745_v29  ;;  %v12966_v29 = vld [vmem:[%s21829_s5 + $0x238] sm:$0xff] }
 0x3f1   : > { %15631 = vmatpush3.msra.mxu0 %v12969_v43  ;;  %15600 = vmatmul.mubr.f32.gmra.mxu1 %v20730_v22  ;;  %v12986_v22 = vld [vmem:[%s21829_s5 + $0x2d8] sm:$0xff] }
 0x3f2   : > { %15526 = vmatmul.mubr.f32.gmra.mxu0 %v21037_v32  ;;  %15632 = vmatprep.subr.mxu0 %v12968_v15  ;;  %v21155_v43 = vld [vmem:[#allocation2 + $0x112] sm:$0xff] }
 0x3f3   : > { %15528 = vmatprep.mubr.f32.mxu0 %v21044_v58  ;;  %15633 = vmatpush3.msra.mxu0 %v12968_v15  ;;  %v12959_v15 = vld [vmem:[%s21829_s5 + $0x200] sm:$0xff] }
 0x3f4   : > { %15602 = vmatprep.mubr.f32.mxu1 %v20758_v35  ;;  %15634 = vmatprep.subr.mxu0 %v12967_v6  ;;  %v12985_v35 = vld [vmem:[%s21829_s5 + $0x2d0] sm:$0xff] }
 0x3f5   : > { %15635 = vmatpush3.msra.mxu0 %v12967_v6  ;;  %15603 = vmatmul.mubr.f32.gmra.mxu1 %v20802_v46  ;;  %v21068_v46 = vld [vmem:[#allocation2 + $0x82] sm:$0xff]  ;;  %v10157_v6 = vld [vmem:[#allocation2 + $0x19] sm:$0xff] }
 0x3f6   : > { %15529 = vmatmul.mubr.f32.gmra.mxu0 %v21054_v63  ;;  %15636 = vmatprep.subr.mxu0 %v12966_v29 }
 0x3f7   : > { %15531 = vmatprep.mubr.f32.mxu0 %v21058_v42  ;;  %15696 = vmatprep.subr.mxu1 %v12986_v22 }
 0x3f8   : > { %15605 = vmatprep.mubr.f32.mxu1 %v20833_v40  ;;  %15637 = vmatpush3.msra.mxu0 %v12966_v29  ;;  %v12964_v40 = vld [vmem:[%s21829_s5 + $0x228] sm:$0xff]  ;;  %v13022_v29 = vld [vmem:[%s21829_s5 + $0x3f8] sm:$0xff] }
 0x3f9   : > { %15697 = vmatpush3.msra.mxu1 %v12986_v22  ;;  %15638 = vmatprep.subr.mxu0 %v12965_v48  ;;  %v13004_v22 = vld [vmem:[%s21829_s5 + $0x368] sm:$0xff] }
 0x3fa   : > { %15532 = vmatmul.mubr.f32.gmra.mxu0 %v21068_v46  ;;  %15698 = vmatprep.subr.mxu1 %v12985_v35 }
 0x3fb   : > { %15534 = vmatprep.mubr.f32.mxu0 %v21071_v11  ;;  %15699 = vmatpush3.msra.mxu1 %v12985_v35  ;;  %v13010_v35 = vld [vmem:[%s21829_s5 + $0x398] sm:$0xff] }
 0x3fc   : > { %15606 = vmatmul.mubr.f32.gmra.mxu1 %v20818_v30  ;;  %15639 = vmatpush3.msra.mxu0 %v12965_v48  ;;  %v12963_v30 = vld [vmem:[%s21829_s5 + $0x220] sm:$0xff] }
 0x3fd   : > { %15700 = vmatprep.subr.mxu1 %v12984_v41  ;;  %15608 = vmatprep.mubr.f32.mxu1 %v20846_v5  ;;  %v12982_v5 = vld [vmem:[%s21829_s5 + $0x2b8] sm:$0xff]  ;;  %v13003_v48 = vld [vmem:[%s21829_s5 + $0x360] sm:$0xff] }
 0x3fe   : > { %15535 = vmatmul.mubr.f32.gmra.mxu0 %v21081_v26  ;;  %15701 = vmatpush3.msra.mxu1 %v12984_v41  ;;  %v21293_v41 = vld [vmem:[#allocation2 + $0x122] sm:$0xff] }
 0x3ff   : > { %15537 = vmatprep.mubr.f32.mxu0 %v21088_v10  ;;  %15640 = vmatprep.subr.mxu0 %v12964_v40 }
 0x400   : > { %15702 = vmatprep.subr.mxu1 %v12983_v18  ;;  %15641 = vmatpush3.msra.mxu0 %v12964_v40  ;;  %v21299_v40 = vld [vmem:[#allocation2 + $0x121] sm:$0xff] }
 0x401   : > { %15703 = vmatpush3.msra.mxu1 %v12983_v18  ;;  %15642 = vmatprep.subr.mxu0 %v12963_v30  ;;  %v13008_v18 = vld [vmem:[%s21829_s5 + $0x388] sm:$0xff] }
 0x402   : > { %15538 = vmatmul.mubr.f32.gmra.mxu0 %v21097_v49  ;;  %15609 = vmatmul.mubr.f32.gmra.mxu1 %v20890_v62  ;;  %v12980_v62 = vld [vmem:[%s21829_s5 + $0x2a8] sm:$0xff] }
 0x403   : > { %15540 = vmatprep.mubr.f32.mxu0 %v21100_v19  ;;  %15704 = vmatprep.subr.mxu1 %v12982_v5 }
 0x404   : > { %15611 = vmatprep.mubr.f32.mxu1 %v20911_v59  ;;  %15705 = vmatpush3.msra.mxu1 %v12982_v5  ;;  %v12979_v59 = vld [vmem:[%s21829_s5 + $0x2a0] sm:$0xff]  ;;  %v21310_v5 = vld [vmem:[#allocation2 + $0x12a] sm:$0xff] }
 0x405   : > { %15643 = vmatpush3.msra.mxu0 %v12963_v30  ;;  %15706 = vmatprep.subr.mxu1 %v12981_v0  ;;  %v12991_v30 = vld [vmem:[%s21829_s5 + $0x300] sm:$0xff] }
 0x406   : > { %15541 = vmatmul.mubr.f32.gmra.mxu0 %v21108_v38  ;;  %15707 = vmatpush3.msra.mxu1 %v12981_v0  ;;  %v13007_v0 = vld [vmem:[%s21829_s5 + $0x380] sm:$0xff] }
 0x407   : > { %15543 = vmatprep.mubr.f32.mxu0 %v21117_v37  ;;  %15612 = vmatmul.mubr.f32.gmra.mxu1 %v20901_v31  ;;  %v12978_v31 = vld [vmem:[%s21829_s5 + $0x298] sm:$0xff] }
 0x408   : > { %15644 = vmatprep.subr.mxu0 %v12962_v1  ;;  %15708 = vmatprep.subr.mxu1 %v12980_v62 }
 0x409   : > { %15614 = vmatprep.mubr.f32.mxu1 %v20921_v34  ;;  %15645 = vmatpush3.msra.mxu0 %v12962_v1  ;;  %v21138_v34 = vld [vmem:[#allocation2 + $0xfa] sm:$0xff] }
 0x40a   : > { %15544 = vmatmul.mubr.f32.gmra.mxu0 %v21124_v3  ;;  %15709 = vmatpush3.msra.mxu1 %v12980_v62  ;;  %v13038_v1 = vld [vmem:[%s21829_s5 + $0x478] sm:$0xff]  ;;  %v10658_v62 = vld [vmem:[#allocation2 + $0x30] sm:$0xff] }
 0x40b   : > { %15546 = vmatprep.mubr.f32.mxu0 %v21131_v12  ;;  %15710 = vmatprep.subr.mxu1 %v12979_v59 }
 0x40c   : > { %15646 = vmatprep.subr.mxu0 %v12961_v4  ;;  %15711 = vmatpush3.msra.mxu1 %v12979_v59  ;;  %v10909_v59 = vld [vmem:[#allocation2 + $0x39] sm:$0xff] }
 0x40d   : > { %15615 = vmatmul.mubr.f32.gmra.mxu1 %v20947_v47  ;;  %15647 = vmatpush3.msra.mxu0 %v12961_v4  ;;  %v12976_v47 = vld [vmem:[%s21829_s5 + $0x288] sm:$0xff]  ;;  %v10659_v4 = vld [vmem:[#allocation2 + $0x38] sm:$0xff] }
 0x40e   : > { %15712 = vmatprep.subr.mxu1 %v12978_v31  ;;  %15547 = vmatmul.mubr.f32.gmra.mxu0 %v21138_v34 }
 0x40f   : > { %15617 = vmatprep.mubr.f32.mxu1 %v9157_v61  ;;  %15713 = vmatpush3.msra.mxu1 %v12978_v31  ;;  %v13006_v61 = vld [vmem:[%s21829_s5 + $0x378] sm:$0xff]  ;;  %v13037_v31 = vld [vmem:[%s21829_s5 + $0x470] sm:$0xff] }
 0x410   : > { %15549 = vmatprep.mubr.f32.mxu0 %v21149_v45  ;;  %15648 = vmatprep.subr.mxu0 %v12960_v50 }
 0x411   : > { %15714 = vmatprep.subr.mxu1 %v12977_v27  ;;  %15649 = vmatpush3.msra.mxu0 %v12960_v50  ;;  %v10910_v50 = vld [vmem:[#allocation2 + $0x49] sm:$0xff] }
 0x412   : > { %15715 = vmatpush3.msra.mxu1 %v12977_v27  ;;  %15550 = vmatmul.mubr.f32.gmra.mxu0 %v21155_v43  ;;  %v10660_v27 = vld [vmem:[#allocation2 + $0x48] sm:$0xff] }
 0x413   : > { %15618 = vmatmul.mubr.f32.gmra.mxu1 %v9158_v36  ;;  %15716 = vmatprep.subr.mxu1 %v12976_v47  ;;  %v13005_v36 = vld [vmem:[%s21829_s5 + $0x370] sm:$0xff] }
 0x414   : > { %15650 = vmatprep.subr.mxu0 %v12959_v15  ;;  %15717 = vmatpush3.msra.mxu1 %v12976_v47  ;;  %v10911_v47 = vld [vmem:[#allocation2 + $0x51] sm:$0xff] }
 0x415   : > { %15720 = vmatprep.mubr.f32.mxu1 %v21001_v54  ;;  %15651 = vmatpush3.msra.mxu0 %v12959_v15  ;;  %v21178_v54 = vld [vmem:[#allocation2 + $0x31] sm:$0xff] }
 0x416   : > { %15652 = vmatprep.mubr.f32.mxu0 %v10157_v6  ;;  %15718 = vmatprep.subr.mxu1 %v12975_v7  ;;  %v10661_v15 = vld [vmem:[#allocation2 + $0x50] sm:$0xff]  ;;  %v10662_v6 = vld [vmem:[#allocation2 + $0x60] sm:$0xff] }
 0x417   : > { %15719 = vmatpush3.msra.mxu1 %v12975_v7  ;;  %15756 = vmatprep.subr.mxu0 %v13006_v61  ;;  %v13036_v7 = vld [vmem:[%s21829_s5 + $0x468] sm:$0xff] }
 0x418   : > { %15721 = vmatmul.mubr.f32.vlgmr.msra.gmra.mxu1 %v21009_v14  ;;  %15653 = vmatmul.mubr.f32.vlgmr.msra.gmra.mxu0 %v10158_v53  ;;  %v15987_v14 = vld [vmem:[#allocation2 + $0x39] sm:$0xff] }
 0x419   : > { %15723 = vmatprep.mubr.f32.mxu1 %v21016_v13  ;;  %15757 = vmatpush3.msra.mxu0 %v13006_v61  ;;  %v13021_v13 = vld [vmem:[%s21829_s5 + $0x3f0] sm:$0xff]  ;;  %v10912_v61 = vld [vmem:[#allocation2 + $0x61] sm:$0xff] }
 0x41a   : > { %15655 = vmatprep.mubr.f32.mxu0 %v21178_v54  ;;  %15758 = vmatprep.subr.mxu0 %v13005_v36  ;;  %v13035_v53 = vld [vmem:[%s21829_s5 + $0x460] sm:$0xff] }
 0x41b   : > { %15759 = vmatpush3.msra.mxu0 %v13005_v36  ;;  %15824 = vmatprep.subr.mxu1 %v13022_v29  ;;  %v10913_v36 = vld [vmem:[#allocation2 + $0x69] sm:$0xff] }
 0x41c   : > { %15724 = vmatmul.mubr.f32.gmra.mxu1 %v21023_v28  ;;  %15656 = vmatmul.mubr.f32.gmra.mxu0 %v15987_v14  ;;  %v13002_v28 = vld [vmem:[%s21829_s5 + $0x358] sm:$0xff] }
 0x41d   : > { %15726 = vmatprep.mubr.f32.mxu1 %v21030_v17  ;;  %15658 = vmatprep.mubr.f32.mxu0 %v20694_v56  ;;  %v13001_v56 = vld [vmem:[%s21829_s5 + $0x350] sm:$0xff]  ;;  %v13034_v14 = vld [vmem:[%s21829_s5 + $0x458] sm:$0xff] }
 0x41e   : > { %15760 = vmatprep.subr.mxu0 %v13004_v22  ;;  %15825 = vmatpush3.msra.mxu1 %v13022_v29  ;;  %v12997_v17 = vld [vmem:[%s21829_s5 + $0x330] sm:$0xff]  ;;  %v10663_v29 = vld [vmem:[#allocation2 + $0x68] sm:$0xff] }
 0x41f   : > { %15761 = vmatpush3.msra.mxu0 %v13004_v22  ;;  %15826 = vmatprep.subr.mxu1 %v13021_v13  ;;  %v10914_v22 = vld [vmem:[#allocation2 + $0x79] sm:$0xff] }
 0x420   : > { %15727 = vmatmul.mubr.f32.gmra.mxu1 %v21037_v32  ;;  %15659 = vmatmul.mubr.f32.gmra.mxu0 %v20696_v9  ;;  %v13020_v9 = vld [vmem:[%s21829_s5 + $0x3e8] sm:$0xff]  ;;  %v13014_v32 = vld [vmem:[%s21829_s5 + $0x3b8] sm:$0xff] }
 0x421   : > { %15729 = vmatprep.mubr.f32.mxu1 %v21044_v58  ;;  %15762 = vmatprep.subr.mxu0 %v13003_v48  ;;  %v12994_v58 = vld [vmem:[%s21829_s5 + $0x318] sm:$0xff] }
 0x422   : > { %15661 = vmatprep.mubr.f32.mxu0 %v20723_v20  ;;  %15763 = vmatpush3.msra.mxu0 %v13003_v48  ;;  %v13000_v20 = vld [vmem:[%s21829_s5 + $0x348] sm:$0xff] }
 0x423   : > { %15764 = vmatprep.subr.mxu0 %v13002_v28  ;;  %15827 = vmatpush3.msra.mxu1 %v13021_v13  ;;  %v10664_v13 = vld [vmem:[#allocation2 + $0x78] sm:$0xff]  ;;  %v10915_v48 = vld [vmem:[#allocation2 + $0x81] sm:$0xff] }
 0x424   : > { %15730 = vmatmul.mubr.f32.gmra.mxu1 %v21054_v63  ;;  %15662 = vmatmul.mubr.f32.gmra.mxu0 %v20754_v8  ;;  %v13019_v8 = vld [vmem:[%s21829_s5 + $0x3e0] sm:$0xff] }
 0x425   : > { %15732 = vmatprep.mubr.f32.mxu1 %v21058_v42  ;;  %15765 = vmatpush3.msra.mxu0 %v13002_v28  ;;  %v13011_v63 = vld [vmem:[%s21829_s5 + $0x3a0] sm:$0xff] }
 0x426   : > { %15664 = vmatprep.mubr.f32.mxu0 %v20782_v33  ;;  %15766 = vmatprep.subr.mxu0 %v13001_v56  ;;  %v12999_v33 = vld [vmem:[%s21829_s5 + $0x340] sm:$0xff] }
 0x427   : > { %15767 = vmatpush3.msra.mxu0 %v13001_v56  ;;  %15828 = vmatprep.subr.mxu1 %v13020_v9  ;;  %v10665_v28 = vld [vmem:[#allocation2 + $0x80] sm:$0xff]  ;;  %v13033_v56 = vld [vmem:[%s21829_s5 + $0x450] sm:$0xff] }
 0x428   : > { %15733 = vmatmul.mubr.f32.gmra.mxu1 %v21068_v46  ;;  %15665 = vmatmul.mubr.f32.gmra.mxu0 %v20784_v57  ;;  %v12998_v57 = vld [vmem:[%s21829_s5 + $0x338] sm:$0xff] }
 0x429   : > { %15735 = vmatprep.mubr.f32.mxu1 %v21071_v11  ;;  %15667 = vmatprep.mubr.f32.mxu0 %v20811_v2  ;;  %v13018_v2 = vld [vmem:[%s21829_s5 + $0x3d8] sm:$0xff] }
 0x42a   : > { %15768 = vmatprep.subr.mxu0 %v13000_v20  ;;  %15829 = vmatpush3.msra.mxu1 %v13020_v9 }
 0x42b   : > { %15769 = vmatpush3.msra.mxu0 %v13000_v20  ;;  %15830 = vmatprep.subr.mxu1 %v13019_v8  ;;  %v10916_v20 = vld [vmem:[#allocation2 + $0x91] sm:$0xff] }
 0x42c   : > { %15736 = vmatmul.mubr.f32.gmra.mxu1 %v21081_v26  ;;  %15668 = vmatmul.mubr.f32.gmra.mxu0 %v20842_v39  ;;  %v13017_v39 = vld [vmem:[%s21829_s5 + $0x3d0] sm:$0xff] }
 0x42d   : > { %15738 = vmatprep.mubr.f32.mxu1 %v21088_v10  ;;  %15770 = vmatprep.subr.mxu0 %v12999_v33 }
 0x42e   : > { %15670 = vmatprep.mubr.f32.mxu0 %v20872_v16  ;;  %15771 = vmatpush3.msra.mxu0 %v12999_v33  ;;  %v13016_v16 = vld [vmem:[%s21829_s5 + $0x3c8] sm:$0xff] }
 0x42f   : > { %15831 = vmatpush3.msra.mxu1 %v13019_v8  ;;  %15772 = vmatprep.subr.mxu0 %v12998_v57  ;;  %v10666_v8 = vld [vmem:[#allocation2 + $0x90] sm:$0xff] }
 0x430   : > { %15739 = vmatmul.mubr.f32.gmra.mxu1 %v21097_v49  ;;  %15832 = vmatprep.subr.mxu1 %v13018_v2 }
 0x431   : > { %15671 = vmatmul.mubr.f32.gmra.mxu0 %v20874_v44  ;;  %15741 = vmatprep.mubr.f32.mxu1 %v21100_v19  ;;  %v12996_v44 = vld [vmem:[%s21829_s5 + $0x328] sm:$0xff] }
 0x432   : > { %15773 = vmatpush3.msra.mxu0 %v12998_v57  ;;  %15833 = vmatpush3.msra.mxu1 %v13018_v2  ;;  %v10917_v57 = vld [vmem:[#allocation2 + $0x99] sm:$0xff] }
 0x433   : > { %15673 = vmatprep.mubr.f32.mxu0 %v20897_v25  ;;  %15834 = vmatprep.subr.mxu1 %v13017_v39  ;;  %v13015_v25 = vld [vmem:[%s21829_s5 + $0x3c0] sm:$0xff]  ;;  %v10667_v2 = vld [vmem:[#allocation2 + $0x98] sm:$0xff] }
 0x434   : > { %15774 = vmatprep.subr.mxu0 %v12997_v17  ;;  %15835 = vmatpush3.msra.mxu1 %v13017_v39  ;;  %v13032_v39 = vld [vmem:[%s21829_s5 + $0x448] sm:$0xff] }
 0x435   : > { %15742 = vmatmul.mubr.f32.gmra.mxu1 %v21108_v38  ;;  %15775 = vmatpush3.msra.mxu0 %v12997_v17 }
 0x436   : > { %15836 = vmatprep.subr.mxu1 %v13016_v16  ;;  %15674 = vmatmul.mubr.f32.gmra.mxu0 %v20917_v21  ;;  %v12995_v21 = vld [vmem:[%s21829_s5 + $0x320] sm:$0xff] }
 0x437   : > { %15744 = vmatprep.mubr.f32.mxu1 %v21117_v37  ;;  %15837 = vmatpush3.msra.mxu1 %v13016_v16  ;;  %v10918_v16 = vld [vmem:[#allocation2 + $0xa9] sm:$0xff] }
 0x438   : > { %15676 = vmatprep.mubr.f32.mxu0 %v20937_v24  ;;  %15776 = vmatprep.subr.mxu0 %v12996_v44  ;;  %v13013_v24 = vld [vmem:[%s21829_s5 + $0x3b0] sm:$0xff] }
 0x439   : > { %15838 = vmatprep.subr.mxu1 %v13015_v25  ;;  %15777 = vmatpush3.msra.mxu0 %v12996_v44  ;;  %v10668_v44 = vld [vmem:[#allocation2 + $0xa8] sm:$0xff] }
 0x43a   : > { %15839 = vmatpush3.msra.mxu1 %v13015_v25  ;;  %15677 = vmatmul.mubr.f32.gmra.mxu0 %v20939_v55  ;;  %v13012_v55 = vld [vmem:[%s21829_s5 + $0x3a8] sm:$0xff] }
 0x43b   : > { %15745 = vmatmul.mubr.f32.gmra.mxu1 %v21124_v3  ;;  %15840 = vmatprep.subr.mxu1 %v13014_v32 }
 0x43c   : > { %15747 = vmatprep.mubr.f32.mxu1 %v21131_v12  ;;  %15778 = vmatprep.subr.mxu0 %v12995_v21 }
 0x43d   : > { %15841 = vmatpush3.msra.mxu1 %v13014_v32  ;;  %15679 = vmatprep.mubr.f32.mxu0 %v20953_v23  ;;  %v12993_v23 = vld [vmem:[%s21829_s5 + $0x310] sm:$0xff]  ;;  %v13031_v32 = vld [vmem:[%s21829_s5 + $0x440] sm:$0xff] }
 0x43e   : > { %15779 = vmatpush3.msra.mxu0 %v12995_v21  ;;  %15842 = vmatprep.subr.mxu1 %v13013_v24 }
 0x43f   : > { %15843 = vmatpush3.msra.mxu1 %v13013_v24  ;;  %15780 = vmatprep.subr.mxu0 %v12994_v58  ;;  %v10919_v24 = vld [vmem:[#allocation2 + $0xb1] sm:$0xff] }
 0x440   : > { %15748 = vmatmul.mubr.f32.gmra.mxu1 %v21138_v34  ;;  %15844 = vmatprep.subr.mxu1 %v13012_v55 }
 0x441   : > { %15680 = vmatmul.mubr.f32.gmra.mxu0 %v20969_v51  ;;  %15750 = vmatprep.mubr.f32.mxu1 %v21149_v45  ;;  %v12992_v51 = vld [vmem:[%s21829_s5 + $0x308] sm:$0xff] }
 0x442   : > { %15781 = vmatpush3.msra.mxu0 %v12994_v58  ;;  %15845 = vmatpush3.msra.mxu1 %v13012_v55  ;;  %v10669_v58 = vld [vmem:[#allocation2 + $0xb0] sm:$0xff] }
 0x443   : > { %15682 = vmatprep.mubr.f32.mxu0 %v20982_v52  ;;  %15846 = vmatprep.subr.mxu1 %v13011_v63  ;;  %v13009_v52 = vld [vmem:[%s21829_s5 + $0x390] sm:$0xff] }
 0x444   : > { %15782 = vmatprep.subr.mxu0 %v12993_v23  ;;  %15847 = vmatpush3.msra.mxu1 %v13011_v63 }
 0x445   : > { %15751 = vmatmul.mubr.f32.gmra.mxu1 %v21155_v43  ;;  %15783 = vmatpush3.msra.mxu0 %v12993_v23  ;;  %v10920_v23 = vld [vmem:[#allocation2 + $0xc1] sm:$0xff] }
 0x446   : > { %15848 = vmatprep.subr.mxu1 %v13010_v35  ;;  %15683 = vmatmul.mubr.f32.gmra.mxu0 %v20984_v60  ;;  %v21305_v60 = vld [vmem:[#allocation2 + $0x129] sm:$0xff] }
 0x447   : > { %15753 = vmatprep.mubr.f32.mxu1 %v21293_v41  ;;  %15849 = vmatpush3.msra.mxu1 %v13010_v35  ;;  %v13030_v35 = vld [vmem:[%s21829_s5 + $0x438] sm:$0xff] }
 0x448   : > { %15685 = vmatprep.mubr.f32.mxu0 %v21299_v40  ;;  %15784 = vmatprep.subr.mxu0 %v12992_v51 }
 0x449   : > { %15850 = vmatprep.subr.mxu1 %v13009_v52  ;;  %15785 = vmatpush3.msra.mxu0 %v12992_v51 }
 0x44a   : > { %15851 = vmatpush3.msra.mxu1 %v13009_v52  ;;  %15686 = vmatmul.mubr.f32.gmra.mxu0 %v21305_v60  ;;  %v10670_v52 = vld [vmem:[#allocation2 + $0xc0] sm:$0xff] }
 0x44b   : > { %15754 = vmatmul.mubr.f32.gmra.mxu1 %v21310_v5  ;;  %15852 = vmatprep.subr.mxu1 %v13008_v18 }
 0x44c   : > { %15786 = vmatprep.subr.mxu0 %v12991_v30  ;;  %15853 = vmatpush3.msra.mxu1 %v13008_v18 }
 0x44d   : > { %15856 = vmatprep.mubr.f32.mxu1 %v21178_v54  ;;  %15787 = vmatpush3.msra.mxu0 %v12991_v30  ;;  %v10921_v30 = vld [vmem:[#allocation2 + $0xc9] sm:$0xff] }
 0x44e   : > { %15788 = vmatprep.mubr.f32.mxu0 %v10658_v62  ;;  %15854 = vmatprep.subr.mxu1 %v13007_v0 }
 0x44f   : > { %15855 = vmatpush3.msra.mxu1 %v13007_v0  ;;  %15892 = vmatprep.subr.mxu0 %v13038_v1  ;;  %v10671_v0 = vld [vmem:[#allocation2 + $0xc8] sm:$0xff] }
 0x450   : > { %15857 = vmatmul.mubr.f32.vlgmr.msra.gmra.mxu1 %v10909_v59  ;;  %15789 = vmatmul.mubr.f32.vlgmr.msra.gmra.mxu0 %v10659_v4  ;;  %v10922_v4 = vld [vmem:[#allocation2 + $0xd9] sm:$0xff] }
 0x451   : > { %15859 = vmatprep.mubr.f32.mxu1 %v10910_v50  ;;  %15893 = vmatpush3.msra.mxu0 %v13038_v1  ;;  %v13029_v1 = vld [vmem:[%s21829_s5 + $0x430] sm:$0xff]  ;;  %v10672_v50 = vld [vmem:[#allocation2 + $0xd8] sm:$0xff] }
 0x452   : > { %15791 = vmatprep.mubr.f32.mxu0 %v10660_v27  ;;  %15894 = vmatprep.subr.mxu0 %v13037_v31 }
 0x453   : > { %15895 = vmatpush3.msra.mxu0 %v13037_v31 }
 0x454   : > { %15860 = vmatmul.mubr.f32.gmra.mxu1 %v10911_v47  ;;  %15792 = vmatmul.mubr.f32.gmra.mxu0 %v10661_v15  ;;  %v10923_v15 = vld [vmem:[#allocation2 + $0xe1] sm:$0xff] }
 0x455   : > { %15862 = vmatprep.mubr.f32.mxu1 %v10912_v61  ;;  %15794 = vmatprep.mubr.f32.mxu0 %v10662_v6  ;;  %v13028_v61 = vld [vmem:[%s21829_s5 + $0x428] sm:$0xff] }
 0x456   : > { %15896 = vmatprep.subr.mxu0 %v13036_v7  ;;  %v15450_v54 = vpop.f32.mrf.mxu1 }
 0x457   : > { %15897 = vmatpush3.msra.mxu0 %v13036_v7  ;;  %v10673_v7 = vld [vmem:[#allocation2 + $0xe0] sm:$0xff] }
 0x458   : > { %15863 = vmatmul.mubr.f32.gmra.mxu1 %v10913_v36  ;;  %15795 = vmatmul.mubr.f32.gmra.mxu0 %v10663_v29  ;;  %v9537_v9 = vpop.f32.mrf.mxu1  ;;  %v10674_v36 = vld [vmem:[#allocation2 + $0xf0] sm:$0xff] }
 0x459   : > { %15865 = vmatprep.mubr.f32.mxu1 %v10914_v22  ;;  %15898 = vmatprep.subr.mxu0 %v13035_v53 }
 0x45a   : > { %15797 = vmatprep.mubr.f32.mxu0 %v10664_v13  ;;  %15899 = vmatpush3.msra.mxu0 %v13035_v53  ;;  %v10924_v53 = vld [vmem:[#allocation2 + $0xf1] sm:$0xff] }
 0x45b   : > { %15900 = vmatprep.subr.mxu0 %v13034_v14  ;;  %v10675_v13 = vld [vmem:[#allocation2 + $0xf8] sm:$0xff] }
 0x45c   : > { %15866 = vmatmul.mubr.f32.gmra.mxu1 %v10915_v48  ;;  %15798 = vmatmul.mubr.f32.gmra.mxu0 %v10665_v28 }
 0x45d   : > { %15868 = vmatprep.mubr.f32.mxu1 %v10916_v20  ;;  %15901 = vmatpush3.msra.mxu0 %v13034_v14  ;;  %v15453_v33 = vpop.f32.mrf.mxu1  ;;  %v10925_v14 = vld [vmem:[#allocation2 + $0xf9] sm:$0xff] }
 0x45e   : > { %15800 = vmatprep.mubr.f32.mxu0 %v10666_v8  ;;  %15902 = vmatprep.subr.mxu0 %v13033_v56  ;;  %v10676_v8 = vld [vmem:[#allocation2 + $0x108] sm:$0xff] }
 0x45f   : > { %15903 = vmatpush3.msra.mxu0 %v13033_v56  ;;  %v9547_v17 = vpop.f32.mrf.mxu1  ;;  %v10926_v56 = vld [vmem:[#allocation2 + $0x109] sm:$0xff] }
 0x460   : > { %15869 = vmatmul.mubr.f32.gmra.mxu1 %v10917_v57  ;;  %15801 = vmatmul.mubr.f32.gmra.mxu0 %v10667_v2  ;;  %v10927_v57 = vld [vmem:[#allocation2 + $0x111] sm:$0xff] }
 0x461   : > { %15871 = vmatprep.mubr.f32.mxu1 %v10918_v16  ;;  %15803 = vmatprep.mubr.f32.mxu0 %v10668_v44  ;;  %v15382_v25 = vpop.f32.mrf.mxu0  ;;  %v10677_v2 = vld [vmem:[#allocation2 + $0x110] sm:$0xff] }
 0x462   : > { %15904 = vmatprep.subr.mxu0 %v13032_v39  ;;  %v21342_v21 = vadd.f32 %v15450_v54, %v15382_v25  ;;  %v15456_v63 = vpop.f32.mrf.mxu1  ;;  %v13027_v54 = vld [vmem:[%s21829_s5 + $0x420] sm:$0xff] }
 0x463   : > { %15905 = vmatpush3.msra.mxu0 %v13032_v39  ;;  %v9352_v55 = vpop.f32.mrf.mxu0  ;;  %v13025_v39 = vld [vmem:[%s21829_s5 + $0x410] sm:$0xff]  ;;  %v10678_v25 = vld [vmem:[#allocation2 + $0x120] sm:$0xff] }
 0x464   : > { %15872 = vmatmul.mubr.f32.gmra.mxu1 %v10919_v24  ;;  %15804 = vmatmul.mubr.f32.gmra.mxu0 %v10669_v58  ;;  %v21347_v51 = vadd.f32 %v9537_v9, %v9352_v55  ;;  %v9557_v59 = vpop.f32.mrf.mxu1  ;;  %v13026_v9 = vld [vmem:[%s21829_s5 + $0x418] sm:$0xff]  ;;  %v10679_v58 = vld [vmem:[#allocation2 + $0x128] sm:$0xff] }
 0x465   : > { %15874 = vmatprep.mubr.f32.mxu1 %v10920_v23  ;;  %15906 = vmatprep.subr.mxu0 %v13031_v32  ;;  %v13024_v55 = vld [vmem:[%s21829_s5 + $0x408] sm:$0xff]  ;;  %v10930_v23 = vld [vmem:[#allocation2 + $0x139] sm:$0xff] }
 0x466   : > { %15806 = vmatprep.mubr.f32.mxu0 %v10670_v52  ;;  %15907 = vmatpush3.msra.mxu0 %v13031_v32  ;;  %v15385_v18 = vpop.f32.mrf.mxu0  ;;  %v13023_v52 = vld [vmem:[%s21829_s5 + $0x400] sm:$0xff] }
 0x467   : > { %15908 = vmatprep.subr.mxu0 %v13030_v35  ;;  %v21352_v62 = vadd.f32 %v15453_v33, %v15385_v18 }
 0x468   : > { %15875 = vmatmul.mubr.f32.gmra.mxu1 %v10921_v30  ;;  %15807 = vmatmul.mubr.f32.gmra.mxu0 %v10671_v0  ;;  %v9362_v31 = vpop.f32.mrf.mxu0  ;;  %v10931_v30 = vld [vmem:[#allocation2 + $0x141] sm:$0xff] }
 0x469   : > { %15877 = vmatprep.mubr.f32.mxu1 %v10922_v4  ;;  %15909 = vmatpush3.msra.mxu0 %v13030_v35  ;;  %v21354_v27 = vadd.f32 %v9547_v17, %v9362_v31  ;;  %v15459_v47 = vpop.f32.mrf.mxu1  ;;  %v10680_v35 = vld [vmem:[#allocation2 + $0x138] sm:$0xff]  ;;  %v10681_v0 = vld [vmem:[#allocation2 + $0x140] sm:$0xff] }
 0x46a   : > { %15809 = vmatprep.mubr.f32.mxu0 %v10672_v50  ;;  %15910 = vmatprep.subr.mxu0 %v13029_v1  ;;  %v11159_v50 = vld [vmem:[#allocation2 + $0x3a] sm:$0xff] }
 0x46b   : > { %15911 = vmatpush3.msra.mxu0 %v13029_v1  ;;  %v9567_v6 = vpop.f32.mrf.mxu1 }
 0x46c   : > { %15878 = vmatmul.mubr.f32.gmra.mxu1 %v10923_v15  ;;  %15810 = vmatmul.mubr.f32.gmra.mxu0 %v10673_v7  ;;  %v11160_v7 = vld [vmem:[#allocation2 + $0x4a] sm:$0xff] }
 0x46d   : > { %15880 = vmatprep.mubr.f32.mxu1 %v10924_v53  ;;  %15812 = vmatprep.mubr.f32.mxu0 %v10674_v36  ;;  %v15388_v29 = vpop.f32.mrf.mxu0  ;;  %v11161_v36 = vld [vmem:[#allocation2 + $0x52] sm:$0xff] }
 0x46e   : > { %15912 = vmatprep.subr.mxu0 %v13028_v61  ;;  %v21362_v22 = vadd.f32 %v15456_v63, %v15388_v29  ;;  %v15462_v28 = vpop.f32.mrf.mxu1 }
 0x46f   : > { %15913 = vmatpush3.msra.mxu0 %v13028_v61  ;;  %v9372_v48 = vpop.f32.mrf.mxu0 }
 0x470   : > { %15881 = vmatmul.mubr.f32.gmra.mxu1 %v10925_v14  ;;  %15813 = vmatmul.mubr.f32.gmra.mxu0 %v10675_v13  ;;  %v21367_v20 = vadd.f32 %v9557_v59, %v9372_v48  ;;  %v9577_v16 = vpop.f32.mrf.mxu1  ;;  %v11163_v48 = vld [vmem:[#allocation2 + $0x6a] sm:$0xff] }
 0x471   : > { %15883 = vmatprep.mubr.f32.mxu1 %v10926_v56  ;;  %15914 = vmatprep.subr.mxu0 %v13027_v54 }
 0x472   : > { %15815 = vmatprep.mubr.f32.mxu0 %v10676_v8  ;;  %15915 = vmatpush3.msra.mxu0 %v13027_v54  ;;  %v15391_v33 = vpop.f32.mrf.mxu0  ;;  %v11162_v54 = vld [vmem:[#allocation2 + $0x62] sm:$0xff] }
 0x473   : > { %15916 = vmatprep.subr.mxu0 %v13026_v9  ;;  %v21372_v17 = vadd.f32 %v15459_v47, %v15391_v33 }
 0x474   : > { %15884 = vmatmul.mubr.f32.gmra.mxu1 %v10927_v57  ;;  %15816 = vmatmul.mubr.f32.gmra.mxu0 %v10677_v2  ;;  %v9382_v44 = vpop.f32.mrf.mxu0 }
 0x475   : > { %15886 = vmatprep.mubr.f32.mxu1 %v21299_v40  ;;  %15917 = vmatpush3.msra.mxu0 %v13026_v9  ;;  %v21375_v32 = vadd.f32 %v9567_v6, %v9382_v44  ;;  %v15465_v24 = vpop.f32.mrf.mxu1 }
 0x476   : > { %15818 = vmatprep.mubr.f32.mxu0 %v10678_v25  ;;  %15918 = vmatprep.subr.mxu0 %v13025_v39 }
 0x477   : > { %15919 = vmatpush3.msra.mxu0 %v13025_v39  ;;  %v9587_v63 = vpop.f32.mrf.mxu1 }
 0x478   : > { %15887 = vmatmul.mubr.f32.gmra.mxu1 %v21305_v60  ;;  %15819 = vmatmul.mubr.f32.gmra.mxu0 %v10679_v58  ;;  %v11158_v60 = vld [vmem:[#allocation2 + $0x32] sm:$0xff] }
 0x479   : > { %15889 = vmatprep.mubr.f32.mxu1 %v10930_v23  ;;  %15821 = vmatprep.mubr.f32.mxu0 %v10680_v35  ;;  %v15394_v40 = vpop.f32.mrf.mxu0 }
 0x47a   : > { %15920 = vmatprep.subr.mxu0 %v13024_v55  ;;  %v21384_v18 = vadd.f32 %v15462_v28, %v15394_v40  ;;  %v15468_v59 = vpop.f32.mrf.mxu1 }
 0x47b   : > { %15921 = vmatpush3.msra.mxu0 %v13024_v55  ;;  %v9392_v1 = vpop.f32.mrf.mxu0 }
 0x47c   : > { %15890 = vmatmul.mubr.f32.gmra.mxu1 %v10931_v30  ;;  %15822 = vmatmul.mubr.f32.gmra.mxu0 %v10681_v0  ;;  %v21386_v4 = vadd.f32 %v9577_v16, %v9392_v1  ;;  %v9597_v15 = vpop.f32.mrf.mxu1 }
 0x47d   : > { %15922 = vmatprep.subr.mxu0 %v13023_v52  ;;  %15924 = vmatprep.mubr.f32.mxu0 %v11158_v60 }
 0x47e   : > { %15923 = vmatpush3.msra.mxu0 %v13023_v52  ;;  %v15397_v31 = vpop.f32.mrf.mxu0 }
 0x47f   : > { %v21388_v47 = vadd.f32 %v15465_v24, %v15397_v31 }
 0x480   : > { %15925 = vmatmul.mubr.f32.vlgmr.msra.gmra.mxu0 %v11159_v50  ;;  %v9402_v61 = vpop.f32.mrf.mxu0 }
 0x481   : > { %15927 = vmatprep.mubr.f32.mxu0 %v11160_v7  ;;  %v21390_v6 = vadd.f32 %v9587_v63, %v9402_v61  ;;  %v15471_v53 = vpop.f32.mrf.mxu1 }
 0x483   : > { %v9607_v29 = vpop.f32.mrf.mxu1 }
 0x484   : > { %15928 = vmatmul.mubr.f32.gmra.mxu0 %v11161_v36  ;;  %v11181_v36 = vld [vmem:[#allocation2 + $0x142] sm:$0xff] }
 0x485   : > { %15930 = vmatprep.mubr.f32.mxu0 %v11162_v54  ;;  %v15400_v14 = vpop.f32.mrf.mxu0 }
 0x486   : > { %v21392_v13 = vadd.f32 %v15468_v59, %v15400_v14  ;;  %v15474_v56 = vpop.f32.mrf.mxu1 }
 0x487   : > { %v9412_v28 = vpop.f32.mrf.mxu0 }
 0x488   : > { %15931 = vmatmul.mubr.f32.gmra.mxu0 %v11163_v48  ;;  %v21394_v9 = vadd.f32 %v9597_v15, %v9412_v28  ;;  %v9617_v57 = vpop.f32.mrf.mxu1 }
 0x489   : > { %15933 = vmatprep.mubr.f32.mxu0 %v21058_v42 }
 0x48a   : > { %v15403_v8 = vpop.f32.mrf.mxu0 }
 0x48b   : > { %v21397_v33 = vadd.f32 %v15471_v53, %v15403_v8 }
 0x48c   : > { %15934 = vmatmul.mubr.f32.gmra.mxu0 %v21068_v46  ;;  %v9422_v2 = vpop.f32.mrf.mxu0 }
 0x48d   : > { %15936 = vmatprep.mubr.f32.mxu0 %v21071_v11  ;;  %v21401_v39 = vadd.f32 %v9607_v29, %v9422_v2  ;;  %v15477_v16 = vpop.f32.mrf.mxu1 }
 0x48f   : > { %v9627_v44 = vpop.f32.mrf.mxu1 }
 0x490   : > { %15937 = vmatmul.mubr.f32.gmra.mxu0 %v21081_v26 }
 0x491   : > { %15939 = vmatprep.mubr.f32.mxu0 %v21088_v10  ;;  %v15406_v25 = vpop.f32.mrf.mxu0 }
 0x492   : > { %v21405_v24 = vadd.f32 %v15474_v56, %v15406_v25  ;;  %v15480_v58 = vpop.f32.mrf.mxu1 }
 0x493   : > { %v9432_v42 = vpop.f32.mrf.mxu0 }
 0x494   : > { %15940 = vmatmul.mubr.f32.gmra.mxu0 %v21097_v49  ;;  %v21408_v55 = vadd.f32 %v9617_v57, %v9432_v42  ;;  %v9637_v63 = vpop.f32.mrf.mxu1 }
 0x495   : > { %15942 = vmatprep.mubr.f32.mxu0 %v21100_v19 }
 0x496   : > { %v15409_v46 = vpop.f32.mrf.mxu0 }
 0x497   : > { %v21411_v11 = vadd.f32 %v15477_v16, %v15409_v46 }
 0x498   : > { %15943 = vmatmul.mubr.f32.gmra.mxu0 %v21108_v38  ;;  %v9442_v26 = vpop.f32.mrf.mxu0 }
 0x499   : > { %15945 = vmatprep.mubr.f32.mxu0 %v21117_v37  ;;  %v21415_v10 = vadd.f32 %v9627_v44, %v9442_v26  ;;  %v15483_v23 = vpop.f32.mrf.mxu1 }
 0x49b   : > { %v9647_v35 = vpop.f32.mrf.mxu1 }
 0x49c   : > { %15946 = vmatmul.mubr.f32.gmra.mxu0 %v21124_v3 }
 0x49d   : > { %15948 = vmatprep.mubr.f32.mxu0 %v21131_v12  ;;  %v15412_v49 = vpop.f32.mrf.mxu0  ;;  %v15586_v40 = vpop.f32.mrf.mxu1 }
 0x49e   : > { %v21419_v19 = vadd.f32 %v15480_v58, %v15412_v49 }
 0x49f   : > { %v9452_v52 = vpop.f32.mrf.mxu0  ;;  %v10014_v30 = vpop.f32.mrf.mxu1 }
 0x4a0   : > { %15949 = vmatmul.mubr.f32.gmra.mxu0 %v21138_v34  ;;  %v21422_v38 = vadd.f32 %v9637_v63, %v9452_v52 }
 0x4a1   : > { %15951 = vmatprep.mubr.f32.mxu0 %v21149_v45  ;;  %v15589_v37 = vpop.f32.mrf.mxu1  ;;  %v11180_v45 = vld [vmem:[#allocation2 + $0x13a] sm:$0xff] }
 0x4a2   : > { %v15415_v0 = vpop.f32.mrf.mxu0 }
 0x4a3   : > { %v21425_v1 = vadd.f32 %v15483_v23, %v15415_v0  ;;  %v10024_v59 = vpop.f32.mrf.mxu1 }
 0x4a4   : > { %15952 = vmatmul.mubr.f32.gmra.mxu0 %v21155_v43  ;;  %v9462_v3 = vpop.f32.mrf.mxu0 }
 0x4a5   : > { %15954 = vmatprep.mubr.f32.mxu0 %v21293_v41  ;;  %v21429_v12 = vadd.f32 %v9647_v35, %v9462_v3  ;;  %v15592_v60 = vpop.f32.mrf.mxu1 }
 0x4a6   : > { %v15518_v31 = vpop.f32.mrf.mxu0 }
 0x4a7   : > { %v9883_v34 = vadd.f32 %v15518_v31, %v21342_v21  ;;  %v10034_v50 = vpop.f32.mrf.mxu1 }
 0x4a8   : > { %15955 = vmatmul.mubr.f32.gmra.mxu0 %v21310_v5  ;;  %v9763_v15 = vpop.f32.mrf.mxu0 }
 0x4a9   : > { %15957 = vmatprep.mubr.f32.mxu0 %v11180_v45  ;;  %v9882_v7 = vadd.f32 %v9763_v15, %v21347_v51  ;;  %v15595_v61 = vpop.f32.mrf.mxu1  ;;  %v21434_v53 = vadd.f32 %v15586_v40, %v9883_v34 }
 0x4aa   : > { %v15521_v43 = vpop.f32.mrf.mxu0 }
 0x4ab   : > { %v9885_v41 = vadd.f32 %v15521_v43, %v21352_v62  ;;  %v10044_v29 = vpop.f32.mrf.mxu1  ;;  %v21437_v54 = vadd.f32 %v10014_v30, %v9882_v7 }
 0x4ac   : > { %15958 = vmatmul.mubr.f32.gmra.mxu0 %v11181_v36  ;;  %v9773_v21 = vpop.f32.mrf.mxu0 }
 0x4ad   : > { %v9884_v14 = vadd.f32 %v9773_v21, %v21354_v27  ;;  %v15598_v5 = vpop.f32.mrf.mxu1  ;;  %v21440_v48 = vadd.f32 %v15589_v37, %v9885_v41 }
 0x4ae   : > { %v15524_v28 = vpop.f32.mrf.mxu0 }
 0x4af   : > { %v9887_v51 = vadd.f32 %v15524_v28, %v21362_v22  ;;  %v10054_v56 = vpop.f32.mrf.mxu1  ;;  %v21443_v8 = vadd.f32 %v10024_v59, %v9884_v14 }
 0x4b0   : > { %v9783_v57 = vpop.f32.mrf.mxu0 }
 0x4b1   : > { %v9886_v2 = vadd.f32 %v9783_v57, %v21367_v20  ;;  %v15601_v62 = vpop.f32.mrf.mxu1  ;;  %v21446_v16 = vadd.f32 %v15592_v60, %v9887_v51 }
 0x4b2   : > { %v15527_v44 = vpop.f32.mrf.mxu0 }
 0x4b3   : > { %v9889_v25 = vadd.f32 %v15527_v44, %v21372_v17  ;;  %v10064_v42 = vpop.f32.mrf.mxu1  ;;  %v21449_v27 = vadd.f32 %v10034_v50, %v9886_v2 }
 0x4b4   : > { %v9793_v58 = vpop.f32.mrf.mxu0 }
 0x4b5   : > { %v9888_v46 = vadd.f32 %v9793_v58, %v21375_v32  ;;  %v15604_v63 = vpop.f32.mrf.mxu1  ;;  %v21452_v22 = vadd.f32 %v15595_v61, %v9889_v25 }
 0x4b6   : > { %v15530_v26 = vpop.f32.mrf.mxu0 }
 0x4b7   : > { %v9891_v23 = vadd.f32 %v15530_v26, %v21384_v18  ;;  %v21455_v35 = vadd.f32 %v10044_v29, %v9888_v46  ;;  %v10074_v49 = vpop.f32.mrf.mxu1 }
 0x4b8   : > { %v9803_v20 = vpop.f32.mrf.mxu0 }
 0x4b9   : > { %v9890_v40 = vadd.f32 %v9803_v20, %v21386_v4  ;;  %v21458_v52 = vadd.f32 %v15598_v5, %v9891_v23 }
 0x4ba   : > { %v15533_v17 = vpop.f32.mrf.mxu0 }
 0x4bb   : > { %v9893_v30 = vadd.f32 %v15533_v17, %v21388_v47  ;;  %v21461_v37 = vadd.f32 %v10054_v56, %v9890_v40 }
 0x4bc   : > { %v9813_v32 = vpop.f32.mrf.mxu0  ;;  %v15607_v0 = vpop.f32.mrf.mxu1 }
 0x4bd   : > { %v9892_v59 = vadd.f32 %v9813_v32, %v21390_v6  ;;  %v21464_v3 = vadd.f32 %v15601_v62, %v9893_v30 }
 0x4be   : > { %v15536_v18 = vpop.f32.mrf.mxu0  ;;  %v10084_v60 = vpop.f32.mrf.mxu1 }
 0x4bf   : > { %v9895_v31 = vadd.f32 %v15536_v18, %v21392_v13  ;;  %v21467_v34 = vadd.f32 %v10064_v42, %v9892_v59 }
 0x4c0   : > { %v9823_v4 = vpop.f32.mrf.mxu0 }
 0x4c1   : > { %v9894_v50 = vadd.f32 %v9823_v4, %v21394_v9  ;;  %v21470_v45 = vadd.f32 %v15604_v63, %v9895_v31 }
 0x4c2   : > { %v15539_v47 = vpop.f32.mrf.mxu0  ;;  %v15610_v15 = vpop.f32.mrf.mxu1 }
 0x4c3   : > { %v9897_v7 = vadd.f32 %v15539_v47, %v21397_v33  ;;  %v21473_v61 = vadd.f32 %v10074_v49, %v9894_v50 }
 0x4c4   : > { %v9833_v6 = vpop.f32.mrf.mxu0  ;;  %v10094_v43 = vpop.f32.mrf.mxu1 }
 0x4c5   : > { %v9896_v36 = vadd.f32 %v9833_v6, %v21401_v39  ;;  %v21476_v41 = vadd.f32 %v15607_v0, %v9897_v7 }
 0x4c6   : > { %v15542_v13 = vpop.f32.mrf.mxu0 }
 0x4c7   : > { %v9899_v29 = vadd.f32 %v15542_v13, %v21405_v24  ;;  %v15613_v21 = vpop.f32.mrf.mxu1  ;;  %v21479_v14 = vadd.f32 %v10084_v60, %v9896_v36 }
 0x4c8   : > { %v9843_v9 = vpop.f32.mrf.mxu0 }
 0x4c9   : > { %v9898_v5 = vadd.f32 %v9843_v9, %v21408_v55  ;;  %v10104_v28 = vpop.f32.mrf.mxu1  ;;  %v21482_v51 = vadd.f32 %v15610_v15, %v9899_v29 }
 0x4ca   : > { %v15545_v33 = vpop.f32.mrf.mxu0 }
 0x4cb   : > { %v9901_v56 = vadd.f32 %v15545_v33, %v21411_v11  ;;  %v21485_v57 = vadd.f32 %v10094_v43, %v9898_v5 }
 0x4cc   : > { %v9853_v39 = vpop.f32.mrf.mxu0 }
 0x4cd   : > { %v9900_v2 = vadd.f32 %v9853_v39, %v21415_v10  ;;  %v15616_v62 = vpop.f32.mrf.mxu1  ;;  %v21488_v44 = vadd.f32 %v15613_v21, %v9901_v56 }
 0x4ce   : > { %v15548_v24 = vpop.f32.mrf.mxu0 }
 0x4cf   : > { %v9903_v25 = vadd.f32 %v15548_v24, %v21419_v19  ;;  %v10114_v42 = vpop.f32.mrf.mxu1  ;;  %v21491_v58 = vadd.f32 %v10104_v28, %v9900_v2 }
 0x4d0   : > { %v9863_v55 = vpop.f32.mrf.mxu0 }
 0x4d1   : > { %v9902_v46 = vadd.f32 %v9863_v55, %v21422_v38  ;;  %v21494_v63 = vadd.f32 %v15616_v62, %v9903_v25 }
 0x4d2   : > { %v15551_v11 = vpop.f32.mrf.mxu0 }
 0x4d3   : > { %v15619_v26 = vpop.f32.mrf.mxu1  ;;  %v9905_v23 = vadd.f32 %v15551_v11, %v21425_v1  ;;  %v21497_v20 = vadd.f32 %v10114_v42, %v9902_v46 }
 0x4d4   : > { %v9873_v10 = vpop.f32.mrf.mxu0 }
 0x4d5   : > { %v10124_v49 = vpop.f32.mrf.mxu1  ;;  %v9904_v40 = vadd.f32 %v9873_v10, %v21429_v12  ;;  %v21500_v17 = vadd.f32 %v15619_v26, %v9905_v23 }
 0x4d7   : > { %v21502_v19 = vadd.f32 %v10124_v49, %v9904_v40 }
 0x4d8   : > { %v21504_v30 = vpop.f32.mrf.mxu1  ;;  %v15654_v32 = vpop.f32.mrf.mxu0 }
 0x4d9   : > { %v21507_v38 = vadd.f32 %v15654_v32, %v21434_v53 }
 0x4da   : > { %v21509_v0 = vpop.f32.mrf.mxu1  ;;  %v10264_v59 = vpop.f32.mrf.mxu0 }
 0x4db   : > { %v21512_v1 = vadd.f32 %v10264_v59, %v21437_v54 }
 0x4dc   : > { %v21514_v18 = vpop.f32.mrf.mxu1  ;;  %v15657_v60 = vpop.f32.mrf.mxu0 }
 0x4dd   : > { %v21517_v12 = vadd.f32 %v15657_v60, %v21440_v48 }
 0x4de   : > { %v21519_v31 = vpop.f32.mrf.mxu1  ;;  %v10274_v4 = vpop.f32.mrf.mxu0 }
 0x4df   : > { %v21522_v50 = vadd.f32 %v10274_v4, %v21443_v8 }
 0x4e0   : > { %v21524_v53 = vpop.f32.mrf.mxu1  ;;  %v15660_v47 = vpop.f32.mrf.mxu0 }
 0x4e1   : > { %v21527_v15 = vadd.f32 %v15660_v47, %v21446_v16 }
 0x4e2   : > { %v21529_v54 = vpop.f32.mrf.mxu1  ;;  %v10284_v7 = vpop.f32.mrf.mxu0 }
 0x4e3   : > { %v21532_v6 = vadd.f32 %v10284_v7, %v21449_v27 }
 0x4e4   : > { %v21534_v48 = vpop.f32.mrf.mxu1  ;;  %v15663_v43 = vpop.f32.mrf.mxu0 }
 0x4e5   : > { %v21537_v36 = vadd.f32 %v15663_v43, %v21452_v22 }
 0x4e6   : > { %v21539_v8 = vpop.f32.mrf.mxu1  ;;  %v10294_v13 = vpop.f32.mrf.mxu0 }
 0x4e7   : > { %v21542_v29 = vadd.f32 %v10294_v13, %v21455_v35 }
 0x4e8   : > { %v21544_v16 = vpop.f32.mrf.mxu1  ;;  %v15666_v21 = vpop.f32.mrf.mxu0 }
 0x4e9   : > { %v21547_v9 = vadd.f32 %v15666_v21, %v21458_v52 }
 0x4ea   : > { %v21549_v27 = vpop.f32.mrf.mxu1  ;;  %v10304_v5 = vpop.f32.mrf.mxu0 }
 0x4eb   : > { %v21552_v28 = vadd.f32 %v10304_v5, %v21461_v37 }
 0x4ec   : > { %v21554_v22 = vpop.f32.mrf.mxu1  ;;  %v15669_v33 = vpop.f32.mrf.mxu0 }
 0x4ed   : > { %v21557_v56 = vadd.f32 %v15669_v33, %v21464_v3 }
 0x4ee   : > { %v21559_v35 = vpop.f32.mrf.mxu1  ;;  %v10314_v39 = vpop.f32.mrf.mxu0 }
 0x4ef   : > { %v21562_v2 = vadd.f32 %v10314_v39, %v21467_v34 }
 0x4f0   : > { %v21564_v52 = vpop.f32.mrf.mxu1 }
 0x4f1   : > { %v15672_v62 = vpop.f32.mrf.mxu0 }
 0x4f2   : > { %v21567_v24 = vadd.f32 %v15672_v62, %v21470_v45  ;;  %v21569_v37 = vpop.f32.mrf.mxu1 }
 0x4f3   : > { %v10324_v25 = vpop.f32.mrf.mxu0 }
 0x4f4   : > { %v21572_v42 = vadd.f32 %v10324_v25, %v21473_v61 }
 0x4f5   : > { %v21574_v3 = vpop.f32.mrf.mxu1 }
 0x4f6   : > { %22481 = vst [vmem:[#allocation50_spill] sm:$0xff] %v21574_v3  ;;  %v15675_v55 = vpop.f32.mrf.mxu0 }
 0x4f7   : > { %v21577_v46 = vadd.f32 %v15675_v55, %v21476_v41  ;;  %v21579_v34 = vpop.f32.mrf.mxu1 }
 0x4f8   : > { %22482 = vst [vmem:[#allocation67_spill] sm:$0xff] %v21579_v34  ;;  %v10334_v11 = vpop.f32.mrf.mxu0 }
 0x4f9   : > { %v21582_v26 = vadd.f32 %v10334_v11, %v21479_v14 }
 0x4fa   : > { %v15678_v45 = vpop.f32.mrf.mxu0 }
 0x4fb   : > { %22483 = vst [vmem:[#allocation73_spill] sm:$0xff] %v21582_v26  ;;  %v21584_v23 = vpop.f32.mrf.mxu1  ;;  %v21587_v10 = vadd.f32 %v15678_v45, %v21482_v51 }
 0x4fc   : > { %22484 = vst [vmem:[#allocation60_spill] sm:$0xff] %v21584_v23  ;;  %v10344_v61 = vpop.f32.mrf.mxu0 }
 0x4fd   : > { %22485 = vst [vmem:[#allocation13_spill] sm:$0xff] %v21587_v10  ;;  %v21589_v49 = vpop.f32.mrf.mxu1  ;;  %v21592_v40 = vadd.f32 %v10344_v61, %v21485_v57 }
 0x4fe   : > { %22486 = vst [vmem:[#allocation12_spill] sm:$0xff] %v21589_v49 }
 0x4ff   : > { %22487 = vst [vmem:[#allocation53_spill] sm:$0xff] %v21592_v40 }
 0x500   : > { %v21594_v41 = vpop.f32.mrf.mxu1 }
 0x501   : > { %22488 = vst [vmem:[#allocation52_spill] sm:$0xff] %v21594_v41  ;;  %v15681_v32 = vpop.f32.mrf.mxu0 }
 0x502   : > { %v21597_v59 = vadd.f32 %v15681_v32, %v21488_v44  ;;  %v21599_v14 = vpop.f32.mrf.mxu1 }
 0x503   : > { %22490 = vst [vmem:[#allocation76_spill] sm:$0xff] %v21599_v14  ;;  %v10354_v60 = vpop.f32.mrf.mxu0 }
 0x504   : > { %22489 = vst [vmem:[#allocation5_spill] sm:$0xff] %v21597_v59  ;;  %v21602_v4 = vadd.f32 %v10354_v60, %v21491_v58 }
 0x505   : > { %v21604_v51 = vpop.f32.mrf.mxu1 }
 0x506   : > { %22491 = vst [vmem:[#allocation61_spill] sm:$0xff] %v21602_v4  ;;  %22492 = vst [vmem:[#allocation37_spill] sm:$0xff] %v21604_v51  ;;  %v15684_v47 = vpop.f32.mrf.mxu0 }
 0x507   : > { %v21607_v7 = vadd.f32 %v15684_v47, %v21494_v63  ;;  %v21609_v57 = vpop.f32.mrf.mxu1 }
 0x508   : > { %22494 = vst [vmem:[#allocation77_spill] sm:$0xff] %v21609_v57  ;;  %v10364_v43 = vpop.f32.mrf.mxu0 }
 0x509   : > { %22493 = vst [vmem:[#allocation36_spill] sm:$0xff] %v21607_v7  ;;  %v21612_v13 = vadd.f32 %v10364_v43, %v21497_v20 }
 0x50a   : > { %v15687_v44 = vpop.f32.mrf.mxu0 }
 0x50b   : > { %22495 = vst [vmem:[#allocation55_spill] sm:$0xff] %v21612_v13  ;;  %v21614_v21 = vpop.f32.mrf.mxu1  ;;  %v21617_v5 = vadd.f32 %v15687_v44, %v21500_v17 }
 0x50c   : > { %22496 = vst [vmem:[#allocation54_spill] sm:$0xff] %v21614_v21  ;;  %v10374_v58 = vpop.f32.mrf.mxu0 }
 0x50d   : > { %22497 = vst [vmem:[#allocation6_spill] sm:$0xff] %v21617_v5  ;;  %v21619_v33 = vpop.f32.mrf.mxu1  ;;  %v21622_v39 = vadd.f32 %v10374_v58, %v21502_v19 }
 0x50e   : > { %22498 = vst [vmem:[#allocation64_spill] sm:$0xff] %v21619_v33 }
 0x50f   : > { %22499 = vst [vmem:[#allocation39_spill] sm:$0xff] %v21622_v39 }
 0x510   : > { %v15858_v63 = vpop.f32.mrf.mxu1  ;;  %v15790_v62 = vpop.f32.mrf.mxu0 }
 0x512   : > { %v10765_v25 = vpop.f32.mrf.mxu0  ;;  %v11015_v55 = vpop.f32.mrf.mxu1 }
 0x514   : > { %v15793_v11 = vpop.f32.mrf.mxu0  ;;  %v15861_v20 = vpop.f32.mrf.mxu1 }
 0x516   : > { %v10775_v45 = vpop.f32.mrf.mxu0  ;;  %v11025_v60 = vpop.f32.mrf.mxu1 }
 0x518   : > { %v15796_v61 = vpop.f32.mrf.mxu0  ;;  %v15864_v17 = vpop.f32.mrf.mxu1 }
 0x51a   : > { %v10785_v32 = vpop.f32.mrf.mxu0  ;;  %v21630_v19 = vpop.f32.mrf.mxu1 }
 0x51c   : > { %v15799_v47 = vpop.f32.mrf.mxu0  ;;  %v21636_v21 = vpop.f32.mrf.mxu1 }
 0x51e   : > { %v21624_v43 = vpop.f32.mrf.mxu0  ;;  %v21642_v13 = vpop.f32.mrf.mxu1 }
 0x520   : > { %v21626_v44 = vpop.f32.mrf.mxu0  ;;  %v21648_v14 = vpop.f32.mrf.mxu1 }
 0x522   : > { %v21628_v33 = vpop.f32.mrf.mxu0  ;;  %v21654_v59 = vpop.f32.mrf.mxu1 }
 0x524   : > { %v21632_v58 = vpop.f32.mrf.mxu0  ;;  %v21660_v23 = vpop.f32.mrf.mxu1 }
 0x526   : > { %v21634_v39 = vpop.f32.mrf.mxu0 }
 0x528   : > { %v21638_v5 = vpop.f32.mrf.mxu0 }
 0x52a   : > { %v21640_v57 = vpop.f32.mrf.mxu0 }
 0x52c   : > { %v21644_v51 = vpop.f32.mrf.mxu0 }
 0x52d   : > { %22500 = vst [vmem:[#allocation38_spill] sm:$0xff] %v21644_v51 }
 0x52e   : > { %v21646_v7 = vpop.f32.mrf.mxu0 }
 0x52f   : > { %22501 = vst [vmem:[#allocation80_spill] sm:$0xff] %v21646_v7  ;;  %v10634_v7 = vadd.f32 %v21504_v30, %v21507_v38  ;;  %v10635_v30 = vadd.f32 %v21519_v31, %v21522_v50  ;;  %v10637_v31 = vadd.f32 %v21529_v54, %v21532_v6 }
 0x530   : > { %v21650_v4 = vpop.f32.mrf.mxu0 }
 0x531   : > { %22502 = vst [vmem:[#allocation46_spill] sm:$0xff] %v21650_v4  ;;  %v10885_v34 = vadd.f32 %v15790_v62, %v10634_v7  ;;  %v21670_v4 = vpop.f32.mrf.mxu1  ;;  %v10638_v7 = vadd.f32 %v21524_v53, %v21527_v15 }
 0x532   : > { %v21652_v41 = vpop.f32.mrf.mxu0 }
 0x533   : > { %22503 = vst [vmem:[#allocation42_spill] sm:$0xff] %v21652_v41  ;;  %v10633_v41 = vadd.f32 %v21509_v0, %v21512_v1  ;;  %v11135_v38 = vadd.f32 %v15858_v63, %v10885_v34  ;;  %v21682_v62 = vpop.f32.mrf.mxu1  ;;  %v21688_v1 = vld [vmem:[%s21830_s6] ss:$0 sm:$0xff]  ;;  %v10888_v63 = vadd.f32 %v10785_v32, %v10637_v31  ;;  %v10644_v31 = vadd.f32 %v21554_v22, %v21557_v56 }
 0x534   : > { %v21656_v49 = vpop.f32.mrf.mxu0 }
 0x535   : > { %22504 = vst [vmem:[#allocation7_spill] sm:$0xff] %v21656_v49  ;;  %v10884_v49 = vadd.f32 %v10765_v25, %v10633_v41  ;;  %v10640_v25 = vadd.f32 %v21534_v48, %v21537_v36 }
 0x536   : > { %v21658_v40 = vpop.f32.mrf.mxu0 }
 0x537   : > { %22505 = vst [vmem:[#allocation63_spill] sm:$0xff] %v21658_v40  ;;  %v10636_v40 = vadd.f32 %v21514_v18, %v21517_v12  ;;  %v10886_v18 = vadd.f32 %v10775_v45, %v10635_v30  ;;  %v11134_v41 = vadd.f32 %v11015_v55, %v10884_v49  ;;  %v10891_v36 = vadd.f32 %v15799_v47, %v10640_v25 }
 0x538   : > { %v21662_v10 = vpop.f32.mrf.mxu0 }
 0x539   : > { %22506 = vst [vmem:[#allocation45_spill] sm:$0xff] %v21662_v10  ;;  %v10887_v10 = vadd.f32 %v15793_v11, %v10636_v40  ;;  %v10889_v40 = vadd.f32 %v15796_v61, %v10638_v7  ;;  %v21695_v11 = vpop.f32.mrf.mxu1  ;;  %v11136_v45 = vadd.f32 %v11025_v60, %v10886_v18  ;;  %v11138_v60 = vadd.f32 %v21630_v19, %v10888_v63 }
 0x53a   : > { %v21666_v51 = vpop.f32.mrf.mxu0  ;;  %v10895_v63 = vadd.f32 %v21632_v58, %v10644_v31 }
 0x53b   : > { %v11137_v15 = vadd.f32 %v15861_v20, %v10887_v10  ;;  %v10639_v10 = vadd.f32 %v21539_v8, %v21542_v29  ;;  %v11139_v48 = vadd.f32 %v15864_v17, %v10889_v40  ;;  %v21709_v7 = vpop.f32.mrf.mxu1 }
 0x53c   : > { %v21672_v26 = vpop.f32.mrf.mxu0 }
 0x53d   : > { %v10890_v18 = vadd.f32 %v21624_v43, %v10639_v10  ;;  %v11141_v43 = vadd.f32 %v21636_v21, %v10891_v36 }
 0x53e   : > { %v21676_v3 = vpop.f32.mrf.mxu0 }
 0x540   : > { %v15926_v0 = vpop.f32.mrf.mxu0 }
 0x541   : > { %v11385_v12 = vadd.f32 %v15926_v0, %v11135_v38  ;;  %v10642_v38 = vadd.f32 %v21544_v16, %v21547_v9 }
 0x542   : > { %v11265_v50 = vpop.f32.mrf.mxu0 }
 0x543   : > { %v11416_v34 = vadd.f32 %v21688_v1, %v11385_v12  ;;  %v11384_v53 = vadd.f32 %v11265_v50, %v11134_v41  ;;  %v10893_v17 = vadd.f32 %v21626_v44, %v10642_v38  ;;  %v10641_v12 = vadd.f32 %v21549_v27, %v21552_v28  ;;  %v21724_v50 = vpop.f32.mrf.mxu1  ;;  %v22508_v38 = vld [vmem:[#allocation73_spill] sm:$0xff] }
 0x544   : > { %v15929_v49 = vpop.f32.mrf.mxu0 }
 0x545   : > { %v11440_v55 = vmax.f32 %v11416_v34, 0.0  ;;  %v11415_v54 = vadd.f32 %v21688_v1, %v11384_v53  ;;  %v11387_v6 = vadd.f32 %v15929_v49, %v11137_v15  ;;  %v10892_v40 = vadd.f32 %v21628_v33, %v10641_v12  ;;  %v22512_v12 = vld [vmem:[#allocation60_spill] sm:$0xff] }
 0x546   : > { %v11275_v20 = vpop.f32.mrf.mxu0  ;;  %v11140_v53 = vadd.f32 %v21642_v13, %v10890_v18  ;;  %v10643_v15 = vadd.f32 %v21559_v35, %v21562_v2  ;;  %v11143_v33 = vadd.f32 %v21648_v14, %v10893_v17  ;;  %v10646_v49 = vadd.f32 %v21564_v52, %v21567_v24  ;;  %v22511_v17 = vld [vmem:[#allocation13_spill] sm:$0xff] }
 0x547   : > { %11464 = vst [vmem:[%s21700_s22 + $0x8] sm:$0xff] %v11440_v55  ;;  %v11439_v61 = vmax.f32 %v11415_v54, 0.0  ;;  %v11418_v32 = vadd.f32 %v21688_v1, %v11387_v6  ;;  %v11386_v30 = vadd.f32 %v11275_v20, %v11136_v45  ;;  %v15882_v55 = vpop.f32.mrf.mxu1  ;;  %v11142_v13 = vadd.f32 %v21654_v59, %v10892_v40 }
 0x548   : > { %v15932_v0 = vpop.f32.mrf.mxu0  ;;  %v10894_v35 = vadd.f32 %v21634_v39, %v10643_v15  ;;  %v10897_v6 = vadd.f32 %v21638_v5, %v10646_v49  ;;  %v10645_v45 = vadd.f32 %v21569_v37, %v21572_v42  ;;  %v11145_v39 = vadd.f32 %v21660_v23, %v10895_v63  ;;  %v22519_v49 = vld [vmem:[#allocation52_spill] sm:$0xff] }
 0x549   : > { %11463 = vst [vmem:[%s21700_s22] sm:$0xff] %v11439_v61  ;;  %v11442_v8 = vmax.f32 %v11418_v32, 0.0  ;;  %v11417_v29 = vadd.f32 %v21688_v1, %v11386_v30  ;;  %v11389_v47 = vadd.f32 %v15932_v0, %v11139_v48  ;;  %v22507_v48 = vld [vmem:[#allocation50_spill] sm:$0xff]  ;;  %v11095_v61 = vpop.f32.mrf.mxu1  ;;  %v22509_v0 = vld [vmem:[#allocation67_spill] sm:$0xff] }
 0x54a   : > { %v11285_v41 = vpop.f32.mrf.mxu0  ;;  %v10896_v20 = vadd.f32 %v21640_v57, %v10645_v45  ;;  %v10648_v36 = vadd.f32 %v22507_v48, %v21577_v46  ;;  %v11144_v30 = vadd.f32 %v21670_v4, %v10894_v35  ;;  %v11147_v23 = vadd.f32 %v21682_v62, %v10897_v6  ;;  %v22510_v57 = vld [vmem:[#allocation38_spill] sm:$0xff]  ;;  %v22520_v45 = vld [vmem:[#allocation61_spill] sm:$0xff] }
 0x54b   : > { %11466 = vst [vmem:[%s21700_s22 + $0x18] sm:$0xff] %v11442_v8  ;;  %v11441_v16 = vmax.f32 %v11417_v29, 0.0  ;;  %v11420_v9 = vadd.f32 %v21688_v1, %v11389_v47  ;;  %v11388_v19 = vadd.f32 %v11285_v41, %v11138_v60  ;;  %v10647_v60 = vadd.f32 %v22509_v0, %v22508_v38 }
 0x54c   : > { %v15935_v44 = vpop.f32.mrf.mxu0  ;;  %v10899_v8 = vadd.f32 %v22510_v57, %v10648_v36  ;;  %v10650_v41 = vadd.f32 %v22512_v12, %v22511_v17  ;;  %v11146_v4 = vadd.f32 %v21695_v11, %v10896_v20 }
 0x54d   : > { %11465 = vst [vmem:[%s21700_s22 + $0x10] sm:$0xff] %v11441_v16  ;;  %v11444_v34 = vmax.f32 %v11420_v9, 0.0  ;;  %v11419_v27 = vadd.f32 %v21688_v1, %v11388_v19  ;;  %v11391_v28 = vadd.f32 %v15935_v44, %v11141_v43  ;;  %v15885_v16 = vpop.f32.mrf.mxu1  ;;  %v22513_v19 = vld [vmem:[#allocation80_spill] sm:$0xff]  ;;  %v22514_v44 = vld [vmem:[#allocation46_spill] sm:$0xff] }
 0x54e   : > { %v11295_v21 = vpop.f32.mrf.mxu0  ;;  %v10898_v43 = vadd.f32 %v22513_v19, %v10647_v60  ;;  %v11149_v63 = vadd.f32 %v21709_v7, %v10899_v8  ;;  %v22527_v8 = vld [vmem:[#allocation55_spill] sm:$0xff]  ;;  %v22529_v19 = vld [vmem:[#allocation6_spill] sm:$0xff] }
 0x54f   : > { %11468 = vst [vmem:[%s21700_s22 + $0x28] sm:$0xff] %v11444_v34  ;;  %v11443_v22 = vmax.f32 %v11419_v27, 0.0  ;;  %v11422_v56 = vadd.f32 %v21688_v1, %v11391_v28  ;;  %v11390_v25 = vadd.f32 %v11295_v21, %v11140_v53  ;;  %v10901_v34 = vadd.f32 %v22514_v44, %v10650_v41  ;;  %v22515_v27 = vld [vmem:[#allocation53_spill] sm:$0xff]  ;;  %v22516_v28 = vld [vmem:[#allocation12_spill] sm:$0xff] }
 0x550   : > { %v15938_v54 = vpop.f32.mrf.mxu0  ;;  %v10649_v53 = vadd.f32 %v22516_v28, %v22515_v27  ;;  %v11148_v6 = vadd.f32 %v21724_v50, %v10898_v43  ;;  %v22525_v50 = vld [vmem:[#allocation63_spill] sm:$0xff]  ;;  %v22530_v43 = vld [vmem:[#allocation54_spill] sm:$0xff] }
 0x551   : > { %11467 = vst [vmem:[%s21700_s22 + $0x20] sm:$0xff] %v11443_v22  ;;  %v11446_v2 = vmax.f32 %v11422_v56, 0.0  ;;  %v11421_v14 = vadd.f32 %v21688_v1, %v11390_v25  ;;  %v11393_v58 = vadd.f32 %v15938_v54, %v11143_v33  ;;  %v22517_v22 = vld [vmem:[#allocation42_spill] sm:$0xff]  ;;  %v22518_v25 = vld [vmem:[#allocation5_spill] sm:$0xff]  ;;  %v11151_v7 = vadd.f32 %v15882_v55, %v10901_v34  ;;  %v22531_v28 = vld [vmem:[#allocation39_spill] sm:$0xff] }
 0x552   : > { %v11305_v10 = vpop.f32.mrf.mxu0  ;;  %v10900_v56 = vadd.f32 %v22517_v22, %v10649_v53  ;;  %v10652_v54 = vadd.f32 %v22519_v49, %v22518_v25  ;;  %v22532_v53 = vld [vmem:[#allocation64_spill] sm:$0xff] }
 0x553   : > { %11470 = vst [vmem:[%s21700_s22 + $0x38] sm:$0xff] %v11446_v2  ;;  %v11445_v52 = vmax.f32 %v11421_v14, 0.0  ;;  %v11424_v24 = vadd.f32 %v21688_v1, %v11393_v58  ;;  %v11392_v59 = vadd.f32 %v11305_v10, %v11142_v13  ;;  %v11105_v13 = vpop.f32.mrf.mxu1  ;;  %v22521_v10 = vld [vmem:[#allocation76_spill] sm:$0xff] }
 0x554   : > { %v15941_v32 = vpop.f32.mrf.mxu0  ;;  %v11150_v38 = vadd.f32 %v11095_v61, %v10900_v56 }
 0x555   : > { %11469 = vst [vmem:[%s21700_s22 + $0x30] sm:$0xff] %v11445_v52  ;;  %v11448_v5 = vmax.f32 %v11424_v24, 0.0  ;;  %v11423_v37 = vadd.f32 %v21688_v1, %v11392_v59  ;;  %v11395_v42 = vadd.f32 %v15941_v32, %v11145_v39  ;;  %v10651_v52 = vadd.f32 %v22521_v10, %v22520_v45  ;;  %v22522_v59 = vld [vmem:[#allocation7_spill] sm:$0xff]  ;;  %v15888_v32 = vpop.f32.mrf.mxu1 }
 0x556   : > { %v11315_v18 = vpop.f32.mrf.mxu0  ;;  %v10903_v39 = vadd.f32 %v22522_v59, %v10652_v54 }
 0x557   : > { %11472 = vst [vmem:[%s21700_s22 + $0x48] sm:$0xff] %v11448_v5  ;;  %v11447_v46 = vmax.f32 %v11423_v37, 0.0  ;;  %v11426_v29 = vadd.f32 %v21688_v1, %v11395_v42  ;;  %v11394_v47 = vadd.f32 %v11315_v18, %v11144_v30  ;;  %v22523_v5 = vld [vmem:[#allocation36_spill] sm:$0xff]  ;;  %v22524_v37 = vld [vmem:[#allocation37_spill] sm:$0xff]  ;;  %v10902_v0 = vadd.f32 %v22525_v50, %v10651_v52 }
 0x558   : > { %v15944_v9 = vpop.f32.mrf.mxu0  ;;  %v10654_v42 = vadd.f32 %v22524_v37, %v22523_v5  ;;  %v11153_v41 = vadd.f32 %v15885_v16, %v10903_v39 }
 0x559   : > { %11471 = vst [vmem:[%s21700_s22 + $0x40] sm:$0xff] %v11447_v46  ;;  %v11450_v62 = vmax.f32 %v11426_v29, 0.0  ;;  %v11425_v40 = vadd.f32 %v21688_v1, %v11394_v47  ;;  %v11397_v31 = vadd.f32 %v15944_v9, %v11147_v23  ;;  %v22526_v23 = vld [vmem:[#allocation45_spill] sm:$0xff]  ;;  %v11115_v9 = vpop.f32.mrf.mxu1  ;;  %v11152_v27 = vadd.f32 %v11105_v13, %v10902_v0 }
 0x55a   : > { %v11325_v15 = vpop.f32.mrf.mxu0  ;;  %v10905_v57 = vadd.f32 %v22526_v23, %v10654_v42  ;;  %v22528_v46 = vld [vmem:[#allocation77_spill] sm:$0xff] }
 0x55b   : > { %11474 = vst [vmem:[%s21700_s22 + $0x58] sm:$0xff] %v11450_v62  ;;  %v11449_v21 = vmax.f32 %v11425_v40, 0.0  ;;  %v11428_v33 = vadd.f32 %v21688_v1, %v11397_v31  ;;  %v11396_v11 = vadd.f32 %v11325_v15, %v11146_v4  ;;  %v10653_v29 = vadd.f32 %v22528_v46, %v22527_v8  ;;  %v15891_v22 = vpop.f32.mrf.mxu1 }
 0x55c   : > { %v15947_v35 = vpop.f32.mrf.mxu0  ;;  %v10656_v62 = vadd.f32 %v22530_v43, %v22529_v19  ;;  %v10655_v15 = vadd.f32 %v22532_v53, %v22531_v28  ;;  %v11155_v16 = vadd.f32 %v15888_v32, %v10905_v57 }
 0x55d   : > { %11473 = vst [vmem:[%s21700_s22 + $0x50] sm:$0xff] %v11449_v21  ;;  %v11452_v2 = vmax.f32 %v11428_v33, 0.0  ;;  %v11427_v14 = vadd.f32 %v21688_v1, %v11396_v11  ;;  %v11399_v58 = vadd.f32 %v15947_v35, %v11149_v63  ;;  %v10904_v4 = vadd.f32 %v21666_v51, %v10653_v29  ;;  %v11125_v45 = vpop.f32.mrf.mxu1 }
 0x55e   : > { %v11335_v24 = vpop.f32.mrf.mxu0  ;;  %v10907_v33 = vadd.f32 %v21672_v26, %v10656_v62  ;;  %v10906_v49 = vadd.f32 %v21676_v3, %v10655_v15 }
 0x55f   : > { %11476 = vst [vmem:[%s21700_s22 + $0x68] sm:$0xff] %v11452_v2  ;;  %v11451_v20 = vmax.f32 %v11427_v14, 0.0  ;;  %v11430_v48 = vadd.f32 %v21688_v1, %v11399_v58  ;;  %v11398_v36 = vadd.f32 %v11335_v24, %v11148_v6  ;;  %v11154_v25 = vadd.f32 %v11115_v9, %v10904_v4 }
 0x560   : > { %v15950_v30 = vpop.f32.mrf.mxu0  ;;  %v11157_v6 = vadd.f32 %v15891_v22, %v10907_v33 }
 0x561   : > { %11475 = vst [vmem:[%s21700_s22 + $0x60] sm:$0xff] %v11451_v20  ;;  %v11454_v60 = vmax.f32 %v11430_v48, 0.0  ;;  %v11429_v55 = vadd.f32 %v21688_v1, %v11398_v36  ;;  %v11401_v18 = vadd.f32 %v15950_v30, %v11151_v7  ;;  %v11156_v7 = vadd.f32 %v11125_v45, %v10906_v49 }
 0x562   : > { %v11345_v47 = vpop.f32.mrf.mxu0 }
 0x563   : > { %11478 = vst [vmem:[%s21700_s22 + $0x78] sm:$0xff] %v11454_v60  ;;  %v11453_v17 = vmax.f32 %v11429_v55, 0.0  ;;  %v11432_v12 = vadd.f32 %v21688_v1, %v11401_v18  ;;  %v11400_v61 = vadd.f32 %v11345_v47, %v11150_v38 }
 0x564   : > { %v15953_v40 = vpop.f32.mrf.mxu0 }
 0x565   : > { %11477 = vst [vmem:[%s21700_s22 + $0x70] sm:$0xff] %v11453_v17  ;;  %v11456_v31 = vmax.f32 %v11432_v12, 0.0  ;;  %v11431_v44 = vadd.f32 %v21688_v1, %v11400_v61  ;;  %v11403_v34 = vadd.f32 %v15953_v40, %v11153_v41 }
 0x566   : > { %v11355_v21 = vpop.f32.mrf.mxu0 }
 0x567   : > { %11480 = vst [vmem:[%s21700_s22 + $0x88] sm:$0xff] %v11456_v31  ;;  %v11455_v51 = vmax.f32 %v11431_v44, 0.0  ;;  %v11434_v11 = vadd.f32 %v21688_v1, %v11403_v34  ;;  %v11402_v63 = vadd.f32 %v11355_v21, %v11152_v27 }
 0x568   : > { %v15956_v56 = vpop.f32.mrf.mxu0 }
 0x569   : > { %11479 = vst [vmem:[%s21700_s22 + $0x80] sm:$0xff] %v11455_v51  ;;  %v11458_v54 = vmax.f32 %v11434_v11, 0.0  ;;  %v11433_v13 = vadd.f32 %v21688_v1, %v11402_v63  ;;  %v11405_v35 = vadd.f32 %v15956_v56, %v11155_v16 }
 0x56a   : > { %v11365_v2 = vpop.f32.mrf.mxu0 }
 0x56b   : > { %11482 = vst [vmem:[%s21700_s22 + $0x98] sm:$0xff] %v11458_v54  ;;  %v11457_v26 = vmax.f32 %v11433_v13, 0.0  ;;  %v11436_v14 = vadd.f32 %v21688_v1, %v11405_v35  ;;  %v11404_v58 = vadd.f32 %v11365_v2, %v11154_v25 }
 0x56c   : > { %v15959_v10 = vpop.f32.mrf.mxu0 }
 0x56d   : > { %11481 = vst [vmem:[%s21700_s22 + $0x90] sm:$0xff] %v11457_v26  ;;  %v11460_v3 = vmax.f32 %v11436_v14, 0.0  ;;  %v11435_v52 = vadd.f32 %v21688_v1, %v11404_v58  ;;  %v11407_v24 = vadd.f32 %v15959_v10, %v11157_v6 }
 0x56e   : > { %v11375_v59 = vpop.f32.mrf.mxu0 }
 0x56f   : > { %11484 = vst [vmem:[%s21700_s22 + $0xa8] sm:$0xff] %v11460_v3  ;;  %v11459_v39 = vmax.f32 %v11435_v52, 0.0  ;;  %v11438_v20 = vadd.f32 %v21688_v1, %v11407_v24  ;;  %v11406_v48 = vadd.f32 %v11375_v59, %v11156_v7 }
 0x571   : > { %11483 = vst [vmem:[%s21700_s22 + $0xa0] sm:$0xff] %v11459_v39  ;;  %v11462_v36 = vmax.f32 %v11438_v20, 0.0  ;;  %v11437_v32 = vadd.f32 %v21688_v1, %v11406_v48 }
 0x573   : > { %11486 = vst [vmem:[%s21700_s22 + $0xb8] sm:$0xff] %v11462_v36  ;;  %v11461_v5 = vmax.f32 %v11437_v32, 0.0 }
 0x575   : > { %11485 = vst [vmem:[%s21700_s22 + $0xb0] sm:$0xff] %v11461_v5 }
 0x576 PF: > { %s17_s26 = sadd.s32 1, %s16010_s26   ;;  %s22533_s24 = smov %s16006_s25 }
 0x577   : > { %p14_p5 = scmp.ge.s32.totalorder %s17_s26, 4   ;;  %s22534_s25 = smov %s22536_s27 }
 0x579   :  { %16 = sbr.rel (!%p14_p5) target bundleno = 2 (0x2), region = 113 }

</bundles_post_ra>
